<compile_context>
chip_gen: v7x
topology: tpu7x:2x2x1
jax: 0.10.0
libtpu: 0.0.40
codegen_flags: <defaults>
</compile_context>

<pallas_src>
import math
from functools import partial

import jax
import jax.numpy as jnp
from jax.experimental import pallas as pl
from jax.experimental.pallas import tpu as pltpu

FEAT2D = 128
REID_FEAT = 64
EPS_IN = 1e-5     # nn.InstanceNorm2d default eps
EPS_NORM = 1e-12  # F.normalize default eps


def _round_up(x, m):
    return -(-x // m) * m


# --------------------------------------------------------------------------
# fused kernel: 3x3 conv (all heads) -> InstanceNorm -> ReLU -> 1x1 convs
#               (+ emb_scale * L2-normalize on the id-feat lanes)
# --------------------------------------------------------------------------
def _fused_decoder_kernel(x_ref, w3_ref, w1_ref, b_ref, o_ref, *,
                          H, W, Wp, id_off, id_len, emb_scale):
    """One batch element per grid step.

    x_ref : (1, H+3, Wp, 128)  zero-padded NHWC input (Wp = round_up(W+2, 8))
    w3_ref: (3, 384, 512)      bf16; w3_ref[kw][kh*128:(kh+1)*128] = W3[kh, kw]
    w1_ref: (512, 128)         bf16 block-diagonal fused 1x1 weights (padded)
    b_ref : (1, 128)           f32 fused 1x1 bias (zero in padding lanes)
    o_ref : (1, H, Wp, 128)    fused, channel-padded, lane-dense output
    """
    C = x_ref.shape[-1]          # 128
    CC = w3_ref.shape[-1]        # 512 = 4 heads * 128
    CP = w1_ref.shape[-1]        # 128 padded fused output channels
    HP = H + 2                   # padded rows actually used by the conv
    R = H * Wp                   # conv-output rows (includes masked W padding)

    # ---- 3x3 "SAME" conv: 3 bf16 MXU matmuls with K = 3*128 ----------------
    # Flatten to (rows, 128); free relayout because Wp % 8 == 0.
    x2d = x_ref[...].reshape(x_ref.shape[1] * Wp, C)
    acc = None
    for kw in range(3):
        # Shift along W once per kw: a crop-safe sublane shift (XLU); the
        # three kh windows below are then sublane-aligned (kh*Wp % 8 == 0).
        xk = x2d[kw:kw + HP * Wp, :]
        parts = [
            xk[kh * Wp: kh * Wp + R, :].astype(jnp.bfloat16) for kh in range(3)
        ]
        lhs = jnp.concatenate(parts, axis=1)                    # (R, 384) bf16
        contrib = jnp.dot(lhs, w3_ref[kw],
                          preferred_element_type=jnp.float32)   # (R, 512) f32
        acc = contrib if acc is None else acc + contrib

    # ---- InstanceNorm2d (biased var, eps=1e-5): one-pass masked stats ------
    acc3 = acc.reshape(H, Wp, CC)
    col = jax.lax.broadcasted_iota(jnp.int32, (H, Wp, 1), 1)
    macc = jnp.where(col < W, acc3, 0.0).reshape(R, CC)         # zero W-padding
    inv_n = 1.0 / float(H * W)
    s1 = jnp.sum(macc, axis=0, keepdims=True)                   # (1, 512)
    s2 = jnp.sum(macc * macc, axis=0, keepdims=True)
    mean = s1 * inv_n
    var = jnp.maximum(s2 * inv_n - mean * mean, 0.0)
    inv_std = jax.lax.rsqrt(var + EPS_IN)

    # ---- normalize + ReLU (f32), then fused 1x1 convs (bf16 MXU) -----------
    y = jnp.maximum((macc - mean) * inv_std, 0.0)
    out = jnp.dot(y.astype(jnp.bfloat16), w1_ref[...],
                  preferred_element_type=jnp.float32) + b_ref[...]   # (R, 128)

    # ---- emb_scale * F.normalize(id_feat, dim=channel) on id-feat lanes ----
    lane = jax.lax.broadcasted_iota(jnp.int32, (R, CP), 1)
    is_id = jnp.logical_and(lane >= id_off, lane < id_off + id_len)
    ssq = jnp.sum(jnp.where(is_id, out * out, 0.0), axis=1, keepdims=True)
    scale = emb_scale * jax.lax.rsqrt(jnp.maximum(ssq, EPS_NORM * EPS_NORM))
    out = jnp.where(is_id, out * scale, out)

    o_ref[...] = out.reshape(1, H, Wp, CP).astype(o_ref.dtype)


def _vmem_bytes_estimate(Hp_pad, Wp, H, C, CC, CP):
    R = H * Wp
    blocks = (2 * Hp_pad * Wp * C * 4      # double-buffered input block (f32)
              + 2 * 3 * 3 * C * CC * 2     # conv weights (bf16)
              + 2 * CC * CP * 2            # 1x1 block-diagonal weights (bf16)
              + 2 * CP * 4                 # bias
              + 2 * H * Wp * CP * 4)       # double-buffered output block (f32)
    interm = (Hp_pad * Wp * C * 4          # flattened f32 input value
              + R * 3 * C * 2              # bf16 (rows, 384) conv LHS
              + 2 * R * CC * 4             # f32 conv acc + masked copy
              + R * CC * 2                 # bf16 normalized activations
              + 2 * R * CP * 4)            # f32 head output + temporaries
    return blocks + interm


def _run_fused(x_pad, w3k, w1bd, b_all, *, H, W, Wp, id_off, id_len, emb_scale):
    B, Hp_pad, _, C = x_pad.shape
    CC = w3k.shape[-1]
    CP = w1bd.shape[-1]
    kern = partial(_fused_decoder_kernel, H=H, W=W, Wp=Wp,
                   id_off=id_off, id_len=id_len, emb_scale=emb_scale)
    est = _vmem_bytes_estimate(Hp_pad, Wp, H, C, CC, CP)
    vmem_limit = int(min(max(2 * est, 32 * 1024 * 1024), 64 * 1024 * 1024))
    return pl.pallas_call(
        kern,
        out_shape=jax.ShapeDtypeStruct((B, H, Wp, CP), jnp.float32),
        grid=(B,),
        in_specs=[
            pl.BlockSpec((1, Hp_pad, Wp, C), lambda b: (b, 0, 0, 0)),
            pl.BlockSpec((3, 3 * C, CC), lambda b: (0, 0, 0)),
            pl.BlockSpec((CC, CP), lambda b: (0, 0)),
            pl.BlockSpec((1, CP), lambda b: (0, 0)),
        ],
        out_specs=pl.BlockSpec((1, H, Wp, CP), lambda b: (b, 0, 0, 0)),
        compiler_params=pltpu.CompilerParams(
            dimension_semantics=("parallel",),
            vmem_limit_bytes=vmem_limit),
    )(x_pad, w3k, w1bd, b_all)


# --------------------------------------------------------------------------
# parameter construction / fusion
# --------------------------------------------------------------------------
def init_params(key, n_classes):
    """Deterministic synthetic parameter init (shapes from DecoderImage.__init__)."""
    heads = {
        "img_center": n_classes,
        "img_offset": 2,
        "img_size": 2,
        "img_id_feat": REID_FEAT,
    }
    params = {}
    for name, cout in heads.items():
        key, k3, k1, kb = jax.random.split(key, 4)
        w3 = jax.random.normal(k3, (3, 3, FEAT2D, FEAT2D), jnp.float32) * 0.05
        w1 = jax.random.normal(k1, (FEAT2D, cout), jnp.float32) * 0.05
        b1 = jax.random.normal(kb, (1, cout), jnp.float32) * 0.05
        params[name] = (w3, w1, b1)
    return params


def fuse_params(params, n_classes):
    """Build the fused kernel weights (bf16 matmul operands, f32 bias)."""
    heads = (("img_center", n_classes), ("img_offset", 2),
             ("img_size", 2), ("img_id_feat", REID_FEAT))
    CC = len(heads) * FEAT2D                       # 512
    CP = 128                                       # lane-dense padded output
    total = sum(c for _, c in heads)
    assert total <= CP

    # 3x3 weights of all heads concatenated on the output-channel axis,
    # then restacked per kw with the three kh taps along the K axis.
    w3_all = jnp.concatenate([params[n][0] for n, _ in heads], axis=-1)  # (3,3,128,512)
    w3k = jnp.stack(
        [jnp.concatenate([w3_all[kh, kw] for kh in range(3)], axis=0)
         for kw in range(3)], axis=0).astype(jnp.bfloat16)               # (3,384,512)

    # Block-diagonal fused 1x1 weights + concatenated bias (zero padding lanes).
    w1bd = jnp.zeros((CC, CP), jnp.float32)
    b_all = jnp.zeros((1, CP), jnp.float32)
    offsets = {}
    off = 0
    for i, (name, cout) in enumerate(heads):
        _, w1_i, b1_i = params[name]
        w1bd = w1bd.at[i * FEAT2D:(i + 1) * FEAT2D, off:off + cout].set(w1_i)
        b_all = b_all.at[0, off:off + cout].set(b1_i[0])
        offsets[name] = (off, cout)
        off += cout
    return w3k, w1bd.astype(jnp.bfloat16), b_all, offsets


# --------------------------------------------------------------------------
# forward pass (NCHW in / NCHW out, matching the PyTorch module)
# --------------------------------------------------------------------------
def decoder_image_forward(x_nchw, w3k, w1bd, b_all, *, offsets, emb_scale):
    B, C, H, W = x_nchw.shape
    assert C == FEAT2D
    Wp = _round_up(W + 2, 8)       # padded width (sublane aligned)
    Hp_pad = H + 3                 # 1 top + 2 bottom rows (1 conv pad + overhang)
    id_off, id_len = offsets["img_id_feat"]

    x = jnp.transpose(x_nchw, (0, 2, 3, 1))                     # NCHW -> NHWC
    # The zero-pad fuses with the (mandatory) layout relayout above in XLA,
    # so it does not add an extra HBM round trip of its own.
    x_pad = jnp.pad(x, ((0, 0), (1, Hp_pad - H - 1), (1, Wp - W - 1), (0, 0)))

    y = _run_fused(x_pad, w3k, w1bd, b_all, H=H, W=W, Wp=Wp,
                   id_off=id_off, id_len=id_len, emb_scale=emb_scale)
    y = y[:, :, :W, :]                                          # crop W padding

    outs = {}
    for name, (off, cout) in offsets.items():
        outs[name] = jnp.transpose(y[..., off:off + cout], (0, 3, 1, 2))
    return outs


# ----------------------- pure-JAX reference (for checking) -----------------------
def _ref_head(x_nhwc, w3, w1, b1, do_norm, emb_scale):
    y = jax.lax.conv_general_dilated(
        x_nhwc, w3, window_strides=(1, 1), padding="SAME",
        dimension_numbers=("NHWC", "HWIO", "NHWC"),
        precision=jax.lax.Precision.HIGHEST)
    mean = jnp.mean(y, axis=(1, 2), keepdims=True)
    var = jnp.mean((y - mean) ** 2, axis=(1, 2), keepdims=True)
    y = (y - mean) / jnp.sqrt(var + EPS_IN)
    y = jnp.maximum(y, 0.0)
    out = jnp.einsum("bhwc,cd->bhwd", y, w1,
                     precision=jax.lax.Precision.HIGHEST) + b1[0]
    if do_norm:
        norm = jnp.sqrt(jnp.sum(out * out, axis=-1, keepdims=True))
        out = emb_scale * out / jnp.maximum(norm, EPS_NORM)
    return jnp.transpose(out, (0, 3, 1, 2))


if __name__ == "__main__":
    n_classes, n_ids = 3, 100
    emb_scale = math.sqrt(2.0) * math.log(n_ids - 1)

    B, H, W = 2, 16, 16
    key = jax.random.PRNGKey(0)
    kx, kp = jax.random.split(key)
    x = jax.random.normal(kx, (B, FEAT2D, H, W), jnp.float32)   # NCHW input
    params = init_params(kp, n_classes)
    w3k, w1bd, b_all, offsets = fuse_params(params, n_classes)

    fwd = jax.jit(partial(decoder_image_forward,
                          offsets=offsets, emb_scale=emb_scale))
    outs = fwd(x, w3k, w1bd, b_all)
    jax.block_until_ready(outs)

    # sanity-check against a pure-JAX f32 reference (tolerance covers the bf16
    # MXU operands; stats / normalize are kept in f32 inside the kernel).
    x_nhwc = jnp.transpose(x, (0, 2, 3, 1))
    for name, do_norm in (("img_center", False), ("img_offset", False),
                          ("img_size", False), ("img_id_feat", True)):
        w3, w1, b1 = params[name]
        ref = _ref_head(x_nhwc, w3, w1, b1, do_norm, emb_scale)
        got = outs[name]
        assert got.shape == ref.shape, (name, got.shape, ref.shape)
        max_err = float(jnp.max(jnp.abs(got - ref)))
        assert jnp.allclose(got, ref, rtol=2e-2, atol=2e-2), (name, max_err)

    print("KERNEL_OK")
</pallas_src>

<mosaic_0001>
module attributes {stable_mosaic.version = 11 : i64} {
  func.func @_fused_decoder_kernel(%arg0: i32, %arg1: memref<1x19x24x128xf32, #tpu.memory_space<vmem>>, %arg2: memref<3x384x512xbf16, #tpu.memory_space<vmem>>, %arg3: memref<512x128xbf16, #tpu.memory_space<vmem>>, %arg4: memref<1x128xf32, #tpu.memory_space<vmem>>, %arg5: memref<1x16x24x128xf32, #tpu.memory_space<vmem>>) attributes {dimension_semantics = [#tpu.dimension_semantics<parallel>], iteration_bounds = array<i64: 2>, scalar_prefetch = 0 : i64, scratch_operands = 0 : i64, tpu.core_type = #tpu.core_type<tc>, window_params = [{transform_indices = @transform_0, window_bounds = array<i64: 1, 19, 24, 128>}, {pipeline_mode = #tpu.pipeline_mode<synchronous>, transform_indices = @transform_1, window_bounds = array<i64: 3, 384, 512>}, {pipeline_mode = #tpu.pipeline_mode<synchronous>, transform_indices = @transform_2, window_bounds = array<i64: 512, 128>}, {pipeline_mode = #tpu.pipeline_mode<synchronous>, transform_indices = @transform_3, window_bounds = array<i64: 1, 128>}, {transform_indices = @transform_4, window_bounds = array<i64: 1, 16, 24, 128>}]} {
    %c0 = arith.constant 0 : index
    %c0_0 = arith.constant 0 : index
    %c0_1 = arith.constant 0 : index
    %c0_2 = arith.constant 0 : index
    %0 = vector.load %arg1[%c0, %c0_0, %c0_1, %c0_2] : memref<1x19x24x128xf32, #tpu.memory_space<vmem>>, vector<1x19x24x128xf32>
    %1 = vector.shape_cast %0 : vector<1x19x24x128xf32> to vector<456x128xf32>
    %2 = vector.extract_strided_slice %1 {offsets = [0, 0], sizes = [432, 128], strides = [1, 1]} : vector<456x128xf32> to vector<432x128xf32>
    %3 = vector.extract_strided_slice %2 {offsets = [0, 0], sizes = [384, 128], strides = [1, 1]} : vector<432x128xf32> to vector<384x128xf32>
    %4 = arith.truncf %3 : vector<384x128xf32> to vector<384x128xbf16>
    %5 = vector.extract_strided_slice %2 {offsets = [24, 0], sizes = [384, 128], strides = [1, 1]} : vector<432x128xf32> to vector<384x128xf32>
    %6 = arith.truncf %5 : vector<384x128xf32> to vector<384x128xbf16>
    %7 = vector.extract_strided_slice %2 {offsets = [48, 0], sizes = [384, 128], strides = [1, 1]} : vector<432x128xf32> to vector<384x128xf32>
    %8 = arith.truncf %7 : vector<384x128xf32> to vector<384x128xbf16>
    %9 = tpu.concatenate %4, %6, %8 in 1 : vector<384x128xbf16>, vector<384x128xbf16>, vector<384x128xbf16> -> vector<384x384xbf16>
    %c0_3 = arith.constant 0 : index
    %c0_4 = arith.constant 0 : index
    %c0_5 = arith.constant 0 : index
    %10 = vector.load %arg2[%c0_3, %c0_4, %c0_5] : memref<3x384x512xbf16, #tpu.memory_space<vmem>>, vector<1x384x512xbf16>
    %11 = vector.shape_cast %10 : vector<1x384x512xbf16> to vector<384x512xbf16>
    %cst = arith.constant dense<0.000000e+00> : vector<384x512xf32>
    %12 = tpu.matmul %9, %11, %cst {dimension_numbers = #tpu.dot_dimension_numbers<[1], [0], [0], [1], [0, 0, 1, 1], [], []>} : vector<384x384xbf16>, vector<384x512xbf16>, vector<384x512xf32> -> vector<384x512xf32>
    %13 = vector.extract_strided_slice %1 {offsets = [1, 0], sizes = [432, 128], strides = [1, 1]} : vector<456x128xf32> to vector<432x128xf32>
    %14 = vector.extract_strided_slice %13 {offsets = [0, 0], sizes = [384, 128], strides = [1, 1]} : vector<432x128xf32> to vector<384x128xf32>
    %15 = arith.truncf %14 : vector<384x128xf32> to vector<384x128xbf16>
    %16 = vector.extract_strided_slice %13 {offsets = [24, 0], sizes = [384, 128], strides = [1, 1]} : vector<432x128xf32> to vector<384x128xf32>
    %17 = arith.truncf %16 : vector<384x128xf32> to vector<384x128xbf16>
    %18 = vector.extract_strided_slice %13 {offsets = [48, 0], sizes = [384, 128], strides = [1, 1]} : vector<432x128xf32> to vector<384x128xf32>
    %19 = arith.truncf %18 : vector<384x128xf32> to vector<384x128xbf16>
    %20 = tpu.concatenate %15, %17, %19 in 1 : vector<384x128xbf16>, vector<384x128xbf16>, vector<384x128xbf16> -> vector<384x384xbf16>
    %c1 = arith.constant 1 : index
    %c0_6 = arith.constant 0 : index
    %c0_7 = arith.constant 0 : index
    %21 = vector.load %arg2[%c1, %c0_6, %c0_7] : memref<3x384x512xbf16, #tpu.memory_space<vmem>>, vector<1x384x512xbf16>
    %22 = vector.shape_cast %21 : vector<1x384x512xbf16> to vector<384x512xbf16>
    %cst_8 = arith.constant dense<0.000000e+00> : vector<384x512xf32>
    %23 = tpu.matmul %20, %22, %cst_8 {dimension_numbers = #tpu.dot_dimension_numbers<[1], [0], [0], [1], [0, 0, 1, 1], [], []>} : vector<384x384xbf16>, vector<384x512xbf16>, vector<384x512xf32> -> vector<384x512xf32>
    %24 = arith.addf %12, %23 : vector<384x512xf32>
    %25 = vector.extract_strided_slice %1 {offsets = [2, 0], sizes = [432, 128], strides = [1, 1]} : vector<456x128xf32> to vector<432x128xf32>
    %26 = vector.extract_strided_slice %25 {offsets = [0, 0], sizes = [384, 128], strides = [1, 1]} : vector<432x128xf32> to vector<384x128xf32>
    %27 = arith.truncf %26 : vector<384x128xf32> to vector<384x128xbf16>
    %28 = vector.extract_strided_slice %25 {offsets = [24, 0], sizes = [384, 128], strides = [1, 1]} : vector<432x128xf32> to vector<384x128xf32>
    %29 = arith.truncf %28 : vector<384x128xf32> to vector<384x128xbf16>
    %30 = vector.extract_strided_slice %25 {offsets = [48, 0], sizes = [384, 128], strides = [1, 1]} : vector<432x128xf32> to vector<384x128xf32>
    %31 = arith.truncf %30 : vector<384x128xf32> to vector<384x128xbf16>
    %32 = tpu.concatenate %27, %29, %31 in 1 : vector<384x128xbf16>, vector<384x128xbf16>, vector<384x128xbf16> -> vector<384x384xbf16>
    %c2 = arith.constant 2 : index
    %c0_9 = arith.constant 0 : index
    %c0_10 = arith.constant 0 : index
    %33 = vector.load %arg2[%c2, %c0_9, %c0_10] : memref<3x384x512xbf16, #tpu.memory_space<vmem>>, vector<1x384x512xbf16>
    %34 = vector.shape_cast %33 : vector<1x384x512xbf16> to vector<384x512xbf16>
    %cst_11 = arith.constant dense<0.000000e+00> : vector<384x512xf32>
    %35 = tpu.matmul %32, %34, %cst_11 {dimension_numbers = #tpu.dot_dimension_numbers<[1], [0], [0], [1], [0, 0, 1, 1], [], []>} : vector<384x384xbf16>, vector<384x512xbf16>, vector<384x512xf32> -> vector<384x512xf32>
    %36 = arith.addf %24, %35 : vector<384x512xf32>
    %37 = vector.shape_cast %36 : vector<384x512xf32> to vector<16x24x512xf32>
    %38 = tpu.iota {dimensions = array<i32: 1>} : vector<16x24x1xi32>
    %c16_i32 = arith.constant 16 : i32
    %39 = vector.broadcast %c16_i32 : i32 to vector<16x24x1xi32>
    %40 = arith.cmpi slt, %38, %39 : vector<16x24x1xi32>
    %cst_12 = arith.constant 0.000000e+00 : f32
    %41 = vector.shape_cast %40 : vector<16x24x1xi1> to vector<16x24x1xi1>
    %42 = vector.broadcast %41 : vector<16x24x1xi1> to vector<16x24x512xi1>
    %43 = vector.broadcast %cst_12 : f32 to vector<16x24x512xf32>
    %44 = arith.select %42, %37, %43 : vector<16x24x512xi1>, vector<16x24x512xf32>
    %45 = vector.shape_cast %44 : vector<16x24x512xf32> to vector<384x512xf32>
    %cst_13 = arith.constant dense<0.000000e+00> : vector<512xf32>
    %46 = vector.multi_reduction <add>, %45, %cst_13 [0] : vector<384x512xf32> to vector<512xf32>
    %47 = vector.shape_cast %46 : vector<512xf32> to vector<1x512xf32>
    %48 = arith.mulf %45, %45 : vector<384x512xf32>
    %cst_14 = arith.constant dense<0.000000e+00> : vector<512xf32>
    %49 = vector.multi_reduction <add>, %48, %cst_14 [0] : vector<384x512xf32> to vector<512xf32>
    %50 = vector.shape_cast %49 : vector<512xf32> to vector<1x512xf32>
    %cst_15 = arith.constant 3.906250e-03 : f32
    %51 = vector.broadcast %cst_15 : f32 to vector<1x512xf32>
    %52 = arith.mulf %47, %51 : vector<1x512xf32>
    %cst_16 = arith.constant 3.906250e-03 : f32
    %53 = vector.broadcast %cst_16 : f32 to vector<1x512xf32>
    %54 = arith.mulf %50, %53 : vector<1x512xf32>
    %55 = arith.mulf %52, %52 : vector<1x512xf32>
    %56 = arith.subf %54, %55 : vector<1x512xf32>
    %cst_17 = arith.constant 0.000000e+00 : f32
    %57 = vector.broadcast %cst_17 : f32 to vector<1x512xf32>
    %58 = arith.maximumf %56, %57 : vector<1x512xf32>
    %cst_18 = arith.constant 9.99999974E-6 : f32
    %59 = vector.broadcast %cst_18 : f32 to vector<1x512xf32>
    %60 = arith.addf %58, %59 : vector<1x512xf32>
    %61 = math.rsqrt %60 : vector<1x512xf32>
    %62 = vector.broadcast %52 : vector<1x512xf32> to vector<384x512xf32>
    %63 = arith.subf %45, %62 : vector<384x512xf32>
    %64 = vector.broadcast %61 : vector<1x512xf32> to vector<384x512xf32>
    %65 = arith.mulf %63, %64 : vector<384x512xf32>
    %cst_19 = arith.constant 0.000000e+00 : f32
    %66 = vector.broadcast %cst_19 : f32 to vector<384x512xf32>
    %67 = arith.maximumf %65, %66 : vector<384x512xf32>
    %68 = arith.truncf %67 : vector<384x512xf32> to vector<384x512xbf16>
    %c0_20 = arith.constant 0 : index
    %c0_21 = arith.constant 0 : index
    %69 = vector.load %arg3[%c0_20, %c0_21] : memref<512x128xbf16, #tpu.memory_space<vmem>>, vector<512x128xbf16>
    %cst_22 = arith.constant dense<0.000000e+00> : vector<384x128xf32>
    %70 = tpu.matmul %68, %69, %cst_22 {dimension_numbers = #tpu.dot_dimension_numbers<[1], [0], [0], [1], [0, 0, 1, 1], [], []>} : vector<384x512xbf16>, vector<512x128xbf16>, vector<384x128xf32> -> vector<384x128xf32>
    %c0_23 = arith.constant 0 : index
    %c0_24 = arith.constant 0 : index
    %71 = vector.load %arg4[%c0_23, %c0_24] : memref<1x128xf32, #tpu.memory_space<vmem>>, vector<1x128xf32>
    %72 = vector.broadcast %71 : vector<1x128xf32> to vector<384x128xf32>
    %73 = arith.addf %70, %72 : vector<384x128xf32>
    %74 = tpu.iota {dimensions = array<i32: 1>} : vector<384x128xi32>
    %c7_i32 = arith.constant 7 : i32
    %75 = vector.broadcast %c7_i32 : i32 to vector<384x128xi32>
    %76 = arith.cmpi sge, %74, %75 : vector<384x128xi32>
    %c71_i32 = arith.constant 71 : i32
    %77 = vector.broadcast %c71_i32 : i32 to vector<384x128xi32>
    %78 = arith.cmpi slt, %74, %77 : vector<384x128xi32>
    %79 = arith.andi %76, %78 : vector<384x128xi1>
    %80 = arith.mulf %73, %73 : vector<384x128xf32>
    %cst_25 = arith.constant 0.000000e+00 : f32
    %81 = vector.broadcast %cst_25 : f32 to vector<384x128xf32>
    %82 = arith.select %79, %80, %81 : vector<384x128xi1>, vector<384x128xf32>
    %cst_26 = arith.constant dense<0.000000e+00> : vector<384xf32>
    %83 = vector.multi_reduction <add>, %82, %cst_26 [1] : vector<384x128xf32> to vector<384xf32>
    %84 = vector.shape_cast %83 : vector<384xf32> to vector<384x1xf32>
    %cst_27 = arith.constant 1.000000e-24 : f32
    %85 = vector.broadcast %cst_27 : f32 to vector<384x1xf32>
    %86 = arith.maximumf %84, %85 : vector<384x1xf32>
    %87 = math.rsqrt %86 : vector<384x1xf32>
    %cst_28 = arith.constant 6.49848079 : f32
    %88 = vector.broadcast %cst_28 : f32 to vector<384x1xf32>
    %89 = arith.mulf %88, %87 : vector<384x1xf32>
    %90 = vector.broadcast %89 : vector<384x1xf32> to vector<384x128xf32>
    %91 = arith.mulf %73, %90 : vector<384x128xf32>
    %92 = arith.select %79, %91, %73 : vector<384x128xi1>, vector<384x128xf32>
    %93 = vector.shape_cast %92 : vector<384x128xf32> to vector<1x16x24x128xf32>
    %c0_29 = arith.constant 0 : index
    %c0_30 = arith.constant 0 : index
    %c0_31 = arith.constant 0 : index
    %c0_32 = arith.constant 0 : index
    %94 = vector.load %arg5[%c0_29, %c0_30, %c0_31, %c0_32] : memref<1x16x24x128xf32, #tpu.memory_space<vmem>>, vector<1x16x24x128xf32>
    tpu.vector_store %arg5[%c0_29, %c0_30, %c0_31, %c0_32], %93 {strides = array<i32>} : memref<1x16x24x128xf32, #tpu.memory_space<vmem>>, vector<1x16x24x128xf32>,
    return
  }
  func.func @transform_0(%arg0: i32) -> (i32, i32, i32, i32) {
    %c0_i32 = arith.constant 0 : i32
    %c0_i32_0 = arith.constant 0 : i32
    %c0_i32_1 = arith.constant 0 : i32
    %c0_i32_2 = arith.constant 0 : i32
    return %arg0, %c0_i32, %c0_i32_0, %c0_i32_1 : i32, i32, i32, i32
  }
  func.func @transform_1(%arg0: i32) -> (i32, i32, i32) {
    %c0_i32 = arith.constant 0 : i32
    %c0_i32_0 = arith.constant 0 : i32
    %c0_i32_1 = arith.constant 0 : i32
    %c0_i32_2 = arith.constant 0 : i32
    return %c0_i32, %c0_i32_0, %c0_i32_1 : i32, i32, i32
  }
  func.func @transform_2(%arg0: i32) -> (i32, i32) {
    %c0_i32 = arith.constant 0 : i32
    %c0_i32_0 = arith.constant 0 : i32
    %c0_i32_1 = arith.constant 0 : i32
    return %c0_i32, %c0_i32_0 : i32, i32
  }
  func.func @transform_3(%arg0: i32) -> (i32, i32) {
    %c0_i32 = arith.constant 0 : i32
    %c0_i32_0 = arith.constant 0 : i32
    %c0_i32_1 = arith.constant 0 : i32
    return %c0_i32, %c0_i32_0 : i32, i32
  }
  func.func @transform_4(%arg0: i32) -> (i32, i32, i32, i32) {
    %c0_i32 = arith.constant 0 : i32
    %c0_i32_0 = arith.constant 0 : i32
    %c0_i32_1 = arith.constant 0 : i32
    %c0_i32_2 = arith.constant 0 : i32
    return %arg0, %c0_i32, %c0_i32_0, %c0_i32_1 : i32, i32, i32, i32
  }
}

</mosaic_0001>

<bundles_post_ra>
// kernel: decoder_image_forward.1
= control target key start
LH: loop header
LB: loop body
LE: loop exit
PB: predicated region body
PF: predicated region fallthrough
CT: control target
= control target key end

     0   :  { %9 = vsyncpa [#allocation3], 0  ;;  %s15397_s0 = inlined_call_operand.vmem [shape: f32[2,19,24,128], index: 0, kind: input, shape index: {}]   ;;  %s15398_s1 = inlined_call_operand.hbm [shape: bf16[3,384,512], index: 1, kind: input, shape index: {}]   ;;  %s15399_s2 = inlined_call_operand.hbm [shape: bf16[512,128], index: 2, kind: input, shape index: {}]   ;;  %s15400_s3 = inlined_call_operand.hbm [shape: f32[1,128], index: 3, kind: input, shape index: {}]   ;;  %s15401_s4 = inlined_call_operand.vmem [shape: f32[2,16,24,128], index: 4, kind: output, shape index: {}]  }
   0x1   :  { %10 = vsyncpa [#allocation5], 0  ;;  %s11195_s15 = smov 0  }
   0x2 LB: > { %s11162_s16 = smov [#allocation4]   ;;  %s11201_s18 = sadd.s32 4294967295, %s11160_s15   ;;  %s11160_s15 = sphi %s11195_s15, %s16_s15  }
   0x3   : > { %s161_s17 = sshll.u32 %s11162_s16, 4  ;;  %p9042_p0 = scmp.ge.s32.totalorder %s11160_s15, 1  ;;  %s11210_s17 = int_to_ptr.vmem [resolvable:$true] %s161_s17 }
   0x4   : > { %p136_p1 = scmp.lt.s32.totalorder %s11160_s15, 3  ;;  %p15402_p2 = scmp.eq.s32.totalorder %s11201_s18, 0 }
   0x5   : > { %s11163_s20 = smov [#allocation2]   ;;  %s11164_s23 = smov [#allocation6]  }
   0x6   : > { %p11206_p3 = pnand %p9042_p0, %p136_p1  ;;  %s148_s21 = sshll.u32 %s11163_s20, 4  ;;  %s11214_s21 = int_to_ptr.vmem [resolvable:$true] %s148_s21 }
   0x7   : > { %s11222_s24 = sshll.u32 %s11164_s23, 4  ;;  %s11062_s27 = scalar_lea.hbm %s15399_s2, 4096  ;;  %s176_s24 = int_to_ptr.vmem [resolvable:$true] %s11222_s24 }
   0x8   : > { %s15692_s19 = scalar_select %p11206_p3, 1, 0 }
   0x9   : > { %p10462_p4 = pneg %p11206_p3  ;;  %p11063_p6 = scmp.ne.s32.totalorder %s15399_s2, %s11062_s27 }
   0xa   : > { %p11069_p10 = scmp.lt.u32.totalorder %s11062_s27, %s15399_s2 }
   0xb   : > { %p11218_p5 = pnand %p15402_p2, %p10462_p4 }
   0xd   : > { %p11232_p7 = pneg %p11218_p5 }
   0xf   : > { %p11065_p8 = pnand %p11232_p7, %p11063_p6 }
  0x11   : > { %p11066_p9 = pneg %p11065_p8 }
  0x13   : > { %p11071_p11 = pnand %p11069_p10, %p11066_p9 }
  0x15   : > { %11074 = shalt.err (!%p11071_p11)
}
  0x16   : > { %s11075_s7 = scalar_lea.vmem %s11210_s17, 4096  ;;  %p11083_p1 = scmp.lt.s32.totalorder %s11210_s17, %s11210_s17 }
  0x17   : > { %p11076_p12 = scmp.ne.s32.totalorder %s11210_s17, %s11075_s7  ;;  %p11084_p4 = scmp.lt.s32.totalorder %s11075_s7, %s11075_s7 }
  0x19   : > { %p11078_p13 = pnand %p11076_p12, %p11232_p7  ;;  %p11085_p6 = por %p11084_p4, %p11083_p1 }
  0x1b   : > { %p11079_p0 = pneg %p11078_p13 }
  0x1d   : > { %p11086_p8 = pnand %p11085_p6, %p11079_p0 }
  0x1f   : > { %11089 = shalt.err (!%p11086_p8)
}
  0x20   : > { %s11165_s8 = smov 64   ;;  %s11166_s9 = smov 4  }
  0x21   : > { %10468 = dma.hbm_to_vmem [thread:$0]  (!%p11218_p5), %s15399_s2, 4096, %s11210_s17, [#allocation5], %s11165_s8, %s11165_s8, %s11166_s9  }
  0x22   : > { %s11090_s14 = scalar_lea.hbm %s15398_s1, 36864 }
  0x23   : > { %p11091_p9 = scmp.ne.s32.totalorder %s15398_s1, %s11090_s14  ;;  %p11097_p12 = scmp.lt.u32.totalorder %s11090_s14, %s15398_s1 }
  0x25   : > { %p11093_p10 = pnand %p11091_p9, %p11232_p7 }
  0x27   : > { %p11094_p11 = pneg %p11093_p10 }
  0x29   : > { %p11099_p13 = pnand %p11097_p12, %p11094_p11 }
  0x2b   : > { %11102 = shalt.err (!%p11099_p13)
}
  0x2c   : > { %s11103_s17 = scalar_lea.vmem %s11214_s21, 36864  ;;  %p11111_p6 = scmp.lt.s32.totalorder %s11214_s21, %s11214_s21 }
  0x2d   : > { %p11104_p0 = scmp.ne.s32.totalorder %s11214_s21, %s11103_s17  ;;  %p11112_p8 = scmp.lt.s32.totalorder %s11103_s17, %s11103_s17 }
  0x2f   : > { %p11106_p1 = pnand %p11104_p0, %p11232_p7  ;;  %p11113_p9 = por %p11112_p8, %p11111_p6 }
  0x31   : > { %p11107_p4 = pneg %p11106_p1 }
  0x33   : > { %p11114_p10 = pnand %p11113_p9, %p11107_p4 }
  0x35   : > { %11117 = shalt.err (!%p11114_p10)
}
  0x36   : > { %s11167_s26 = smov 256   ;;  %s11168_s27 = smov 16  }
  0x37   : > { %10465 = dma.hbm_to_vmem [thread:$0]  (!%p11218_p5), %s15398_s1, 36864, %s11214_s21, [#allocation3], %s11167_s26, %s11167_s26, %s11168_s27  }
  0x38   : > { %s11118_s7 = scalar_lea.hbm %s15400_s3, 16 }
  0x39   : > { %p11119_p11 = scmp.ne.s32.totalorder %s15400_s3, %s11118_s7  ;;  %p11125_p0 = scmp.lt.u32.totalorder %s11118_s7, %s15400_s3 }
  0x3b   : > { %p11121_p12 = pnand %p11119_p11, %p11232_p7 }
  0x3d   : > { %p11122_p13 = pneg %p11121_p12 }
  0x3f   : > { %p11127_p1 = pnand %p11125_p0, %p11122_p13 }
  0x41   : > { %11130 = shalt.err (!%p11127_p1)
}
  0x42   : > { %s11131_s12 = scalar_lea.vmem %s176_s24, 16  ;;  %s11138_s21 = scalar_lea.vmem %s176_s24, 32 }
  0x43   : > { %p11132_p4 = scmp.ne.s32.totalorder %s176_s24, %s11131_s12  ;;  %p11139_p9 = scmp.lt.s32.totalorder %s176_s24, %s176_s24 }
  0x44   : > { %p11140_p10 = scmp.lt.s32.totalorder %s11138_s21, %s11131_s12 }
  0x45   : > { %p11134_p6 = pnand %p11132_p4, %p11232_p7 }
  0x46   : > { %p11141_p2 = por %p11140_p10, %p11139_p9 }
  0x47   : > { %p11135_p8 = pneg %p11134_p6 }
  0x49   : > { %p11142_p3 = pnand %p11141_p2, %p11135_p8 }
  0x4b   : > { %11145 = shalt.err (!%p11142_p3)
}
  0x4c   : > { %10471 = dma.hbm_to_vmem [thread:$0]  (!%p11218_p5), %s15400_s3, 16, %s176_s24, [#allocation5]  }
  0x4d   : > { %p15695_p11 = scmp.ne.s32.totalorder %s15692_s19, 0 }
  0x4f   : > { %196 = sbr.rel (%p15695_p11) target bundleno = 2359 (0x937), region = 36 }
  0x56   : > { %p15696_p12 = scmp.eq.s32.totalorder %s11201_s18, 0 }
  0x58   : > { %11151 = dma.done.wait (%p15696_p12), [#allocation3], 36864   ;;  %p15697_p7 = pmov %p15696_p12 }
  0x5a   : > { %11153 = vsyncadd (%p15697_p7), [#allocation3], 4294930432  ;;  %p15698_p13 = pmov %p15697_p7 }
  0x5b   : > { %p15699_p2 = pmov %p15697_p7 }
  0x5c   : > { %11155 = dma.done.wait (%p15698_p13), [#allocation5], 4112  }
  0x5d   : > { %11157 = vsyncadd (%p15699_p2), [#allocation5], 4294963184  ;;  %v15412_v0 = vmov 0   ;;  %v10494_v1 = vld [vmem:[#allocation2 + $0x304] ss:$16 sps:$4 sm:$0xff]   ;;  %p230_p3 = scmp.lt.s32.totalorder %s11201_s18, 1 }
  0x5e   : > { %1802 = vmatprep.mubr.bf16.mxu0 %v15412_v0  ;;  %v10496_v2 = vld [vmem:[#allocation2 + $0x504] ss:$16 sps:$4 sm:$0xff]   ;;  %1497 = vmatprep.subr.bf16.mxu1 %v10494_v1  ;;  %v10498_v3 = vld [vmem:[#allocation2 + $0x300] ss:$16 sps:$4 sm:$0xff]   ;;  %vm543_vm0 = vsmask.f32 7424 }
  0x5f   : > { %v10499_v4 = vld [vmem:[#allocation2 + $0x500] ss:$16 sps:$4 sm:$0xff]   ;;  %1770 = vmatprep.subr.bf16.mxu0 %v10496_v2  ;;  %v10500_v5 = vld [vmem:[#allocation2 + $0x324] ss:$16 sps:$4 sm:$0xff]   ;;  %1498 = vmatpush1.bf16.msra.mxu1 %v10498_v3  ;;  %s16389_s18 = smov (!%p230_p3, %s11201_s18), 1  ;;  %vm4312_vm1 = vcmask 1046528  }
  0x60   : > { %1771 = vmatpush1.bf16.msra.mxu0 %v10499_v4  ;;  %v10502_v6 = vld [vmem:[#allocation2 + $0x524] ss:$16 sps:$4 sm:$0xff]   ;;  %v10504_v7 = vld [vmem:[#allocation2 + $0x320] ss:$16 sps:$4 sm:$0xff]   ;;  %1499 = vmatprep.subr.bf16.mxu1 %v10500_v5  ;;  %s10448_s19 = smul.u32 456, %s16389_s18 }
  0x61   : > { %v10505_v8 = vld [vmem:[#allocation2 + $0x520] ss:$16 sps:$4 sm:$0xff]   ;;  %1772 = vmatprep.subr.bf16.mxu0 %v10502_v6  ;;  %v10506_v9 = vld [vmem:[#allocation2 + $0x344] ss:$16 sps:$4 sm:$0xff]   ;;  %s10449_s16 = smul.u32 384, %s16389_s18 }
  0x62   : > { %v10508_v10 = vld [vmem:[#allocation2 + $0x544] ss:$16 sps:$4 sm:$0xff]   ;;  %v10510_v11 = vld [vmem:[#allocation2 + $0x340] ss:$16 sps:$4 sm:$0xff]   ;;  %s11314_s30 = scalar_lea.vmem %s15397_s0, %s10448_s19 }
  0x63   : > { %v10511_v12 = vld [vmem:[#allocation2 + $0x540] ss:$16 sps:$4 sm:$0xff]   ;;  %1500 = vmatpush1.bf16.msra.mxu1 %v10504_v7  ;;  %v10512_v13 = vld [vmem:[#allocation2 + $0x364] ss:$16 sps:$4 sm:$0xff]   ;;  %v11318_v29 = vld [vmem:[%s11314_s30 + $0x38] sm:$0xff]  ;;  %s15099_s25 = scalar_lea.vmem %s15401_s4, %s10449_s16 }
  0x64   : > { %1773 = vmatpush1.bf16.msra.mxu0 %v10505_v8  ;;  %1501 = vmatprep.subr.bf16.mxu1 %v10506_v9  ;;  %v10514_v14 = vld [vmem:[#allocation2 + $0x564] ss:$16 sps:$4 sm:$0xff]   ;;  %v10516_v15 = vld [vmem:[#allocation2 + $0x360] ss:$16 sps:$4 sm:$0xff]   ;;  %v11324_v32 = vld [vmem:[%s11314_s30 + $0x48] sm:$0xff] }
  0x65   : > { %1774 = vmatprep.subr.bf16.mxu0 %v10508_v10  ;;  %v10517_v16 = vld [vmem:[#allocation2 + $0x560] ss:$16 sps:$4 sm:$0xff]   ;;  %v10518_v17 = vld [vmem:[#allocation2 + $0x384] ss:$16 sps:$4 sm:$0xff]   ;;  %v11340_v41 = vld [vmem:[%s11314_s30 + $0x58] sm:$0xff] }
  0x66   : > { %v10520_v18 = vld [vmem:[#allocation2 + $0x584] ss:$16 sps:$4 sm:$0xff]   ;;  %v10522_v19 = vld [vmem:[#allocation2 + $0x380] ss:$16 sps:$4 sm:$0xff]   ;;  %v11358_v55 = vld [vmem:[%s11314_s30 + $0x68] sm:$0xff] }
  0x67   : > { %1502 = vmatpush1.bf16.msra.mxu1 %v10510_v11  ;;  %v10523_v20 = vld [vmem:[#allocation2 + $0x580] ss:$16 sps:$4 sm:$0xff]   ;;  %v10524_v21 = vld [vmem:[#allocation2 + $0x3a4] ss:$16 sps:$4 sm:$0xff]   ;;  %v244_v56 = vld [vmem:[%s11314_s30 + $0x18] sm:$0xff] }
  0x68   : > { %1775 = vmatpush1.bf16.msra.mxu0 %v10511_v12  ;;  %1503 = vmatprep.subr.bf16.mxu1 %v10512_v13  ;;  %v10526_v22 = vld [vmem:[#allocation2 + $0x5a4] ss:$16 sps:$4 sm:$0xff]   ;;  %v10528_v23 = vld [vmem:[#allocation2 + $0x3a0] ss:$16 sps:$4 sm:$0xff]   ;;  %v11371_v62 = vld [vmem:[%s11314_s30 + $0x28] sm:$0xff] }
  0x69   : > { %1776 = vmatprep.subr.bf16.mxu0 %v10514_v14  ;;  %v10529_v24 = vld [vmem:[#allocation2 + $0x5a0] ss:$16 sps:$4 sm:$0xff]   ;;  %v10530_v25 = vld [vmem:[#allocation2 + $0x3c4] ss:$16 sps:$4 sm:$0xff]   ;;  %v11391_v13 = vld [vmem:[%s11314_s30 + $0x78] sm:$0xff] }
  0x6a   : > { %v10532_v26 = vld [vmem:[#allocation2 + $0x5c4] ss:$16 sps:$4 sm:$0xff]   ;;  %v10534_v27 = vld [vmem:[#allocation2 + $0x3c0] ss:$16 sps:$4 sm:$0xff]  }
  0x6b   : > { %1504 = vmatpush1.bf16.msra.mxu1 %v10516_v15  ;;  %v247_v28 = vld [vmem:[%s11314_s30 + $0x30] sm:$0xff]  ;;  %v11321_v31 = vld [vmem:[%s11314_s30 + $0x40] sm:$0xff] }
  0x6c   : > { %1777 = vmatpush1.bf16.msra.mxu0 %v10517_v16  ;;  %1505 = vmatprep.subr.bf16.mxu1 %v10518_v17  ;;  %v10535_v30 = vld [vmem:[#allocation2 + $0x5c0] ss:$16 sps:$4 sm:$0xff]   ;;  %v11327_v33 = vpack.c.bf16 %v11318_v29, %v247_v28  ;;  %v10536_v34 = vld [vmem:[#allocation2 + $0x3e4] ss:$16 sps:$4 sm:$0xff]   ;;  %v11331_v35 = vpack.c.bf16 %v11324_v32, %v11321_v31  ;;  %v11377_v2 = vpack.c.bf16 %v247_v28, %v11371_v62 }
  0x6d   : > { %1778 = vmatprep.subr.bf16.mxu0 %v10520_v18  ;;  %v10538_v36 = vld [vmem:[#allocation2 + $0x5e4] ss:$16 sps:$4 sm:$0xff]   ;;  %v10540_v43 = vld [vmem:[#allocation2 + $0x3e0] ss:$16 sps:$4 sm:$0xff]  }
  0x6e   : > { %v569_v37 = vshrl.u32 %v11327_v33, 16  ;;  %v571_v38 = vshll.u32 %v11327_v33, 16  ;;  %v576_v39 = vshll.u32 %v11331_v35, 16  ;;  %v11337_v40 = vld [vmem:[%s11314_s30 + $0x50] sm:$0xff]  ;;  %v596_v51 = vshrl.u32 %v11331_v35, 16  ;;  %v11355_v54 = vld [vmem:[%s11314_s30 + $0x60] sm:$0xff] }
  0x6f   : > { %1506 = vmatpush1.bf16.msra.mxu1 %v10522_v19  ;;  %v10541_v44 = vld [vmem:[#allocation2 + $0x5e0] ss:$16 sps:$4 sm:$0xff]   ;;  %v11346_v46 = vpack.c.bf16 %v11340_v41, %v11337_v40  ;;  %v10542_v47 = vld [vmem:[#allocation2 + $0x404] ss:$16 sps:$4 sm:$0xff]   ;;  %v11368_v61 = vpack.c.bf16 %v11358_v55, %v11355_v54  ;;  %v564_v6 = vshll.u32 %v11377_v2, 16 }
  0x70   : > { %1779 = vmatpush1.bf16.msra.mxu0 %v10523_v20  ;;  %1507 = vmatprep.subr.bf16.mxu1 %v10524_v21  ;;  %v11342_v42 = vrot.slane %v571_v38, 1  ;;  %v578_v45 = vrot.slane %v576_v39, 1  ;;  %v10544_v50 = vld [vmem:[#allocation2 + $0x400] ss:$16 sps:$4 sm:$0xff]   ;;  %v10545_v53 = vld [vmem:[#allocation2 + $0x424] ss:$16 sps:$4 sm:$0xff]  }
  0x71   : > { %1780 = vmatprep.subr.bf16.mxu0 %v10526_v22  ;;  %v600_v52 = vshll.u32 %v11346_v46, 16  ;;  %v11363_v57 = vld [vmem:[%s11314_s30 + $0x20] sm:$0xff]  ;;  %15701 = vst [vmem:[#allocation10_spill] sm:$0xff] %v11368_v61  ;;  %v616_v8 = vshrl.u32 %v11346_v46, 16  ;;  %v620_v9 = vshll.u32 %v11368_v61, 16  ;;  %v11388_v12 = vld [vmem:[%s11314_s30 + $0x70] sm:$0xff] }
  0x72   : > { %v574_v48 = vor.u32 %v11342_v42, %v569_v37  ;;  %v10547_v58 = vld [vmem:[#allocation2 + $0x420] ss:$16 sps:$4 sm:$0xff]   ;;  %v598_v59 = vor.u32 %v596_v51, %v578_v45  ;;  %v11374_v63 = vpack.c.bf16 %v11363_v57, %v244_v56  ;;  %v10548_v1 = vld [vmem:[#allocation2 + $0x444] ss:$16 sps:$4 sm:$0xff]   ;;  %v11393_v14 = vrot.slane %v564_v6, 1  ;;  %v11420_v37 = vld [vmem:[%s11314_s30 + $0x88] sm:$0xff] }
  0x73   : > { %1508 = vmatpush1.bf16.msra.mxu1 %v10528_v23  ;;  %v602_v60 = vrot.slane %v600_v52, 1  ;;  %v10550_v5 = vld [vmem:[#allocation2 + $0x440] ss:$16 sps:$4 sm:$0xff]   ;;  %v10551_v11 = vld [vmem:[#allocation2 + $0x464] ss:$16 sps:$4 sm:$0xff]   ;;  %v622_v19 = vrot.slane %v620_v9, 1  ;;  %v11399_v20 = vpack.c.bf16 %v11391_v13, %v11388_v12  ;;  %v11453_v9 = vpack.c.bf16 %v11371_v62, %v11363_v57 }
  0x74   : > { %1781 = vmatpush1.bf16.msra.mxu0 %v10529_v24  ;;  %1509 = vmatprep.subr.bf16.mxu1 %v10530_v25  ;;  %v11350_v49 = vsel %vm543_vm0, %v574_v48, %v578_v45  ;;  %v557_v3 = vshrl.u32 %v11374_v63, 16  ;;  %v559_v4 = vshll.u32 %v11374_v63, 16  ;;  %v10553_v16 = vld [vmem:[#allocation2 + $0x460] ss:$16 sps:$4 sm:$0xff]   ;;  %v10554_v17 = vld [vmem:[#allocation2 + $0x484] ss:$16 sps:$4 sm:$0xff]  }
  0x75   : > { %1782 = vmatprep.subr.bf16.mxu0 %v10532_v26  ;;  %15700 = vst [vmem:[#allocation9_spill] sm:$0xff] %v11350_v49  ;;  %v11383_v7 = vsel %vm543_vm0, %v598_v59, %v602_v60  ;;  %v618_v18 = vor.u32 %v616_v8, %v602_v60  ;;  %15703 = vst [vmem:[#allocation12_spill] sm:$0xff] %v11399_v20  ;;  %v241_v22 = vld [vmem:[%s11314_s30] sm:$0xff]  ;;  %v242_v23 = vld [vmem:[%s11314_s30 + $0x8] sm:$0xff]  ;;  %v632_v25 = vshrl.u32 %v11368_v61, 16  ;;  %v636_v28 = vshll.u32 %v11399_v20, 16 }
  0x76   : > { %15702 = vst [vmem:[#allocation11_spill] sm:$0xff] %v11383_v7  ;;  %v561_v10 = vrot.slane %v559_v4, 1  ;;  %v10556_v24 = vld [vmem:[#allocation2 + $0x480] ss:$16 sps:$4 sm:$0xff]   ;;  %v10560_v48 = vld [vmem:[#allocation2 + $0x4c4] ss:$16 sps:$4 sm:$0xff]  }
  0x77   : > { %1510 = vmatpush1.bf16.msra.mxu1 %v10534_v27  ;;  %v11410_v26 = vsel %vm543_vm0, %v618_v18, %v622_v19  ;;  %v10557_v27 = vld [vmem:[#allocation2 + $0x4a4] ss:$16 sps:$4 sm:$0xff]   ;;  %v634_v38 = vor.u32 %v632_v25, %v622_v19  ;;  %v10559_v39 = vld [vmem:[#allocation2 + $0x4a0] ss:$16 sps:$4 sm:$0xff]   ;;  %v648_v52 = vshrl.u32 %v11399_v20, 16  ;;  %v11448_v4 = vld [vmem:[%s11314_s30 + $0x98] sm:$0xff] }
  0x78   : > { %1783 = vmatpush1.bf16.msra.mxu0 %v10535_v30  ;;  %1511 = vmatprep.subr.bf16.mxu1 %v10536_v34  ;;  %v562_v15 = vor.u32 %v561_v10, %v557_v3  ;;  %15704 = vst [vmem:[#allocation13_spill] sm:$0xff] %v11410_v26  ;;  %v243_v30 = vld [vmem:[%s11314_s30 + $0x10] sm:$0xff]  ;;  %v11414_v34 = vpack.c.bf16 %v242_v23, %v241_v22  ;;  %v588_v3 = vshrl.u32 %v11377_v2, 16  ;;  %v10568_v8 = vld [vmem:[#allocation2 + $0x30c] ss:$16 sps:$4 sm:$0xff]   ;;  %15708 = vst [vmem:[#allocation17_spill] sm:$0xff] %v11453_v9 }
  0x79   : > { %1784 = vmatprep.subr.bf16.mxu0 %v10538_v36  ;;  %v11417_v36 = vld [vmem:[%s11314_s30 + $0x80] sm:$0xff]  ;;  %v11463_v22 = vpack.c.bf16 %v11337_v40, %v11324_v32  ;;  %v10566_v23 = vld [vmem:[#allocation2 + $0x308] ss:$16 sps:$4 sm:$0xff]   ;;  %v584_v25 = vshll.u32 %v11453_v9, 16 }
  0x7a   : > { %v11403_v21 = vsel %vm543_vm0, %v562_v15, %v11393_v14  ;;  %v547_v45 = vshll.u32 %v11414_v34, 16  ;;  %v545_v51 = vshrl.u32 %v11414_v34, 16  ;;  %v590_v18 = vor.u32 %v588_v3, %v11393_v14  ;;  %v10595_v57 = vld [vmem:[#allocation2 + $0x4] ss:$16 sps:$4 sm:$0xff]  }
  0x7b   : > { %1512 = vmatpush1.bf16.msra.mxu1 %v10540_v43  ;;  %1529 = vmatprep.mubr.bf16.mxu1 %v11403_v21  ;;  %v638_v43 = vrot.slane %v636_v28, 1  ;;  %15710 = vst [vmem:[#allocation19_spill] sm:$0xff] %v11463_v22  ;;  %v10598_v62 = vld [vmem:[#allocation2 + $0x24] ss:$16 sps:$4 sm:$0xff]   ;;  %v10571_v28 = vld [vmem:[#allocation2 + $0x32c] ss:$16 sps:$4 sm:$0xff]  }
  0x7c   : > { %1785 = vmatpush1.bf16.msra.mxu0 %v10541_v44  ;;  %1513 = vmatprep.subr.bf16.mxu1 %v10542_v47  ;;  %v11424_v44 = vpack.c.bf16 %v244_v56, %v243_v30  ;;  %v11429_v47 = vpack.c.bf16 %v11420_v37, %v11417_v36  ;;  %v10562_v56 = vld [vmem:[#allocation2 + $0x4c0] ss:$16 sps:$4 sm:$0xff]  }
  0x7d   : > { %v650_v6 = vor.u32 %v648_v52, %v638_v43  ;;  %3069 = vmatprep.subr.bf16.mxu0 %v10595_v57  ;;  %v10601_v52 = vld [vmem:[#allocation2 + $0x44] ss:$16 sps:$4 sm:$0xff]  }
  0x7e   : > { %15705 = vst [vmem:[#allocation14_spill] sm:$0xff] %v11429_v47  ;;  %v552_v59 = vshll.u32 %v11424_v44, 16  ;;  %v652_v60 = vshll.u32 %v11429_v47, 16  ;;  %v664_v32 = vshrl.u32 %v11429_v47, 16  ;;  %v10623_v47 = vld [vmem:[#allocation2 + $0x100] ss:$16 sps:$4 sm:$0xff]  }
  0x7f   : > { %1803 = vmatmul.mubr.bf16.vlgmr.msra.gmra.mrb[0].mxu0 %v11350_v49  ;;  %1514 = vmatpush1.bf16.msra.mxu1 %v10544_v50  ;;  %v11433_v50 = vpack.c.bf16 %v11321_v31, %v11318_v29  ;;  %v11445_v31 = vld [vmem:[%s11314_s30 + $0x90] sm:$0xff] }
  0x80   : > { %1812 = vmatprep.mubr.bf16.mxu0 %v15412_v0  ;;  %1515 = vmatprep.subr.bf16.mxu1 %v10545_v53  ;;  %v11438_v53 = vsel %vm543_vm0, %v634_v38, %v638_v43  ;;  %v654_v15 = vrot.slane %v652_v60, 1  ;;  %v11481_v43 = vld [vmem:[%s11314_s30 + $0xa0] sm:$0xff]  ;;  %v10569_v60 = vld [vmem:[#allocation2 + $0x328] ss:$16 sps:$4 sm:$0xff]  }
  0x81   : > { %15706 = vst [vmem:[#allocation15_spill] sm:$0xff] %v11433_v50  ;;  %15707 = vst [vmem:[#allocation16_spill] sm:$0xff] %v11438_v53  ;;  %v592_v29 = vshll.u32 %v11433_v50, 16  ;;  %v608_v38 = vshrl.u32 %v11433_v50, 16 }
  0x82   : > { %v11471_v14 = vsel %vm543_vm0, %v650_v6, %v654_v15  ;;  %v10574_v6 = vld [vmem:[#allocation2 + $0x34c] ss:$16 sps:$4 sm:$0xff]  }
  0x83   : > { %1516 = vmatpush1.bf16.msra.mxu1 %v10547_v58  ;;  %v549_v58 = vrot.slane %v547_v45, 1  ;;  %v594_v19 = vrot.slane %v592_v29, 1  ;;  %15711 = vst [vmem:[#allocation20_spill] sm:$0xff] %v11471_v14  ;;  %v11484_v45 = vld [vmem:[%s11314_s30 + $0xa8] sm:$0xff] }
  0x84   : > { %1517 = vmatprep.subr.bf16.mxu1 %v10548_v1  ;;  %v10563_v1 = vld [vmem:[#allocation2 + $0x4e4] ss:$16 sps:$4 sm:$0xff]  }
  0x85   : > { %v550_v10 = vor.u32 %v549_v58, %v545_v51  ;;  %v11476_v30 = vsel %vm543_vm0, %v590_v18, %v594_v19  ;;  %v666_v58 = vor.u32 %v664_v32, %v654_v15  ;;  %v610_v3 = vor.u32 %v608_v38, %v594_v19  ;;  %v10572_v19 = vld [vmem:[#allocation2 + $0x348] ss:$16 sps:$4 sm:$0xff]   ;;  %v10605_v32 = vld [vmem:[#allocation2 + $0x60] ss:$16 sps:$4 sm:$0xff]  }
  0x87   : > { %1813 = vmatmul.mubr.bf16.gmra.mrb[4].mxu0 %v11383_v7  ;;  %1518 = vmatpush1.bf16.msra.mxu1 %v10550_v5  ;;  %v10565_v5 = vld [vmem:[#allocation2 + $0x4e0] ss:$16 sps:$4 sm:$0xff]  }
  0x88   : > { %1822 = vmatprep.mubr.bf16.mxu0 %v15412_v0  ;;  %1519 = vmatprep.subr.bf16.mxu1 %v10551_v11  ;;  %v554_v11 = vrot.slane %v552_v59, 1 }
  0x8b   : > { %1520 = vmatpush1.bf16.msra.mxu1 %v10553_v16  ;;  %v11458_v16 = vpack.c.bf16 %v11448_v4, %v11445_v31 }
  0x8c   : > { %1521 = vmatprep.subr.bf16.mxu1 %v10554_v17  ;;  %v10593_v17 = vld [vmem:[#allocation2] ss:$16 sps:$4 sm:$0xff]  }
  0x8d   : > { %15709 = vst [vmem:[#allocation18_spill] sm:$0xff] %v11458_v16  ;;  %v668_v40 = vshll.u32 %v11458_v16, 16  ;;  %3070 = vmatpush1.bf16.msra.mxu0 %v10593_v17  ;;  %v680_v18 = vshrl.u32 %v11458_v16, 16  ;;  %v10592_v16 = vld [vmem:[#allocation2 + $0x40c] ss:$16 sps:$4 sm:$0xff]  }
  0x8e   : > { %3071 = vmatprep.subr.bf16.mxu0 %v10598_v62  ;;  %v624_v62 = vshrl.u32 %v11463_v22, 16 }
  0x8f   : > { %1823 = vmatmul.mubr.bf16.gmra.mrb[8].mxu0 %v11410_v26  ;;  %1522 = vmatpush1.bf16.msra.mxu1 %v10556_v24  ;;  %v580_v24 = vshrl.u32 %v11424_v44, 16  ;;  %v670_v59 = vrot.slane %v668_v40, 1  ;;  %v10610_v40 = vld [vmem:[#allocation2 + $0x84] ss:$16 sps:$4 sm:$0xff]  }
  0x90   : > { %1832 = vmatprep.mubr.bf16.mxu0 %v15412_v0  ;;  %1523 = vmatprep.subr.bf16.mxu1 %v10557_v27  ;;  %v11468_v27 = vsel %vm543_vm0, %v550_v10, %v554_v11  ;;  %v604_v10 = vshrl.u32 %v11453_v9, 16 }
  0x91   : > { %v582_v51 = vor.u32 %v580_v24, %v554_v11  ;;  %v11500_v11 = vld [vmem:[%s11314_s30 + $0xb0] sm:$0xff]  ;;  %v11506_v17 = vsel %vm543_vm0, %v666_v58, %v670_v59  ;;  %v682_v38 = vor.u32 %v680_v18, %v670_v59  ;;  %v11528_v58 = vpack.c.bf16 %v11388_v12, %v11358_v55 }
  0x92   : > { %15714 = vst [vmem:[#allocation23_spill] sm:$0xff] %v11506_v17  ;;  %v10607_v24 = vld [vmem:[#allocation2 + $0x64] ss:$16 sps:$4 sm:$0xff]  }
  0x93   : > { %1524 = vmatpush1.bf16.msra.mxu1 %v10559_v39  ;;  %v612_v39 = vshll.u32 %v11463_v22, 16  ;;  %15716 = vst [vmem:[#allocation25_spill] sm:$0xff] %v11528_v58 }
  0x94   : > { %1525 = vmatprep.subr.bf16.mxu1 %v10560_v48  ;;  %v10596_v48 = vld [vmem:[#allocation2 + $0x20] ss:$16 sps:$4 sm:$0xff]  }
  0x95   : > { %v614_v29 = vrot.slane %v612_v39, 1  ;;  %3072 = vmatpush1.bf16.msra.mxu0 %v10596_v48 }
  0x96   : > { %3073 = vmatprep.subr.bf16.mxu0 %v10601_v52 }
  0x97   : > { %1833 = vmatmul.mubr.bf16.gmra.mrb[12].mxu0 %v11438_v53  ;;  %1526 = vmatpush1.bf16.msra.mxu1 %v10562_v56  ;;  %v586_v56 = vrot.slane %v584_v25, 1  ;;  %v11514_v57 = vsel %vm543_vm0, %v610_v3, %v614_v29  ;;  %v10577_v25 = vld [vmem:[#allocation2 + $0x36c] ss:$16 sps:$4 sm:$0xff]  }
  0x98   : > { %1842 = vmatprep.mubr.bf16.mxu0 %v15412_v0  ;;  %1527 = vmatprep.subr.bf16.mxu1 %v10563_v1  ;;  %v11491_v1 = vpack.c.bf16 %v11484_v45, %v11481_v43  ;;  %v10580_v3 = vld [vmem:[#allocation2 + $0x38c] ss:$16 sps:$4 sm:$0xff]  }
  0x99   : > { %v11503_v15 = vsel %vm543_vm0, %v582_v51, %v586_v56  ;;  %v626_v51 = vor.u32 %v624_v62, %v614_v29  ;;  %v10613_v62 = vld [vmem:[#allocation2 + $0xa4] ss:$16 sps:$4 sm:$0xff]  }
  0x9a   : > { %15712 = vst [vmem:[#allocation21_spill] sm:$0xff] %v11491_v1  ;;  %v696_v55 = vshrl.u32 %v11491_v1, 16 }
  0x9b   : > { %1528 = vmatpush1.bf16.msra.mxu1 %v10565_v5  ;;  %v11496_v5 = vpack.c.bf16 %v11355_v54, %v11340_v41  ;;  %v684_v41 = vshll.u32 %v11491_v1, 16  ;;  %v11511_v54 = vld [vmem:[%s11314_s30 + $0xb8] sm:$0xff] }
  0x9c   : > { %2043 = vmatprep.subr.bf16.mxu1 %v10568_v8  ;;  %v10599_v8 = vld [vmem:[#allocation2 + $0x40] ss:$16 sps:$4 sm:$0xff]   ;;  %v11524_v48 = vpack.c.bf16 %v11511_v54, %v11500_v11  ;;  %v10587_v1 = vld [vmem:[#allocation2 + $0x3e8] ss:$16 sps:$4 sm:$0xff]  }
  0x9d   : > { %15713 = vst [vmem:[#allocation22_spill] sm:$0xff] %v11496_v5  ;;  %3074 = vmatpush1.bf16.msra.mxu0 %v10599_v8  ;;  %v686_v39 = vrot.slane %v684_v41, 1  ;;  %v640_v59 = vshrl.u32 %v11496_v5, 16  ;;  %v644_v41 = vshll.u32 %v11528_v58, 16 }
  0x9e   : > { %1530 = vmatmul.mubr.bf16.vlgmr.msra.gmra.mrb[0].mxu1 %v11468_v27  ;;  %15715 = vst [vmem:[#allocation24_spill] sm:$0xff] %v11524_v48  ;;  %3075 = vmatprep.subr.bf16.mxu0 %v10607_v24  ;;  %v700_v12 = vshll.u32 %v11524_v48, 16  ;;  %v10619_v24 = vld [vmem:[#allocation2 + $0xc4] ss:$16 sps:$4 sm:$0xff]  }
  0x9f   : > { %1843 = vmatmul.mubr.bf16.gmra.mrb[16].mxu0 %v11471_v14  ;;  %2044 = vmatpush1.bf16.msra.mxu1 %v10566_v23  ;;  %v628_v23 = vshll.u32 %v11496_v5, 16  ;;  %v11539_v8 = vsel %vm543_vm0, %v682_v38, %v686_v39 }
  0xa0   : > { %1539 = vmatprep.mubr.bf16.mxu1 %v11476_v30  ;;  %1852 = vmatprep.mubr.bf16.mxu0 %v15412_v0  ;;  %15718 = vst [vmem:[#allocation27_spill] sm:$0xff] %v11539_v8 }
  0xa1   : > { %2045 = vmatprep.subr.bf16.mxu1 %v10571_v28  ;;  %v606_v28 = vor.u32 %v604_v10, %v586_v56  ;;  %v630_v52 = vrot.slane %v628_v23, 1  ;;  %3076 = vmatpush1.bf16.msra.mxu0 %v10605_v32  ;;  %v10608_v56 = vld [vmem:[#allocation2 + $0x80] ss:$16 sps:$4 sm:$0xff]   ;;  %v11544_v10 = vld [vmem:[%s11314_s30 + $0xc8] sm:$0xff]  ;;  %v702_v32 = vrot.slane %v700_v12, 1  ;;  %v11573_v12 = vld [vmem:[%s11314_s30 + $0xd8] sm:$0xff] }
  0xa2   : > { %3077 = vmatprep.subr.bf16.mxu0 %v10610_v40  ;;  %v10611_v23 = vld [vmem:[#allocation2 + $0xa0] ss:$16 sps:$4 sm:$0xff]  }
  0xa3   : > { %2046 = vmatpush1.bf16.msra.mxu1 %v10569_v60  ;;  %v10575_v60 = vld [vmem:[#allocation2 + $0x368] ss:$16 sps:$4 sm:$0xff]   ;;  %v11536_v29 = vsel %vm543_vm0, %v606_v28, %v11342_v42  ;;  %v11547_v18 = vsel %vm543_vm0, %v626_v51, %v630_v52  ;;  %v10583_v42 = vld [vmem:[#allocation2 + $0x3ac] ss:$16 sps:$4 sm:$0xff]   ;;  %v11560_v28 = vpack.c.bf16 %v11417_v36, %v11391_v13  ;;  %v642_v38 = vor.u32 %v640_v59, %v630_v52  ;;  %v11570_v59 = vld [vmem:[%s11314_s30 + $0xd0] sm:$0xff] }
  0xa4   : > { %2047 = vmatprep.subr.bf16.mxu1 %v10574_v6  ;;  %v11532_v6 = vld [vmem:[%s11314_s30 + $0xc0] sm:$0xff]  ;;  %15717 = vst [vmem:[#allocation26_spill] sm:$0xff] %v11536_v29  ;;  %15719 = vst [vmem:[#allocation28_spill] sm:$0xff] %v11547_v18  ;;  %v646_v51 = vrot.slane %v644_v41, 1  ;;  %v656_v36 = vshrl.u32 %v11528_v58, 16 }
  0xa5   : > { %3078 = vmatpush1.bf16.msra.mxu0 %v10608_v56  ;;  %v11556_v40 = vpack.c.bf16 %v11544_v10, %v11532_v6  ;;  %15721 = vst [vmem:[#allocation30_spill] sm:$0xff] %v11560_v28  ;;  %v712_v56 = vshrl.u32 %v11524_v48, 16  ;;  %v660_v52 = vshll.u32 %v11560_v28, 16  ;;  %v11588_v48 = vpack.c.bf16 %v11445_v31, %v11420_v37  ;;  %v10604_v31 = vld [vmem:[#allocation2 + $0x42c] ss:$16 sps:$4 sm:$0xff]  }
  0xa6   : > { %1540 = vmatmul.mubr.bf16.gmra.mrb[4].mxu1 %v11503_v15  ;;  %3079 = vmatprep.subr.bf16.mxu0 %v10613_v62  ;;  %v11576_v41 = vsel %vm543_vm0, %v642_v38, %v646_v51  ;;  %v10589_v62 = vld [vmem:[#allocation2 + $0x3ec] ss:$16 sps:$4 sm:$0xff]  }
  0xa7   : > { %1853 = vmatmul.mubr.bf16.gmra.mrb[20].mxu0 %v11506_v17  ;;  %1549 = vmatprep.mubr.bf16.mxu1 %v11514_v57  ;;  %15720 = vst [vmem:[#allocation29_spill] sm:$0xff] %v11556_v40  ;;  %v716_v13 = vshll.u32 %v11556_v40, 16  ;;  %15723 = vst [vmem:[#allocation32_spill] sm:$0xff] %v11576_v41 }
  0xa8   : > { %1862 = vmatprep.mubr.bf16.mxu0 %v15412_v0  ;;  %2048 = vmatpush1.bf16.msra.mxu1 %v10572_v19  ;;  %v10578_v19 = vld [vmem:[#allocation2 + $0x388] ss:$16 sps:$4 sm:$0xff]   ;;  %15725 = vst [vmem:[#allocation34_spill] sm:$0xff] %v11588_v48 }
  0xa9   : > { %2049 = vmatprep.subr.bf16.mxu1 %v10577_v25  ;;  %v698_v25 = vor.u32 %v696_v55, %v686_v39  ;;  %3080 = vmatpush1.bf16.msra.mxu0 %v10611_v23  ;;  %v10617_v39 = vld [vmem:[#allocation2 + $0xc0] ss:$16 sps:$4 sm:$0xff]   ;;  %v718_v38 = vrot.slane %v716_v13, 1  ;;  %v728_v13 = vshrl.u32 %v11556_v40, 16 }
  0xaa   : > { %3081 = vmatprep.subr.bf16.mxu0 %v10619_v24  ;;  %v10620_v23 = vld [vmem:[#allocation2 + $0xe0] ss:$16 sps:$4 sm:$0xff]   ;;  %v10625_v24 = vld [vmem:[#allocation2 + $0x104] ss:$16 sps:$4 sm:$0xff]  }
  0xab   : > { %v11564_v55 = vsel %vm543_vm0, %v698_v25, %v702_v32  ;;  %v714_v25 = vor.u32 %v712_v56, %v702_v32  ;;  %v11594_v32 = vld [vmem:[%s11314_s30 + $0xe8] sm:$0xff] }
  0xac   : > { %2050 = vmatpush1.bf16.msra.mxu1 %v10575_v60  ;;  %v10581_v60 = vld [vmem:[#allocation2 + $0x3a8] ss:$16 sps:$4 sm:$0xff]   ;;  %15722 = vst [vmem:[#allocation31_spill] sm:$0xff] %v11564_v55 }
  0xad   : > { %2051 = vmatprep.subr.bf16.mxu1 %v10580_v3  ;;  %v10586_v3 = vld [vmem:[#allocation2 + $0x3cc] ss:$16 sps:$4 sm:$0xff]   ;;  %3082 = vmatpush1.bf16.msra.mxu0 %v10617_v39  ;;  %v662_v39 = vrot.slane %v660_v52, 1  ;;  %v10590_v56 = vld [vmem:[#allocation2 + $0x408] ss:$16 sps:$4 sm:$0xff]  }
  0xae   : > { %1550 = vmatmul.mubr.bf16.gmra.mrb[8].mxu1 %v11536_v29  ;;  %v10631_v52 = vld [vmem:[#allocation2 + $0x124] ss:$16 sps:$4 sm:$0xff]  }
  0xaf   : > { %1863 = vmatmul.mubr.bf16.gmra.mrb[24].mxu0 %v11539_v8  ;;  %1559 = vmatprep.mubr.bf16.mxu1 %v11547_v18 }
  0xb0   : > { %1872 = vmatprep.mubr.bf16.mxu0 %v15412_v0  ;;  %2052 = vmatpush1.bf16.msra.mxu1 %v10578_v19  ;;  %v10584_v19 = vld [vmem:[#allocation2 + $0x3c8] ss:$16 sps:$4 sm:$0xff]  }
  0xb1   : > { %2053 = vmatprep.subr.bf16.mxu1 %v10583_v42  ;;  %v10622_v42 = vld [vmem:[#allocation2 + $0xe4] ss:$16 sps:$4 sm:$0xff]  }
  0xb2   : > { %3083 = vmatprep.subr.bf16.mxu0 %v10622_v42  ;;  %v676_v42 = vshll.u32 %v11588_v48, 16 }
  0xb3   : > { %3084 = vmatpush1.bf16.msra.mxu0 %v10620_v23  ;;  %v10634_v23 = vld [vmem:[#allocation2 + $0x144] ss:$16 sps:$4 sm:$0xff]  }
  0xb4   : > { %2054 = vmatpush1.bf16.msra.mxu1 %v10581_v60  ;;  %v11584_v60 = vpack.c.bf16 %v11573_v12, %v11570_v59  ;;  %3085 = vmatprep.subr.bf16.mxu0 %v10625_v24  ;;  %v10602_v24 = vld [vmem:[#allocation2 + $0x428] ss:$16 sps:$4 sm:$0xff]   ;;  %v678_v20 = vrot.slane %v676_v42, 1  ;;  %v10643_v42 = vld [vmem:[#allocation2 + $0x184] ss:$16 sps:$4 sm:$0xff]  }
  0xb5   : > { %2055 = vmatprep.subr.bf16.mxu1 %v10586_v3  ;;  %v658_v3 = vor.u32 %v656_v36, %v646_v51  ;;  %v11597_v51 = vsel %vm543_vm0, %v714_v25, %v718_v38  ;;  %v10629_v36 = vld [vmem:[#allocation2 + $0x120] ss:$16 sps:$4 sm:$0xff]   ;;  %v15727_v25 = vmov 0  }
  0xb6   : > { %1560 = vmatmul.mubr.bf16.gmra.mrb[12].mxu1 %v11350_v49  ;;  %15724 = vst [vmem:[#allocation33_spill] sm:$0xff] %v11584_v60  ;;  %v732_v37 = vshll.u32 %v11584_v60, 16 }
  0xb7   : > { %1873 = vmatmul.mubr.bf16.gmra.mrb[28].mxu0 %v11564_v55  ;;  %1569 = vmatprep.mubr.bf16.mxu1 %v11576_v41 }
  0xb8   : > { %1882 = vmatprep.mubr.bf16.mxu0 %v15412_v0  ;;  %2056 = vmatpush1.bf16.msra.mxu1 %v10584_v19  ;;  %v11591_v0 = vld [vmem:[%s11314_s30 + $0xe0] sm:$0xff]  ;;  %v11602_v19 = vsel %vm543_vm0, %v658_v3, %v662_v39  ;;  %v730_v3 = vor.u32 %v728_v13, %v718_v38  ;;  %v734_v40 = vrot.slane %v732_v37, 1  ;;  %v11622_v38 = vld [vmem:[%s11314_s30 + $0xf8] sm:$0xff] }
  0xb9   : > { %2057 = vmatprep.subr.bf16.mxu1 %v10589_v62  ;;  %15726 = vst [vmem:[#allocation35_spill] sm:$0xff] %v11602_v19  ;;  %v672_v62 = vshrl.u32 %v11560_v28, 16  ;;  %3086 = vmatpush1.bf16.msra.mxu0 %v10623_v47  ;;  %v11612_v41 = vpack.c.bf16 %v11594_v32, %v11591_v0  ;;  %v10614_v13 = vld [vmem:[#allocation2 + $0x448] ss:$16 sps:$4 sm:$0xff]   ;;  %v10637_v37 = vld [vmem:[#allocation2 + $0x164] ss:$16 sps:$4 sm:$0xff]  }
  0xba   : > { %3087 = vmatprep.subr.bf16.mxu0 %v10631_v52  ;;  %v11625_v49 = vsel %vm543_vm0, %v730_v3, %v734_v40  ;;  %v10626_v52 = vld [vmem:[#allocation2 + $0x468] ss:$16 sps:$4 sm:$0xff]  }
  0xbb   : > { %15728 = vst [vmem:[#allocation36_spill] sm:$0xff] %v11612_v41  ;;  %v674_v47 = vor.u32 %v672_v62, %v662_v39  ;;  %v744_v39 = vshrl.u32 %v11584_v60, 16  ;;  %v748_v62 = vshll.u32 %v11612_v41, 16 }
  0xbc   : > { %2058 = vmatpush1.bf16.msra.mxu1 %v10587_v1  ;;  %v10616_v1 = vld [vmem:[#allocation2 + $0x44c] ss:$16 sps:$4 sm:$0xff]  }
  0xbd   : > { %2059 = vmatprep.subr.bf16.mxu1 %v10592_v16  ;;  %v10632_v16 = vld [vmem:[#allocation2 + $0x140] ss:$16 sps:$4 sm:$0xff]   ;;  %3088 = vmatpush1.bf16.msra.mxu0 %v10629_v36  ;;  %v750_v3 = vrot.slane %v748_v62, 1  ;;  %v10646_v62 = vld [vmem:[#allocation2 + $0x1a4] ss:$16 sps:$4 sm:$0xff]  }
  0xbe   : > { %1570 = vmatmul.mubr.bf16.gmra.mrb[16].mxu1 %v11383_v7  ;;  %v11616_v7 = vpack.c.bf16 %v11481_v43, %v11448_v4  ;;  %3089 = vmatprep.subr.bf16.mxu0 %v10634_v23  ;;  %v10628_v4 = vld [vmem:[#allocation2 + $0x46c] ss:$16 sps:$4 sm:$0xff]   ;;  %v10635_v43 = vld [vmem:[#allocation2 + $0x160] ss:$16 sps:$4 sm:$0xff]   ;;  %v746_v23 = vor.u32 %v744_v39, %v734_v40  ;;  %v10638_v39 = vld [vmem:[#allocation2 + $0x488] ss:$16 sps:$4 sm:$0xff]  }
  0xbf   : > { %1883 = vmatmul.mubr.bf16.gmra.mrb[32].mxu0 %v11597_v51  ;;  %1579 = vmatprep.mubr.bf16.mxu1 %v11602_v19  ;;  %v11619_v19 = vld [vmem:[%s11314_s30 + $0xf0] sm:$0xff]  ;;  %v11650_v40 = vld [vmem:[%s11314_s30 + $0x108] sm:$0xff] }
  0xc0   : > { %1892 = vmatprep.mubr.bf16.mxu0 %v15727_v25  ;;  %15729 = vst [vmem:[#allocation37_spill] sm:$0xff] %v11616_v7  ;;  %2060 = vmatpush1.bf16.msra.mxu1 %v10590_v56  ;;  %v11630_v56 = vsel %vm543_vm0, %v674_v47, %v678_v20  ;;  %v692_v36 = vshll.u32 %v11616_v7, 16  ;;  %v11640_v47 = vpack.c.bf16 %v11622_v38, %v11619_v19 }
  0xc1   : > { %2061 = vmatprep.subr.bf16.mxu1 %v10604_v31  ;;  %15730 = vst [vmem:[#allocation38_spill] sm:$0xff] %v11630_v56  ;;  %v688_v31 = vshrl.u32 %v11588_v48, 16  ;;  %3090 = vmatpush1.bf16.msra.mxu0 %v10632_v16  ;;  %v11653_v48 = vsel %vm543_vm0, %v746_v23, %v750_v3 }
  0xc2   : > { %15731 = vst [vmem:[#allocation39_spill] sm:$0xff] %v11640_v47  ;;  %v694_v60 = vrot.slane %v692_v36, 1  ;;  %3091 = vmatprep.subr.bf16.mxu0 %v10637_v37  ;;  %v704_v37 = vshrl.u32 %v11616_v7, 16  ;;  %v10650_v36 = vld [vmem:[#allocation2 + $0x4a8] ss:$16 sps:$4 sm:$0xff]  }
  0xc3   : > { %v690_v16 = vor.u32 %v688_v31, %v678_v20  ;;  %v760_v20 = vshrl.u32 %v11612_v41, 16  ;;  %v764_v31 = vshll.u32 %v11640_v47, 16 }
  0xc4   : > { %2062 = vmatpush1.bf16.msra.mxu1 %v10602_v24  ;;  %v10640_v24 = vld [vmem:[#allocation2 + $0x48c] ss:$16 sps:$4 sm:$0xff]  }
  0xc5   : > { %2063 = vmatprep.subr.bf16.mxu1 %v10616_v1  ;;  %v10641_v1 = vld [vmem:[#allocation2 + $0x180] ss:$16 sps:$4 sm:$0xff]   ;;  %3092 = vmatpush1.bf16.msra.mxu0 %v10635_v43  ;;  %v10649_v43 = vld [vmem:[#allocation2 + $0x1c4] ss:$16 sps:$4 sm:$0xff]   ;;  %v766_v23 = vrot.slane %v764_v31, 1 }
  0xc6   : > { %1580 = vmatmul.mubr.bf16.gmra.mrb[20].mxu1 %v11410_v26  ;;  %v11644_v26 = vpack.c.bf16 %v11500_v11, %v11484_v45  ;;  %3093 = vmatprep.subr.bf16.mxu0 %v10643_v42  ;;  %v10644_v45 = vld [vmem:[#allocation2 + $0x1a0] ss:$16 sps:$4 sm:$0xff]   ;;  %v10652_v11 = vld [vmem:[#allocation2 + $0x4ac] ss:$16 sps:$4 sm:$0xff]   ;;  %v762_v42 = vor.u32 %v760_v20, %v750_v3  ;;  %v10655_v20 = vld [vmem:[#allocation2 + $0x1e4] ss:$16 sps:$4 sm:$0xff]  }
  0xc7   : > { %1893 = vmatmul.mubr.bf16.gmra.mrb[36].mxu0 %v11625_v49  ;;  %1589 = vmatprep.mubr.bf16.mxu1 %v11630_v56  ;;  %v11647_v56 = vld [vmem:[%s11314_s30 + $0x100] sm:$0xff]  ;;  %v11678_v3 = vld [vmem:[%s11314_s30 + $0x118] sm:$0xff] }
  0xc8   : > { %1902 = vmatprep.mubr.bf16.mxu0 %v15727_v25  ;;  %15732 = vst [vmem:[#allocation40_spill] sm:$0xff] %v11644_v26  ;;  %2064 = vmatpush1.bf16.msra.mxu1 %v10614_v13  ;;  %v11658_v13 = vsel %vm543_vm0, %v690_v16, %v694_v60  ;;  %v11668_v16 = vpack.c.bf16 %v11650_v40, %v11647_v56  ;;  %v10656_v31 = vld [vmem:[#allocation2 + $0x4c8] ss:$16 sps:$4 sm:$0xff]  }
  0xc9   : > { %2065 = vmatprep.subr.bf16.mxu1 %v10628_v4  ;;  %15733 = vst [vmem:[#allocation41_spill] sm:$0xff] %v11658_v13  ;;  %v708_v4 = vshll.u32 %v11644_v26, 16  ;;  %3094 = vmatpush1.bf16.msra.mxu0 %v10641_v1  ;;  %v706_v1 = vor.u32 %v704_v37, %v694_v60  ;;  %v11681_v7 = vsel %vm543_vm0, %v762_v42, %v766_v23  ;;  %v776_v60 = vshrl.u32 %v11640_v47, 16  ;;  %v11706_v47 = vld [vmem:[%s11314_s30 + $0x128] sm:$0xff] }
  0xca   : > { %15734 = vst [vmem:[#allocation42_spill] sm:$0xff] %v11668_v16  ;;  %3095 = vmatprep.subr.bf16.mxu0 %v10646_v62  ;;  %15736 = vst [vmem:[#allocation44_spill] sm:$0xff] %v11681_v7  ;;  %v780_v37 = vshll.u32 %v11668_v16, 16  ;;  %v720_v62 = vshrl.u32 %v11644_v26, 16 }
  0xcb   : > { %v710_v41 = vrot.slane %v708_v4, 1  ;;  %v778_v4 = vor.u32 %v776_v60, %v766_v23  ;;  %v792_v60 = vshrl.u32 %v11668_v16, 16 }
  0xcc   : > { %2066 = vmatpush1.bf16.msra.mxu1 %v10626_v52  ;;  %v10647_v52 = vld [vmem:[#allocation2 + $0x1c0] ss:$16 sps:$4 sm:$0xff]  }
  0xcd   : > { %2067 = vmatprep.subr.bf16.mxu1 %v10640_v24  ;;  %v10658_v24 = vld [vmem:[#allocation2 + $0x4cc] ss:$16 sps:$4 sm:$0xff]   ;;  %3096 = vmatpush1.bf16.msra.mxu0 %v10644_v45 }
  0xce   : > { %1590 = vmatmul.mubr.bf16.gmra.mrb[24].mxu1 %v11438_v53  ;;  %v11672_v53 = vpack.c.bf16 %v11532_v6, %v11511_v54  ;;  %3097 = vmatprep.subr.bf16.mxu0 %v10649_v43  ;;  %v10653_v54 = vld [vmem:[#allocation2 + $0x1e0] ss:$16 sps:$4 sm:$0xff]   ;;  %v10661_v6 = vld [vmem:[#allocation2 + $0x4ec] ss:$16 sps:$4 sm:$0xff]   ;;  %v782_v43 = vrot.slane %v780_v37, 1 }
  0xcf   : > { %1903 = vmatmul.mubr.bf16.gmra.mrb[40].mxu0 %v11653_v48  ;;  %1599 = vmatprep.mubr.bf16.mxu1 %v11658_v13  ;;  %v11675_v13 = vld [vmem:[%s11314_s30 + $0x110] sm:$0xff] }
  0xd0   : > { %1912 = vmatprep.mubr.bf16.mxu0 %v15727_v25  ;;  %15735 = vst [vmem:[#allocation43_spill] sm:$0xff] %v11672_v53  ;;  %2068 = vmatpush1.bf16.msra.mxu1 %v10638_v39  ;;  %v11686_v39 = vsel %vm543_vm0, %v706_v1, %v710_v41  ;;  %v724_v45 = vshll.u32 %v11672_v53, 16  ;;  %v11696_v42 = vpack.c.bf16 %v11678_v3, %v11675_v13  ;;  %v11703_v1 = vld [vmem:[%s11314_s30 + $0x120] sm:$0xff] }
  0xd1   : > { %2069 = vmatprep.subr.bf16.mxu1 %v10652_v11  ;;  %15737 = vst [vmem:[#allocation45_spill] sm:$0xff] %v11686_v39  ;;  %3098 = vmatpush1.bf16.msra.mxu0 %v10647_v52  ;;  %v10659_v11 = vld [vmem:[#allocation2 + $0x4e8] ss:$16 sps:$4 sm:$0xff]   ;;  %v11709_v23 = vsel %vm543_vm0, %v778_v4, %v782_v43  ;;  %v11731_v4 = vld [vmem:[%s11314_s30 + $0x130] sm:$0xff] }
  0xd2   : > { %15738 = vst [vmem:[#allocation46_spill] sm:$0xff] %v11696_v42  ;;  %v726_v52 = vrot.slane %v724_v45, 1  ;;  %3099 = vmatprep.subr.bf16.mxu0 %v10655_v20  ;;  %15740 = vst [vmem:[#allocation48_spill] sm:$0xff] %v11709_v23  ;;  %v10664_v20 = vld [vmem:[#allocation2 + $0x50c] ss:$16 sps:$4 sm:$0xff]  }
  0xd4   : > { %2070 = vmatpush1.bf16.msra.mxu1 %v10650_v36  ;;  %v722_v36 = vor.u32 %v720_v62, %v710_v41  ;;  %v796_v41 = vshll.u32 %v11696_v42, 16 }
  0xd5   : > { %2071 = vmatprep.subr.bf16.mxu1 %v10658_v24  ;;  %v11700_v24 = vpack.c.bf16 %v11570_v59, %v11544_v10  ;;  %3100 = vmatpush1.bf16.msra.mxu0 %v10653_v54  ;;  %v736_v10 = vshrl.u32 %v11672_v53, 16 }
  0xd6   : > { %1600 = vmatmul.mubr.bf16.gmra.mrb[28].mxu1 %v11471_v14  ;;  %v11714_v37 = vsel %vm543_vm0, %v722_v36, %v726_v52  ;;  %v798_v54 = vrot.slane %v796_v41, 1  ;;  %v11734_v36 = vld [vmem:[%s11314_s30 + $0x138] sm:$0xff] }
  0xd7   : > { %1913 = vmatmul.mubr.bf16.gmra.mrb[44].mxu0 %v11681_v7  ;;  %1609 = vmatprep.mubr.bf16.mxu1 %v11686_v39  ;;  %15739 = vst [vmem:[#allocation47_spill] sm:$0xff] %v11700_v24  ;;  %15741 = vst [vmem:[#allocation49_spill] sm:$0xff] %v11714_v37  ;;  %v740_v59 = vshll.u32 %v11700_v24, 16  ;;  %v738_v62 = vor.u32 %v736_v10, %v726_v52  ;;  %v11804_v39 = vpack.c.bf16 %v11675_v13, %v11650_v40 }
  0xd8   : > { %1922 = vmatprep.mubr.bf16.mxu0 %v15727_v25  ;;  %2072 = vmatpush1.bf16.msra.mxu1 %v10656_v31  ;;  %v794_v31 = vor.u32 %v792_v60, %v782_v43  ;;  %v808_v43 = vshrl.u32 %v11696_v42, 16  ;;  %v11759_v42 = vld [vmem:[%s11314_s30 + $0x140] sm:$0xff] }
  0xd9   : > { %2073 = vmatprep.subr.bf16.mxu1 %v10661_v6  ;;  %v11724_v6 = vpack.c.bf16 %v11706_v47, %v11703_v1  ;;  %v742_v45 = vrot.slane %v740_v59, 1  ;;  %v11752_v59 = vpack.c.bf16 %v11734_v36, %v11731_v4  ;;  %15752 = vst [vmem:[#allocation60_spill] sm:$0xff] %v11804_v39 }
  0xda   : > { %v11737_v16 = vsel %vm543_vm0, %v794_v31, %v798_v54  ;;  %v810_v41 = vor.u32 %v808_v43, %v798_v54  ;;  %v11771_v54 = vld [vmem:[%s11314_s30 + $0x160] sm:$0xff]  ;;  %v11774_v43 = vld [vmem:[%s11314_s30 + $0x168] sm:$0xff] }
  0xdb   : > { %15742 = vst [vmem:[#allocation50_spill] sm:$0xff] %v11724_v6  ;;  %15744 = vst [vmem:[#allocation52_spill] sm:$0xff] %v11737_v16  ;;  %v812_v60 = vshll.u32 %v11724_v6, 16  ;;  %v11742_v52 = vsel %vm543_vm0, %v738_v62, %v742_v45  ;;  %v11756_v62 = vpack.c.bf16 %v11619_v19, %v11594_v32  ;;  %v828_v32 = vshll.u32 %v11752_v59, 16 }
  0xdc   : > { %2074 = vmatpush1.bf16.msra.mxu1 %v10659_v11  ;;  %v11728_v11 = vpack.c.bf16 %v11591_v0, %v11573_v12  ;;  %15745 = vst [vmem:[#allocation53_spill] sm:$0xff] %v11742_v52  ;;  %v752_v0 = vshrl.u32 %v11700_v24, 16  ;;  %15746 = vst [vmem:[#allocation54_spill] sm:$0xff] %v11752_v59 }
  0xdd   : > { %2316 = vmatprep.subr.bf16.mxu1 %v10664_v20  ;;  %v814_v10 = vrot.slane %v812_v60, 1  ;;  %15747 = vst [vmem:[#allocation55_spill] sm:$0xff] %v11756_v62  ;;  %v784_v13 = vshrl.u32 %v11756_v62, 16 }
  0xde   : > { %1610 = vmatmul.mubr.bf16.gmra.mrb[32].mxu1 %v11506_v17  ;;  %15743 = vst [vmem:[#allocation51_spill] sm:$0xff] %v11728_v11  ;;  %v756_v12 = vshll.u32 %v11728_v11, 16  ;;  %v754_v20 = vor.u32 %v752_v0, %v742_v45  ;;  %v824_v45 = vshrl.u32 %v11724_v6, 16  ;;  %v768_v0 = vshrl.u32 %v11728_v11, 16 }
  0xdf   : > { %1923 = vmatmul.mubr.bf16.gmra.mrb[48].mxu0 %v11709_v23  ;;  %1619 = vmatprep.mubr.bf16.mxu1 %v11714_v37  ;;  %v11765_v37 = vld [vmem:[%s11314_s30 + $0x150] sm:$0xff]  ;;  %v11777_v60 = vsel %vm543_vm0, %v810_v41, %v814_v10  ;;  %v11794_v41 = vpack.c.bf16 %v11647_v56, %v11622_v38  ;;  %v830_v11 = vrot.slane %v828_v32, 1  ;;  %v11814_v56 = vld [vmem:[%s11314_s30 + $0x178] sm:$0xff]  ;;  %v804_v32 = vshll.u32 %v11804_v39, 16 }
  0xe0   : > { %1932 = vmatprep.mubr.bf16.mxu0 %v15727_v25  ;;  %v758_v31 = vrot.slane %v756_v12, 1  ;;  %v772_v12 = vshll.u32 %v11756_v62, 16  ;;  %v826_v6 = vor.u32 %v824_v45, %v814_v10  ;;  %v11811_v38 = vld [vmem:[%s11314_s30 + $0x170] sm:$0xff] }
  0xe1   : > { %15750 = vst [vmem:[#allocation58_spill] sm:$0xff] %v11794_v41  ;;  %v788_v10 = vshll.u32 %v11794_v41, 16 }
  0xe2   : > { %v11782_v19 = vsel %vm543_vm0, %v754_v20, %v758_v31  ;;  %v770_v14 = vor.u32 %v768_v0, %v758_v31  ;;  %v774_v24 = vrot.slane %v772_v12, 1  ;;  %v11821_v40 = vsel %vm543_vm0, %v826_v6, %v830_v11 }
  0xe3   : > { %15748 = vst [vmem:[#allocation56_spill] sm:$0xff] %v11782_v19  ;;  %v11831_v0 = vpack.c.bf16 %v11703_v1, %v11678_v3  ;;  %v11835_v12 = vpack.c.bf16 %v11814_v56, %v11811_v38  ;;  %v790_v62 = vrot.slane %v788_v10, 1  ;;  %v806_v1 = vrot.slane %v804_v32, 1 }
  0xe4   : > { %v11827_v31 = vsel %vm543_vm0, %v770_v14, %v774_v24  ;;  %v800_v14 = vshrl.u32 %v11794_v41, 16  ;;  %v786_v3 = vor.u32 %v784_v13, %v774_v24 }
  0xe5   : > { %15754 = vst [vmem:[#allocation62_spill] sm:$0xff] %v11827_v31  ;;  %15755 = vst [vmem:[#allocation63_spill] sm:$0xff] %v11831_v0  ;;  %v892_v10 = vshll.u32 %v11835_v12, 16 }
  0xe6   : > { %1620 = vmatmul.mubr.bf16.gmra.mrb[36].mxu1 %v11539_v8  ;;  %v11762_v8 = vld [vmem:[%s11314_s30 + $0x148] sm:$0xff]  ;;  %15756 = vst [vmem:[#allocation64_spill] sm:$0xff] %v11835_v12  ;;  %v11857_v24 = vsel %vm543_vm0, %v786_v3, %v790_v62 }
  0xe7   : > { %1933 = vmatmul.mubr.bf16.gmra.mrb[52].mxu0 %v11737_v16  ;;  %1629 = vmatprep.mubr.bf16.mxu1 %v11742_v52  ;;  %v11768_v52 = vld [vmem:[%s11314_s30 + $0x158] sm:$0xff]  ;;  %v11788_v17 = vpack.c.bf16 %v11762_v8, %v11759_v42 }
  0xe8   : > { %1942 = vmatprep.mubr.bf16.mxu0 %v15727_v25  ;;  %v11798_v20 = vpack.c.bf16 %v11768_v52, %v11765_v37 }
  0xe9   : > { %15749 = vst [vmem:[#allocation57_spill] sm:$0xff] %v11788_v17  ;;  %v844_v53 = vshll.u32 %v11788_v17, 16  ;;  %v856_v18 = vshrl.u32 %v11788_v17, 16 }
  0xea   : > { %15751 = vst [vmem:[#allocation59_spill] sm:$0xff] %v11798_v20  ;;  %v860_v45 = vshll.u32 %v11798_v20, 16  ;;  %v872_v29 = vshrl.u32 %v11798_v20, 16  ;;  %v832_v20 = vshrl.u32 %v11831_v0, 16 }
  0xeb   : > { %v846_v6 = vrot.slane %v844_v53, 1  ;;  %v816_v53 = vshrl.u32 %v11804_v39, 16 }
  0xec   : > { %v862_v61 = vrot.slane %v860_v45, 1  ;;  %v11850_v45 = vpack.c.bf16 %v11731_v4, %v11706_v47  ;;  %v802_v4 = vor.u32 %v800_v14, %v790_v62  ;;  %v894_v14 = vrot.slane %v892_v10, 1 }
  0xed   : > { %v858_v47 = vor.u32 %v856_v18, %v846_v6  ;;  %v11878_v18 = vld [vmem:[%s11314_s30 + $0x188] sm:$0xff]  ;;  %v904_v10 = vshrl.u32 %v11835_v12, 16  ;;  %v11926_v12 = vpack.c.bf16 %v11765_v37, %v11762_v8 }
  0xee   : > { %1630 = vmatmul.mubr.bf16.gmra.mrb[40].mxu1 %v11564_v55  ;;  %v11808_v55 = vpack.c.bf16 %v11774_v43, %v11771_v54  ;;  %15757 = vst [vmem:[#allocation65_spill] sm:$0xff] %v11850_v45  ;;  %v836_v13 = vshll.u32 %v11850_v45, 16  ;;  %v11868_v32 = vsel %vm543_vm0, %v802_v4, %v806_v1  ;;  %v874_v3 = vor.u32 %v872_v29, %v862_v61 }
  0xef   : > { %1943 = vmatmul.mubr.bf16.gmra.mrb[56].mxu0 %v11777_v60  ;;  %1639 = vmatprep.mubr.bf16.mxu1 %v11782_v19  ;;  %v840_v19 = vshrl.u32 %v11752_v59, 16  ;;  %15762 = vst [vmem:[#allocation70_spill] sm:$0xff] %v11926_v12 }
  0xf0   : > { %1952 = vmatprep.mubr.bf16.mxu0 %v15727_v25  ;;  %15753 = vst [vmem:[#allocation61_spill] sm:$0xff] %v11808_v55  ;;  %v876_v26 = vshll.u32 %v11808_v55, 16  ;;  %v888_v17 = vshrl.u32 %v11808_v55, 16  ;;  %v11875_v55 = vld [vmem:[%s11314_s30 + $0x180] sm:$0xff] }
  0xf1   : > { %v842_v59 = vor.u32 %v840_v19, %v830_v11  ;;  %v820_v19 = vshll.u32 %v11831_v0, 16  ;;  %v11892_v29 = vpack.c.bf16 %v11878_v18, %v11875_v55 }
  0xf2   : > { %v878_v11 = vrot.slane %v876_v26, 1 }
  0xf3   : > { %v822_v26 = vrot.slane %v820_v19, 1  ;;  %v818_v19 = vor.u32 %v816_v53, %v806_v1  ;;  %15759 = vst [vmem:[#allocation67_spill] sm:$0xff] %v11892_v29  ;;  %v838_v53 = vrot.slane %v836_v13, 1 }
  0xf4   : > { %v11881_v62 = vsel %vm543_vm0, %v874_v3, %v878_v11  ;;  %v908_v3 = vshll.u32 %v11892_v29, 16 }
  0xf5   : > { %v834_v1 = vor.u32 %v832_v20, %v822_v26  ;;  %v11909_v20 = vld [vmem:[%s11314_s30 + $0x190] sm:$0xff] }
  0xf6   : > { %1640 = vmatmul.mubr.bf16.gmra.mrb[44].mxu1 %v11597_v51 }
  0xf7   : > { %1953 = vmatmul.mubr.bf16.gmra.mrb[60].mxu0 %v11821_v40  ;;  %1649 = vmatprep.mubr.bf16.mxu1 %v11827_v31  ;;  %v11854_v31 = vsel %vm543_vm0, %v842_v59, %v846_v6  ;;  %v11865_v59 = vsel %vm543_vm0, %v858_v47, %v862_v61  ;;  %v11884_v6 = vsel %vm543_vm0, %v818_v19, %v822_v26  ;;  %v11912_v26 = vld [vmem:[%s11314_s30 + $0x198] sm:$0xff] }
  0xf8   : > { %1962 = vmatprep.mubr.bf16.mxu0 %v15727_v25  ;;  %15758 = vst [vmem:[#allocation66_spill] sm:$0xff] %v11884_v6  ;;  %v890_v61 = vor.u32 %v888_v17, %v878_v11  ;;  %v11896_v47 = vpack.c.bf16 %v11759_v42, %v11734_v36  ;;  %v11904_v19 = vsel %vm543_vm0, %v834_v1, %v838_v53  ;;  %v848_v17 = vshrl.u32 %v11850_v45, 16 }
  0xf9   : > { %15761 = vst [vmem:[#allocation69_spill] sm:$0xff] %v11904_v19  ;;  %v11918_v42 = vor.u32 %v904_v10, %v894_v14  ;;  %v910_v36 = vrot.slane %v908_v3, 1  ;;  %v11922_v13 = vpack.c.bf16 %v11912_v26, %v11909_v20 }
  0xfa   : > { %15760 = vst [vmem:[#allocation68_spill] sm:$0xff] %v11896_v47  ;;  %v11899_v4 = vsel %vm543_vm0, %v890_v61, %v894_v14  ;;  %v852_v11 = vshll.u32 %v11896_v47, 16  ;;  %v850_v61 = vor.u32 %v848_v17, %v838_v53  ;;  %v864_v3 = vshrl.u32 %v11896_v47, 16  ;;  %v293_v17 = vld [vmem:[%s11314_s30 + $0x1a0] sm:$0xff] }
  0xfb   : > { %v924_v14 = vshll.u32 %v11922_v13, 16  ;;  %v868_v53 = vshll.u32 %v11926_v12, 16 }
  0xfc   : > { %v854_v1 = vrot.slane %v852_v11, 1  ;;  %v294_v11 = vld [vmem:[%s11314_s30 + $0x1a8] sm:$0xff] }
  0xfd   : > { %v926_v37 = vrot.slane %v924_v14, 1 }
  0xfe   : > { %1650 = vmatmul.mubr.bf16.gmra.mrb[48].mxu1 %v11625_v49  ;;  %v11935_v10 = vsel %vm543_vm0, %v850_v61, %v854_v1  ;;  %v866_v61 = vor.u32 %v864_v3, %v854_v1  ;;  %v295_v1 = vld [vmem:[%s11314_s30 + $0x1b0] sm:$0xff] }
  0xff   : > { %1963 = vmatmul.mubr.bf16.gmra.mrb[64].mxu0 %v11854_v31  ;;  %1659 = vmatprep.mubr.bf16.mxu1 %v11857_v24  ;;  %15764 = vst [vmem:[#allocation72_spill] sm:$0xff] %v11935_v10  ;;  %v11966_v14 = vpack.c.bf16 %v295_v1, %v295_v1 }
 0x100   : > { %1972 = vmatprep.mubr.bf16.mxu0 %v15727_v25 }
 0x101   : > { %15767 = vst [vmem:[#allocation75_spill] sm:$0xff] %v11966_v14 }
 0x106   : > { %1660 = vmatmul.mubr.bf16.gmra.mrb[52].mxu1 %v11653_v48 }
 0x107   : > { %1973 = vmatmul.mubr.bf16.gmra.mrb[68].mxu0 %v11865_v59  ;;  %1669 = vmatprep.mubr.bf16.mxu1 %v11868_v32 }
 0x108   : > { %1982 = vmatprep.mubr.bf16.mxu0 %v15727_v25 }
 0x10e   : > { %1670 = vmatmul.mubr.bf16.gmra.mrb[56].mxu1 %v11681_v7  ;;  %v11949_v7 = vpack.c.bf16 %v11771_v54, %v11768_v52 }
 0x10f   : > { %1983 = vmatmul.mubr.bf16.gmra.mrb[72].mxu0 %v11881_v62  ;;  %1679 = vmatprep.mubr.bf16.mxu1 %v11884_v6  ;;  %v870_v6 = vrot.slane %v868_v53, 1 }
 0x110   : > { %1992 = vmatprep.mubr.bf16.mxu0 %v15727_v25  ;;  %15765 = vst [vmem:[#allocation73_spill] sm:$0xff] %v11949_v7 }
 0x116   : > { %1680 = vmatmul.mubr.bf16.gmra.mrb[60].mxu1 %v11709_v23  ;;  %v11930_v23 = vsel %vm543_vm0, %v11918_v42, %v910_v36 }
 0x117   : > { %1993 = vmatmul.mubr.bf16.gmra.mrb[76].mxu0 %v11899_v4  ;;  %1689 = vmatprep.mubr.bf16.mxu1 %v11904_v19  ;;  %15763 = vst [vmem:[#allocation71_spill] sm:$0xff] %v11930_v23  ;;  %v920_v19 = vshrl.u32 %v11892_v29, 16  ;;  %v11945_v29 = vpack.c.bf16 %v294_v11, %v293_v17  ;;  %v11970_v17 = vpack.c.bf16 %v11811_v38, %v11774_v43 }
 0x118   : > { %2002 = vmatprep.mubr.bf16.mxu0 %v15727_v25 }
 0x119   : > { %v922_v8 = vor.u32 %v920_v19, %v910_v36  ;;  %v880_v19 = vshrl.u32 %v11926_v12, 16  ;;  %v884_v36 = vshll.u32 %v11949_v7, 16 }
 0x11b   : > { %v11952_v47 = vsel %vm543_vm0, %v922_v8, %v926_v37  ;;  %v882_v3 = vor.u32 %v880_v19, %v870_v6  ;;  %v886_v53 = vrot.slane %v884_v36, 1  ;;  %v957_v8 = vshrl.u32 %v11945_v29, 16 }
 0x11c   : > { %15766 = vst [vmem:[#allocation74_spill] sm:$0xff] %v11952_v47  ;;  %v11988_v19 = vpack.c.bf16 %v11875_v55, %v11814_v56 }
 0x11e   : > { %1690 = vmatmul.mubr.bf16.gmra.mrb[64].mxu1 %v11737_v16  ;;  %v936_v16 = vshrl.u32 %v11922_v13, 16 }
 0x11f   : > { %2003 = vmatmul.mubr.bf16.gmra.mrb[80].mxu0 %v11930_v23  ;;  %1699 = vmatprep.mubr.bf16.mxu1 %v11935_v10  ;;  %v940_v23 = vshll.u32 %v11945_v29, 16  ;;  %v11957_v10 = vsel %vm543_vm0, %v866_v61, %v870_v6  ;;  %v961_v61 = vshll.u32 %v11966_v14, 16  ;;  %v15787_v14 = vld [vmem:[#allocation11_spill] sm:$0xff] }
 0x120   : > { %2012 = vmatprep.mubr.bf16.mxu0 %v15727_v25  ;;  %v938_v52 = vor.u32 %v936_v16, %v926_v37  ;;  %v896_v16 = vshrl.u32 %v11949_v7, 16 }
 0x121   : > { %v942_v54 = vrot.slane %v940_v23, 1  ;;  %v900_v23 = vshll.u32 %v11970_v17, 16  ;;  %v963_v38 = vrot.slane %v961_v61, 1  ;;  %v928_v61 = vshrl.u32 %v11988_v19, 16 }
 0x122   : > { %v898_v6 = vor.u32 %v896_v16, %v886_v53 }
 0x123   : > { %v11973_v11 = vsel %vm543_vm0, %v938_v52, %v942_v54  ;;  %v959_v43 = vor.u32 %v957_v8, %v942_v54  ;;  %v902_v37 = vrot.slane %v900_v23, 1  ;;  %v912_v52 = vshrl.u32 %v11970_v17, 16 }
 0x124   : > { %15768 = vst [vmem:[#allocation76_spill] sm:$0xff] %v11973_v11 }
 0x125   : > { %v11991_v36 = vsel %vm543_vm0, %v959_v43, %v963_v38  ;;  %v11994_v1 = vsel %vm543_vm0, %v898_v6, %v902_v37  ;;  %v914_v56 = vor.u32 %v912_v52, %v902_v37  ;;  %v12030_v37 = vpack.c.bf16 %v11875_v55, %v11875_v55 }
 0x126   : > { %1700 = vmatmul.mubr.bf16.gmra.mrb[68].mxu1 %v11777_v60  ;;  %15769 = vst [vmem:[#allocation77_spill] sm:$0xff] %v11991_v36 }
 0x127   : > { %2013 = vmatmul.mubr.bf16.gmra.mrb[84].mxu0 %v11952_v47  ;;  %1709 = vmatprep.mubr.bf16.mxu1 %v11957_v10  ;;  %v11978_v47 = vsel %vm543_vm0, %v882_v3, %v886_v53  ;;  %v916_v3 = vshll.u32 %v11988_v19, 16  ;;  %v12004_v53 = vpack.c.bf16 %v11909_v20, %v11878_v18  ;;  %v12017_v18 = vpack.c.bf16 %v11912_v26, %v11912_v26 }
 0x128   : > { %2022 = vmatprep.mubr.bf16.mxu0 %v15727_v25  ;;  %15772 = vst [vmem:[#allocation80_spill] sm:$0xff] %v12030_v37 }
 0x129   : > { %v918_v54 = vrot.slane %v916_v3, 1  ;;  %15770 = vst [vmem:[#allocation78_spill] sm:$0xff] %v12004_v53  ;;  %v932_v16 = vshll.u32 %v12004_v53, 16  ;;  %15771 = vst [vmem:[#allocation79_spill] sm:$0xff] %v12017_v18  ;;  %v949_v38 = vshrl.u32 %v12004_v53, 16  ;;  %v953_v6 = vshll.u32 %v12017_v18, 16 }
 0x12a   : > { %v945_v3 = vshll.u32 %v12030_v37, 16  ;;  %v15788_v37 = vld [vmem:[#allocation14_spill] sm:$0xff] }
 0x12b   : > { %v12007_v8 = vsel %vm543_vm0, %v914_v56, %v918_v54  ;;  %v930_v23 = vor.u32 %v928_v61, %v918_v54  ;;  %v934_v43 = vrot.slane %v932_v16, 1  ;;  %v955_v52 = vrot.slane %v953_v6, 1  ;;  %v10662_v61 = vld [vmem:[#allocation2 + $0x508] ss:$16 sps:$4 sm:$0xff]   ;;  %v10667_v16 = vld [vmem:[#allocation2 + $0x52c] ss:$16 sps:$4 sm:$0xff]  }
 0x12c   : > { %v947_v54 = vrot.slane %v945_v3, 1  ;;  %v10685_v6 = vld [vmem:[#allocation2 + $0x224] ss:$16 sps:$4 sm:$0xff]   ;;  %v10686_v3 = vld [vmem:[#allocation2 + $0x240] ss:$16 sps:$4 sm:$0xff]  }
 0x12d   : > { %v12020_v20 = vsel %vm543_vm0, %v930_v23, %v934_v43  ;;  %v951_v26 = vor.u32 %v949_v38, %v934_v43  ;;  %v10682_v23 = vld [vmem:[#allocation2 + $0x204] ss:$16 sps:$4 sm:$0xff]   ;;  %v10680_v43 = vld [vmem:[#allocation2 + $0x200] ss:$16 sps:$4 sm:$0xff]   ;;  %v10670_v38 = vld [vmem:[#allocation2 + $0x54c] ss:$16 sps:$4 sm:$0xff]  }
 0x12e   : > { %1710 = vmatmul.mubr.bf16.gmra.mrb[72].mxu1 %v11821_v40  ;;  %v12042_v55 = vsel %vm543_vm0, %v11918_v42, %v947_v54  ;;  %v10665_v42 = vld [vmem:[#allocation2 + $0x528] ss:$16 sps:$4 sm:$0xff]   ;;  %3342 = vmatprep.subr.bf16.mxu0 %v10682_v23  ;;  %v10676_v54 = vld [vmem:[#allocation2 + $0x58c] ss:$16 sps:$4 sm:$0xff]   ;;  %v10689_v23 = vld [vmem:[#allocation2 + $0x260] ss:$16 sps:$4 sm:$0xff]  }
 0x12f   : > { %2023 = vmatmul.mubr.bf16.gmra.mrb[88].mxu0 %v11973_v11  ;;  %1719 = vmatprep.mubr.bf16.mxu1 %v11978_v47  ;;  %v12034_v56 = vsel %vm543_vm0, %v951_v26, %v955_v52  ;;  %v10683_v26 = vld [vmem:[#allocation2 + $0x220] ss:$16 sps:$4 sm:$0xff]   ;;  %v10688_v52 = vld [vmem:[#allocation2 + $0x244] ss:$16 sps:$4 sm:$0xff]  }
 0x130   : > { %2032 = vmatprep.mubr.bf16.mxu0 %v15727_v25  ;;  %v15795_v18 = vld [vmem:[#allocation38_spill] sm:$0xff] }
 0x136   : > { %1720 = vmatmul.mubr.bf16.gmra.mrb[76].mxu1 %v11854_v31 }
 0x137   : > { %2033 = vmatmul.mubr.bf16.gmra.mrb[92].mxu0 %v11991_v36  ;;  %1729 = vmatprep.mubr.bf16.mxu1 %v11994_v1 }
 0x138   : > { %3101 = vmatprep.mubr.bf16.mxu0 %v11374_v63 }
 0x13e   : > { %1730 = vmatmul.mubr.bf16.gmra.mrb[80].mxu1 %v11865_v59 }
 0x13f   : > { %3102 = vmatmul.mubr.bf16.vlgmr.msra.gmra.mrb[0].mxu0 %v11414_v34  ;;  %1739 = vmatprep.mubr.bf16.mxu1 %v12007_v8 }
 0x140   : > { %3111 = vmatprep.mubr.bf16.mxu0 %v11377_v2  ;;  %3343 = vmatpush1.bf16.msra.mxu0 %v10680_v43  ;;  %v10697_v43 = vld [vmem:[#allocation2 + $0x284] ss:$16 sps:$4 sm:$0xff]  }
 0x141   : > { %3344 = vmatprep.subr.bf16.mxu0 %v10685_v6  ;;  %v15776_v6 = vld [vmem:[#allocation34_spill] sm:$0xff] }
 0x144   : > { %3345 = vmatpush1.bf16.msra.mxu0 %v10683_v26  ;;  %v10695_v26 = vld [vmem:[#allocation2 + $0x280] ss:$16 sps:$4 sm:$0xff]  }
 0x145   : > { %3346 = vmatprep.subr.bf16.mxu0 %v10688_v52  ;;  %v10694_v52 = vld [vmem:[#allocation2 + $0x5cc] ss:$16 sps:$4 sm:$0xff]  }
 0x146   : > { %1740 = vmatmul.mubr.bf16.gmra.mrb[84].mxu1 %v11881_v62 }
 0x147   : > { %3112 = vmatmul.mubr.bf16.gmra.mrb[4].mxu0 %v11424_v44  ;;  %1749 = vmatprep.mubr.bf16.mxu1 %v12020_v20 }
 0x148   : > { %3121 = vmatprep.mubr.bf16.mxu0 %v11433_v50  ;;  %3347 = vmatpush1.bf16.msra.mxu0 %v10686_v3 }
 0x14e   : > { %1750 = vmatmul.mubr.bf16.gmra.mrb[88].mxu1 %v11899_v4 }
 0x14f   : > { %3122 = vmatmul.mubr.bf16.gmra.mrb[8].mxu0 %v11453_v9  ;;  %1759 = vmatprep.mubr.bf16.mxu1 %v12034_v56 }
 0x150   : > { %3131 = vmatprep.mubr.bf16.mxu0 %v11463_v22 }
 0x156   : > { %1760 = vmatmul.mubr.bf16.gmra.mrb[92].mxu1 %v12042_v55 }
 0x157   : > { %3132 = vmatmul.mubr.bf16.gmra.mrb[12].mxu0 %v11327_v33  ;;  %2075 = vmatprep.mubr.bf16.mxu1 %v11403_v21  ;;  %v10668_v21 = vld [vmem:[#allocation2 + $0x548] ss:$16 sps:$4 sm:$0xff]  }
 0x158   : > { %3141 = vmatprep.mubr.bf16.mxu0 %v11496_v5 }
 0x15e   : > { %2076 = vmatmul.mubr.bf16.vlgmr.msra.gmra.mrb[96].mxu1 %v11468_v27  ;;  %v10673_v27 = vld [vmem:[#allocation2 + $0x56c] ss:$16 sps:$4 sm:$0xff]  }
 0x15f   : > { %3142 = vmatmul.mubr.bf16.gmra.mrb[16].mxu0 %v11331_v35  ;;  %2317 = vmatpush1.bf16.msra.mxu1 %v10662_v61  ;;  %v10691_v61 = vld [vmem:[#allocation2 + $0x264] ss:$16 sps:$4 sm:$0xff]  }
 0x160   : > { %2085 = vmatprep.mubr.bf16.mxu1 %v11476_v30  ;;  %3151 = vmatprep.mubr.bf16.mxu0 %v11528_v58  ;;  %v10671_v30 = vld [vmem:[#allocation2 + $0x568] ss:$16 sps:$4 sm:$0xff]  }
 0x161   : > { %2318 = vmatprep.subr.bf16.mxu1 %v10667_v16  ;;  %v10674_v16 = vld [vmem:[#allocation2 + $0x588] ss:$16 sps:$4 sm:$0xff]   ;;  %3348 = vmatprep.subr.bf16.mxu0 %v10691_v61 }
 0x162   : > { %3349 = vmatpush1.bf16.msra.mxu0 %v10689_v23  ;;  %v15781_v23 = vld [vmem:[#allocation9_spill] sm:$0xff]  ;;  %v15816_v58 = vld [vmem:[#allocation55_spill] sm:$0xff] }
 0x163   : > { %2319 = vmatpush1.bf16.msra.mxu1 %v10665_v42  ;;  %v15773_v42 = vld [vmem:[#allocation26_spill] sm:$0xff]  ;;  %3350 = vmatprep.subr.bf16.mxu0 %v10697_v43  ;;  %v15784_v43 = vld [vmem:[#allocation37_spill] sm:$0xff] }
 0x164   : > { %2320 = vmatprep.subr.bf16.mxu1 %v10670_v38  ;;  %v15775_v38 = vld [vmem:[#allocation28_spill] sm:$0xff] }
 0x166   : > { %2086 = vmatmul.mubr.bf16.gmra.mrb[100].mxu1 %v11503_v15  ;;  %v10679_v15 = vld [vmem:[#allocation2 + $0x5ac] ss:$16 sps:$4 sm:$0xff]   ;;  %3351 = vmatpush1.bf16.msra.mxu0 %v10695_v26 }
 0x167   : > { %3152 = vmatmul.mubr.bf16.gmra.mrb[20].mxu0 %v11346_v46  ;;  %2095 = vmatprep.mubr.bf16.mxu1 %v11514_v57  ;;  %v15774_v57 = vld [vmem:[#allocation10_spill] sm:$0xff] }
 0x168   : > { %3161 = vmatprep.mubr.bf16.mxu0 %v11560_v28  ;;  %2321 = vmatpush1.bf16.msra.mxu1 %v10668_v21  ;;  %v10677_v21 = vld [vmem:[#allocation2 + $0x5a8] ss:$16 sps:$4 sm:$0xff]  }
 0x169   : > { %2322 = vmatprep.subr.bf16.mxu1 %v10673_v27 }
 0x16c   : > { %2323 = vmatpush1.bf16.msra.mxu1 %v10671_v30  ;;  %v10700_v30 = vld [vmem:[#allocation2 + $0x2a4] ss:$16 sps:$4 sm:$0xff]  }
 0x16d   : > { %2324 = vmatprep.subr.bf16.mxu1 %v10676_v54  ;;  %3352 = vmatprep.subr.bf16.mxu0 %v10700_v30  ;;  %v10704_v30 = vld [vmem:[#allocation2 + $0x2e0] ss:$16 sps:$4 sm:$0xff]  }
 0x16e   : > { %2096 = vmatmul.mubr.bf16.gmra.mrb[104].mxu1 %v15773_v42  ;;  %v10692_v42 = vld [vmem:[#allocation2 + $0x5c8] ss:$16 sps:$4 sm:$0xff]  }
 0x16f   : > { %3162 = vmatmul.mubr.bf16.gmra.mrb[24].mxu0 %v15774_v57  ;;  %2105 = vmatprep.mubr.bf16.mxu1 %v15775_v38  ;;  %v10698_v38 = vld [vmem:[#allocation2 + $0x2a0] ss:$16 sps:$4 sm:$0xff]  }
 0x170   : > { %3171 = vmatprep.mubr.bf16.mxu0 %v15776_v6  ;;  %2325 = vmatpush1.bf16.msra.mxu1 %v10674_v16  ;;  %v10703_v16 = vld [vmem:[#allocation2 + $0x2c4] ss:$16 sps:$4 sm:$0xff]  }
 0x171   : > { %v12060_v27 = vpop.f32.mrb[0].mxu1  ;;  %2326 = vmatprep.subr.bf16.mxu1 %v10679_v15  ;;  %v15783_v15 = vld [vmem:[#allocation32_spill] sm:$0xff]  ;;  %3353 = vmatpush1.bf16.msra.mxu0 %v10698_v38  ;;  %v15804_v6 = vld [vmem:[#allocation47_spill] sm:$0xff] }
 0x172   : > { %15777 = vst [vmem:[#allocation26_spill] sm:$0xff] %v12060_v27  ;;  %v12062_v3 = vpop.f32.mrb[1].mxu1  ;;  %v15782_v27 = vld [vmem:[#allocation12_spill] sm:$0xff]  ;;  %3354 = vmatprep.subr.bf16.mxu0 %v10703_v16 }
 0x173   : > { %15778 = vst [vmem:[#allocation10_spill] sm:$0xff] %v12062_v3  ;;  %v12064_v54 = vpop.f32.mrb[2].mxu1 }
 0x174   : > { %15779 = vst [vmem:[#allocation28_spill] sm:$0xff] %v12064_v54  ;;  %v12066_v61 = vpop.f32.mrb[3].mxu1  ;;  %2327 = vmatpush1.bf16.msra.mxu1 %v10677_v21  ;;  %v10701_v54 = vld [vmem:[#allocation2 + $0x2c0] ss:$16 sps:$4 sm:$0xff]   ;;  %v10706_v21 = vld [vmem:[#allocation2 + $0x2e4] ss:$16 sps:$4 sm:$0xff]  }
 0x175   : > { %15780 = vst [vmem:[#allocation81_spill] sm:$0xff] %v12066_v61  ;;  %2328 = vmatprep.subr.bf16.mxu1 %v10694_v52  ;;  %3355 = vmatpush1.bf16.msra.mxu0 %v10701_v54  ;;  %v15794_v54 = vld [vmem:[#allocation18_spill] sm:$0xff] }
 0x176   : > { %2106 = vmatmul.mubr.bf16.gmra.mrb[108].mxu1 %v15781_v23  ;;  %3356 = vmatprep.subr.bf16.mxu0 %v10706_v21  ;;  %v10707_v21 = vld [vmem:[#allocation2 + $0x5e8] ss:$16 sps:$4 sm:$0xff]  }
 0x177   : > { %3172 = vmatmul.mubr.bf16.gmra.mrb[28].mxu0 %v15782_v27  ;;  %2115 = vmatprep.mubr.bf16.mxu1 %v15783_v15  ;;  %v15789_v15 = vld [vmem:[#allocation35_spill] sm:$0xff] }
 0x178   : > { %3181 = vmatprep.mubr.bf16.mxu0 %v15784_v43  ;;  %2329 = vmatpush1.bf16.msra.mxu1 %v10692_v42  ;;  %v15790_v42 = vld [vmem:[#allocation40_spill] sm:$0xff]  ;;  %v15796_v43 = vld [vmem:[#allocation43_spill] sm:$0xff] }
 0x179   : > { %v1541_v3 = vpop.f32.mrb[4].mxu1  ;;  %3357 = vmatpush1.bf16.msra.mxu0 %v10704_v30 }
 0x17a   : > { %v1543_v61 = vpop.f32.mrb[5].mxu1 }
 0x17b   : > { %v12072_v26 = vpop.f32.mrb[6].mxu1 }
 0x17c   : > { %15785 = vst [vmem:[#allocation9_spill] sm:$0xff] %v12072_v26  ;;  %v12074_v52 = vpop.f32.mrb[7].mxu1  ;;  %v15793_v26 = vld [vmem:[#allocation13_spill] sm:$0xff] }
 0x17d   : > { %15786 = vst [vmem:[#allocation12_spill] sm:$0xff] %v12074_v52  ;;  %v10709_v52 = vld [vmem:[#allocation2 + $0x5ec] ss:$16 sps:$4 sm:$0xff]  }
 0x17e   : > { %2116 = vmatmul.mubr.bf16.gmra.mrb[112].mxu1 %v15787_v14  ;;  %2330 = vmatprep.subr.bf16.mxu1 %v10709_v52 }
 0x17f   : > { %3182 = vmatmul.mubr.bf16.gmra.mrb[32].mxu0 %v15788_v37  ;;  %2125 = vmatprep.mubr.bf16.mxu1 %v15789_v15 }
 0x180   : > { %3191 = vmatprep.mubr.bf16.mxu0 %v15790_v42  ;;  %2331 = vmatpush1.bf16.msra.mxu1 %v10707_v21  ;;  %v15803_v42 = vld [vmem:[#allocation41_spill] sm:$0xff]  ;;  %v15807_v21 = vld [vmem:[#allocation20_spill] sm:$0xff] }
 0x181   : > { %v12080_v3 = vpop.f32.mrb[8].mxu1 }
 0x182   : > { %15791 = vst [vmem:[#allocation32_spill] sm:$0xff] %v12080_v3  ;;  %v12082_v38 = vpop.f32.mrb[9].mxu1 }
 0x183   : > { %15792 = vst [vmem:[#allocation11_spill] sm:$0xff] %v12082_v38  ;;  %v1555_v61 = vpop.f32.mrb[10].mxu1  ;;  %v15802_v38 = vld [vmem:[#allocation21_spill] sm:$0xff] }
 0x184   : > { %v1557_v16 = vpop.f32.mrb[11].mxu1 }
 0x185   : > { %v15801_v16 = vld [vmem:[#allocation16_spill] sm:$0xff] }
 0x186   : > { %2126 = vmatmul.mubr.bf16.gmra.mrb[116].mxu1 %v15793_v26 }
 0x187   : > { %3192 = vmatmul.mubr.bf16.gmra.mrb[36].mxu0 %v15794_v54  ;;  %2135 = vmatprep.mubr.bf16.mxu1 %v15795_v18 }
 0x188   : > { %3201 = vmatprep.mubr.bf16.mxu0 %v15796_v43 }
 0x189   : > { %v12088_v15 = vpop.f32.mrb[12].mxu1 }
 0x18a   : > { %15797 = vst [vmem:[#allocation14_spill] sm:$0xff] %v12088_v15  ;;  %v12090_v30 = vpop.f32.mrb[13].mxu1 }
 0x18b   : > { %15798 = vst [vmem:[#allocation35_spill] sm:$0xff] %v12090_v30  ;;  %v12092_v3 = vpop.f32.mrb[14].mxu1  ;;  %v15808_v30 = vld [vmem:[#allocation24_spill] sm:$0xff] }
 0x18c   : > { %15799 = vst [vmem:[#allocation13_spill] sm:$0xff] %v12092_v3  ;;  %v12094_v61 = vpop.f32.mrb[15].mxu1  ;;  %v15809_v3 = vld [vmem:[#allocation45_spill] sm:$0xff] }
 0x18d   : > { %15800 = vst [vmem:[#allocation18_spill] sm:$0xff] %v12094_v61  ;;  %v15810_v61 = vld [vmem:[#allocation51_spill] sm:$0xff] }
 0x18e   : > { %2136 = vmatmul.mubr.bf16.gmra.mrb[120].mxu1 %v15801_v16 }
 0x18f   : > { %3202 = vmatmul.mubr.bf16.gmra.mrb[40].mxu0 %v15802_v38  ;;  %2145 = vmatprep.mubr.bf16.mxu1 %v15803_v42 }
 0x190   : > { %3211 = vmatprep.mubr.bf16.mxu0 %v15804_v6 }
 0x191   : > { %v1571_v18 = vpop.f32.mrb[16].mxu1 }
 0x192   : > { %v1573_v43 = vpop.f32.mrb[17].mxu1  ;;  %v15813_v18 = vld [vmem:[#allocation23_spill] sm:$0xff] }
 0x193   : > { %v12100_v52 = vpop.f32.mrb[18].mxu1  ;;  %v15814_v43 = vld [vmem:[#allocation29_spill] sm:$0xff] }
 0x194   : > { %15805 = vst [vmem:[#allocation38_spill] sm:$0xff] %v12100_v52  ;;  %v12102_v15 = vpop.f32.mrb[19].mxu1  ;;  %v10712_v52 = vld [vmem:[#allocation2 + $0xc] ss:$16 sps:$4 sm:$0xff]  }
 0x195   : > { %15806 = vst [vmem:[#allocation16_spill] sm:$0xff] %v12102_v15  ;;  %v15815_v15 = vld [vmem:[#allocation49_spill] sm:$0xff]  ;;  %3615 = vmatprep.subr.bf16.mxu1 %v10712_v52 }
 0x196   : > { %2146 = vmatmul.mubr.bf16.gmra.mrb[124].mxu1 %v15807_v21 }
 0x197   : > { %3212 = vmatmul.mubr.bf16.gmra.mrb[44].mxu0 %v15808_v30  ;;  %2155 = vmatprep.mubr.bf16.mxu1 %v15809_v3 }
 0x198   : > { %3221 = vmatprep.mubr.bf16.mxu0 %v15810_v61 }
 0x199   : > { %v12108_v28 = vpop.f32.mrb[20].mxu1 }
 0x19a   : > { %15811 = vst [vmem:[#allocation21_spill] sm:$0xff] %v12108_v28  ;;  %v12110_v36 = vpop.f32.mrb[21].mxu1 }
 0x19b   : > { %15812 = vst [vmem:[#allocation41_spill] sm:$0xff] %v12110_v36  ;;  %v1585_v42 = vpop.f32.mrb[22].mxu1  ;;  %v15823_v36 = vld [vmem:[#allocation53_spill] sm:$0xff] }
 0x19c   : > { %v1587_v6 = vpop.f32.mrb[23].mxu1  ;;  %v15821_v42 = vld [vmem:[#allocation27_spill] sm:$0xff] }
 0x19d   : > { %v15822_v6 = vld [vmem:[#allocation33_spill] sm:$0xff] }
 0x19e   : > { %2156 = vmatmul.mubr.bf16.gmra.mrb[128].mxu1 %v15813_v18 }
 0x19f   : > { %3222 = vmatmul.mubr.bf16.gmra.mrb[48].mxu0 %v15814_v43  ;;  %2165 = vmatprep.mubr.bf16.mxu1 %v15815_v15 }
 0x1a0   : > { %3231 = vmatprep.mubr.bf16.mxu0 %v15816_v58 }
 0x1a1   : > { %v12116_v11 = vpop.f32.mrb[24].mxu1 }
 0x1a2   : > { %15817 = vst [vmem:[#allocation20_spill] sm:$0xff] %v12116_v11  ;;  %v12118_v3 = vpop.f32.mrb[25].mxu1  ;;  %v15826_v11 = vld [vmem:[#allocation31_spill] sm:$0xff] }
 0x1a3   : > { %15818 = vst [vmem:[#allocation24_spill] sm:$0xff] %v12118_v3  ;;  %v12120_v61 = vpop.f32.mrb[26].mxu1  ;;  %v15827_v3 = vld [vmem:[#allocation36_spill] sm:$0xff] }
 0x1a4   : > { %15819 = vst [vmem:[#allocation45_spill] sm:$0xff] %v12120_v61  ;;  %v12122_v28 = vpop.f32.mrb[27].mxu1  ;;  %v15828_v61 = vld [vmem:[#allocation56_spill] sm:$0xff] }
 0x1a5   : > { %15820 = vst [vmem:[#allocation23_spill] sm:$0xff] %v12122_v28 }
 0x1a6   : > { %2166 = vmatmul.mubr.bf16.gmra.mrb[132].mxu1 %v15821_v42 }
 0x1a7   : > { %3232 = vmatmul.mubr.bf16.gmra.mrb[52].mxu0 %v15822_v6  ;;  %2175 = vmatprep.mubr.bf16.mxu1 %v15823_v36 }
 0x1a8   : > { %3241 = vmatprep.mubr.bf16.mxu0 %v11794_v41 }
 0x1a9   : > { %v1601_v15 = vpop.f32.mrb[28].mxu1 }
 0x1aa   : > { %v1603_v5 = vpop.f32.mrb[29].mxu1  ;;  %v15832_v15 = vld [vmem:[#allocation62_spill] sm:$0xff] }
 0x1ab   : > { %v12128_v58 = vpop.f32.mrb[30].mxu1  ;;  %v15831_v5 = vld [vmem:[#allocation39_spill] sm:$0xff] }
 0x1ac   : > { %15824 = vst [vmem:[#allocation29_spill] sm:$0xff] %v12128_v58  ;;  %v12130_v52 = vpop.f32.mrb[31].mxu1 }
 0x1ad   : > { %15825 = vst [vmem:[#allocation49_spill] sm:$0xff] %v12130_v52 }
 0x1ae   : > { %2176 = vmatmul.mubr.bf16.gmra.mrb[136].mxu1 %v15826_v11 }
 0x1af   : > { %3242 = vmatmul.mubr.bf16.gmra.mrb[56].mxu0 %v15827_v3  ;;  %2185 = vmatprep.mubr.bf16.mxu1 %v15828_v61 }
 0x1b0   : > { %3251 = vmatprep.mubr.bf16.mxu0 %v11804_v39 }
 0x1b1   : > { %v12136_v28 = vpop.f32.mrb[32].mxu1 }
 0x1b2   : > { %15829 = vst [vmem:[#allocation27_spill] sm:$0xff] %v12136_v28  ;;  %v12138_v22 = vpop.f32.mrb[33].mxu1 }
 0x1b3   : > { %15830 = vst [vmem:[#allocation33_spill] sm:$0xff] %v12138_v22  ;;  %v1615_v36 = vpop.f32.mrb[34].mxu1 }
 0x1b4   : > { %v1617_v41 = vpop.f32.mrb[35].mxu1  ;;  %v15837_v36 = vld [vmem:[#allocation42_spill] sm:$0xff] }
 0x1b6   : > { %2186 = vmatmul.mubr.bf16.gmra.mrb[140].mxu1 %v11597_v51 }
 0x1b7   : > { %3252 = vmatmul.mubr.bf16.gmra.mrb[60].mxu0 %v15831_v5  ;;  %2195 = vmatprep.mubr.bf16.mxu1 %v15832_v15 }
 0x1b8   : > { %3261 = vmatprep.mubr.bf16.mxu0 %v11831_v0 }
 0x1b9   : > { %v12144_v52 = vpop.f32.mrb[36].mxu1 }
 0x1ba   : > { %15833 = vst [vmem:[#allocation53_spill] sm:$0xff] %v12144_v52  ;;  %v12146_v58 = vpop.f32.mrb[37].mxu1 }
 0x1bb   : > { %15834 = vst [vmem:[#allocation31_spill] sm:$0xff] %v12146_v58  ;;  %v12148_v61 = vpop.f32.mrb[38].mxu1  ;;  %v15840_v58 = vld [vmem:[#allocation46_spill] sm:$0xff] }
 0x1bc   : > { %15835 = vst [vmem:[#allocation36_spill] sm:$0xff] %v12148_v61  ;;  %v12150_v39 = vpop.f32.mrb[39].mxu1 }
 0x1bd   : > { %15836 = vst [vmem:[#allocation56_spill] sm:$0xff] %v12150_v39  ;;  %v15841_v39 = vld [vmem:[#allocation68_spill] sm:$0xff] }
 0x1be   : > { %2196 = vmatmul.mubr.bf16.gmra.mrb[144].mxu1 %v11625_v49 }
 0x1bf   : > { %3262 = vmatmul.mubr.bf16.gmra.mrb[64].mxu0 %v15837_v36  ;;  %2205 = vmatprep.mubr.bf16.mxu1 %v11857_v24 }
 0x1c0   : > { %3271 = vmatprep.mubr.bf16.mxu0 %v11850_v45 }
 0x1c1   : > { %v1631_v41 = vpop.f32.mrb[40].mxu1 }
 0x1c2   : > { %v1633_v15 = vpop.f32.mrb[41].mxu1  ;;  %v15844_v41 = vld [vmem:[#allocation44_spill] sm:$0xff] }
 0x1c3   : > { %v12156_v22 = vpop.f32.mrb[42].mxu1  ;;  %v15845_v15 = vld [vmem:[#allocation50_spill] sm:$0xff] }
 0x1c4   : > { %15838 = vst [vmem:[#allocation39_spill] sm:$0xff] %v12156_v22  ;;  %v12158_v28 = vpop.f32.mrb[43].mxu1  ;;  %v15846_v22 = vld [vmem:[#allocation66_spill] sm:$0xff] }
 0x1c5   : > { %15839 = vst [vmem:[#allocation62_spill] sm:$0xff] %v12158_v28 }
 0x1c6   : > { %2206 = vmatmul.mubr.bf16.gmra.mrb[148].mxu1 %v11653_v48 }
 0x1c7   : > { %3272 = vmatmul.mubr.bf16.gmra.mrb[68].mxu0 %v15840_v58  ;;  %2215 = vmatprep.mubr.bf16.mxu1 %v11868_v32 }
 0x1c8   : > { %3281 = vmatprep.mubr.bf16.mxu0 %v15841_v39 }
 0x1c9   : > { %v12164_v61 = vpop.f32.mrb[44].mxu1 }
 0x1ca   : > { %15842 = vst [vmem:[#allocation42_spill] sm:$0xff] %v12164_v61  ;;  %v12166_v52 = vpop.f32.mrb[45].mxu1  ;;  %v15851_v61 = vld [vmem:[#allocation48_spill] sm:$0xff] }
 0x1cb   : > { %15843 = vst [vmem:[#allocation46_spill] sm:$0xff] %v12166_v52  ;;  %v1645_v24 = vpop.f32.mrb[46].mxu1 }
 0x1cc   : > { %v1647_v45 = vpop.f32.mrb[47].mxu1  ;;  %v15852_v24 = vld [vmem:[#allocation54_spill] sm:$0xff] }
 0x1cd   : > { %v15853_v45 = vld [vmem:[#allocation69_spill] sm:$0xff] }
 0x1ce   : > { %2216 = vmatmul.mubr.bf16.gmra.mrb[152].mxu1 %v15844_v41 }
 0x1cf   : > { %3282 = vmatmul.mubr.bf16.gmra.mrb[72].mxu0 %v15845_v15  ;;  %2225 = vmatprep.mubr.bf16.mxu1 %v15846_v22 }
 0x1d0   : > { %3291 = vmatprep.mubr.bf16.mxu0 %v11926_v12 }
 0x1d1   : > { %v12172_v28 = vpop.f32.mrb[48].mxu1 }
 0x1d2   : > { %15847 = vst [vmem:[#allocation44_spill] sm:$0xff] %v12172_v28  ;;  %v12174_v0 = vpop.f32.mrb[49].mxu1  ;;  %v15856_v28 = vld [vmem:[#allocation52_spill] sm:$0xff] }
 0x1d3   : > { %15848 = vst [vmem:[#allocation50_spill] sm:$0xff] %v12174_v0  ;;  %v12176_v32 = vpop.f32.mrb[50].mxu1  ;;  %v15857_v0 = vld [vmem:[#allocation57_spill] sm:$0xff] }
 0x1d4   : > { %15849 = vst [vmem:[#allocation66_spill] sm:$0xff] %v12176_v32  ;;  %v12178_v39 = vpop.f32.mrb[51].mxu1  ;;  %v15858_v32 = vld [vmem:[#allocation72_spill] sm:$0xff] }
 0x1d5   : > { %15850 = vst [vmem:[#allocation82_spill] sm:$0xff] %v12178_v39 }
 0x1d6   : > { %2226 = vmatmul.mubr.bf16.gmra.mrb[156].mxu1 %v15851_v61 }
 0x1d7   : > { %3292 = vmatmul.mubr.bf16.gmra.mrb[76].mxu0 %v15852_v24  ;;  %2235 = vmatprep.mubr.bf16.mxu1 %v15853_v45 }
 0x1d8   : > { %3301 = vmatprep.mubr.bf16.mxu0 %v11949_v7 }
 0x1d9   : > { %v1661_v52 = vpop.f32.mrb[52].mxu1 }
 0x1da   : > { %v1663_v22 = vpop.f32.mrb[53].mxu1  ;;  %v15861_v52 = vld [vmem:[#allocation59_spill] sm:$0xff] }
 0x1db   : > { %v12184_v9 = vpop.f32.mrb[54].mxu1 }
 0x1dc   : > { %15854 = vst [vmem:[#allocation48_spill] sm:$0xff] %v12184_v9  ;;  %v12186_v12 = vpop.f32.mrb[55].mxu1 }
 0x1dd   : > { %15855 = vst [vmem:[#allocation54_spill] sm:$0xff] %v12186_v12 }
 0x1de   : > { %2236 = vmatmul.mubr.bf16.gmra.mrb[160].mxu1 %v15856_v28 }
 0x1df   : > { %3302 = vmatmul.mubr.bf16.gmra.mrb[80].mxu0 %v15857_v0  ;;  %2245 = vmatprep.mubr.bf16.mxu1 %v15858_v32 }
 0x1e0   : > { %3311 = vmatprep.mubr.bf16.mxu0 %v11970_v17 }
 0x1e1   : > { %v12192_v39 = vpop.f32.mrb[56].mxu1 }
 0x1e2   : > { %15859 = vst [vmem:[#allocation69_spill] sm:$0xff] %v12192_v39  ;;  %v12194_v50 = vpop.f32.mrb[57].mxu1 }
 0x1e3   : > { %15860 = vst [vmem:[#allocation52_spill] sm:$0xff] %v12194_v50  ;;  %v1675_v45 = vpop.f32.mrb[58].mxu1 }
 0x1e4   : > { %v1677_v7 = vpop.f32.mrb[59].mxu1  ;;  %v15866_v45 = vld [vmem:[#allocation61_spill] sm:$0xff] }
 0x1e6   : > { %2246 = vmatmul.mubr.bf16.gmra.mrb[164].mxu1 %v11777_v60 }
 0x1e7   : > { %3312 = vmatmul.mubr.bf16.gmra.mrb[84].mxu0 %v15861_v52  ;;  %2255 = vmatprep.mubr.bf16.mxu1 %v11957_v10 }
 0x1e8   : > { %3321 = vmatprep.mubr.bf16.mxu0 %v11988_v19 }
 0x1e9   : > { %v12200_v22 = vpop.f32.mrb[60].mxu1 }
 0x1ea   : > { %15862 = vst [vmem:[#allocation57_spill] sm:$0xff] %v12200_v22  ;;  %v12202_v12 = vpop.f32.mrb[61].mxu1 }
 0x1eb   : > { %15863 = vst [vmem:[#allocation72_spill] sm:$0xff] %v12202_v12  ;;  %v12204_v32 = vpop.f32.mrb[62].mxu1  ;;  %v15869_v12 = vld [vmem:[#allocation64_spill] sm:$0xff] }
 0x1ec   : > { %15864 = vst [vmem:[#allocation59_spill] sm:$0xff] %v12204_v32  ;;  %v12206_v9 = vpop.f32.mrb[63].mxu1 }
 0x1ed   : > { %15865 = vst [vmem:[#allocation83_spill] sm:$0xff] %v12206_v9 }
 0x1ee   : > { %2256 = vmatmul.mubr.bf16.gmra.mrb[168].mxu1 %v11821_v40 }
 0x1ef   : > { %3322 = vmatmul.mubr.bf16.gmra.mrb[88].mxu0 %v15866_v45  ;;  %2265 = vmatprep.mubr.bf16.mxu1 %v11978_v47 }
 0x1f0   : > { %3331 = vmatprep.mubr.bf16.mxu0 %v12004_v53  ;;  %v10743_v53 = vld [vmem:[#allocation2 + $0x640] ss:$16 sps:$4 sm:$0xff]  }
 0x1f1   : > { %v1691_v7 = vpop.f32.mrb[64].mxu1 }
 0x1f2   : > { %v1693_v10 = vpop.f32.mrb[65].mxu1  ;;  %v10739_v7 = vld [vmem:[#allocation2 + $0x604] ss:$16 sps:$4 sm:$0xff]  }
 0x1f3   : > { %v12212_v50 = vpop.f32.mrb[66].mxu1  ;;  %v10737_v10 = vld [vmem:[#allocation2 + $0x600] ss:$16 sps:$4 sm:$0xff]   ;;  %4951 = vmatprep.subr.bf16.mxu0 %v10739_v7 }
 0x1f4   : > { %15867 = vst [vmem:[#allocation61_spill] sm:$0xff] %v12212_v50  ;;  %v12214_v39 = vpop.f32.mrb[67].mxu1 }
 0x1f5   : > { %15868 = vst [vmem:[#allocation84_spill] sm:$0xff] %v12214_v39  ;;  %v10742_v39 = vld [vmem:[#allocation2 + $0x624] ss:$16 sps:$4 sm:$0xff]  }
 0x1f6   : > { %2266 = vmatmul.mubr.bf16.gmra.mrb[172].mxu1 %v11854_v31 }
 0x1f7   : > { %3332 = vmatmul.mubr.bf16.gmra.mrb[92].mxu0 %v15869_v12  ;;  %2275 = vmatprep.mubr.bf16.mxu1 %v11994_v1 }
 0x1f8   : > { %3374 = vmatprep.mubr.bf16.mxu0 %v15727_v25 }
 0x1f9   : > { %v12220_v9 = vpop.f32.mrb[68].mxu1 }
 0x1fa   : > { %15870 = vst [vmem:[#allocation64_spill] sm:$0xff] %v12220_v9  ;;  %v12222_v32 = vpop.f32.mrb[69].mxu1  ;;  %v10740_v9 = vld [vmem:[#allocation2 + $0x620] ss:$16 sps:$4 sm:$0xff]  }
 0x1fb   : > { %15871 = vst [vmem:[#allocation85_spill] sm:$0xff] %v12222_v32  ;;  %v1705_v47 = vpop.f32.mrb[70].mxu1  ;;  %v10745_v32 = vld [vmem:[#allocation2 + $0x644] ss:$16 sps:$4 sm:$0xff]  }
 0x1fc   : > { %v1707_v22 = vpop.f32.mrb[71].mxu1 }
 0x1fe   : > { %2276 = vmatmul.mubr.bf16.gmra.mrb[176].mxu1 %v11865_v59 }
 0x1ff   : > { %3375 = vmatmul.mubr.bf16.vlgmr.msra.gmra.mrb[0].mxu0 %v11327_v33  ;;  %2285 = vmatprep.mubr.bf16.mxu1 %v12007_v8  ;;  %v10751_v8 = vld [vmem:[#allocation2 + $0x664] ss:$16 sps:$4 sm:$0xff]  }
 0x200   : > { %3384 = vmatprep.mubr.bf16.mxu0 %v15727_v25  ;;  %4952 = vmatpush1.bf16.msra.mxu0 %v10737_v10 }
 0x201   : > { %v12228_v1 = vpop.f32.mrb[72].mxu1  ;;  %4953 = vmatprep.subr.bf16.mxu0 %v10742_v39  ;;  %v10749_v39 = vld [vmem:[#allocation2 + $0x660] ss:$16 sps:$4 sm:$0xff]  }
 0x202   : > { %15872 = vst [vmem:[#allocation86_spill] sm:$0xff] %v12228_v1  ;;  %v12230_v50 = vpop.f32.mrb[73].mxu1  ;;  %v10823_v1 = vld [vmem:[#allocation2 + $0x2ac] ss:$16 sps:$4 sm:$0xff]  }
 0x203   : > { %15873 = vst [vmem:[#allocation87_spill] sm:$0xff] %v12230_v50  ;;  %v12232_v22 = vpop.f32.mrb[74].mxu1  ;;  %v10752_v50 = vld [vmem:[#allocation2 + $0x680] ss:$16 sps:$4 sm:$0xff]  }
 0x204   : > { %15874 = vst [vmem:[#allocation88_spill] sm:$0xff] %v12232_v22  ;;  %v12234_v47 = vpop.f32.mrb[75].mxu1  ;;  %4954 = vmatpush1.bf16.msra.mxu0 %v10740_v9  ;;  %v10754_v9 = vld [vmem:[#allocation2 + $0x684] ss:$16 sps:$4 sm:$0xff]  }
 0x205   : > { %15875 = vst [vmem:[#allocation89_spill] sm:$0xff] %v12234_v47  ;;  %4955 = vmatprep.subr.bf16.mxu0 %v10745_v32  ;;  %v10755_v32 = vld [vmem:[#allocation2 + $0x6a0] ss:$16 sps:$4 sm:$0xff]  }
 0x206   : > { %2286 = vmatmul.mubr.bf16.gmra.mrb[180].mxu1 %v11881_v62 }
 0x207   : > { %3385 = vmatmul.mubr.bf16.gmra.mrb[4].mxu0 %v11331_v35  ;;  %2295 = vmatprep.mubr.bf16.mxu1 %v12020_v20  ;;  %v10757_v20 = vld [vmem:[#allocation2 + $0x6a4] ss:$16 sps:$4 sm:$0xff]  }
 0x208   : > { %3394 = vmatprep.mubr.bf16.mxu0 %v15727_v25  ;;  %4956 = vmatpush1.bf16.msra.mxu0 %v10743_v53 }
 0x209   : > { %v1721_v7 = vpop.f32.mrb[76].mxu1  ;;  %4957 = vmatprep.subr.bf16.mxu0 %v10751_v8 }
 0x20a   : > { %v1723_v10 = vpop.f32.mrb[77].mxu1 }
 0x20b   : > { %v12240_v22 = vpop.f32.mrb[78].mxu1  ;;  %v10763_v10 = vld [vmem:[#allocation2 + $0x6c4] ss:$16 sps:$4 sm:$0xff]  }
 0x20c   : > { %15876 = vst [vmem:[#allocation90_spill] sm:$0xff] %v12240_v22  ;;  %v12242_v47 = vpop.f32.mrb[79].mxu1  ;;  %4958 = vmatpush1.bf16.msra.mxu0 %v10749_v39  ;;  %v10778_v22 = vld [vmem:[#allocation2 + $0x744] ss:$16 sps:$4 sm:$0xff]  }
 0x20d   : > { %15877 = vst [vmem:[#allocation91_spill] sm:$0xff] %v12242_v47  ;;  %4959 = vmatprep.subr.bf16.mxu0 %v10754_v9  ;;  %v10761_v47 = vld [vmem:[#allocation2 + $0x6c0] ss:$16 sps:$4 sm:$0xff]  }
 0x20e   : > { %2296 = vmatmul.mubr.bf16.gmra.mrb[184].mxu1 %v11899_v4  ;;  %v10764_v9 = vld [vmem:[#allocation2 + $0x6e0] ss:$16 sps:$4 sm:$0xff]  }
 0x20f   : > { %3395 = vmatmul.mubr.bf16.gmra.mrb[8].mxu0 %v11346_v46  ;;  %2305 = vmatprep.mubr.bf16.mxu1 %v12034_v56  ;;  %v10766_v56 = vld [vmem:[#allocation2 + $0x6e4] ss:$16 sps:$4 sm:$0xff]  }
 0x210   : > { %3404 = vmatprep.mubr.bf16.mxu0 %v15727_v25  ;;  %4960 = vmatpush1.bf16.msra.mxu0 %v10752_v50 }
 0x211   : > { %v12248_v53 = vpop.f32.mrb[80].mxu1  ;;  %4961 = vmatprep.subr.bf16.mxu0 %v10757_v20 }
 0x212   : > { %15878 = vst [vmem:[#allocation92_spill] sm:$0xff] %v12248_v53  ;;  %v12250_v8 = vpop.f32.mrb[81].mxu1  ;;  %v10721_v53 = vld [vmem:[#allocation2 + $0x6c] ss:$16 sps:$4 sm:$0xff]  }
 0x213   : > { %15879 = vst [vmem:[#allocation93_spill] sm:$0xff] %v12250_v8  ;;  %v1735_v7 = vpop.f32.mrb[82].mxu1  ;;  %v10769_v8 = vld [vmem:[#allocation2 + $0x704] ss:$16 sps:$4 sm:$0xff]  }
 0x214   : > { %v1737_v39 = vpop.f32.mrb[83].mxu1  ;;  %4962 = vmatpush1.bf16.msra.mxu0 %v10755_v32  ;;  %v10710_v32 = vld [vmem:[#allocation2 + $0x8] ss:$16 sps:$4 sm:$0xff]  }
 0x215   : > { %4963 = vmatprep.subr.bf16.mxu0 %v10763_v10  ;;  %v10767_v10 = vld [vmem:[#allocation2 + $0x700] ss:$16 sps:$4 sm:$0xff]  }
 0x216   : > { %2306 = vmatmul.mubr.bf16.gmra.mrb[188].mxu1 %v12042_v55  ;;  %v10715_v55 = vld [vmem:[#allocation2 + $0x2c] ss:$16 sps:$4 sm:$0xff]  }
 0x217   : > { %3405 = vmatmul.mubr.bf16.gmra.mrb[12].mxu0 %v15774_v57  ;;  %2348 = vmatprep.mubr.bf16.mxu1 %v15727_v25 }
 0x218   : > { %3414 = vmatprep.mubr.bf16.mxu0 %v15727_v25  ;;  %4964 = vmatpush1.bf16.msra.mxu0 %v10761_v47  ;;  %v10713_v47 = vld [vmem:[#allocation2 + $0x28] ss:$16 sps:$4 sm:$0xff]  }
 0x219   : > { %v12256_v50 = vpop.f32.mrb[84].mxu1  ;;  %4965 = vmatprep.subr.bf16.mxu0 %v10766_v56  ;;  %v10718_v56 = vld [vmem:[#allocation2 + $0x4c] ss:$16 sps:$4 sm:$0xff]  }
 0x21a   : > { %15880 = vst [vmem:[#allocation94_spill] sm:$0xff] %v12256_v50  ;;  %v12258_v20 = vpop.f32.mrb[85].mxu1  ;;  %v10775_v50 = vld [vmem:[#allocation2 + $0x724] ss:$16 sps:$4 sm:$0xff]  }
 0x21b   : > { %15881 = vst [vmem:[#allocation95_spill] sm:$0xff] %v12258_v20  ;;  %v12260_v7 = vpop.f32.mrb[86].mxu1  ;;  %v10716_v20 = vld [vmem:[#allocation2 + $0x48] ss:$16 sps:$4 sm:$0xff]  }
 0x21c   : > { %15882 = vst [vmem:[#allocation96_spill] sm:$0xff] %v12260_v7  ;;  %v12262_v39 = vpop.f32.mrb[87].mxu1  ;;  %4966 = vmatpush1.bf16.msra.mxu0 %v10764_v9 }
 0x21d   : > { %15883 = vst [vmem:[#allocation97_spill] sm:$0xff] %v12262_v39  ;;  %4967 = vmatprep.subr.bf16.mxu0 %v10769_v8  ;;  %v10719_v8 = vld [vmem:[#allocation2 + $0x68] ss:$16 sps:$4 sm:$0xff]  }
 0x21e   : > { %2349 = vmatmul.mubr.bf16.vlgmr.msra.gmra.mrb[96].mxu1 %v15781_v23 }
 0x21f   : > { %3415 = vmatmul.mubr.bf16.gmra.mrb[16].mxu0 %v15782_v27  ;;  %3616 = vmatpush1.bf16.msra.mxu1 %v10710_v32  ;;  %v10773_v32 = vld [vmem:[#allocation2 + $0x720] ss:$16 sps:$4 sm:$0xff]  }
 0x220   : > { %2358 = vmatprep.mubr.bf16.mxu1 %v15727_v25  ;;  %3424 = vmatprep.mubr.bf16.mxu0 %v15727_v25 }
 0x221   : > { %3617 = vmatprep.subr.bf16.mxu1 %v10715_v55  ;;  %v1751_v7 = vpop.f32.mrb[88].mxu1  ;;  %4968 = vmatpush1.bf16.msra.mxu0 %v10767_v10  ;;  %v10781_v55 = vld [vmem:[#allocation2 + $0x764] ss:$16 sps:$4 sm:$0xff]  }
 0x222   : > { %v1753_v39 = vpop.f32.mrb[89].mxu1  ;;  %4969 = vmatprep.subr.bf16.mxu0 %v10775_v50  ;;  %v10776_v7 = vld [vmem:[#allocation2 + $0x740] ss:$16 sps:$4 sm:$0xff]  }
 0x223   : > { %v12268_v9 = vpop.f32.mrb[90].mxu1  ;;  %3618 = vmatpush1.bf16.msra.mxu1 %v10713_v47  ;;  %v10724_v39 = vld [vmem:[#allocation2 + $0x8c] ss:$16 sps:$4 sm:$0xff]  }
 0x224   : > { %15884 = vst [vmem:[#allocation98_spill] sm:$0xff] %v12268_v9  ;;  %v12270_v23 = vpop.f32.mrb[91].mxu1  ;;  %3619 = vmatprep.subr.bf16.mxu1 %v10718_v56  ;;  %v10722_v56 = vld [vmem:[#allocation2 + $0x88] ss:$16 sps:$4 sm:$0xff]   ;;  %v10727_v9 = vld [vmem:[#allocation2 + $0xac] ss:$16 sps:$4 sm:$0xff]  }
 0x225   : > { %15885 = vst [vmem:[#allocation99_spill] sm:$0xff] %v12270_v23  ;;  %4970 = vmatpush1.bf16.msra.mxu0 %v10773_v32  ;;  %v10779_v23 = vld [vmem:[#allocation2 + $0x760] ss:$16 sps:$4 sm:$0xff]   ;;  %v10730_v32 = vld [vmem:[#allocation2 + $0xcc] ss:$16 sps:$4 sm:$0xff]  }
 0x226   : > { %2359 = vmatmul.mubr.bf16.gmra.mrb[100].mxu1 %v15787_v14  ;;  %4971 = vmatprep.subr.bf16.mxu0 %v10778_v22  ;;  %v10725_v22 = vld [vmem:[#allocation2 + $0xa8] ss:$16 sps:$4 sm:$0xff]  }
 0x227   : > { %3425 = vmatmul.mubr.bf16.gmra.mrb[20].mxu0 %v15788_v37  ;;  %2368 = vmatprep.mubr.bf16.mxu1 %v15727_v25 }
 0x228   : > { %3434 = vmatprep.mubr.bf16.mxu0 %v15727_v25  ;;  %3620 = vmatpush1.bf16.msra.mxu1 %v10716_v20  ;;  %v10787_v20 = vld [vmem:[#allocation2 + $0x784] ss:$16 sps:$4 sm:$0xff]  }
 0x229   : > { %v12276_v50 = vpop.f32.mrb[92].mxu1  ;;  %3621 = vmatprep.subr.bf16.mxu1 %v10721_v53  ;;  %4972 = vmatpush1.bf16.msra.mxu0 %v10776_v7  ;;  %v10785_v53 = vld [vmem:[#allocation2 + $0x780] ss:$16 sps:$4 sm:$0xff]   ;;  %v10728_v7 = vld [vmem:[#allocation2 + $0xc8] ss:$16 sps:$4 sm:$0xff]  }
 0x22a   : > { %15886 = vst [vmem:[#allocation100_spill] sm:$0xff] %v12276_v50  ;;  %v12278_v10 = vpop.f32.mrb[93].mxu1  ;;  %4973 = vmatprep.subr.bf16.mxu0 %v10781_v55  ;;  %v10793_v55 = vld [vmem:[#allocation2 + $0x7c4] ss:$16 sps:$4 sm:$0xff]   ;;  %v10833_v50 = vld [vmem:[#allocation2 + $0x860] ss:$16 sps:$4 sm:$0xff]  }
 0x22b   : > { %15887 = vst [vmem:[#allocation101_spill] sm:$0xff] %v12278_v10  ;;  %v1765_v47 = vpop.f32.mrb[94].mxu1  ;;  %v10832_v10 = vld [vmem:[#allocation2 + $0x844] ss:$16 sps:$4 sm:$0xff]  }
 0x22c   : > { %v1767_v14 = vpop.f32.mrb[95].mxu1  ;;  %3622 = vmatpush1.bf16.msra.mxu1 %v10719_v8  ;;  %v10790_v8 = vld [vmem:[#allocation2 + $0x7a4] ss:$16 sps:$4 sm:$0xff]   ;;  %v10736_v47 = vld [vmem:[#allocation2 + $0x10c] ss:$16 sps:$4 sm:$0xff]  }
 0x22d   : > { %3623 = vmatprep.subr.bf16.mxu1 %v10724_v39  ;;  %4974 = vmatpush1.bf16.msra.mxu0 %v10779_v23  ;;  %v10788_v39 = vld [vmem:[#allocation2 + $0x7a0] ss:$16 sps:$4 sm:$0xff]   ;;  %v10799_v14 = vld [vmem:[#allocation2 + $0x7e4] ss:$16 sps:$4 sm:$0xff]  }
 0x22e   : > { %2369 = vmatmul.mubr.bf16.gmra.mrb[104].mxu1 %v15793_v26  ;;  %4975 = vmatprep.subr.bf16.mxu0 %v10787_v20  ;;  %v10733_v26 = vld [vmem:[#allocation2 + $0xec] ss:$16 sps:$4 sm:$0xff]   ;;  %v10791_v23 = vld [vmem:[#allocation2 + $0x7c0] ss:$16 sps:$4 sm:$0xff]  }
 0x22f   : > { %3435 = vmatmul.mubr.bf16.gmra.mrb[24].mxu0 %v15794_v54  ;;  %2378 = vmatprep.mubr.bf16.mxu1 %v15727_v25  ;;  %v10797_v20 = vld [vmem:[#allocation2 + $0x7e0] ss:$16 sps:$4 sm:$0xff]  }
 0x230   : > { %3444 = vmatprep.mubr.bf16.mxu0 %v15727_v25  ;;  %3624 = vmatpush1.bf16.msra.mxu1 %v10722_v56  ;;  %v10734_v56 = vld [vmem:[#allocation2 + $0x108] ss:$16 sps:$4 sm:$0xff]  }
 0x231   : > { %3625 = vmatprep.subr.bf16.mxu1 %v10727_v9  ;;  %4976 = vmatpush1.bf16.msra.mxu0 %v10785_v53  ;;  %v10731_v9 = vld [vmem:[#allocation2 + $0xe8] ss:$16 sps:$4 sm:$0xff]   ;;  %v10760_v53 = vld [vmem:[#allocation2 + $0x14c] ss:$16 sps:$4 sm:$0xff]  }
 0x232   : > { %4977 = vmatprep.subr.bf16.mxu0 %v10790_v8  ;;  %v10772_v8 = vld [vmem:[#allocation2 + $0x16c] ss:$16 sps:$4 sm:$0xff]  }
 0x234   : > { %3626 = vmatpush1.bf16.msra.mxu1 %v10725_v22  ;;  %v10746_v22 = vld [vmem:[#allocation2 + $0x128] ss:$16 sps:$4 sm:$0xff]  }
 0x235   : > { %3627 = vmatprep.subr.bf16.mxu1 %v10730_v32  ;;  %4978 = vmatpush1.bf16.msra.mxu0 %v10788_v39  ;;  %v10758_v32 = vld [vmem:[#allocation2 + $0x148] ss:$16 sps:$4 sm:$0xff]  }
 0x236   : > { %2379 = vmatmul.mubr.bf16.gmra.mrb[108].mxu1 %v15801_v16  ;;  %4979 = vmatprep.subr.bf16.mxu0 %v10793_v55  ;;  %v10748_v16 = vld [vmem:[#allocation2 + $0x12c] ss:$16 sps:$4 sm:$0xff]   ;;  %v10782_v39 = vld [vmem:[#allocation2 + $0x188] ss:$16 sps:$4 sm:$0xff]  }
 0x237   : > { %3445 = vmatmul.mubr.bf16.gmra.mrb[28].mxu0 %v15802_v38  ;;  %2388 = vmatprep.mubr.bf16.mxu1 %v15727_v25  ;;  %v10802_v55 = vld [vmem:[#allocation2 + $0x1cc] ss:$16 sps:$4 sm:$0xff]  }
 0x238   : > { %3454 = vmatprep.mubr.bf16.mxu0 %v15727_v25  ;;  %3628 = vmatpush1.bf16.msra.mxu1 %v10728_v7  ;;  %v10784_v7 = vld [vmem:[#allocation2 + $0x18c] ss:$16 sps:$4 sm:$0xff]  }
 0x239   : > { %3629 = vmatprep.subr.bf16.mxu1 %v10733_v26  ;;  %4980 = vmatpush1.bf16.msra.mxu0 %v10791_v23  ;;  %v10796_v26 = vld [vmem:[#allocation2 + $0x1ac] ss:$16 sps:$4 sm:$0xff]  }
 0x23a   : > { %4981 = vmatprep.subr.bf16.mxu0 %v10799_v14  ;;  %v10805_v23 = vld [vmem:[#allocation2 + $0x1ec] ss:$16 sps:$4 sm:$0xff]   ;;  %v15892_v14 = vld [vmem:[#allocation19_spill] sm:$0xff] }
 0x23c   : > { %3630 = vmatpush1.bf16.msra.mxu1 %v10731_v9  ;;  %v10800_v9 = vld [vmem:[#allocation2 + $0x1c8] ss:$16 sps:$4 sm:$0xff]  }
 0x23d   : > { %3631 = vmatprep.subr.bf16.mxu1 %v10736_v47  ;;  %4982 = vmatpush1.bf16.msra.mxu0 %v10797_v20  ;;  %v10808_v47 = vld [vmem:[#allocation2 + $0x20c] ss:$16 sps:$4 sm:$0xff]  }
 0x23e   : > { %2389 = vmatmul.mubr.bf16.gmra.mrb[112].mxu1 %v15807_v21  ;;  %v10770_v21 = vld [vmem:[#allocation2 + $0x168] ss:$16 sps:$4 sm:$0xff]  }
 0x23f   : > { %3455 = vmatmul.mubr.bf16.gmra.mrb[32].mxu0 %v15808_v30  ;;  %2398 = vmatprep.mubr.bf16.mxu1 %v15727_v25 }
 0x240   : > { %3464 = vmatprep.mubr.bf16.mxu0 %v15727_v25  ;;  %3632 = vmatpush1.bf16.msra.mxu1 %v10734_v56  ;;  %v4329_v56 = vrot.slane %v15892_v14, 1 }
 0x241   : > { %3633 = vmatprep.subr.bf16.mxu1 %v10748_v16 }
 0x244   : > { %3634 = vmatpush1.bf16.msra.mxu1 %v10746_v22  ;;  %v15893_v22 = vld [vmem:[#allocation74_spill] sm:$0xff] }
 0x245   : > { %3635 = vmatprep.subr.bf16.mxu1 %v10760_v53  ;;  %v4319_v53 = vrot.slane %v11327_v33, 1 }
 0x246   : > { %2399 = vmatmul.mubr.bf16.gmra.mrb[116].mxu1 %v15813_v18  ;;  %v10794_v18 = vld [vmem:[#allocation2 + $0x1a8] ss:$16 sps:$4 sm:$0xff]  }
 0x247   : > { %3465 = vmatmul.mubr.bf16.gmra.mrb[36].mxu0 %v15814_v43  ;;  %2408 = vmatprep.mubr.bf16.mxu1 %v15727_v25 }
 0x248   : > { %3474 = vmatprep.mubr.bf16.mxu0 %v15727_v25  ;;  %3636 = vmatpush1.bf16.msra.mxu1 %v10758_v32  ;;  %v15894_v32 = vld [vmem:[#allocation22_spill] sm:$0xff] }
 0x249   : > { %3637 = vmatprep.subr.bf16.mxu1 %v10772_v8  ;;  %v4333_v8 = vrot.slane %v15894_v32, 1 }
 0x24c   : > { %3638 = vmatpush1.bf16.msra.mxu1 %v10770_v21 }
 0x24d   : > { %3639 = vmatprep.subr.bf16.mxu1 %v10784_v7  ;;  %v12388_v7 = vsel %vm4312_vm1, %v4329_v56, %v4333_v8 }
 0x24e   : > { %2409 = vmatmul.mubr.bf16.gmra.mrb[120].mxu1 %v15821_v42  ;;  %v10803_v42 = vld [vmem:[#allocation2 + $0x1e8] ss:$16 sps:$4 sm:$0xff]  }
 0x24f   : > { %3475 = vmatmul.mubr.bf16.gmra.mrb[40].mxu0 %v15822_v6  ;;  %2418 = vmatprep.mubr.bf16.mxu1 %v15727_v25 }
 0x250   : > { %3484 = vmatprep.mubr.bf16.mxu0 %v15727_v25  ;;  %3640 = vmatpush1.bf16.msra.mxu1 %v10782_v39  ;;  %v15896_v39 = vld [vmem:[#allocation76_spill] sm:$0xff] }
 0x251   : > { %3641 = vmatprep.subr.bf16.mxu1 %v10796_v26  ;;  %v4320_v26 = vrot.slane %v11331_v35, 1 }
 0x254   : > { %3642 = vmatpush1.bf16.msra.mxu1 %v10794_v18  ;;  %v15897_v18 = vld [vmem:[#allocation25_spill] sm:$0xff] }
 0x255   : > { %3643 = vmatprep.subr.bf16.mxu1 %v10802_v55  ;;  %v4337_v55 = vrot.slane %v15897_v18, 1 }
 0x256   : > { %2419 = vmatmul.mubr.bf16.gmra.mrb[124].mxu1 %v15826_v11 }
 0x257   : > { %3485 = vmatmul.mubr.bf16.gmra.mrb[44].mxu0 %v15827_v3  ;;  %2428 = vmatprep.mubr.bf16.mxu1 %v15727_v25 }
 0x258   : > { %3494 = vmatprep.mubr.bf16.mxu0 %v15727_v25  ;;  %3644 = vmatpush1.bf16.msra.mxu1 %v10800_v9  ;;  %v12397_v9 = vsel %vm4312_vm1, %v4319_v53, %v4320_v26 }
 0x259   : > { %3645 = vmatprep.subr.bf16.mxu1 %v10805_v23  ;;  %v12400_v23 = vsel %vm4312_vm1, %v4333_v8, %v4337_v55  ;;  %v15904_v8 = vld [vmem:[#allocation34_spill] sm:$0xff] }
 0x25c   : > { %3646 = vmatpush1.bf16.msra.mxu1 %v10803_v42  ;;  %v15900_v42 = vld [vmem:[#allocation77_spill] sm:$0xff] }
 0x25d   : > { %3888 = vmatprep.subr.bf16.mxu1 %v10808_v47  ;;  %v4326_v47 = vrot.slane %v11346_v46, 1 }
 0x25e   : > { %2429 = vmatmul.mubr.bf16.gmra.mrb[128].mxu1 %v11597_v51 }
 0x25f   : > { %3495 = vmatmul.mubr.bf16.gmra.mrb[48].mxu0 %v15831_v5  ;;  %2438 = vmatprep.mubr.bf16.mxu1 %v15727_v25 }
 0x260   : > { %3504 = vmatprep.mubr.bf16.mxu0 %v15727_v25 }
 0x266   : > { %2439 = vmatmul.mubr.bf16.gmra.mrb[132].mxu1 %v11625_v49  ;;  %v15888_v49 = vld [vmem:[#allocation67_spill] sm:$0xff] }
 0x267   : > { %3505 = vmatmul.mubr.bf16.gmra.mrb[52].mxu0 %v15837_v36  ;;  %2448 = vmatprep.mubr.bf16.mxu1 %v15727_v25  ;;  %15895 = vst [vmem:[#allocation67_spill] sm:$0xff] %v12388_v7 }
 0x268   : > { %3514 = vmatprep.mubr.bf16.mxu0 %v15727_v25 }
 0x26e   : > { %2449 = vmatmul.mubr.bf16.gmra.mrb[136].mxu1 %v11653_v48  ;;  %v4316_v48 = vrot.slane %v11374_v63, 1 }
 0x26f   : > { %3515 = vmatmul.mubr.bf16.gmra.mrb[56].mxu0 %v15840_v58  ;;  %2458 = vmatprep.mubr.bf16.mxu1 %v15727_v25 }
 0x270   : > { %3524 = vmatprep.mubr.bf16.mxu0 %v15727_v25 }
 0x276   : > { %2459 = vmatmul.mubr.bf16.gmra.mrb[140].mxu1 %v15844_v41 }
 0x277   : > { %3525 = vmatmul.mubr.bf16.gmra.mrb[60].mxu0 %v15845_v15  ;;  %2468 = vmatprep.mubr.bf16.mxu1 %v15727_v25 }
 0x278   : > { %3534 = vmatprep.mubr.bf16.mxu0 %v15727_v25 }
 0x27e   : > { %2469 = vmatmul.mubr.bf16.gmra.mrb[144].mxu1 %v15851_v61  ;;  %v15890_v61 = vld [vmem:[#allocation71_spill] sm:$0xff] }
 0x27f   : > { %3535 = vmatmul.mubr.bf16.gmra.mrb[64].mxu0 %v15852_v24  ;;  %2478 = vmatprep.mubr.bf16.mxu1 %v15727_v25  ;;  %15899 = vst [vmem:[#allocation71_spill] sm:$0xff] %v12400_v23 }
 0x280   : > { %3544 = vmatprep.mubr.bf16.mxu0 %v15727_v25 }
 0x286   : > { %2479 = vmatmul.mubr.bf16.gmra.mrb[148].mxu1 %v15856_v28  ;;  %v4317_v28 = vrot.slane %v11377_v2, 1 }
 0x287   : > { %3545 = vmatmul.mubr.bf16.gmra.mrb[68].mxu0 %v15857_v0  ;;  %2488 = vmatprep.mubr.bf16.mxu1 %v15727_v25 }
 0x288   : > { %3554 = vmatprep.mubr.bf16.mxu0 %v15727_v25  ;;  %v12351_v51 = vsel %vm4312_vm1, %v4316_v48, %v4317_v28  ;;  %v15901_v48 = vld [vmem:[#allocation30_spill] sm:$0xff] }
 0x28e   : > { %2489 = vmatmul.mubr.bf16.gmra.mrb[152].mxu1 %v11777_v60  ;;  %v4313_v60 = vrot.slane %v11414_v34, 1 }
 0x28f   : > { %3555 = vmatmul.mubr.bf16.gmra.mrb[72].mxu0 %v15861_v52  ;;  %2498 = vmatprep.mubr.bf16.mxu1 %v15727_v25 }
 0x290   : > { %3564 = vmatprep.mubr.bf16.mxu0 %v15727_v25 }
 0x296   : > { %2499 = vmatmul.mubr.bf16.gmra.mrb[156].mxu1 %v11821_v40  ;;  %v4314_v40 = vrot.slane %v11424_v44, 1 }
 0x297   : > { %3565 = vmatmul.mubr.bf16.gmra.mrb[76].mxu0 %v15866_v45  ;;  %2508 = vmatprep.mubr.bf16.mxu1 %v15727_v25 }
 0x298   : > { %3574 = vmatprep.mubr.bf16.mxu0 %v15727_v25 }
 0x29e   : > { %2509 = vmatmul.mubr.bf16.gmra.mrb[160].mxu1 %v11854_v31  ;;  %v15889_v31 = vld [vmem:[#allocation15_spill] sm:$0xff] }
 0x29f   : > { %3575 = vmatmul.mubr.bf16.gmra.mrb[80].mxu0 %v15869_v12  ;;  %2518 = vmatprep.mubr.bf16.mxu1 %v15727_v25  ;;  %15898 = vst [vmem:[#allocation15_spill] sm:$0xff] %v12397_v9 }
 0x2a0   : > { %3584 = vmatprep.mubr.bf16.mxu0 %v15727_v25 }
 0x2a6   : > { %2519 = vmatmul.mubr.bf16.gmra.mrb[164].mxu1 %v11865_v59  ;;  %v4324_v59 = vrot.slane %v15889_v31, 1 }
 0x2a7   : > { %3585 = vmatmul.mubr.bf16.gmra.mrb[84].mxu0 %v15888_v49  ;;  %2528 = vmatprep.mubr.bf16.mxu1 %v15727_v25 }
 0x2a8   : > { %3594 = vmatprep.mubr.bf16.mxu0 %v15727_v25  ;;  %v12364_v11 = vsel %vm4312_vm1, %v4317_v28, %v4324_v59  ;;  %v12376_v16 = vsel %vm4312_vm1, %v4324_v59, %v4329_v56  ;;  %v4341_v28 = vrot.slane %v15901_v48, 1  ;;  %v10811_v59 = vld [vmem:[#allocation2 + $0x22c] ss:$16 sps:$4 sm:$0xff]   ;;  %v4331_v56 = vrot.slane %v15774_v57, 1 }
 0x2ae   : > { %2529 = vmatmul.mubr.bf16.gmra.mrb[168].mxu1 %v11881_v62  ;;  %v12361_v62 = vsel %vm4312_vm1, %v4313_v60, %v4314_v40  ;;  %v10806_v60 = vld [vmem:[#allocation2 + $0x208] ss:$16 sps:$4 sm:$0xff]  }
 0x2af   : > { %3595 = vmatmul.mubr.bf16.gmra.mrb[88].mxu0 %v11922_v13  ;;  %2538 = vmatprep.mubr.bf16.mxu1 %v15727_v25 }
 0x2b0   : > { %3604 = vmatprep.mubr.bf16.mxu0 %v15727_v25 }
 0x2b6   : > { %2539 = vmatmul.mubr.bf16.gmra.mrb[172].mxu1 %v11899_v4  ;;  %v15891_v4 = vld [vmem:[#allocation17_spill] sm:$0xff] }
 0x2b7   : > { %3605 = vmatmul.mubr.bf16.gmra.mrb[92].mxu0 %v11945_v29  ;;  %2548 = vmatprep.mubr.bf16.mxu1 %v15727_v25  ;;  %v4322_v41 = vrot.slane %v15891_v4, 1 }
 0x2b8   : > { %4983 = vmatprep.mubr.bf16.mxu0 %v12351_v51 }
 0x2b9   : > { %v12373_v20 = vsel %vm4312_vm1, %v4314_v40, %v4322_v41  ;;  %v12385_v21 = vsel %vm4312_vm1, %v4322_v41, %v4319_v53  ;;  %v12409_v40 = vsel %vm4312_vm1, %v4320_v26, %v4326_v47  ;;  %v10826_v41 = vld [vmem:[#allocation2 + $0x804] ss:$16 sps:$4 sm:$0xff]   ;;  %v10814_v26 = vld [vmem:[#allocation2 + $0x24c] ss:$16 sps:$4 sm:$0xff]  }
 0x2ba   : > { %15902 = vst [vmem:[#allocation17_spill] sm:$0xff] %v12409_v40  ;;  %v10829_v53 = vld [vmem:[#allocation2 + $0x824] ss:$16 sps:$4 sm:$0xff]   ;;  %5224 = vmatprep.subr.bf16.mxu0 %v10826_v41 }
 0x2be   : > { %2549 = vmatmul.mubr.bf16.gmra.mrb[176].mxu1 %v15890_v61  ;;  %v12412_v61 = vsel %vm4312_vm1, %v4337_v55, %v4341_v28 }
 0x2bf   : > { %4984 = vmatmul.mubr.bf16.vlgmr.msra.gmra.mrb[0].mxu0 %v12361_v62  ;;  %2558 = vmatprep.mubr.bf16.mxu1 %v15727_v25  ;;  %15903 = vst [vmem:[#allocation19_spill] sm:$0xff] %v12412_v61 }
 0x2c0   : > { %4993 = vmatprep.mubr.bf16.mxu0 %v12364_v11 }
 0x2c6   : > { %2559 = vmatmul.mubr.bf16.gmra.mrb[180].mxu1 %v15893_v22  ;;  %v10809_v22 = vld [vmem:[#allocation2 + $0x228] ss:$16 sps:$4 sm:$0xff]  }
 0x2c7   : > { %4994 = vmatmul.mubr.bf16.gmra.mrb[4].mxu0 %v12373_v20  ;;  %2568 = vmatprep.mubr.bf16.mxu1 %v15727_v25 }
 0x2c8   : > { %5003 = vmatprep.mubr.bf16.mxu0 %v12376_v16 }
 0x2ce   : > { %2569 = vmatmul.mubr.bf16.gmra.mrb[184].mxu1 %v15896_v39  ;;  %v4345_v39 = vrot.slane %v15904_v8, 1 }
 0x2cf   : > { %5004 = vmatmul.mubr.bf16.gmra.mrb[8].mxu0 %v12385_v21  ;;  %2578 = vmatprep.mubr.bf16.mxu1 %v15727_v25 }
 0x2d0   : > { %5013 = vmatprep.mubr.bf16.mxu0 %v12388_v7  ;;  %v12424_v55 = vsel %vm4312_vm1, %v4341_v28, %v4345_v39  ;;  %v10815_v28 = vld [vmem:[#allocation2 + $0x268] ss:$16 sps:$4 sm:$0xff]  }
 0x2d1   : > { %15906 = vst [vmem:[#allocation22_spill] sm:$0xff] %v12424_v55 }
 0x2d6   : > { %2579 = vmatmul.mubr.bf16.gmra.mrb[188].mxu1 %v15900_v42  ;;  %v10827_v42 = vld [vmem:[#allocation2 + $0x820] ss:$16 sps:$4 sm:$0xff]  }
 0x2d7   : > { %5014 = vmatmul.mubr.bf16.gmra.mrb[12].mxu0 %v12397_v9  ;;  %3647 = vmatprep.mubr.bf16.mxu1 %v11374_v63  ;;  %v10824_v63 = vld [vmem:[#allocation2 + $0x800] ss:$16 sps:$4 sm:$0xff]  }
 0x2d8   : > { %5023 = vmatprep.mubr.bf16.mxu0 %v12400_v23  ;;  %5225 = vmatpush1.bf16.msra.mxu0 %v10824_v63  ;;  %v10830_v63 = vld [vmem:[#allocation2 + $0x840] ss:$16 sps:$4 sm:$0xff]  }
 0x2d9   : > { %5226 = vmatprep.subr.bf16.mxu0 %v10829_v53  ;;  %v10835_v53 = vld [vmem:[#allocation2 + $0x864] ss:$16 sps:$4 sm:$0xff]  }
 0x2dc   : > { %5227 = vmatpush1.bf16.msra.mxu0 %v10827_v42  ;;  %v10821_v42 = vld [vmem:[#allocation2 + $0x2a8] ss:$16 sps:$4 sm:$0xff]  }
 0x2dd   : > { %5228 = vmatprep.subr.bf16.mxu0 %v10832_v10  ;;  %v4339_v10 = vrot.slane %v15788_v37, 1 }
 0x2de   : > { %3648 = vmatmul.mubr.bf16.vlgmr.msra.gmra.mrb[96].mxu1 %v11414_v34  ;;  %v12421_v34 = vsel %vm4312_vm1, %v4326_v47, %v4331_v56  ;;  %v4335_v47 = vrot.slane %v15782_v27, 1 }
 0x2df   : > { %5024 = vmatmul.mubr.bf16.gmra.mrb[16].mxu0 %v12409_v40  ;;  %3889 = vmatpush1.bf16.msra.mxu1 %v10806_v60  ;;  %15905 = vst [vmem:[#allocation74_spill] sm:$0xff] %v12421_v34  ;;  %v10817_v60 = vld [vmem:[#allocation2 + $0x26c] ss:$16 sps:$4 sm:$0xff]  }
 0x2e0   : > { %3657 = vmatprep.mubr.bf16.mxu1 %v11377_v2  ;;  %5033 = vmatprep.mubr.bf16.mxu0 %v12412_v61  ;;  %v10812_v2 = vld [vmem:[#allocation2 + $0x248] ss:$16 sps:$4 sm:$0xff]  }
 0x2e1   : > { %3890 = vmatprep.subr.bf16.mxu1 %v10811_v59  ;;  %v15907_v59 = vld [vmem:[#allocation37_spill] sm:$0xff]  ;;  %5229 = vmatpush1.bf16.msra.mxu0 %v10830_v63 }
 0x2e2   : > { %v4349_v41 = vrot.slane %v15907_v59, 1  ;;  %5230 = vmatprep.subr.bf16.mxu0 %v10835_v53  ;;  %v10844_v63 = vld [vmem:[#allocation2 + $0x8a4] ss:$16 sps:$4 sm:$0xff]   ;;  %v10842_v53 = vld [vmem:[#allocation2 + $0x8a0] ss:$16 sps:$4 sm:$0xff]  }
 0x2e3   : > { %3891 = vmatpush1.bf16.msra.mxu1 %v10809_v22  ;;  %v10820_v22 = vld [vmem:[#allocation2 + $0x28c] ss:$16 sps:$4 sm:$0xff]  }
 0x2e4   : > { %3892 = vmatprep.subr.bf16.mxu1 %v10814_v26  ;;  %v12436_v26 = vsel %vm4312_vm1, %v4345_v39, %v4349_v41 }
 0x2e5   : > { %15909 = vst [vmem:[#allocation25_spill] sm:$0xff] %v12436_v26  ;;  %5231 = vmatpush1.bf16.msra.mxu0 %v10833_v50  ;;  %v15913_v50 = vld [vmem:[#allocation43_spill] sm:$0xff] }
 0x2e6   : > { %3658 = vmatmul.mubr.bf16.gmra.mrb[100].mxu1 %v11424_v44  ;;  %v12433_v44 = vsel %vm4312_vm1, %v4331_v56, %v4335_v47  ;;  %v15910_v56 = vld [vmem:[#allocation40_spill] sm:$0xff] }
 0x2e7   : > { %5034 = vmatmul.mubr.bf16.gmra.mrb[20].mxu0 %v12421_v34  ;;  %3667 = vmatprep.mubr.bf16.mxu1 %v15889_v31  ;;  %15908 = vst [vmem:[#allocation76_spill] sm:$0xff] %v12433_v44  ;;  %v10818_v31 = vld [vmem:[#allocation2 + $0x288] ss:$16 sps:$4 sm:$0xff]   ;;  %v4353_v39 = vrot.slane %v15910_v56, 1 }
 0x2e8   : > { %5043 = vmatprep.mubr.bf16.mxu0 %v12424_v55  ;;  %3893 = vmatpush1.bf16.msra.mxu1 %v10812_v2  ;;  %v10841_v2 = vld [vmem:[#allocation2 + $0x884] ss:$16 sps:$4 sm:$0xff]  }
 0x2e9   : > { %3894 = vmatprep.subr.bf16.mxu1 %v10817_v60  ;;  %v10839_v60 = vld [vmem:[#allocation2 + $0x880] ss:$16 sps:$4 sm:$0xff]   ;;  %5232 = vmatprep.subr.bf16.mxu0 %v10841_v2  ;;  %v10850_v2 = vld [vmem:[#allocation2 + $0x8e4] ss:$16 sps:$4 sm:$0xff]  }
 0x2ea   : > { %5233 = vmatpush1.bf16.msra.mxu0 %v10839_v60 }
 0x2eb   : > { %5234 = vmatprep.subr.bf16.mxu0 %v10844_v63  ;;  %v15916_v63 = vld [vmem:[#allocation47_spill] sm:$0xff] }
 0x2ec   : > { %3895 = vmatpush1.bf16.msra.mxu1 %v10815_v28  ;;  %v10838_v28 = vld [vmem:[#allocation2 + $0x2cc] ss:$16 sps:$4 sm:$0xff]  }
 0x2ed   : > { %3896 = vmatprep.subr.bf16.mxu1 %v10820_v22  ;;  %v12448_v22 = vsel %vm4312_vm1, %v4349_v41, %v4353_v39  ;;  %v10845_v41 = vld [vmem:[#allocation2 + $0x8c0] ss:$16 sps:$4 sm:$0xff]  }
 0x2ee   : > { %3668 = vmatmul.mubr.bf16.gmra.mrb[104].mxu1 %v15891_v4  ;;  %v12445_v4 = vsel %vm4312_vm1, %v4335_v47, %v4339_v10  ;;  %15912 = vst [vmem:[#allocation30_spill] sm:$0xff] %v12448_v22  ;;  %v4357_v47 = vrot.slane %v15913_v50, 1  ;;  %5235 = vmatpush1.bf16.msra.mxu0 %v10842_v53  ;;  %v10853_v53 = vld [vmem:[#allocation2 + $0x2ec] ss:$16 sps:$4 sm:$0xff]  }
 0x2ef   : > { %5044 = vmatmul.mubr.bf16.gmra.mrb[24].mxu0 %v12433_v44  ;;  %3677 = vmatprep.mubr.bf16.mxu1 %v15892_v14  ;;  %15911 = vst [vmem:[#allocation77_spill] sm:$0xff] %v12445_v4  ;;  %v10836_v14 = vld [vmem:[#allocation2 + $0x2c8] ss:$16 sps:$4 sm:$0xff]  }
 0x2f0   : > { %5053 = vmatprep.mubr.bf16.mxu0 %v12436_v26  ;;  %3897 = vmatpush1.bf16.msra.mxu1 %v10818_v31  ;;  %v10847_v31 = vld [vmem:[#allocation2 + $0x8c4] ss:$16 sps:$4 sm:$0xff]   ;;  %v12460_v60 = vsel %vm4312_vm1, %v4353_v39, %v4357_v47 }
 0x2f1   : > { %3898 = vmatprep.subr.bf16.mxu1 %v10823_v1  ;;  %v4343_v1 = vrot.slane %v15794_v54, 1  ;;  %5236 = vmatprep.subr.bf16.mxu0 %v10847_v31  ;;  %15915 = vst [vmem:[#allocation37_spill] sm:$0xff] %v12460_v60  ;;  %v4351_v31 = vrot.slane %v15808_v30, 1 }
 0x2f2   : > { %5237 = vmatpush1.bf16.msra.mxu0 %v10845_v41  ;;  %v15919_v41 = vld [vmem:[#allocation51_spill] sm:$0xff] }
 0x2f3   : > { %5238 = vmatprep.subr.bf16.mxu0 %v10850_v2  ;;  %v4365_v2 = vrot.slane %v15919_v41, 1 }
 0x2f4   : > { %3899 = vmatpush1.bf16.msra.mxu1 %v10821_v42  ;;  %v12457_v42 = vsel %vm4312_vm1, %v4339_v10, %v4343_v1 }
 0x2f5   : > { %3900 = vmatprep.subr.bf16.mxu1 %v10838_v28  ;;  %15914 = vst [vmem:[#allocation34_spill] sm:$0xff] %v12457_v42  ;;  %v10848_v28 = vld [vmem:[#allocation2 + $0x8e0] ss:$16 sps:$4 sm:$0xff]  }
 0x2f6   : > { %3678 = vmatmul.mubr.bf16.gmra.mrb[108].mxu1 %v11327_v33  ;;  %5239 = vmatpush1.bf16.msra.mxu0 %v10848_v28  ;;  %v15922_v28 = vld [vmem:[#allocation55_spill] sm:$0xff] }
 0x2f7   : > { %5054 = vmatmul.mubr.bf16.gmra.mrb[28].mxu0 %v12445_v4  ;;  %3687 = vmatprep.mubr.bf16.mxu1 %v15894_v32  ;;  %v4347_v32 = vrot.slane %v15802_v38, 1 }
 0x2f8   : > { %5063 = vmatprep.mubr.bf16.mxu0 %v12448_v22  ;;  %3901 = vmatpush1.bf16.msra.mxu1 %v10836_v14  ;;  %v4361_v14 = vrot.slane %v15916_v63, 1 }
 0x2f9   : > { %8019 = vmatprep.subr.bf16.mxu0 %v15727_v25  ;;  %v12470_v10 = vsel %vm4312_vm1, %v4343_v1, %v4347_v32  ;;  %3902 = vmatprep.subr.bf16.mxu1 %v10853_v53  ;;  %v12482_v1 = vsel %vm4312_vm1, %v4347_v32, %v4351_v31 }
 0x2fa   : > { %15917 = vst [vmem:[#allocation40_spill] sm:$0xff] %v12470_v10  ;;  %v12473_v39 = vsel %vm4312_vm1, %v4357_v47, %v4361_v14  ;;  %15920 = vst [vmem:[#allocation47_spill] sm:$0xff] %v12482_v1  ;;  %v12485_v47 = vsel %vm4312_vm1, %v4361_v14, %v4365_v2  ;;  %v15925_v14 = vld [vmem:[#allocation58_spill] sm:$0xff] }
 0x2fb   : > { %15918 = vst [vmem:[#allocation43_spill] sm:$0xff] %v12473_v39  ;;  %15921 = vst [vmem:[#allocation51_spill] sm:$0xff] %v12485_v47  ;;  %v4373_v53 = vrot.slane %v15925_v14, 1 }
 0x2fe   : > { %3688 = vmatmul.mubr.bf16.gmra.mrb[112].mxu1 %v11331_v35 }
 0x2ff   : > { %5064 = vmatmul.mubr.bf16.gmra.mrb[32].mxu0 %v12457_v42  ;;  %3697 = vmatprep.mubr.bf16.mxu1 %v15897_v18  ;;  %v10851_v18 = vld [vmem:[#allocation2 + $0x2e8] ss:$16 sps:$4 sm:$0xff]  }
 0x300   : > { %5073 = vmatprep.mubr.bf16.mxu0 %v12460_v60  ;;  %3903 = vmatpush1.bf16.msra.mxu1 %v10851_v18 }
 0x306   : > { %3698 = vmatmul.mubr.bf16.gmra.mrb[116].mxu1 %v11346_v46 }
 0x307   : > { %5074 = vmatmul.mubr.bf16.gmra.mrb[36].mxu0 %v12470_v10  ;;  %3707 = vmatprep.mubr.bf16.mxu1 %v15901_v48  ;;  %v4355_v48 = vrot.slane %v15814_v43, 1 }
 0x308   : > { %5083 = vmatprep.mubr.bf16.mxu0 %v12473_v39  ;;  %v4369_v39 = vrot.slane %v15922_v28, 1 }
 0x309   : > { %v12494_v18 = vsel %vm4312_vm1, %v4351_v31, %v4355_v48 }
 0x30a   : > { %15923 = vst [vmem:[#allocation55_spill] sm:$0xff] %v12494_v18  ;;  %v12497_v32 = vsel %vm4312_vm1, %v4365_v2, %v4369_v39  ;;  %v12509_v31 = vsel %vm4312_vm1, %v4369_v39, %v4373_v53  ;;  %v10856_v2 = vld [vmem:[#allocation2 + $0x60c] ss:$16 sps:$4 sm:$0xff]  }
 0x30b   : > { %15924 = vst [vmem:[#allocation102_spill] sm:$0xff] %v12497_v32  ;;  %15927 = vst [vmem:[#allocation103_spill] sm:$0xff] %v12509_v31  ;;  %5497 = vmatprep.subr.bf16.mxu1 %v10856_v2 }
 0x30e   : > { %3708 = vmatmul.mubr.bf16.gmra.mrb[120].mxu1 %v15774_v57 }
 0x30f   : > { %5084 = vmatmul.mubr.bf16.gmra.mrb[40].mxu0 %v12482_v1  ;;  %3717 = vmatprep.mubr.bf16.mxu1 %v15904_v8  ;;  %v4359_v8 = vrot.slane %v15822_v6, 1 }
 0x310   : > { %5093 = vmatprep.mubr.bf16.mxu0 %v12485_v47 }
 0x311   : > { %v12506_v47 = vsel %vm4312_vm1, %v4355_v48, %v4359_v8 }
 0x312   : > { %15926 = vst [vmem:[#allocation58_spill] sm:$0xff] %v12506_v47 }
 0x316   : > { %3718 = vmatmul.mubr.bf16.gmra.mrb[124].mxu1 %v15782_v27 }
 0x317   : > { %5094 = vmatmul.mubr.bf16.gmra.mrb[44].mxu0 %v12494_v18  ;;  %3727 = vmatprep.mubr.bf16.mxu1 %v15907_v59  ;;  %v4363_v59 = vrot.slane %v15827_v3, 1 }
 0x318   : > { %5103 = vmatprep.mubr.bf16.mxu0 %v12497_v32  ;;  %v15928_v32 = vld [vmem:[#allocation60_spill] sm:$0xff] }
 0x319   : > { %v4377_v60 = vrot.slane %v15928_v32, 1  ;;  %v12518_v48 = vsel %vm4312_vm1, %v4359_v8, %v4363_v59 }
 0x31a   : > { %15929 = vst [vmem:[#allocation60_spill] sm:$0xff] %v12518_v48 }
 0x31b   : > { %v12521_v39 = vsel %vm4312_vm1, %v4373_v53, %v4377_v60  ;;  %v15934_v53 = vld [vmem:[#allocation65_spill] sm:$0xff] }
 0x31c   : > { %15930 = vst [vmem:[#allocation104_spill] sm:$0xff] %v12521_v39 }
 0x31e   : > { %3728 = vmatmul.mubr.bf16.gmra.mrb[128].mxu1 %v15788_v37 }
 0x31f   : > { %5104 = vmatmul.mubr.bf16.gmra.mrb[48].mxu0 %v12506_v47  ;;  %3737 = vmatprep.mubr.bf16.mxu1 %v15910_v56  ;;  %v4367_v56 = vrot.slane %v15831_v5, 1 }
 0x320   : > { %5113 = vmatprep.mubr.bf16.mxu0 %v12509_v31  ;;  %v15931_v31 = vld [vmem:[#allocation63_spill] sm:$0xff] }
 0x321   : > { %v4381_v22 = vrot.slane %v15931_v31, 1  ;;  %v12530_v2 = vsel %vm4312_vm1, %v4363_v59, %v4367_v56 }
 0x322   : > { %15932 = vst [vmem:[#allocation63_spill] sm:$0xff] %v12530_v2 }
 0x323   : > { %v12533_v8 = vsel %vm4312_vm1, %v4377_v60, %v4381_v22  ;;  %v4375_v60 = vrot.slane %v15840_v58, 1 }
 0x324   : > { %15933 = vst [vmem:[#allocation105_spill] sm:$0xff] %v12533_v8 }
 0x326   : > { %3738 = vmatmul.mubr.bf16.gmra.mrb[132].mxu1 %v15794_v54 }
 0x327   : > { %5114 = vmatmul.mubr.bf16.gmra.mrb[52].mxu0 %v12518_v48  ;;  %3747 = vmatprep.mubr.bf16.mxu1 %v15913_v50  ;;  %v4371_v50 = vrot.slane %v15837_v36, 1 }
 0x328   : > { %5123 = vmatprep.mubr.bf16.mxu0 %v12521_v39  ;;  %v4385_v39 = vrot.slane %v15934_v53, 1 }
 0x329   : > { %v12542_v26 = vsel %vm4312_vm1, %v4367_v56, %v4371_v50  ;;  %v12554_v55 = vsel %vm4312_vm1, %v4371_v50, %v4375_v60 }
 0x32a   : > { %15935 = vst [vmem:[#allocation65_spill] sm:$0xff] %v12542_v26  ;;  %v12545_v59 = vsel %vm4312_vm1, %v4381_v22, %v4385_v39  ;;  %v4379_v22 = vrot.slane %v15845_v15, 1 }
 0x32b   : > { %15936 = vst [vmem:[#allocation106_spill] sm:$0xff] %v12545_v59 }
 0x32c   : > { %v12566_v61 = vsel %vm4312_vm1, %v4375_v60, %v4379_v22 }
 0x32e   : > { %3748 = vmatmul.mubr.bf16.gmra.mrb[136].mxu1 %v15802_v38 }
 0x32f   : > { %5124 = vmatmul.mubr.bf16.gmra.mrb[56].mxu0 %v12530_v2  ;;  %3757 = vmatprep.mubr.bf16.mxu1 %v15916_v63  ;;  %v15937_v63 = vld [vmem:[#allocation68_spill] sm:$0xff] }
 0x330   : > { %5133 = vmatprep.mubr.bf16.mxu0 %v12533_v8  ;;  %v4389_v8 = vrot.slane %v15937_v63, 1  ;;  %15938 = vst [vmem:[#allocation68_spill] sm:$0xff] %v12554_v55 }
 0x332   : > { %v12557_v56 = vsel %vm4312_vm1, %v4385_v39, %v4389_v8  ;;  %v15943_v39 = vld [vmem:[#allocation73_spill] sm:$0xff] }
 0x333   : > { %15939 = vst [vmem:[#allocation107_spill] sm:$0xff] %v12557_v56 }
 0x336   : > { %3758 = vmatmul.mubr.bf16.gmra.mrb[140].mxu1 %v15808_v30 }
 0x337   : > { %5134 = vmatmul.mubr.bf16.gmra.mrb[60].mxu0 %v12542_v26  ;;  %3767 = vmatprep.mubr.bf16.mxu1 %v15919_v41  ;;  %v15940_v41 = vld [vmem:[#allocation70_spill] sm:$0xff] }
 0x338   : > { %5143 = vmatprep.mubr.bf16.mxu0 %v12545_v59  ;;  %v4393_v59 = vrot.slane %v15940_v41, 1  ;;  %15941 = vst [vmem:[#allocation70_spill] sm:$0xff] %v12566_v61 }
 0x33a   : > { %v12569_v50 = vsel %vm4312_vm1, %v4389_v8, %v4393_v59  ;;  %v4401_v8 = vrot.slane %v11970_v17, 1 }
 0x33b   : > { %15942 = vst [vmem:[#allocation108_spill] sm:$0xff] %v12569_v50 }
 0x33e   : > { %3768 = vmatmul.mubr.bf16.gmra.mrb[144].mxu1 %v15814_v43 }
 0x33f   : > { %5144 = vmatmul.mubr.bf16.gmra.mrb[64].mxu0 %v12554_v55  ;;  %3777 = vmatprep.mubr.bf16.mxu1 %v15922_v28  ;;  %v4383_v28 = vrot.slane %v15852_v24, 1 }
 0x340   : > { %5153 = vmatprep.mubr.bf16.mxu0 %v12557_v56  ;;  %v4397_v56 = vrot.slane %v15943_v39, 1 }
 0x341   : > { %v12578_v23 = vsel %vm4312_vm1, %v4379_v22, %v4383_v28 }
 0x342   : > { %15944 = vst [vmem:[#allocation73_spill] sm:$0xff] %v12578_v23  ;;  %v12581_v60 = vsel %vm4312_vm1, %v4393_v59, %v4397_v56  ;;  %v12593_v22 = vsel %vm4312_vm1, %v4397_v56, %v4401_v8  ;;  %v4405_v59 = vrot.slane %v11988_v19, 1  ;;  %v15950_v56 = vld [vmem:[#allocation78_spill] sm:$0xff] }
 0x343   : > { %15945 = vst [vmem:[#allocation109_spill] sm:$0xff] %v12581_v60  ;;  %15947 = vst [vmem:[#allocation111_spill] sm:$0xff] %v12593_v22 }
 0x346   : > { %3778 = vmatmul.mubr.bf16.gmra.mrb[148].mxu1 %v15822_v6 }
 0x347   : > { %5154 = vmatmul.mubr.bf16.gmra.mrb[68].mxu0 %v12566_v61  ;;  %3787 = vmatprep.mubr.bf16.mxu1 %v15925_v14  ;;  %v4387_v14 = vrot.slane %v15857_v0, 1 }
 0x348   : > { %5163 = vmatprep.mubr.bf16.mxu0 %v12569_v50 }
 0x349   : > { %v12590_v50 = vsel %vm4312_vm1, %v4383_v28, %v4387_v14  ;;  %v12605_v28 = vsel %vm4312_vm1, %v4401_v8, %v4405_v59  ;;  %v15953_v8 = vld [vmem:[#allocation79_spill] sm:$0xff] }
 0x34a   : > { %15946 = vst [vmem:[#allocation110_spill] sm:$0xff] %v12590_v50  ;;  %15949 = vst [vmem:[#allocation113_spill] sm:$0xff] %v12605_v28 }
 0x34e   : > { %3788 = vmatmul.mubr.bf16.gmra.mrb[152].mxu1 %v15827_v3 }
 0x34f   : > { %5164 = vmatmul.mubr.bf16.gmra.mrb[72].mxu0 %v12578_v23  ;;  %3797 = vmatprep.mubr.bf16.mxu1 %v15928_v32  ;;  %v4391_v32 = vrot.slane %v15861_v52, 1 }
 0x350   : > { %5173 = vmatprep.mubr.bf16.mxu0 %v12581_v60 }
 0x351   : > { %v12602_v60 = vsel %vm4312_vm1, %v4387_v14, %v4391_v32 }
 0x352   : > { %15948 = vst [vmem:[#allocation112_spill] sm:$0xff] %v12602_v60 }
 0x356   : > { %3798 = vmatmul.mubr.bf16.gmra.mrb[156].mxu1 %v15831_v5 }
 0x357   : > { %5174 = vmatmul.mubr.bf16.gmra.mrb[76].mxu0 %v12590_v50  ;;  %3807 = vmatprep.mubr.bf16.mxu1 %v15931_v31  ;;  %v4395_v31 = vrot.slane %v15866_v45, 1 }
 0x358   : > { %5183 = vmatprep.mubr.bf16.mxu0 %v12593_v22  ;;  %v4409_v22 = vrot.slane %v15950_v56, 1 }
 0x359   : > { %v12614_v7 = vsel %vm4312_vm1, %v4391_v32, %v4395_v31 }
 0x35a   : > { %15951 = vst [vmem:[#allocation78_spill] sm:$0xff] %v12614_v7  ;;  %v12617_v14 = vsel %vm4312_vm1, %v4405_v59, %v4409_v22 }
 0x35b   : > { %15952 = vst [vmem:[#allocation114_spill] sm:$0xff] %v12617_v14 }
 0x35e   : > { %3808 = vmatmul.mubr.bf16.gmra.mrb[160].mxu1 %v15837_v36 }
 0x35f   : > { %5184 = vmatmul.mubr.bf16.gmra.mrb[80].mxu0 %v12602_v60  ;;  %3817 = vmatprep.mubr.bf16.mxu1 %v15934_v53  ;;  %v12624_v53 = vrot.slane %v15869_v12, 1 }
 0x360   : > { %5193 = vmatprep.mubr.bf16.mxu0 %v12605_v28  ;;  %v4415_v28 = vrot.slane %v15953_v8, 1 }
 0x361   : > { %v12629_v32 = vsel %vm4312_vm1, %v4395_v31, %v12624_v53  ;;  %v10868_v31 = vld [vmem:[#allocation2 + $0x68c] ss:$16 sps:$4 sm:$0xff]  }
 0x362   : > { %15954 = vst [vmem:[#allocation79_spill] sm:$0xff] %v12629_v32  ;;  %v12632_v59 = vsel %vm4312_vm1, %v4409_v22, %v4415_v28  ;;  %v10860_v22 = vld [vmem:[#allocation2 + $0x648] ss:$16 sps:$4 sm:$0xff]   ;;  %v10865_v28 = vld [vmem:[#allocation2 + $0x66c] ss:$16 sps:$4 sm:$0xff]  }
 0x366   : > { %3818 = vmatmul.mubr.bf16.gmra.mrb[164].mxu1 %v15840_v58 }
 0x367   : > { %5194 = vmatmul.mubr.bf16.gmra.mrb[84].mxu0 %v12614_v7  ;;  %3827 = vmatprep.mubr.bf16.mxu1 %v15937_v63  ;;  %v15955_v63 = vld [vmem:[#allocation80_spill] sm:$0xff] }
 0x368   : > { %5203 = vmatprep.mubr.bf16.mxu0 %v12617_v14  ;;  %v4413_v14 = vrot.slane %v15955_v63, 1  ;;  %v10874_v63 = vld [vmem:[#allocation2 + $0x6cc] ss:$16 sps:$4 sm:$0xff]  }
 0x36a   : > { %v12641_v8 = vsel %vm4312_vm1, %v12624_v53, %v4413_v14  ;;  %v10871_v14 = vld [vmem:[#allocation2 + $0x6ac] ss:$16 sps:$4 sm:$0xff]  }
 0x36e   : > { %3828 = vmatmul.mubr.bf16.gmra.mrb[168].mxu1 %v15845_v15 }
 0x36f   : > { %5204 = vmatmul.mubr.bf16.gmra.mrb[88].mxu0 %v12629_v32  ;;  %3837 = vmatprep.mubr.bf16.mxu1 %v15940_v41  ;;  %v10857_v41 = vld [vmem:[#allocation2 + $0x628] ss:$16 sps:$4 sm:$0xff]  }
 0x370   : > { %5213 = vmatprep.mubr.bf16.mxu0 %v12632_v59 }
 0x376   : > { %3838 = vmatmul.mubr.bf16.gmra.mrb[172].mxu1 %v15852_v24 }
 0x377   : > { %5214 = vmatmul.mubr.bf16.gmra.mrb[92].mxu0 %v12641_v8  ;;  %3847 = vmatprep.mubr.bf16.mxu1 %v15943_v39  ;;  %v10862_v39 = vld [vmem:[#allocation2 + $0x64c] ss:$16 sps:$4 sm:$0xff]  }
 0x378   : > { %5256 = vmatprep.mubr.bf16.mxu0 %v15727_v25 }
 0x37e   : > { %3848 = vmatmul.mubr.bf16.gmra.mrb[176].mxu1 %v15857_v0 }
 0x37f   : > { %5257 = vmatmul.mubr.bf16.vlgmr.msra.gmra.mrb[0].mxu0 %v12397_v9  ;;  %3857 = vmatprep.mubr.bf16.mxu1 %v11970_v17  ;;  %v10854_v17 = vld [vmem:[#allocation2 + $0x608] ss:$16 sps:$4 sm:$0xff]  }
 0x380   : > { %5266 = vmatprep.mubr.bf16.mxu0 %v15727_v25 }
 0x386   : > { %3858 = vmatmul.mubr.bf16.gmra.mrb[180].mxu1 %v15861_v52 }
 0x387   : > { %5267 = vmatmul.mubr.bf16.gmra.mrb[4].mxu0 %v12409_v40  ;;  %3867 = vmatprep.mubr.bf16.mxu1 %v11988_v19  ;;  %v10859_v19 = vld [vmem:[#allocation2 + $0x62c] ss:$16 sps:$4 sm:$0xff]  }
 0x388   : > { %5276 = vmatprep.mubr.bf16.mxu0 %v15727_v25 }
 0x38e   : > { %3868 = vmatmul.mubr.bf16.gmra.mrb[184].mxu1 %v15866_v45 }
 0x38f   : > { %5277 = vmatmul.mubr.bf16.gmra.mrb[8].mxu0 %v12421_v34  ;;  %3877 = vmatprep.mubr.bf16.mxu1 %v15950_v56  ;;  %v10866_v56 = vld [vmem:[#allocation2 + $0x688] ss:$16 sps:$4 sm:$0xff]  }
 0x390   : > { %5286 = vmatprep.mubr.bf16.mxu0 %v15727_v25 }
 0x396   : > { %3878 = vmatmul.mubr.bf16.gmra.mrb[188].mxu1 %v15869_v12 }
 0x397   : > { %5287 = vmatmul.mubr.bf16.gmra.mrb[12].mxu0 %v12433_v44  ;;  %3920 = vmatprep.mubr.bf16.mxu1 %v15727_v25 }
 0x398   : > { %5296 = vmatprep.mubr.bf16.mxu0 %v15727_v25 }
 0x39e   : > { %3921 = vmatmul.mubr.bf16.vlgmr.msra.gmra.mrb[96].mxu1 %v11327_v33  ;;  %v10863_v33 = vld [vmem:[#allocation2 + $0x668] ss:$16 sps:$4 sm:$0xff]  }
 0x39f   : > { %5297 = vmatmul.mubr.bf16.gmra.mrb[16].mxu0 %v12445_v4  ;;  %5498 = vmatpush1.bf16.msra.mxu1 %v10854_v17  ;;  %v10872_v17 = vld [vmem:[#allocation2 + $0x6c8] ss:$16 sps:$4 sm:$0xff]  }
 0x3a0   : > { %3930 = vmatprep.mubr.bf16.mxu1 %v15727_v25  ;;  %5306 = vmatprep.mubr.bf16.mxu0 %v15727_v25 }
 0x3a1   : > { %5499 = vmatprep.subr.bf16.mxu1 %v10859_v19  ;;  %v10877_v19 = vld [vmem:[#allocation2 + $0x6ec] ss:$16 sps:$4 sm:$0xff]  }
 0x3a3   : > { %5500 = vmatpush1.bf16.msra.mxu1 %v10857_v41  ;;  %v10880_v41 = vld [vmem:[#allocation2 + $0x70c] ss:$16 sps:$4 sm:$0xff]  }
 0x3a4   : > { %5501 = vmatprep.subr.bf16.mxu1 %v10862_v39  ;;  %v10878_v39 = vld [vmem:[#allocation2 + $0x708] ss:$16 sps:$4 sm:$0xff]  }
 0x3a6   : > { %3931 = vmatmul.mubr.bf16.gmra.mrb[100].mxu1 %v11331_v35  ;;  %v10869_v35 = vld [vmem:[#allocation2 + $0x6a8] ss:$16 sps:$4 sm:$0xff]  }
 0x3a7   : > { %5307 = vmatmul.mubr.bf16.gmra.mrb[20].mxu0 %v12457_v42  ;;  %3940 = vmatprep.mubr.bf16.mxu1 %v15727_v25 }
 0x3a8   : > { %5316 = vmatprep.mubr.bf16.mxu0 %v15727_v25  ;;  %5502 = vmatpush1.bf16.msra.mxu1 %v10860_v22  ;;  %v10883_v22 = vld [vmem:[#allocation2 + $0x72c] ss:$16 sps:$4 sm:$0xff]  }
 0x3a9   : > { %5503 = vmatprep.subr.bf16.mxu1 %v10865_v28  ;;  %v10886_v28 = vld [vmem:[#allocation2 + $0x74c] ss:$16 sps:$4 sm:$0xff]  }
 0x3ac   : > { %5504 = vmatpush1.bf16.msra.mxu1 %v10863_v33  ;;  %v10884_v33 = vld [vmem:[#allocation2 + $0x748] ss:$16 sps:$4 sm:$0xff]  }
 0x3ad   : > { %5505 = vmatprep.subr.bf16.mxu1 %v10868_v31  ;;  %v10889_v31 = vld [vmem:[#allocation2 + $0x76c] ss:$16 sps:$4 sm:$0xff]  }
 0x3ae   : > { %3941 = vmatmul.mubr.bf16.gmra.mrb[104].mxu1 %v11346_v46  ;;  %v10875_v46 = vld [vmem:[#allocation2 + $0x6e8] ss:$16 sps:$4 sm:$0xff]  }
 0x3af   : > { %5317 = vmatmul.mubr.bf16.gmra.mrb[24].mxu0 %v12470_v10  ;;  %3950 = vmatprep.mubr.bf16.mxu1 %v15727_v25 }
 0x3b0   : > { %5326 = vmatprep.mubr.bf16.mxu0 %v15727_v25  ;;  %5506 = vmatpush1.bf16.msra.mxu1 %v10866_v56  ;;  %v10892_v56 = vld [vmem:[#allocation2 + $0x78c] ss:$16 sps:$4 sm:$0xff]  }
 0x3b1   : > { %5507 = vmatprep.subr.bf16.mxu1 %v10871_v14  ;;  %v10890_v14 = vld [vmem:[#allocation2 + $0x788] ss:$16 sps:$4 sm:$0xff]  }
 0x3b4   : > { %5508 = vmatpush1.bf16.msra.mxu1 %v10869_v35  ;;  %v10895_v35 = vld [vmem:[#allocation2 + $0x7ac] ss:$16 sps:$4 sm:$0xff]  }
 0x3b5   : > { %5509 = vmatprep.subr.bf16.mxu1 %v10874_v63  ;;  %v10898_v63 = vld [vmem:[#allocation2 + $0x7cc] ss:$16 sps:$4 sm:$0xff]  }
 0x3b6   : > { %3951 = vmatmul.mubr.bf16.gmra.mrb[108].mxu1 %v15774_v57  ;;  %v10881_v57 = vld [vmem:[#allocation2 + $0x728] ss:$16 sps:$4 sm:$0xff]  }
 0x3b7   : > { %5327 = vmatmul.mubr.bf16.gmra.mrb[28].mxu0 %v12482_v1  ;;  %3960 = vmatprep.mubr.bf16.mxu1 %v15727_v25 }
 0x3b8   : > { %5336 = vmatprep.mubr.bf16.mxu0 %v15727_v25  ;;  %5510 = vmatpush1.bf16.msra.mxu1 %v10872_v17  ;;  %v10896_v17 = vld [vmem:[#allocation2 + $0x7c8] ss:$16 sps:$4 sm:$0xff]  }
 0x3b9   : > { %5511 = vmatprep.subr.bf16.mxu1 %v10877_v19  ;;  %v10901_v19 = vld [vmem:[#allocation2 + $0x7ec] ss:$16 sps:$4 sm:$0xff]  }
 0x3bc   : > { %5512 = vmatpush1.bf16.msra.mxu1 %v10875_v46  ;;  %v10904_v46 = vld [vmem:[#allocation2 + $0x80c] ss:$16 sps:$4 sm:$0xff]  }
 0x3bd   : > { %5513 = vmatprep.subr.bf16.mxu1 %v10880_v41 }
 0x3be   : > { %3961 = vmatmul.mubr.bf16.gmra.mrb[112].mxu1 %v15782_v27  ;;  %v10887_v27 = vld [vmem:[#allocation2 + $0x768] ss:$16 sps:$4 sm:$0xff]  }
 0x3bf   : > { %5337 = vmatmul.mubr.bf16.gmra.mrb[32].mxu0 %v12494_v18  ;;  %3970 = vmatprep.mubr.bf16.mxu1 %v15727_v25 }
 0x3c0   : > { %5346 = vmatprep.mubr.bf16.mxu0 %v15727_v25  ;;  %5514 = vmatpush1.bf16.msra.mxu1 %v10878_v39 }
 0x3c1   : > { %5515 = vmatprep.subr.bf16.mxu1 %v10883_v22 }
 0x3c4   : > { %5516 = vmatpush1.bf16.msra.mxu1 %v10881_v57 }
 0x3c5   : > { %5517 = vmatprep.subr.bf16.mxu1 %v10886_v28 }
 0x3c6   : > { %3971 = vmatmul.mubr.bf16.gmra.mrb[116].mxu1 %v15788_v37  ;;  %v10893_v37 = vld [vmem:[#allocation2 + $0x7a8] ss:$16 sps:$4 sm:$0xff]  }
 0x3c7   : > { %5347 = vmatmul.mubr.bf16.gmra.mrb[36].mxu0 %v12506_v47  ;;  %3980 = vmatprep.mubr.bf16.mxu1 %v15727_v25 }
 0x3c8   : > { %5356 = vmatprep.mubr.bf16.mxu0 %v15727_v25  ;;  %5518 = vmatpush1.bf16.msra.mxu1 %v10884_v33 }
 0x3c9   : > { %5519 = vmatprep.subr.bf16.mxu1 %v10889_v31 }
 0x3cc   : > { %5520 = vmatpush1.bf16.msra.mxu1 %v10887_v27  ;;  %v10902_v27 = vld [vmem:[#allocation2 + $0x808] ss:$16 sps:$4 sm:$0xff]  }
 0x3cd   : > { %5521 = vmatprep.subr.bf16.mxu1 %v10892_v56  ;;  %v15967_v56 = vld [vmem:[#allocation9_spill] sm:$0xff] }
 0x3ce   : > { %3981 = vmatmul.mubr.bf16.gmra.mrb[120].mxu1 %v15794_v54  ;;  %v10899_v54 = vld [vmem:[#allocation2 + $0x7e8] ss:$16 sps:$4 sm:$0xff]  }
 0x3cf   : > { %5357 = vmatmul.mubr.bf16.gmra.mrb[40].mxu0 %v12518_v48  ;;  %3990 = vmatprep.mubr.bf16.mxu1 %v15727_v25 }
 0x3d0   : > { %5366 = vmatprep.mubr.bf16.mxu0 %v15727_v25  ;;  %5522 = vmatpush1.bf16.msra.mxu1 %v10890_v14 }
 0x3d1   : > { %5523 = vmatprep.subr.bf16.mxu1 %v10895_v35 }
 0x3d4   : > { %5524 = vmatpush1.bf16.msra.mxu1 %v10893_v37  ;;  %v10907_v37 = vld [vmem:[#allocation2 + $0x82c] ss:$16 sps:$4 sm:$0xff]  }
 0x3d5   : > { %5525 = vmatprep.subr.bf16.mxu1 %v10898_v63  ;;  %v15968_v63 = vld [vmem:[#allocation12_spill] sm:$0xff] }
 0x3d6   : > { %3991 = vmatmul.mubr.bf16.gmra.mrb[124].mxu1 %v15802_v38  ;;  %v4403_v38 = vrot.slane %v15888_v49, 1 }
 0x3d7   : > { %5367 = vmatmul.mubr.bf16.gmra.mrb[44].mxu0 %v12530_v2  ;;  %4000 = vmatprep.mubr.bf16.mxu1 %v15727_v25 }
 0x3d8   : > { %5376 = vmatprep.mubr.bf16.mxu0 %v15727_v25  ;;  %5526 = vmatpush1.bf16.msra.mxu1 %v10896_v17 }
 0x3d9   : > { %5527 = vmatprep.subr.bf16.mxu1 %v10901_v19 }
 0x3dc   : > { %5528 = vmatpush1.bf16.msra.mxu1 %v10899_v54  ;;  %v15970_v54 = vld [vmem:[#allocation32_spill] sm:$0xff] }
 0x3dd   : > { %5770 = vmatprep.subr.bf16.mxu1 %v10904_v46 }
 0x3de   : > { %4001 = vmatmul.mubr.bf16.gmra.mrb[128].mxu1 %v15808_v30  ;;  %v12730_v30 = vsel %vm4312_vm1, %v12624_v53, %v4403_v38  ;;  %v15962_v53 = vld [vmem:[#allocation10_spill] sm:$0xff] }
 0x3df   : > { %5377 = vmatmul.mubr.bf16.gmra.mrb[48].mxu0 %v12542_v26  ;;  %4010 = vmatprep.mubr.bf16.mxu1 %v15727_v25  ;;  %15956 = vst [vmem:[#allocation80_spill] sm:$0xff] %v12730_v30 }
 0x3e0   : > { %5386 = vmatprep.mubr.bf16.mxu0 %v15727_v25 }
 0x3e6   : > { %4011 = vmatmul.mubr.bf16.gmra.mrb[132].mxu1 %v15814_v43 }
 0x3e7   : > { %5387 = vmatmul.mubr.bf16.gmra.mrb[52].mxu0 %v12554_v55  ;;  %4020 = vmatprep.mubr.bf16.mxu1 %v15727_v25 }
 0x3e8   : > { %5396 = vmatprep.mubr.bf16.mxu0 %v15727_v25 }
 0x3ee   : > { %4021 = vmatmul.mubr.bf16.gmra.mrb[136].mxu1 %v15822_v6 }
 0x3ef   : > { %5397 = vmatmul.mubr.bf16.gmra.mrb[56].mxu0 %v12566_v61  ;;  %4030 = vmatprep.mubr.bf16.mxu1 %v15727_v25 }
 0x3f0   : > { %5406 = vmatprep.mubr.bf16.mxu0 %v15727_v25 }
 0x3f6   : > { %4031 = vmatmul.mubr.bf16.gmra.mrb[140].mxu1 %v15827_v3  ;;  %v4411_v3 = vrot.slane %v11945_v29, 1 }
 0x3f7   : > { %5407 = vmatmul.mubr.bf16.gmra.mrb[60].mxu0 %v12578_v23  ;;  %4040 = vmatprep.mubr.bf16.mxu1 %v15727_v25 }
 0x3f8   : > { %5416 = vmatprep.mubr.bf16.mxu0 %v15727_v25 }
 0x3fe   : > { %4041 = vmatmul.mubr.bf16.gmra.mrb[144].mxu1 %v15831_v5 }
 0x3ff   : > { %5417 = vmatmul.mubr.bf16.gmra.mrb[64].mxu0 %v12590_v50  ;;  %4050 = vmatprep.mubr.bf16.mxu1 %v15727_v25 }
 0x400   : > { %5426 = vmatprep.mubr.bf16.mxu0 %v15727_v25 }
 0x406   : > { %4051 = vmatmul.mubr.bf16.gmra.mrb[148].mxu1 %v15837_v36 }
 0x407   : > { %5427 = vmatmul.mubr.bf16.gmra.mrb[68].mxu0 %v12602_v60  ;;  %4060 = vmatprep.mubr.bf16.mxu1 %v15727_v25 }
 0x408   : > { %5436 = vmatprep.mubr.bf16.mxu0 %v15727_v25 }
 0x40e   : > { %4061 = vmatmul.mubr.bf16.gmra.mrb[152].mxu1 %v15840_v58  ;;  %v4407_v58 = vrot.slane %v11922_v13, 1 }
 0x40f   : > { %5437 = vmatmul.mubr.bf16.gmra.mrb[72].mxu0 %v12614_v7  ;;  %4070 = vmatprep.mubr.bf16.mxu1 %v15727_v25 }
 0x410   : > { %5446 = vmatprep.mubr.bf16.mxu0 %v15727_v25  ;;  %v12738_v43 = vsel %vm4312_vm1, %v4403_v38, %v4407_v58  ;;  %v12746_v6 = vsel %vm4312_vm1, %v4407_v58, %v4411_v3  ;;  %v15972_v58 = vld [vmem:[#allocation11_spill] sm:$0xff] }
 0x411   : > { %15957 = vst [vmem:[#allocation115_spill] sm:$0xff] %v12738_v43  ;;  %15958 = vst [vmem:[#allocation116_spill] sm:$0xff] %v12746_v6 }
 0x416   : > { %4071 = vmatmul.mubr.bf16.gmra.mrb[156].mxu1 %v15845_v15 }
 0x417   : > { %5447 = vmatmul.mubr.bf16.gmra.mrb[76].mxu0 %v12629_v32  ;;  %4080 = vmatprep.mubr.bf16.mxu1 %v15727_v25 }
 0x418   : > { %5456 = vmatprep.mubr.bf16.mxu0 %v15727_v25 }
 0x41e   : > { %4081 = vmatmul.mubr.bf16.gmra.mrb[160].mxu1 %v15852_v24  ;;  %v15961_v24 = vld [vmem:[#allocation26_spill] sm:$0xff] }
 0x41f   : > { %5457 = vmatmul.mubr.bf16.gmra.mrb[80].mxu0 %v12730_v30  ;;  %4090 = vmatprep.mubr.bf16.mxu1 %v15727_v25  ;;  %v10935_v30 = vld [vmem:[#allocation4 + $0x48] sm:$0xff]  }
 0x420   : > { %5466 = vmatprep.mubr.bf16.mxu0 %v15727_v25 }
 0x426   : > { %4091 = vmatmul.mubr.bf16.gmra.mrb[164].mxu1 %v15857_v0  ;;  %v15959_v0 = vld [vmem:[#allocation75_spill] sm:$0xff] }
 0x427   : > { %5467 = vmatmul.mubr.bf16.gmra.mrb[84].mxu0 %v12738_v43  ;;  %4100 = vmatprep.mubr.bf16.mxu1 %v15727_v25  ;;  %v4417_v5 = vrot.slane %v15959_v0, 1  ;;  %v16012_v43 = vld [vmem:[#allocation42_spill] sm:$0xff] }
 0x428   : > { %5476 = vmatprep.mubr.bf16.mxu0 %v15727_v25 }
 0x429   : > { %v12754_v36 = vsel %vm4312_vm1, %v4411_v3, %v4417_v5  ;;  %v10908_v5 = vld [vmem:[#allocation2 + $0x848] ss:$16 sps:$4 sm:$0xff]  }
 0x42a   : > { %15960 = vst [vmem:[#allocation75_spill] sm:$0xff] %v12754_v36 }
 0x42e   : > { %4101 = vmatmul.mubr.bf16.gmra.mrb[168].mxu1 %v15861_v52 }
 0x42f   : > { %5477 = vmatmul.mubr.bf16.gmra.mrb[88].mxu0 %v12746_v6  ;;  %4110 = vmatprep.mubr.bf16.mxu1 %v15727_v25 }
 0x430   : > { %5486 = vmatprep.mubr.bf16.mxu0 %v15727_v25 }
 0x436   : > { %4111 = vmatmul.mubr.bf16.gmra.mrb[172].mxu1 %v15866_v45 }
 0x437   : > { %5487 = vmatmul.mubr.bf16.gmra.mrb[92].mxu0 %v12754_v36  ;;  %4120 = vmatprep.mubr.bf16.mxu1 %v15727_v25  ;;  %v16004_v36 = vld [vmem:[#allocation36_spill] sm:$0xff] }
 0x43e   : > { %4121 = vmatmul.mubr.bf16.gmra.mrb[176].mxu1 %v15869_v12  ;;  %v15964_v12 = vld [vmem:[#allocation28_spill] sm:$0xff] }
 0x43f   : > { %4130 = vmatprep.mubr.bf16.mxu1 %v15727_v25 }
 0x446   : > { %4131 = vmatmul.mubr.bf16.gmra.mrb[180].mxu1 %v15888_v49  ;;  %v15965_v49 = vld [vmem:[#allocation81_spill] sm:$0xff] }
 0x447   : > { %4140 = vmatprep.mubr.bf16.mxu1 %v15727_v25 }
 0x44e   : > { %4141 = vmatmul.mubr.bf16.gmra.mrb[184].mxu1 %v11922_v13 }
 0x44f   : > { %4150 = vmatprep.mubr.bf16.mxu1 %v15727_v25 }
 0x452   : > { %v5258_v15 = vpop.f32.mrb[0].mxu0 }
 0x453   : > { %v12766_v52 = vadd.f32 %v5258_v15, %v15961_v24  ;;  %v5260_v45 = vpop.f32.mrb[1].mxu0  ;;  %v10916_v24 = vld [vmem:[#allocation2 + $0x88c] ss:$16 sps:$4 sm:$0xff]  }
 0x454   : > { %v12769_v41 = vadd.f32 %v5260_v45, %v15962_v53  ;;  %v5262_v39 = vpop.f32.mrb[2].mxu0  ;;  %v15974_v53 = vld [vmem:[#allocation14_spill] sm:$0xff] }
 0x455   : > { %v12772_v22 = vadd.f32 %v5262_v39, %v15964_v12  ;;  %v5264_v57 = vpop.f32.mrb[3].mxu0 }
 0x456   : > { %15963 = vst [vmem:[#allocation26_spill] sm:$0xff] %v12769_v41  ;;  %v12775_v28 = vadd.f32 %v5264_v57, %v15965_v49  ;;  %4151 = vmatmul.mubr.bf16.gmra.mrb[188].mxu1 %v11945_v29  ;;  %v10905_v29 = vld [vmem:[#allocation2 + $0x828] ss:$16 sps:$4 sm:$0xff]  }
 0x457   : > { %5529 = vmatprep.mubr.bf16.mxu1 %v12351_v51  ;;  %v10910_v51 = vld [vmem:[#allocation2 + $0x84c] ss:$16 sps:$4 sm:$0xff]   ;;  %v15976_v57 = vld [vmem:[#allocation35_spill] sm:$0xff] }
 0x458   : > { %15966 = vst [vmem:[#allocation10_spill] sm:$0xff] %v12775_v28 }
 0x45a   : > { %v5268_v13 = vpop.f32.mrb[4].mxu0 }
 0x45b   : > { %v5270_v33 = vpop.f32.mrb[5].mxu0 }
 0x45c   : > { %v5272_v31 = vpop.f32.mrb[6].mxu0  ;;  %v10914_v33 = vld [vmem:[#allocation2 + $0x888] ss:$16 sps:$4 sm:$0xff]  }
 0x45d   : > { %v12780_v14 = vadd.f32 %v5272_v31, %v15967_v56  ;;  %v5274_v35 = vpop.f32.mrb[7].mxu0  ;;  %v15977_v31 = vld [vmem:[#allocation13_spill] sm:$0xff]  ;;  %v15979_v56 = vld [vmem:[#allocation18_spill] sm:$0xff] }
 0x45e   : > { %v12783_v17 = vadd.f32 %v5274_v35, %v15968_v63  ;;  %5530 = vmatmul.mubr.bf16.vlgmr.msra.gmra.mrb[96].mxu1 %v12361_v62  ;;  %v10913_v62 = vld [vmem:[#allocation2 + $0x86c] ss:$16 sps:$4 sm:$0xff]   ;;  %v10917_v63 = vld [vmem:[#allocation2 + $0x8a8] ss:$16 sps:$4 sm:$0xff]  }
 0x45f   : > { %5771 = vmatpush1.bf16.msra.mxu1 %v10902_v27  ;;  %5539 = vmatprep.mubr.bf16.mxu1 %v12364_v11  ;;  %v10911_v11 = vld [vmem:[#allocation2 + $0x868] ss:$16 sps:$4 sm:$0xff]  }
 0x460   : > { %15969 = vst [vmem:[#allocation28_spill] sm:$0xff] %v12783_v17  ;;  %5772 = vmatprep.subr.bf16.mxu1 %v10907_v37  ;;  %v15981_v37 = vld [vmem:[#allocation67_spill] sm:$0xff] }
 0x462   : > { %v5278_v19 = vpop.f32.mrb[8].mxu0 }
 0x463   : > { %v12788_v46 = vadd.f32 %v5278_v19, %v15970_v54  ;;  %v5280_v38 = vpop.f32.mrb[9].mxu0  ;;  %5773 = vmatpush1.bf16.msra.mxu1 %v10905_v29 }
 0x464   : > { %v12791_v3 = vadd.f32 %v5280_v38, %v15972_v58  ;;  %v5282_v0 = vpop.f32.mrb[10].mxu0  ;;  %5774 = vmatprep.subr.bf16.mxu1 %v10910_v51  ;;  %v10922_v51 = vld [vmem:[#allocation2 + $0x8cc] ss:$16 sps:$4 sm:$0xff]   ;;  %v10920_v38 = vld [vmem:[#allocation2 + $0x8c8] ss:$16 sps:$4 sm:$0xff]  }
 0x465   : > { %15971 = vst [vmem:[#allocation81_spill] sm:$0xff] %v12788_v46  ;;  %v5284_v15 = vpop.f32.mrb[11].mxu0  ;;  %v15982_v58 = vld [vmem:[#allocation38_spill] sm:$0xff] }
 0x466   : > { %15973 = vst [vmem:[#allocation9_spill] sm:$0xff] %v12791_v3  ;;  %5540 = vmatmul.mubr.bf16.gmra.mrb[100].mxu1 %v12373_v20  ;;  %v15983_v15 = vld [vmem:[#allocation16_spill] sm:$0xff] }
 0x467   : > { %5549 = vmatprep.mubr.bf16.mxu1 %v12376_v16  ;;  %5775 = vmatpush1.bf16.msra.mxu1 %v10908_v5  ;;  %v10919_v16 = vld [vmem:[#allocation2 + $0x8ac] ss:$16 sps:$4 sm:$0xff]  }
 0x468   : > { %5776 = vmatprep.subr.bf16.mxu1 %v10913_v62 }
 0x46a   : > { %v5288_v45 = vpop.f32.mrb[12].mxu0 }
 0x46b   : > { %v12796_v39 = vadd.f32 %v5288_v45, %v15974_v53  ;;  %v5290_v12 = vpop.f32.mrb[13].mxu0  ;;  %5777 = vmatpush1.bf16.msra.mxu1 %v10911_v11  ;;  %v15985_v11 = vld [vmem:[#allocation71_spill] sm:$0xff]  ;;  %v15986_v45 = vld [vmem:[#allocation21_spill] sm:$0xff] }
 0x46c   : > { %v12799_v49 = vadd.f32 %v5290_v12, %v15976_v57  ;;  %v5292_v13 = vpop.f32.mrb[14].mxu0  ;;  %5778 = vmatprep.subr.bf16.mxu1 %v10916_v24  ;;  %v10924_v57 = vld [vmem:[#allocation4 + $0x8] sm:$0xff]  }
 0x46d   : > { %15975 = vst [vmem:[#allocation12_spill] sm:$0xff] %v12796_v39  ;;  %v12802_v27 = vadd.f32 %v5292_v13, %v15977_v31  ;;  %v5294_v20 = vpop.f32.mrb[15].mxu0  ;;  %v15988_v13 = vld [vmem:[#allocation41_spill] sm:$0xff] }
 0x46e   : > { %v12805_v35 = vadd.f32 %v5294_v20, %v15979_v56  ;;  %5550 = vmatmul.mubr.bf16.gmra.mrb[104].mxu1 %v12385_v21  ;;  %v10923_v21 = vld [vmem:[#allocation4] sm:$0xff]   ;;  %v15989_v56 = vld [vmem:[#allocation19_spill] sm:$0xff] }
 0x46f   : > { %15978 = vst [vmem:[#allocation32_spill] sm:$0xff] %v12802_v27  ;;  %5559 = vmatprep.mubr.bf16.mxu1 %v15981_v37  ;;  %5779 = vmatpush1.bf16.msra.mxu1 %v10914_v33 }
 0x470   : > { %15980 = vst [vmem:[#allocation11_spill] sm:$0xff] %v12805_v35  ;;  %5780 = vmatprep.subr.bf16.mxu1 %v10919_v16  ;;  %8020 = vmatpush1.bf16.msra.mxu0 %v10923_v21  ;;  %v10925_v16 = vld [vmem:[#allocation4 + $0x10] sm:$0xff]  }
 0x471   : > { %8021 = vmatprep.subr.bf16.mxu0 %v15727_v25 }
 0x472   : > { %v5298_v29 = vpop.f32.mrb[16].mxu0 }
 0x473   : > { %v5300_v19 = vpop.f32.mrb[17].mxu0  ;;  %5781 = vmatpush1.bf16.msra.mxu1 %v10917_v63  ;;  %v15990_v63 = vld [vmem:[#allocation20_spill] sm:$0xff] }
 0x474   : > { %v5302_v54 = vpop.f32.mrb[18].mxu0  ;;  %5782 = vmatprep.subr.bf16.mxu1 %v10922_v51  ;;  %8022 = vmatpush1.bf16.msra.mxu0 %v10924_v57  ;;  %v10926_v19 = vld [vmem:[#allocation4 + $0x18] sm:$0xff]  }
 0x475   : > { %v12810_v0 = vadd.f32 %v5302_v54, %v15982_v58  ;;  %v5304_v5 = vpop.f32.mrb[19].mxu0  ;;  %8023 = vmatprep.subr.bf16.mxu0 %v15727_v25  ;;  %v15991_v54 = vld [vmem:[#allocation24_spill] sm:$0xff] }
 0x476   : > { %v12813_v62 = vadd.f32 %v5304_v5, %v15983_v15  ;;  %5560 = vmatmul.mubr.bf16.gmra.mrb[108].mxu1 %v12397_v9  ;;  %v15992_v5 = vld [vmem:[#allocation45_spill] sm:$0xff] }
 0x477   : > { %5569 = vmatprep.mubr.bf16.mxu1 %v15985_v11  ;;  %5783 = vmatpush1.bf16.msra.mxu1 %v10920_v38  ;;  %v15993_v11 = vld [vmem:[#allocation23_spill] sm:$0xff] }
 0x478   : > { %15984 = vst [vmem:[#allocation14_spill] sm:$0xff] %v12813_v62  ;;  %8024 = vmatpush1.bf16.msra.mxu0 %v10925_v16 }
 0x479   : > { %8025 = vmatprep.subr.bf16.mxu0 %v15727_v25 }
 0x47a   : > { %v5308_v24 = vpop.f32.mrb[20].mxu0 }
 0x47b   : > { %v12819_v53 = vadd.f32 %v5308_v24, %v15986_v45  ;;  %v5310_v12 = vpop.f32.mrb[21].mxu0  ;;  %v10930_v45 = vld [vmem:[#allocation4 + $0x20] sm:$0xff]  }
 0x47c   : > { %v12822_v33 = vadd.f32 %v5310_v12, %v15988_v13  ;;  %v5312_v31 = vpop.f32.mrb[22].mxu0  ;;  %8026 = vmatpush1.bf16.msra.mxu0 %v10926_v19  ;;  %v15994_v12 = vld [vmem:[#allocation22_spill] sm:$0xff] }
 0x47d   : > { %15987 = vst [vmem:[#allocation35_spill] sm:$0xff] %v12819_v53  ;;  %v5314_v20 = vpop.f32.mrb[23].mxu0  ;;  %8027 = vmatprep.subr.bf16.mxu0 %v15727_v25  ;;  %v10927_v13 = vld [vmem:[#allocation2 + $0x8e8] ss:$16 sps:$4 sm:$0xff]   ;;  %v10929_v31 = vld [vmem:[#allocation2 + $0x8ec] ss:$16 sps:$4 sm:$0xff]  }
 0x47e   : > { %5570 = vmatmul.mubr.bf16.gmra.mrb[112].mxu1 %v12409_v40  ;;  %5784 = vmatprep.subr.bf16.mxu1 %v10929_v31  ;;  %v10937_v40 = vld [vmem:[#allocation4 + $0x58] sm:$0xff]  }
 0x47f   : > { %5579 = vmatprep.mubr.bf16.mxu1 %v15989_v56  ;;  %v15995_v56 = vld [vmem:[#allocation29_spill] sm:$0xff]  ;;  %5785 = vmatpush1.bf16.msra.mxu1 %v10927_v13  ;;  %v16001_v13 = vld [vmem:[#allocation30_spill] sm:$0xff] }
 0x480   : > { %8028 = vmatpush1.bf16.msra.mxu0 %v10930_v45  ;;  %v16000_v45 = vld [vmem:[#allocation33_spill] sm:$0xff] }
 0x481   : > { %8029 = vmatprep.subr.bf16.mxu0 %v15727_v25 }
 0x482   : > { %v5318_v37 = vpop.f32.mrb[24].mxu0 }
 0x483   : > { %v12829_v29 = vadd.f32 %v5318_v37, %v15990_v63  ;;  %v5320_v51 = vpop.f32.mrb[25].mxu0 }
 0x484   : > { %v12832_v38 = vadd.f32 %v5320_v51, %v15991_v54  ;;  %v5322_v58 = vpop.f32.mrb[26].mxu0  ;;  %v15996_v51 = vld [vmem:[#allocation49_spill] sm:$0xff] }
 0x485   : > { %v12835_v15 = vadd.f32 %v5322_v58, %v15992_v5  ;;  %v5324_v21 = vpop.f32.mrb[27].mxu0  ;;  %v15998_v54 = vld [vmem:[#allocation25_spill] sm:$0xff]  ;;  %v15999_v5 = vld [vmem:[#allocation27_spill] sm:$0xff] }
 0x486   : > { %v12838_v24 = vadd.f32 %v5324_v21, %v15993_v11  ;;  %5580 = vmatmul.mubr.bf16.gmra.mrb[116].mxu1 %v12421_v34 }
 0x487   : > { %5589 = vmatprep.mubr.bf16.mxu1 %v15994_v12 }
 0x48a   : > { %v5328_v57 = vpop.f32.mrb[28].mxu0 }
 0x48b   : > { %v5330_v20 = vpop.f32.mrb[29].mxu0 }
 0x48c   : > { %v5332_v16 = vpop.f32.mrb[30].mxu0 }
 0x48d   : > { %v12845_v37 = vadd.f32 %v5332_v16, %v15995_v56  ;;  %v5334_v63 = vpop.f32.mrb[31].mxu0  ;;  %v16002_v16 = vld [vmem:[#allocation53_spill] sm:$0xff] }
 0x48e   : > { %v12848_v19 = vadd.f32 %v5334_v63, %v15996_v51  ;;  %5590 = vmatmul.mubr.bf16.gmra.mrb[120].mxu1 %v12433_v44  ;;  %v16003_v51 = vld [vmem:[#allocation31_spill] sm:$0xff] }
 0x48f   : > { %5599 = vmatprep.mubr.bf16.mxu1 %v15998_v54 }
 0x490   : > { %15997 = vst [vmem:[#allocation13_spill] sm:$0xff] %v12848_v19 }
 0x492   : > { %v5338_v58 = vpop.f32.mrb[32].mxu0 }
 0x493   : > { %v12853_v21 = vadd.f32 %v5338_v58, %v15999_v5  ;;  %v5340_v11 = vpop.f32.mrb[33].mxu0  ;;  %v10931_v5 = vld [vmem:[#allocation4 + $0x28] sm:$0xff]  }
 0x494   : > { %v12856_v12 = vadd.f32 %v5340_v11, %v16000_v45  ;;  %v5342_v57 = vpop.f32.mrb[34].mxu0  ;;  %v16005_v45 = vld [vmem:[#allocation56_spill] sm:$0xff]  ;;  %8030 = vmatpush1.bf16.msra.mxu0 %v10931_v5 }
 0x495   : > { %v5344_v31 = vpop.f32.mrb[35].mxu0  ;;  %8031 = vmatprep.subr.bf16.mxu0 %v15727_v25 }
 0x496   : > { %5600 = vmatmul.mubr.bf16.gmra.mrb[124].mxu1 %v12445_v4  ;;  %v16007_v31 = vld [vmem:[#allocation37_spill] sm:$0xff] }
 0x497   : > { %5609 = vmatprep.mubr.bf16.mxu1 %v16001_v13  ;;  %v10932_v13 = vld [vmem:[#allocation4 + $0x30] sm:$0xff]  }
 0x498   : > { %8032 = vmatpush1.bf16.msra.mxu0 %v10932_v13  ;;  %v10934_v13 = vld [vmem:[#allocation4 + $0x40] sm:$0xff]  }
 0x499   : > { %8033 = vmatprep.subr.bf16.mxu0 %v15727_v25 }
 0x49a   : > { %v5348_v20 = vpop.f32.mrb[36].mxu0 }
 0x49b   : > { %v12861_v56 = vadd.f32 %v5348_v20, %v16002_v16  ;;  %v5350_v63 = vpop.f32.mrb[37].mxu0 }
 0x49c   : > { %v12864_v54 = vadd.f32 %v5350_v63, %v16003_v51  ;;  %v5352_v58 = vpop.f32.mrb[38].mxu0  ;;  %v16008_v51 = vld [vmem:[#allocation39_spill] sm:$0xff] }
 0x49d   : > { %v12867_v6 = vadd.f32 %v5352_v58, %v16004_v36  ;;  %v5354_v11 = vpop.f32.mrb[39].mxu0  ;;  %v10933_v36 = vld [vmem:[#allocation4 + $0x38] sm:$0xff]  }
 0x49e   : > { %v12870_v57 = vadd.f32 %v5354_v11, %v16005_v45  ;;  %5610 = vmatmul.mubr.bf16.gmra.mrb[128].mxu1 %v12457_v42  ;;  %v16009_v45 = vld [vmem:[#allocation62_spill] sm:$0xff]  ;;  %8034 = vmatpush1.bf16.msra.mxu0 %v10933_v36 }
 0x49f   : > { %5619 = vmatprep.mubr.bf16.mxu1 %v16007_v31  ;;  %8035 = vmatprep.subr.bf16.mxu0 %v15727_v25  ;;  %v16011_v31 = vld [vmem:[#allocation43_spill] sm:$0xff] }
 0x4a0   : > { %16006 = vst [vmem:[#allocation18_spill] sm:$0xff] %v12870_v57 }
 0x4a2   : > { %v5358_v20 = vpop.f32.mrb[40].mxu0  ;;  %8036 = vmatpush1.bf16.msra.mxu0 %v10934_v13  ;;  %v6440_v13 = vadd.f32 %v12772_v22, %v12766_v52 }
 0x4a3   : > { %v5360_v16 = vpop.f32.mrb[41].mxu0  ;;  %8037 = vmatprep.subr.bf16.mxu0 %v15727_v25 }
 0x4a4   : > { %v5362_v63 = vpop.f32.mrb[42].mxu0  ;;  %v6656_v16 = vmul.f32 %v12772_v22, %v12772_v22 }
 0x4a5   : > { %v12877_v58 = vadd.f32 %v5362_v63, %v16008_v51  ;;  %v5364_v11 = vpop.f32.mrb[43].mxu0 }
 0x4a6   : > { %v12880_v5 = vadd.f32 %v5364_v11, %v16009_v45  ;;  %5620 = vmatmul.mubr.bf16.gmra.mrb[132].mxu1 %v12470_v10  ;;  %v16013_v11 = vld [vmem:[#allocation46_spill] sm:$0xff]  ;;  %v6664_v10 = vmul.f32 %v12780_v14, %v12780_v14  ;;  %8038 = vmatpush1.bf16.msra.mxu0 %v10935_v30 }
 0x4a7   : > { %5629 = vmatprep.mubr.bf16.mxu1 %v16011_v31  ;;  %v6652_v31 = vmul.f32 %v12766_v52, %v12766_v52  ;;  %8039 = vmatprep.subr.bf16.mxu0 %v15727_v25 }
 0x4a8   : > { %16010 = vst [vmem:[#allocation67_spill] sm:$0xff] %v12880_v5 }
 0x4aa   : > { %v5368_v20 = vpop.f32.mrb[44].mxu0 }
 0x4ab   : > { %v12888_v63 = vadd.f32 %v5368_v20, %v16012_v43  ;;  %v5370_v51 = vpop.f32.mrb[45].mxu0  ;;  %v6844_v43 = vadd.f32 %v6656_v16, %v6652_v31  ;;  %v6442_v20 = vadd.f32 %v12780_v14, %v6440_v13  ;;  %v16016_v13 = vld [vmem:[#allocation44_spill] sm:$0xff] }
 0x4ac   : > { %v12892_v36 = vadd.f32 %v5370_v51, %v16013_v11  ;;  %v5372_v45 = vpop.f32.mrb[46].mxu0  ;;  %v6668_v51 = vmul.f32 %v12788_v46, %v12788_v46  ;;  %v16015_v11 = vld [vmem:[#allocation51_spill] sm:$0xff] }
 0x4ad   : > { %v5374_v42 = vpop.f32.mrb[47].mxu0  ;;  %v10936_v45 = vld [vmem:[#allocation4 + $0x50] sm:$0xff]   ;;  %v6846_v4 = vadd.f32 %v6844_v43, %v6664_v10  ;;  %v6443_v44 = vadd.f32 %v12788_v46, %v6442_v20 }
 0x4ae   : > { %16014 = vst [vmem:[#allocation38_spill] sm:$0xff] %v12892_v36  ;;  %5630 = vmatmul.mubr.bf16.gmra.mrb[136].mxu1 %v12482_v1  ;;  %v6676_v42 = vmul.f32 %v12796_v39, %v12796_v39  ;;  %8040 = vmatpush1.bf16.msra.mxu0 %v10936_v45  ;;  %v16017_v10 = vld [vmem:[#allocation50_spill] sm:$0xff] }
 0x4af   : > { %5639 = vmatprep.mubr.bf16.mxu1 %v16015_v11  ;;  %v6847_v16 = vadd.f32 %v6846_v4, %v6668_v51  ;;  %v6445_v31 = vadd.f32 %v12796_v39, %v6443_v44  ;;  %8041 = vmatprep.subr.bf16.mxu0 %v15727_v25  ;;  %v6657_v11 = vmul.f32 %v12775_v28, %v12775_v28  ;;  %v16018_v51 = vld [vmem:[#allocation66_spill] sm:$0xff] }
 0x4b0   : > { %v6680_v4 = vmul.f32 %v12802_v27, %v12802_v27  ;;  %v16020_v46 = vld [vmem:[#allocation102_spill] sm:$0xff] }
 0x4b1   : > { %v6849_v9 = vadd.f32 %v6847_v16, %v6676_v42  ;;  %v10938_v42 = vld [vmem:[#allocation4 + $0x60] sm:$0xff]   ;;  %v6446_v16 = vadd.f32 %v12802_v27, %v6445_v31  ;;  %v6692_v31 = vmul.f32 %v12819_v53, %v12819_v53 }
 0x4b2   : > { %v5378_v30 = vpop.f32.mrb[48].mxu0  ;;  %8042 = vmatpush1.bf16.msra.mxu0 %v10937_v40 }
 0x4b3   : > { %v12911_v34 = vadd.f32 %v5378_v30, %v16016_v13  ;;  %v5380_v1 = vpop.f32.mrb[49].mxu0  ;;  %v6653_v30 = vmul.f32 %v12769_v41, %v12769_v41  ;;  %v6493_v13 = vadd.f32 %v12775_v28, %v12769_v41  ;;  %8043 = vmatprep.subr.bf16.mxu0 %v15727_v25  ;;  %v6669_v41 = vmul.f32 %v12791_v3, %v12791_v3 }
 0x4b4   : > { %v12917_v43 = vadd.f32 %v5380_v1, %v16017_v10  ;;  %v5382_v20 = vpop.f32.mrb[50].mxu0  ;;  %v6665_v1 = vmul.f32 %v12783_v17, %v12783_v17  ;;  %v16019_v10 = vld [vmem:[#allocation82_spill] sm:$0xff]  ;;  %v6448_v40 = vadd.f32 %v12810_v0, %v6446_v16 }
 0x4b5   : > { %v12922_v44 = vadd.f32 %v5382_v20, %v16018_v51  ;;  %v5384_v45 = vpop.f32.mrb[51].mxu0  ;;  %v6688_v20 = vmul.f32 %v12810_v0, %v12810_v0  ;;  %v6897_v51 = vadd.f32 %v6657_v11, %v6653_v30  ;;  %v6495_v28 = vadd.f32 %v12783_v17, %v6493_v13  ;;  %v10939_v30 = vld [vmem:[#allocation4 + $0x68] sm:$0xff]  }
 0x4b6   : > { %v12931_v39 = vadd.f32 %v5384_v45, %v16019_v10  ;;  %5640 = vmatmul.mubr.bf16.gmra.mrb[140].mxu1 %v12494_v18  ;;  %v6850_v45 = vadd.f32 %v6849_v9, %v6680_v4  ;;  %v6677_v18 = vmul.f32 %v12799_v49, %v12799_v49  ;;  %8044 = vmatpush1.bf16.msra.mxu0 %v10938_v42 }
 0x4b7   : > { %5649 = vmatprep.mubr.bf16.mxu1 %v16020_v46  ;;  %v6899_v10 = vadd.f32 %v6897_v51, %v6665_v1  ;;  %v6496_v27 = vadd.f32 %v12791_v3, %v6495_v28  ;;  %v6449_v17 = vadd.f32 %v12819_v53, %v6448_v40  ;;  %v6700_v9 = vmul.f32 %v12829_v29, %v12829_v29  ;;  %v16021_v3 = vld [vmem:[#allocation48_spill] sm:$0xff]  ;;  %v16022_v40 = vld [vmem:[#allocation54_spill] sm:$0xff] }
 0x4b8   : > { %v6852_v13 = vadd.f32 %v6850_v45, %v6688_v20  ;;  %8045 = vmatprep.subr.bf16.mxu0 %v15727_v25  ;;  %v6681_v45 = vmul.f32 %v12805_v35, %v12805_v35 }
 0x4b9   : > { %v6900_v4 = vadd.f32 %v6899_v10, %v6669_v41  ;;  %v6498_v1 = vadd.f32 %v12799_v49, %v6496_v27  ;;  %v6451_v51 = vadd.f32 %v12829_v29, %v6449_v17  ;;  %v6704_v27 = vmul.f32 %v12835_v15, %v12835_v15 }
 0x4ba   : > { %v5388_v11 = vpop.f32.mrb[52].mxu0  ;;  %v6853_v28 = vadd.f32 %v6852_v13, %v6692_v31  ;;  %8046 = vmatpush1.bf16.msra.mxu0 %v10939_v30  ;;  %v6712_v10 = vmul.f32 %v12845_v37, %v12845_v37 }
 0x4bb   : > { %v5390_v46 = vpop.f32.mrb[53].mxu0  ;;  %v6902_v20 = vadd.f32 %v6900_v4, %v6677_v18  ;;  %8047 = vmatprep.subr.bf16.mxu0 %v15727_v25  ;;  %v6499_v17 = vadd.f32 %v12805_v35, %v6498_v1  ;;  %v6689_v18 = vmul.f32 %v12813_v62, %v12813_v62  ;;  %v6452_v31 = vadd.f32 %v12835_v15, %v6451_v51 }
 0x4bc   : > { %v5392_v16 = vpop.f32.mrb[54].mxu0  ;;  %v10940_v46 = vld [vmem:[#allocation4 + $0x70] sm:$0xff]   ;;  %v6855_v41 = vadd.f32 %v6853_v28, %v6700_v9  ;;  %v6693_v9 = vmul.f32 %v12822_v33, %v12822_v33 }
 0x4bd   : > { %v12955_v11 = vadd.f32 %v5392_v16, %v16021_v3  ;;  %v5394_v42 = vpop.f32.mrb[55].mxu0  ;;  %v16024_v3 = vld [vmem:[#allocation103_spill] sm:$0xff]  ;;  %v6903_v30 = vadd.f32 %v6902_v20, %v6681_v45  ;;  %v6501_v13 = vadd.f32 %v12813_v62, %v6499_v17  ;;  %v6454_v28 = vadd.f32 %v12845_v37, %v6452_v31 }
 0x4be   : > { %v12960_v53 = vadd.f32 %v5394_v42, %v16022_v40  ;;  %5650 = vmatmul.mubr.bf16.gmra.mrb[144].mxu1 %v12506_v47  ;;  %8048 = vmatpush1.bf16.msra.mxu0 %v10940_v46  ;;  %v10941_v16 = vld [vmem:[#allocation4 + $0x78] sm:$0xff]   ;;  %v6856_v1 = vadd.f32 %v6855_v41, %v6704_v27  ;;  %v6716_v42 = vmul.f32 %v12853_v21, %v12853_v21  ;;  %v16025_v40 = vld [vmem:[#allocation69_spill] sm:$0xff] }
 0x4bf   : > { %5659 = vmatprep.mubr.bf16.mxu1 %v16024_v3  ;;  %8049 = vmatprep.subr.bf16.mxu0 %v15727_v25  ;;  %v6905_v20 = vadd.f32 %v6903_v30, %v6689_v18  ;;  %v6502_v45 = vadd.f32 %v12822_v33, %v6501_v13  ;;  %v6701_v17 = vmul.f32 %v12832_v38, %v12832_v38  ;;  %v16026_v46 = vld [vmem:[#allocation52_spill] sm:$0xff] }
 0x4c0   : > { %16023 = vst [vmem:[#allocation16_spill] sm:$0xff] %v12960_v53  ;;  %v6858_v27 = vadd.f32 %v6856_v1, %v6712_v10  ;;  %v6455_v31 = vadd.f32 %v12853_v21, %v6454_v28  ;;  %v6705_v10 = vmul.f32 %v12838_v24, %v12838_v24  ;;  %v16028_v1 = vld [vmem:[#allocation104_spill] sm:$0xff] }
 0x4c1   : > { %v6906_v62 = vadd.f32 %v6905_v20, %v6693_v9  ;;  %v6504_v35 = vadd.f32 %v12832_v38, %v6502_v45  ;;  %v6728_v9 = vmul.f32 %v12867_v6, %v12867_v6  ;;  %v16029_v45 = vld [vmem:[#allocation57_spill] sm:$0xff] }
 0x4c2   : > { %v5398_v4 = vpop.f32.mrb[56].mxu0  ;;  %8050 = vmatpush1.bf16.msra.mxu0 %v10941_v16  ;;  %v6859_v18 = vadd.f32 %v6858_v27, %v6716_v42  ;;  %v6457_v30 = vadd.f32 %v12861_v56, %v6455_v31  ;;  %v6713_v16 = vmul.f32 %v12848_v19, %v12848_v19  ;;  %v6717_v31 = vmul.f32 %v12856_v12, %v12856_v12 }
 0x4c3   : > { %v12980_v51 = vadd.f32 %v5398_v4, %v16025_v40  ;;  %v5400_v3 = vpop.f32.mrb[57].mxu0  ;;  %v6724_v4 = vmul.f32 %v12861_v56, %v12861_v56  ;;  %8244 = vmatprep.subr.bf16.mxu0 %v15727_v25  ;;  %v6908_v13 = vadd.f32 %v6906_v62, %v6701_v17  ;;  %v6736_v62 = vmul.f32 %v12877_v58, %v12877_v58 }
 0x4c4   : > { %v12987_v47 = vadd.f32 %v5400_v3, %v16026_v46  ;;  %v5402_v41 = vpop.f32.mrb[58].mxu0  ;;  %v6505_v3 = vadd.f32 %v12838_v24, %v6504_v35  ;;  %v6458_v20 = vadd.f32 %v12867_v6, %v6457_v30  ;;  %v16030_v35 = vld [vmem:[#allocation72_spill] sm:$0xff] }
 0x4c5   : > { %v5404_v40 = vpop.f32.mrb[59].mxu0  ;;  %v6861_v28 = vadd.f32 %v6859_v18, %v6724_v4  ;;  %v6909_v41 = vadd.f32 %v6908_v13, %v6705_v10 }
 0x4c6   : > { %16027 = vst [vmem:[#allocation71_spill] sm:$0xff] %v12987_v47  ;;  %5660 = vmatmul.mubr.bf16.gmra.mrb[148].mxu1 %v12518_v48  ;;  %v6507_v27 = vadd.f32 %v12848_v19, %v6505_v3  ;;  %v6460_v30 = vadd.f32 %v12877_v58, %v6458_v20  ;;  %v16032_v48 = vld [vmem:[#allocation59_spill] sm:$0xff]  ;;  %v6725_v3 = vmul.f32 %v12864_v54, %v12864_v54 }
 0x4c7   : > { %5669 = vmatprep.mubr.bf16.mxu1 %v16028_v1  ;;  %v6862_v18 = vadd.f32 %v6861_v28, %v6728_v9  ;;  %v6740_v1 = vmul.f32 %v12888_v63, %v12888_v63  ;;  %v6911_v13 = vadd.f32 %v6909_v41, %v6713_v16  ;;  %v16033_v19 = vld [vmem:[#allocation83_spill] sm:$0xff]  ;;  %v6748_v9 = vmul.f32 %v12911_v34, %v12911_v34  ;;  %v16035_v16 = vld [vmem:[#allocation105_spill] sm:$0xff] }
 0x4c8   : > { %v6508_v10 = vadd.f32 %v12856_v12, %v6507_v27  ;;  %v6461_v28 = vadd.f32 %v12888_v63, %v6460_v30  ;;  %v6752_v30 = vmul.f32 %v12922_v44, %v12922_v44 }
 0x4ca   : > { %v5408_v42 = vpop.f32.mrb[60].mxu0  ;;  %v6510_v20 = vadd.f32 %v12864_v54, %v6508_v10  ;;  %v6463_v27 = vadd.f32 %v12911_v34, %v6461_v28  ;;  %v6760_v10 = vmul.f32 %v12955_v11, %v12955_v11 }
 0x4cb   : > { %v13008_v17 = vadd.f32 %v5408_v42, %v16029_v45  ;;  %v5410_v46 = vpop.f32.mrb[61].mxu0 }
 0x4cc   : > { %v13014_v4 = vadd.f32 %v5410_v46, %v16030_v35  ;;  %v5412_v40 = vpop.f32.mrb[62].mxu0  ;;  %v6864_v35 = vadd.f32 %v6862_v18, %v6736_v62 }
 0x4cd   : > { %v13020_v42 = vadd.f32 %v5412_v40, %v16032_v48  ;;  %v5414_v45 = vpop.f32.mrb[63].mxu0  ;;  %v6912_v48 = vadd.f32 %v6911_v13, %v6717_v31  ;;  %v6737_v31 = vmul.f32 %v12880_v5, %v12880_v5 }
 0x4ce   : > { %16031 = vst [vmem:[#allocation21_spill] sm:$0xff] %v13014_v4  ;;  %v13026_v46 = vadd.f32 %v5414_v45, %v16033_v19  ;;  %5670 = vmatmul.mubr.bf16.gmra.mrb[152].mxu1 %v12530_v2  ;;  %v6865_v41 = vadd.f32 %v6864_v35, %v6740_v1  ;;  %v6729_v19 = vmul.f32 %v12870_v57, %v12870_v57 }
 0x4cf   : > { %5679 = vmatprep.mubr.bf16.mxu1 %v16035_v16  ;;  %v6914_v40 = vadd.f32 %v6912_v48, %v6725_v3  ;;  %v6511_v2 = vadd.f32 %v12870_v57, %v6510_v20  ;;  %v6464_v1 = vadd.f32 %v12922_v44, %v6463_v27  ;;  %v16036_v3 = vld [vmem:[#allocation61_spill] sm:$0xff]  ;;  %v6741_v16 = vmul.f32 %v12892_v36, %v12892_v36  ;;  %v16038_v20 = vld [vmem:[#allocation84_spill] sm:$0xff] }
 0x4d0   : > { %16034 = vst [vmem:[#allocation41_spill] sm:$0xff] %v13026_v46  ;;  %v6867_v18 = vadd.f32 %v6865_v41, %v6748_v9  ;;  %v6764_v27 = vmul.f32 %v12980_v51, %v12980_v51 }
 0x4d1   : > { %v6915_v9 = vadd.f32 %v6914_v40, %v6729_v19  ;;  %v6513_v48 = vadd.f32 %v12880_v5, %v6511_v2  ;;  %v6749_v2 = vmul.f32 %v12917_v43, %v12917_v43  ;;  %v16040_v40 = vld [vmem:[#allocation106_spill] sm:$0xff] }
 0x4d2   : > { %v5418_v62 = vpop.f32.mrb[64].mxu0 }
 0x4d3   : > { %v5420_v45 = vpop.f32.mrb[65].mxu0  ;;  %v6868_v62 = vadd.f32 %v6867_v18, %v6752_v30  ;;  %v6772_v18 = vmul.f32 %v13008_v17, %v13008_v17 }
 0x4d4   : > { %v5422_v13 = vpop.f32.mrb[66].mxu0  ;;  %v6466_v45 = vadd.f32 %v12955_v11, %v6464_v1 }
 0x4d5   : > { %v13046_v35 = vadd.f32 %v5422_v13, %v16036_v3  ;;  %v5424_v28 = vpop.f32.mrb[67].mxu0  ;;  %v6917_v13 = vadd.f32 %v6915_v9, %v6737_v31  ;;  %v6514_v3 = vadd.f32 %v12892_v36, %v6513_v48  ;;  %v6870_v19 = vadd.f32 %v6868_v62, %v6760_v10  ;;  %v16041_v9 = vld [vmem:[#allocation64_spill] sm:$0xff]  ;;  %v16043_v62 = vld [vmem:[#allocation85_spill] sm:$0xff] }
 0x4d6   : > { %v13052_v41 = vadd.f32 %v5424_v28, %v16038_v20  ;;  %5680 = vmatmul.mubr.bf16.gmra.mrb[156].mxu1 %v12542_v26  ;;  %v6467_v28 = vadd.f32 %v12980_v51, %v6466_v45  ;;  %v6753_v10 = vmul.f32 %v12931_v39, %v12931_v39 }
 0x4d7   : > { %16037 = vst [vmem:[#allocation19_spill] sm:$0xff] %v13046_v35  ;;  %5689 = vmatprep.mubr.bf16.mxu1 %v16040_v40  ;;  %v6918_v30 = vadd.f32 %v6917_v13, %v6741_v16  ;;  %v6516_v1 = vadd.f32 %v12917_v43, %v6514_v3  ;;  %v6871_v5 = vadd.f32 %v6870_v19, %v6764_v27 }
 0x4d8   : > { %16039 = vst [vmem:[#allocation20_spill] sm:$0xff] %v13052_v41  ;;  %v6469_v31 = vadd.f32 %v13008_v17, %v6467_v28  ;;  %v6776_v16 = vmul.f32 %v13020_v42, %v13020_v42  ;;  %v6761_v3 = vmul.f32 %v12960_v53, %v12960_v53 }
 0x4d9   : > { %v6920_v36 = vadd.f32 %v6918_v30, %v6749_v2  ;;  %v6873_v57 = vadd.f32 %v6871_v5, %v6772_v18  ;;  %v6517_v27 = vadd.f32 %v12931_v39, %v6516_v1  ;;  %v6784_v2 = vmul.f32 %v13046_v35, %v13046_v35  ;;  %v16045_v18 = vld [vmem:[#allocation107_spill] sm:$0xff] }
 0x4da   : > { %v5428_v20 = vpop.f32.mrb[68].mxu0  ;;  %v6470_v19 = vadd.f32 %v13020_v42, %v6469_v31  ;;  %v6765_v5 = vmul.f32 %v12987_v47, %v12987_v47 }
 0x4db   : > { %v13068_v48 = vadd.f32 %v5428_v20, %v16041_v9  ;;  %v5430_v26 = vpop.f32.mrb[69].mxu0  ;;  %v6519_v28 = vadd.f32 %v12960_v53, %v6517_v27  ;;  %v6874_v30 = vadd.f32 %v6873_v57, %v6776_v16 }
 0x4dc   : > { %v13073_v45 = vadd.f32 %v5430_v26, %v16043_v62  ;;  %v5432_v40 = vpop.f32.mrb[70].mxu0  ;;  %v6921_v26 = vadd.f32 %v6920_v36, %v6753_v10  ;;  %v6472_v1 = vadd.f32 %v13046_v35, %v6470_v19  ;;  %v6773_v62 = vmul.f32 %v13014_v4, %v13014_v4  ;;  %v16048_v19 = vld [vmem:[#allocation87_spill] sm:$0xff] }
 0x4dd   : > { %16042 = vst [vmem:[#allocation24_spill] sm:$0xff] %v13068_v48  ;;  %v5434_v13 = vpop.f32.mrb[71].mxu0  ;;  %v6788_v20 = vmul.f32 %v13068_v48, %v13068_v48  ;;  %v6520_v9 = vadd.f32 %v12987_v47, %v6519_v28  ;;  %v6876_v10 = vadd.f32 %v6874_v30, %v6784_v2  ;;  %v16050_v2 = vld [vmem:[#allocation88_spill] sm:$0xff] }
 0x4de   : > { %16044 = vst [vmem:[#allocation45_spill] sm:$0xff] %v13073_v45  ;;  %5690 = vmatmul.mubr.bf16.gmra.mrb[160].mxu1 %v12554_v55  ;;  %v6923_v31 = vadd.f32 %v6921_v26, %v6761_v3  ;;  %v6473_v40 = vadd.f32 %v13068_v48, %v6472_v1  ;;  %v16046_v13 = vld [vmem:[#allocation86_spill] sm:$0xff] }
 0x4df   : > { %5699 = vmatprep.mubr.bf16.mxu1 %v16045_v18  ;;  %v6522_v16 = vadd.f32 %v13014_v4, %v6520_v9  ;;  %v6877_v26 = vadd.f32 %v6876_v10, %v6788_v20 }
 0x4e0   : > { %v6924_v57 = vadd.f32 %v6923_v31, %v6765_v5  ;;  %v6777_v5 = vmul.f32 %v13026_v46, %v13026_v46  ;;  %v16052_v31 = vld [vmem:[#allocation89_spill] sm:$0xff] }
 0x4e1   : > { %v6523_v10 = vadd.f32 %v13026_v46, %v6522_v16 }
 0x4e2   : > { %v5438_v36 = vpop.f32.mrb[72].mxu0 }
 0x4e3   : > { %v13096_v27 = vadd.f32 %v5438_v36, %v16046_v13  ;;  %v5440_v18 = vpop.f32.mrb[73].mxu0  ;;  %v6926_v36 = vadd.f32 %v6924_v57, %v6773_v62  ;;  %v16054_v62 = vld [vmem:[#allocation108_spill] sm:$0xff] }
 0x4e4   : > { %v13100_v55 = vadd.f32 %v5440_v18, %v16048_v19  ;;  %v5442_v3 = vpop.f32.mrb[74].mxu0 }
 0x4e5   : > { %16047 = vst [vmem:[#allocation23_spill] sm:$0xff] %v13096_v27  ;;  %v6475_v28 = vadd.f32 %v13096_v27, %v6473_v40  ;;  %v6796_v47 = vmul.f32 %v13096_v27, %v13096_v27  ;;  %v13106_v30 = vadd.f32 %v5442_v3, %v16050_v2  ;;  %v5444_v1 = vpop.f32.mrb[75].mxu0  ;;  %v6785_v40 = vmul.f32 %v13052_v41, %v13052_v41 }
 0x4e6   : > { %16049 = vst [vmem:[#allocation22_spill] sm:$0xff] %v13100_v55  ;;  %v13111_v9 = vadd.f32 %v5444_v1, %v16052_v31  ;;  %5700 = vmatmul.mubr.bf16.gmra.mrb[164].mxu1 %v12566_v61  ;;  %v6927_v19 = vadd.f32 %v6926_v36, %v6777_v5  ;;  %v6525_v3 = vadd.f32 %v13052_v41, %v6523_v10  ;;  %v16055_v61 = vld [vmem:[#allocation90_spill] sm:$0xff]  ;;  %v16057_v5 = vld [vmem:[#allocation91_spill] sm:$0xff] }
 0x4e7   : > { %16051 = vst [vmem:[#allocation29_spill] sm:$0xff] %v13106_v30  ;;  %v6879_v13 = vadd.f32 %v6877_v26, %v6796_v47  ;;  %v6476_v18 = vadd.f32 %v13106_v30, %v6475_v28  ;;  %v6800_v20 = vmul.f32 %v13106_v30, %v13106_v30  ;;  %5709 = vmatprep.mubr.bf16.mxu1 %v16054_v62 }
 0x4e8   : > { %16053 = vst [vmem:[#allocation49_spill] sm:$0xff] %v13111_v9  ;;  %v6789_v47 = vmul.f32 %v13073_v45, %v13073_v45  ;;  %v6929_v2 = vadd.f32 %v6927_v19, %v6785_v40  ;;  %v6526_v1 = vadd.f32 %v13073_v45, %v6525_v3  ;;  %v6797_v16 = vmul.f32 %v13100_v55, %v13100_v55 }
 0x4e9   : > { %v6880_v57 = vadd.f32 %v6879_v13, %v6800_v20  ;;  %v6801_v3 = vmul.f32 %v13111_v9, %v13111_v9 }
 0x4ea   : > { %v5448_v26 = vpop.f32.mrb[76].mxu0  ;;  %v6930_v13 = vadd.f32 %v6929_v2, %v6789_v47  ;;  %v6528_v36 = vadd.f32 %v13100_v55, %v6526_v1  ;;  %v16060_v1 = vld [vmem:[#allocation92_spill] sm:$0xff]  ;;  %v16076_v55 = vld [vmem:[#allocation99_spill] sm:$0xff] }
 0x4eb   : > { %v5450_v28 = vpop.f32.mrb[77].mxu0 }
 0x4ec   : > { %v5452_v31 = vpop.f32.mrb[78].mxu0  ;;  %v6932_v19 = vadd.f32 %v6930_v13, %v6797_v16  ;;  %v6529_v47 = vadd.f32 %v13111_v9, %v6528_v36  ;;  %v16062_v16 = vld [vmem:[#allocation93_spill] sm:$0xff] }
 0x4ed   : > { %v13128_v46 = vadd.f32 %v5452_v31, %v16055_v61  ;;  %v5454_v62 = vpop.f32.mrb[79].mxu0  ;;  %v16059_v61 = vld [vmem:[#allocation109_spill] sm:$0xff] }
 0x4ee   : > { %v13132_v20 = vadd.f32 %v5454_v62, %v16057_v5  ;;  %5710 = vmatmul.mubr.bf16.gmra.mrb[168].mxu1 %v12578_v23  ;;  %v6933_v62 = vadd.f32 %v6932_v19, %v6801_v3  ;;  %v16064_v3 = vld [vmem:[#allocation111_spill] sm:$0xff] }
 0x4ef   : > { %16056 = vst [vmem:[#allocation25_spill] sm:$0xff] %v13128_v46  ;;  %v6478_v10 = vadd.f32 %v13128_v46, %v6476_v18  ;;  %v6808_v40 = vmul.f32 %v13128_v46, %v13128_v46  ;;  %5719 = vmatprep.mubr.bf16.mxu1 %v16059_v61 }
 0x4f0   : > { %16058 = vst [vmem:[#allocation27_spill] sm:$0xff] %v13132_v20  ;;  %v6809_v28 = vmul.f32 %v13132_v20, %v13132_v20  ;;  %v6531_v5 = vadd.f32 %v13132_v20, %v6529_v47 }
 0x4f1   : > { %v6882_v26 = vadd.f32 %v6880_v57, %v6808_v40 }
 0x4f2   : > { %v5458_v2 = vpop.f32.mrb[80].mxu0  ;;  %v6935_v40 = vadd.f32 %v6933_v62, %v6809_v28 }
 0x4f3   : > { %v13145_v18 = vadd.f32 %v5458_v2, %v16060_v1  ;;  %v5460_v31 = vpop.f32.mrb[81].mxu0 }
 0x4f4   : > { %v13149_v13 = vadd.f32 %v5460_v31, %v16062_v16  ;;  %v5462_v23 = vpop.f32.mrb[82].mxu0  ;;  %v16067_v16 = vld [vmem:[#allocation95_spill] sm:$0xff] }
 0x4f5   : > { %16061 = vst [vmem:[#allocation33_spill] sm:$0xff] %v13145_v18  ;;  %v6479_v61 = vadd.f32 %v13145_v18, %v6478_v10  ;;  %v6812_v57 = vmul.f32 %v13145_v18, %v13145_v18  ;;  %v5464_v36 = vpop.f32.mrb[83].mxu0  ;;  %v16065_v23 = vld [vmem:[#allocation94_spill] sm:$0xff] }
 0x4f6   : > { %16063 = vst [vmem:[#allocation30_spill] sm:$0xff] %v13149_v13  ;;  %v6532_v9 = vadd.f32 %v13149_v13, %v6531_v5  ;;  %v6813_v2 = vmul.f32 %v13149_v13, %v13149_v13  ;;  %5720 = vmatmul.mubr.bf16.gmra.mrb[172].mxu1 %v12590_v50 }
 0x4f7   : > { %v6883_v1 = vadd.f32 %v6882_v26, %v6812_v57  ;;  %5729 = vmatprep.mubr.bf16.mxu1 %v16064_v3  ;;  %v16069_v26 = vld [vmem:[#allocation96_spill] sm:$0xff]  ;;  %v16071_v3 = vld [vmem:[#allocation97_spill] sm:$0xff] }
 0x4f8   : > { %v6936_v19 = vadd.f32 %v6935_v40, %v6813_v2 }
 0x4fa   : > { %v5468_v47 = vpop.f32.mrb[84].mxu0 }
 0x4fb   : > { %v13160_v31 = vadd.f32 %v5468_v47, %v16065_v23  ;;  %v5470_v10 = vpop.f32.mrb[85].mxu0 }
 0x4fc   : > { %v13163_v20 = vadd.f32 %v5470_v10, %v16067_v16  ;;  %v5472_v28 = vpop.f32.mrb[86].mxu0 }
 0x4fd   : > { %16066 = vst [vmem:[#allocation53_spill] sm:$0xff] %v13160_v31  ;;  %v6481_v62 = vadd.f32 %v13160_v31, %v6479_v61  ;;  %v6820_v5 = vmul.f32 %v13160_v31, %v13160_v31  ;;  %v13169_v57 = vadd.f32 %v5472_v28, %v16069_v26  ;;  %v5474_v36 = vpop.f32.mrb[87].mxu0  ;;  %v16073_v26 = vld [vmem:[#allocation113_spill] sm:$0xff] }
 0x4fe   : > { %16068 = vst [vmem:[#allocation31_spill] sm:$0xff] %v13163_v20  ;;  %v6534_v40 = vadd.f32 %v13163_v20, %v6532_v9  ;;  %v6821_v2 = vmul.f32 %v13163_v20, %v13163_v20  ;;  %v13175_v47 = vadd.f32 %v5474_v36, %v16071_v3  ;;  %5730 = vmatmul.mubr.bf16.gmra.mrb[176].mxu1 %v12602_v60 }
 0x4ff   : > { %16070 = vst [vmem:[#allocation36_spill] sm:$0xff] %v13169_v57  ;;  %v6885_v23 = vadd.f32 %v6883_v1, %v6820_v5  ;;  %v6482_v10 = vadd.f32 %v13169_v57, %v6481_v62  ;;  %v6824_v61 = vmul.f32 %v13169_v57, %v13169_v57  ;;  %5739 = vmatprep.mubr.bf16.mxu1 %v16073_v26  ;;  %v16074_v5 = vld [vmem:[#allocation98_spill] sm:$0xff] }
 0x500   : > { %16072 = vst [vmem:[#allocation56_spill] sm:$0xff] %v13175_v47  ;;  %v6938_v16 = vadd.f32 %v6936_v19, %v6821_v2  ;;  %v6535_v28 = vadd.f32 %v13175_v47, %v6534_v40  ;;  %v6825_v9 = vmul.f32 %v13175_v47, %v13175_v47 }
 0x501   : > { %v6886_v50 = vadd.f32 %v6885_v23, %v6824_v61  ;;  %v16078_v61 = vld [vmem:[#allocation114_spill] sm:$0xff] }
 0x502   : > { %v6939_v20 = vadd.f32 %v6938_v16, %v6825_v9  ;;  %v5478_v36 = vpop.f32.mrb[88].mxu0 }
 0x503   : > { %v5480_v3 = vpop.f32.mrb[89].mxu0  ;;  %v16079_v36 = vld [vmem:[#allocation100_spill] sm:$0xff] }
 0x504   : > { %v5482_v1 = vpop.f32.mrb[90].mxu0 }
 0x505   : > { %v13186_v62 = vadd.f32 %v5482_v1, %v16074_v5  ;;  %v5484_v13 = vpop.f32.mrb[91].mxu0 }
 0x506   : > { %v13189_v45 = vadd.f32 %v5484_v13, %v16076_v55  ;;  %5740 = vmatmul.mubr.bf16.gmra.mrb[180].mxu1 %v12614_v7 }
 0x507   : > { %16075 = vst [vmem:[#allocation37_spill] sm:$0xff] %v13186_v62  ;;  %v6484_v19 = vadd.f32 %v13186_v62, %v6482_v10  ;;  %v6832_v40 = vmul.f32 %v13186_v62, %v13186_v62  ;;  %5749 = vmatprep.mubr.bf16.mxu1 %v16078_v61  ;;  %v16081_v10 = vld [vmem:[#allocation101_spill] sm:$0xff] }
 0x508   : > { %16077 = vst [vmem:[#allocation39_spill] sm:$0xff] %v13189_v45  ;;  %v6537_v2 = vadd.f32 %v13189_v45, %v6535_v28  ;;  %v6833_v23 = vmul.f32 %v13189_v45, %v13189_v45 }
 0x509   : > { %v6888_v16 = vadd.f32 %v6886_v50, %v6832_v40 }
 0x50a   : > { %v6941_v9 = vadd.f32 %v6939_v20, %v6833_v23  ;;  %v5488_v26 = vpop.f32.mrb[92].mxu0 }
 0x50b   : > { %v13200_v55 = vadd.f32 %v5488_v26, %v16079_v36  ;;  %v5490_v13 = vpop.f32.mrb[93].mxu0 }
 0x50c   : > { %v13203_v3 = vadd.f32 %v5490_v13, %v16081_v10  ;;  %v5492_v1 = vpop.f32.mrb[94].mxu0 }
 0x50d   : > { %16080 = vst [vmem:[#allocation62_spill] sm:$0xff] %v13200_v55  ;;  %v6485_v5 = vadd.f32 %v13200_v55, %v6484_v19  ;;  %v6836_v28 = vmul.f32 %v13200_v55, %v13200_v55  ;;  %v5494_v7 = vpop.f32.mrb[95].mxu0 }
 0x50e   : > { %16082 = vst [vmem:[#allocation43_spill] sm:$0xff] %v13203_v3  ;;  %v6538_v60 = vadd.f32 %v13203_v3, %v6537_v2  ;;  %v6837_v50 = vmul.f32 %v13203_v3, %v13203_v3  ;;  %5750 = vmatmul.mubr.bf16.gmra.mrb[184].mxu1 %v12629_v32 }
 0x50f   : > { %v6487_v20 = vrot.slane %v6485_v5, 4  ;;  %v6889_v40 = vadd.f32 %v6888_v16, %v6836_v28  ;;  %5759 = vmatprep.mubr.bf16.mxu1 %v12632_v59 }
 0x510   : > { %v6540_v23 = vrot.slane %v6538_v60, 4  ;;  %v6942_v61 = vadd.f32 %v6941_v9, %v6837_v50 }
 0x511   : > { %v6488_v26 = vadd.f32 %v6487_v20, %v6485_v5  ;;  %v6891_v36 = vrot.slane %v6889_v40, 4 }
 0x512   : > { %v6541_v19 = vadd.f32 %v6540_v23, %v6538_v60  ;;  %v6944_v13 = vrot.slane %v6942_v61, 4 }
 0x513   : > { %v6489_v10 = vrot.slane %v6488_v26, 2  ;;  %v6892_v1 = vadd.f32 %v6891_v36, %v6889_v40  ;;  %v16100_v36 = vld [vmem:[#allocation71_spill] sm:$0xff] }
 0x514   : > { %v6542_v7 = vrot.slane %v6541_v19, 2  ;;  %v6945_v45 = vadd.f32 %v6944_v13, %v6942_v61  ;;  %v16099_v13 = vld [vmem:[#allocation16_spill] sm:$0xff] }
 0x515   : > { %v6490_v2 = vadd.f32 %v6489_v10, %v6488_v26  ;;  %v6893_v47 = vrot.slane %v6892_v1, 2 }
 0x516   : > { %v6543_v41 = vadd.f32 %v6542_v7, %v6541_v19  ;;  %v6946_v4 = vrot.slane %v6945_v45, 2  ;;  %5760 = vmatmul.mubr.bf16.gmra.mrb[188].mxu1 %v12641_v8  ;;  %v16084_v19 = vld [vmem:[#allocation12_spill] sm:$0xff]  ;;  %v16091_v8 = vld [vmem:[#allocation17_spill] sm:$0xff] }
 0x517   : > { %v6491_v53 = vrot.slane %v6490_v2, 1  ;;  %v6894_v16 = vadd.f32 %v6893_v47, %v6892_v1  ;;  %5802 = vmatprep.mubr.bf16.mxu1 %v15727_v25  ;;  %v16085_v1 = vld [vmem:[#allocation32_spill] sm:$0xff]  ;;  %v16095_v7 = vld [vmem:[#allocation13_spill] sm:$0xff] }
 0x518   : > { %v6544_v28 = vrot.slane %v6543_v41, 1  ;;  %v6947_v9 = vadd.f32 %v6946_v4, %v6945_v45  ;;  %v16083_v45 = vld [vmem:[#allocation81_spill] sm:$0xff] }
 0x519   : > { %v6492_v59 = vadd.f32 %v6491_v53, %v6490_v2  ;;  %v6895_v5 = vrot.slane %v6894_v16, 1  ;;  %v16102_v53 = vld [vmem:[#allocation41_spill] sm:$0xff] }
 0x51a   : > { %v6545_v60 = vadd.f32 %v6544_v28, %v6543_v41  ;;  %v6948_v50 = vrot.slane %v6947_v9, 1  ;;  %v16097_v28 = vld [vmem:[#allocation67_spill] sm:$0xff]  ;;  %v16101_v41 = vld [vmem:[#allocation21_spill] sm:$0xff] }
 0x51b   : > { %v6896_v20 = vadd.f32 %v6895_v5, %v6894_v16  ;;  %v13215_v40 = vmul.f32 0.00390625, %v6492_v59  ;;  %v16086_v16 = vld [vmem:[#allocation35_spill] sm:$0xff]  ;;  %v16096_v59 = vld [vmem:[#allocation18_spill] sm:$0xff] }
 0x51c   : > { %v6949_v23 = vadd.f32 %v6948_v50, %v6947_v9  ;;  %v13217_v61 = vmul.f32 0.00390625, %v6545_v60  ;;  %v16087_v9 = vld [vmem:[#allocation15_spill] sm:$0xff]  ;;  %v16112_v60 = vld [vmem:[#allocation74_spill] sm:$0xff] }
 0x51d   : > { %v7060_v26 = vmul.f32 0.00390625, %v6896_v20  ;;  %v7064_v47 = vmul.f32 %v13215_v40, %v13215_v40  ;;  %v16113_v18 = vsub.f32 %v12766_v52, %v13215_v40  ;;  %v16114_v55 = vsub.f32 %v12772_v22, %v13215_v40 }
 0x51e   : > { %5803 = vmatmul.mubr.bf16.vlgmr.msra.gmra.mrb[96].mxu1 %v16087_v9  ;;  %v7061_v50 = vmul.f32 0.00390625, %v6949_v23  ;;  %v16090_v9 = vld [vmem:[#allocation28_spill] sm:$0xff]  ;;  %v16092_v23 = vld [vmem:[#allocation9_spill] sm:$0xff]  ;;  %v7093_v27 = vsub.f32 0.0, %v13217_v61  ;;  %v16115_v31 = vsub.f32 %v12780_v14, %v13215_v40  ;;  %v16116_v52 = vsub.f32 %v16083_v45, %v13215_v40 }
 0x51f   : > { %v7068_v10 = vsub.f32 %v7060_v26, %v7064_v47  ;;  %5812 = vmatprep.mubr.bf16.mxu1 %v15727_v25  ;;  %v16088_v26 = vld [vmem:[#allocation26_spill] sm:$0xff]  ;;  %v16117_v22 = vsub.f32 %v16084_v19, %v13215_v40  ;;  %v16118_v48 = vsub.f32 %v16085_v1, %v13215_v40 }
 0x520   : > { %v16089_v47 = vld [vmem:[#allocation10_spill] sm:$0xff] }
 0x521   : > { %v7072_v20 = vmax.f32 %v7068_v10, 0.0  ;;  %v16094_v10 = vld [vmem:[#allocation14_spill] sm:$0xff] }
 0x523   : > { %v7076_v5 = vadd.f32 1e-05, %v7072_v20  ;;  %v7065_v20 = vmul.f32 %v13217_v61, %v13217_v61 }
 0x525   : > { %10958 = vrsqrt.f32 %v7076_v5  ;;  %v7069_v2 = vsub.f32 %v7061_v50, %v7065_v20  ;;  %v16093_v5 = vld [vmem:[#allocation11_spill] sm:$0xff] }
 0x526   : > { %5813 = vmatmul.mubr.bf16.gmra.mrb[100].mxu1 %v16091_v8  ;;  %v16098_v8 = vld [vmem:[#allocation38_spill] sm:$0xff] }
 0x527   : > { %5822 = vmatprep.mubr.bf16.mxu1 %v15727_v25  ;;  %v7073_v20 = vmax.f32 %v7069_v2, 0.0 }
 0x529   : > { %v7077_v50 = vadd.f32 1e-05, %v7073_v20 }
 0x52b   : > { %10960 = vrsqrt.f32 %v7077_v50  ;;  %v7092_v50 = vsub.f32 0.0, %v13215_v40 }
 0x52e   : > { %5823 = vmatmul.mubr.bf16.gmra.mrb[104].mxu1 %v16112_v60 }
 0x52f   : > { %v13347_v3 = vpop.eup %10958  ;;  %5832 = vmatprep.mubr.bf16.mxu1 %v15727_v25 }
 0x530   : > { %v7276_v46 = vmul.f32 %v13347_v3, %v16113_v18  ;;  %v7280_v30 = vmul.f32 %v13347_v3, %v16114_v55  ;;  %v7288_v60 = vmul.f32 %v13347_v3, %v16115_v31  ;;  %v7292_v18 = vmul.f32 %v13347_v3, %v16116_v52 }
 0x531   : > { %v7300_v55 = vmul.f32 %v13347_v3, %v16117_v22  ;;  %v7304_v2 = vmul.f32 %v13347_v3, %v16118_v48  ;;  %v7284_v14 = vmul.f32 %v13347_v3, %v7092_v50  ;;  %v16119_v31 = vsub.f32 %v12810_v0, %v13215_v40 }
 0x532   : > { %v7468_v57 = vmax.f32 %v7276_v46, 0.0  ;;  %v7472_v62 = vmax.f32 %v7280_v30, 0.0  ;;  %v7480_v52 = vmax.f32 %v7288_v60, 0.0  ;;  %v7484_v32 = vmax.f32 %v7292_v18, 0.0  ;;  %v16124_v18 = vld [vmem:[#allocation76_spill] sm:$0xff] }
 0x533   : > { %v7312_v45 = vmul.f32 %v13347_v3, %v16119_v31  ;;  %v7492_v20 = vmax.f32 %v7300_v55, 0.0  ;;  %v7496_v19 = vmax.f32 %v7304_v2, 0.0  ;;  %v13390_v22 = vmax.f32 %v7284_v14, 0.0 }
 0x534   : > { %v7660_v35 = vpack.c.bf16 %v7472_v62, %v7468_v57  ;;  %v16120_v48 = vsub.f32 %v16086_v16, %v13215_v40  ;;  %v16121_v0 = vsub.f32 %v12829_v29, %v13215_v40  ;;  %v16122_v50 = vsub.f32 %v12835_v15, %v13215_v40 }
 0x535   : > { %v7504_v4 = vmax.f32 %v7312_v45, 0.0  ;;  %v13396_v30 = vpack.c.bf16 %v7496_v19, %v7492_v20  ;;  %v16123_v62 = vsub.f32 %v12845_v37, %v13215_v40  ;;  %v13411_v16 = vpack.c.bf16 %v7480_v52, %v13390_v22  ;;  %v13424_v45 = vpop.eup %10960 }
 0x536   : > { %v7316_v46 = vmul.f32 %v13347_v3, %v16120_v48  ;;  %v7324_v1 = vmul.f32 %v13347_v3, %v16121_v0  ;;  %v7328_v57 = vmul.f32 %v13347_v3, %v16122_v50  ;;  %v13414_v20 = vpack.c.bf16 %v13390_v22, %v7484_v32  ;;  %5833 = vmatmul.mubr.bf16.gmra.mrb[108].mxu1 %v16124_v18 }
 0x537   : > { %v7336_v2 = vmul.f32 %v13347_v3, %v16123_v62  ;;  %v13417_v29 = vpack.c.bf16 %v7504_v4, %v13390_v22  ;;  %v16125_v37 = vsub.f32 %v12853_v21, %v13215_v40  ;;  %5842 = vmatprep.mubr.bf16.mxu1 %v15727_v25  ;;  %v16126_v4 = vsub.f32 %v12861_v56, %v13215_v40 }
 0x538   : > { %v7508_v60 = vmax.f32 %v7316_v46, 0.0  ;;  %v7516_v15 = vmax.f32 %v7324_v1, 0.0  ;;  %v7520_v55 = vmax.f32 %v7328_v57, 0.0  ;;  %v16127_v19 = vsub.f32 %v12867_v6, %v13215_v40 }
 0x539   : > { %v7528_v14 = vmax.f32 %v7336_v2, 0.0  ;;  %v7340_v31 = vmul.f32 %v13347_v3, %v16125_v37  ;;  %v7348_v52 = vmul.f32 %v13347_v3, %v16126_v4  ;;  %v16128_v21 = vsub.f32 %v12877_v58, %v13215_v40 }
 0x53a   : > { %v13428_v32 = vpack.c.bf16 %v13390_v22, %v7508_v60  ;;  %v7352_v48 = vmul.f32 %v13347_v3, %v16127_v19  ;;  %v16129_v0 = vsub.f32 %v16088_v26, %v13217_v61  ;;  %v16130_v56 = vsub.f32 %v16089_v47, %v13217_v61 }
 0x53b   : > { %v7360_v46 = vmul.f32 %v13347_v3, %v16128_v21  ;;  %v7285_v57 = vmul.f32 %v13424_v45, %v7093_v27  ;;  %v16131_v6 = vsub.f32 %v16090_v9, %v13217_v61  ;;  %v16132_v58 = vsub.f32 %v16092_v23, %v13217_v61 }
 0x53c   : > { %v7277_v1 = vmul.f32 %v13424_v45, %v16129_v0  ;;  %v7281_v50 = vmul.f32 %v13424_v45, %v16130_v56  ;;  %v16133_v26 = vsub.f32 %v12799_v49, %v13217_v61  ;;  %v16134_v47 = vsub.f32 %v16093_v5, %v13217_v61 }
 0x53d   : > { %v7289_v62 = vmul.f32 %v13424_v45, %v16131_v6  ;;  %v7293_v2 = vmul.f32 %v13424_v45, %v16132_v58  ;;  %v16135_v9 = vsub.f32 %v16094_v10, %v13217_v61  ;;  %v13471_v23 = vmax.f32 %v7285_v57, 0.0 }
 0x53e   : > { %v7301_v60 = vmul.f32 %v13424_v45, %v16133_v26  ;;  %v7305_v27 = vmul.f32 %v13424_v45, %v16134_v47  ;;  %v7469_v37 = vmax.f32 %v7277_v1, 0.0  ;;  %v7473_v4 = vmax.f32 %v7281_v50, 0.0 }
 0x53f   : > { %v7313_v18 = vmul.f32 %v13424_v45, %v16135_v9  ;;  %v7481_v19 = vmax.f32 %v7289_v62, 0.0  ;;  %v7485_v21 = vmax.f32 %v7293_v2, 0.0  ;;  %v16136_v5 = vsub.f32 %v12822_v33, %v13217_v61  ;;  %v16139_v33 = vld [vmem:[#allocation77_spill] sm:$0xff] }
 0x540   : > { %v7493_v0 = vmax.f32 %v7301_v60, 0.0  ;;  %v7497_v49 = vmax.f32 %v7305_v27, 0.0  ;;  %v7661_v6 = vpack.c.bf16 %v7473_v4, %v7469_v37  ;;  %v16137_v10 = vsub.f32 %v12832_v38, %v13217_v61  ;;  %5843 = vmatmul.mubr.bf16.gmra.mrb[112].mxu1 %v16139_v33 }
 0x541   : > { %v7505_v56 = vmax.f32 %v7313_v18, 0.0  ;;  %v7665_v58 = vpack.c.bf16 %v7481_v19, %v13471_v23  ;;  %v7317_v26 = vmul.f32 %v13424_v45, %v16136_v5  ;;  %v7669_v50 = vpack.c.bf16 %v13471_v23, %v7485_v21  ;;  %5852 = vmatprep.mubr.bf16.mxu1 %v15727_v25 }
 0x542   : > { %v7325_v1 = vmul.f32 %v13424_v45, %v16137_v10  ;;  %v13483_v57 = vpack.c.bf16 %v7497_v49, %v7493_v0  ;;  %v16138_v2 = vsub.f32 %v12838_v24, %v13217_v61  ;;  %8051 = vmatprep.mubr.bf16.mxu0 %v7661_v6  ;;  %v13493_v38 = vpack.c.bf16 %v7520_v55, %v7516_v15 }
 0x543   : > { %v13486_v62 = vpack.c.bf16 %v7505_v56, %v13471_v23  ;;  %v7509_v47 = vmax.f32 %v7317_v26, 0.0  ;;  %v16140_v9 = vsub.f32 %v16095_v7, %v13217_v61  ;;  %8052 = vmatmul.mubr.bf16.vlgmr.msra.gmra.mrb[96].mxu0 %v7660_v35  ;;  %v13501_v24 = vpack.c.bf16 %v7528_v14, %v13390_v22 }
 0x544   : > { %v7329_v60 = vmul.f32 %v13424_v45, %v16138_v2  ;;  %v7517_v27 = vmax.f32 %v7325_v1, 0.0  ;;  %v16141_v4 = vsub.f32 %v12856_v12, %v13217_v61  ;;  %v7532_v21 = vmax.f32 %v7340_v31, 0.0  ;;  %8059 = vmatprep.mubr.bf16.mxu0 %v7665_v58 }
 0x545   : > { %v7337_v18 = vmul.f32 %v13424_v45, %v16140_v9  ;;  %v13508_v15 = vpack.c.bf16 %v13471_v23, %v7509_v47  ;;  %v16142_v35 = vsub.f32 %v12864_v54, %v13217_v61  ;;  %v16143_v14 = vsub.f32 %v16096_v59, %v13217_v61 }
 0x546   : > { %v7521_v37 = vmax.f32 %v7329_v60, 0.0  ;;  %v7341_v19 = vmul.f32 %v13424_v45, %v16141_v4  ;;  %v13521_v31 = vpack.c.bf16 %v13390_v22, %v7532_v21  ;;  %v7540_v56 = vmax.f32 %v7348_v52, 0.0  ;;  %v16149_v4 = vld [vmem:[#allocation34_spill] sm:$0xff] }
 0x547   : > { %v7529_v7 = vmax.f32 %v7337_v18, 0.0  ;;  %v7349_v55 = vmul.f32 %v13424_v45, %v16142_v35  ;;  %v7353_v0 = vmul.f32 %v13424_v45, %v16143_v14  ;;  %v7544_v54 = vmax.f32 %v7352_v48, 0.0 }
 0x548   : > { %v13518_v49 = vpack.c.bf16 %v7521_v37, %v7517_v27  ;;  %v7533_v12 = vmax.f32 %v7341_v19, 0.0  ;;  %v16144_v59 = vsub.f32 %v16097_v28, %v13217_v61  ;;  %v7552_v1 = vmax.f32 %v7360_v46, 0.0  ;;  %5853 = vmatmul.mubr.bf16.gmra.mrb[116].mxu1 %v16149_v4 }
 0x549   : > { %v13524_v6 = vpack.c.bf16 %v7529_v7, %v13471_v23  ;;  %v7541_v58 = vmax.f32 %v7349_v55, 0.0  ;;  %v7545_v5 = vmax.f32 %v7353_v0, 0.0  ;;  %v16145_v2 = vsub.f32 %v16098_v8, %v13217_v61  ;;  %5862 = vmatprep.mubr.bf16.mxu1 %v15727_v25 }
 0x54a   : > { %v13527_v26 = vpack.c.bf16 %v13471_v23, %v7533_v12  ;;  %v7361_v10 = vmul.f32 %v13424_v45, %v16144_v59  ;;  %v13539_v33 = vpack.c.bf16 %v7544_v54, %v7540_v56  ;;  %v16146_v48 = vsub.f32 %v12888_v63, %v13215_v40 }
 0x54b   : > { %v7365_v52 = vmul.f32 %v13424_v45, %v16145_v2  ;;  %v13537_v60 = vpack.c.bf16 %v7545_v5, %v7541_v58  ;;  %v16147_v28 = vsub.f32 %v12917_v43, %v13217_v61  ;;  %v13550_v9 = vpack.c.bf16 %v7552_v1, %v13390_v22  ;;  %8060 = vmatmul.mubr.bf16.gmra.mrb[100].mxu0 %v13411_v16 }
 0x54c   : > { %v7364_v47 = vmul.f32 %v13347_v3, %v16146_v48  ;;  %v7553_v46 = vmax.f32 %v7361_v10, 0.0  ;;  %v16148_v18 = vsub.f32 %v12931_v39, %v13217_v61  ;;  %v16150_v21 = vsub.f32 %v12911_v34, %v13215_v40  ;;  %8067 = vmatprep.mubr.bf16.mxu0 %v7669_v50 }
 0x54d   : > { %v7373_v27 = vmul.f32 %v13424_v45, %v16147_v28  ;;  %v7557_v8 = vmax.f32 %v7365_v52, 0.0  ;;  %v16151_v7 = vsub.f32 %v12922_v44, %v13215_v40  ;;  %v16152_v34 = vsub.f32 %v16099_v13, %v13217_v61 }
 0x54e   : > { %v7377_v37 = vmul.f32 %v13424_v45, %v16148_v18  ;;  %v7556_v63 = vmax.f32 %v7364_v47, 0.0  ;;  %v7372_v43 = vmul.f32 %v13347_v3, %v16150_v21  ;;  %v13568_v39 = vpack.c.bf16 %v7553_v46, %v13471_v23 }
 0x54f   : > { %v7565_v19 = vmax.f32 %v7373_v27, 0.0  ;;  %v7376_v35 = vmul.f32 %v13347_v3, %v16151_v7  ;;  %v13571_v55 = vpack.c.bf16 %v13471_v23, %v7557_v8  ;;  %v7385_v0 = vmul.f32 %v13424_v45, %v16152_v34  ;;  %v16162_v7 = vld [vmem:[#allocation40_spill] sm:$0xff] }
 0x550   : > { %v7569_v14 = vmax.f32 %v7377_v37, 0.0  ;;  %v13578_v44 = vpack.c.bf16 %v13390_v22, %v7556_v63  ;;  %v7564_v12 = vmax.f32 %v7372_v43, 0.0  ;;  %v16153_v56 = vsub.f32 %v12955_v11, %v13215_v40  ;;  %5863 = vmatmul.mubr.bf16.gmra.mrb[120].mxu1 %v16162_v7 }
 0x551   : > { %v7568_v16 = vmax.f32 %v7376_v35, 0.0  ;;  %v7577_v54 = vmax.f32 %v7385_v0, 0.0  ;;  %v16154_v59 = vsub.f32 %v16100_v36, %v13217_v61  ;;  %v16155_v50 = vsub.f32 %v12980_v51, %v13215_v40  ;;  %5872 = vmatprep.mubr.bf16.mxu1 %v15727_v25 }
 0x552   : > { %v7384_v58 = vmul.f32 %v13347_v3, %v16153_v56  ;;  %v13584_v5 = vpack.c.bf16 %v7569_v14, %v7565_v19  ;;  %v16156_v11 = vsub.f32 %v16101_v41, %v13217_v61  ;;  %v16157_v48 = vsub.f32 %v16102_v53, %v13217_v61 }
 0x553   : > { %v7389_v13 = vmul.f32 %v13424_v45, %v16154_v59  ;;  %v7388_v10 = vmul.f32 %v13347_v3, %v16155_v50  ;;  %v13594_v1 = vpack.c.bf16 %v7568_v16, %v7564_v12  ;;  %v13605_v47 = vpack.c.bf16 %v7577_v54, %v13471_v23  ;;  %v16165_v12 = vld [vmem:[#allocation45_spill] sm:$0xff]  ;;  %8068 = vmatmul.mubr.bf16.gmra.mrb[104].mxu0 %v13414_v20  ;;  %v16167_v54 = vld [vmem:[#allocation24_spill] sm:$0xff]  ;;  %v16169_v50 = vld [vmem:[#allocation22_spill] sm:$0xff] }
 0x554   : > { %v7576_v2 = vmax.f32 %v7384_v58, 0.0  ;;  %v7397_v52 = vmul.f32 %v13424_v45, %v16156_v11  ;;  %v7401_v36 = vmul.f32 %v13424_v45, %v16157_v48  ;;  %v16158_v27 = vsub.f32 %v13008_v17, %v13215_v40  ;;  %v16160_v17 = vld [vmem:[#allocation20_spill] sm:$0xff]  ;;  %v16171_v11 = vld [vmem:[#allocation49_spill] sm:$0xff]  ;;  %8075 = vmatprep.mubr.bf16.mxu0 %v13483_v57 }
 0x555   : > { %v7581_v28 = vmax.f32 %v7389_v13, 0.0  ;;  %v7580_v51 = vmax.f32 %v7388_v10, 0.0  ;;  %v16159_v53 = vsub.f32 %v13020_v42, %v13215_v40  ;;  %v16161_v21 = vsub.f32 %v16160_v17, %v13217_v61  ;;  %v16163_v42 = vld [vmem:[#allocation19_spill] sm:$0xff] }
 0x556   : > { %v7396_v46 = vmul.f32 %v13347_v3, %v16158_v27  ;;  %v13612_v8 = vpack.c.bf16 %v7576_v2, %v13390_v22  ;;  %v7589_v41 = vmax.f32 %v7397_v52, 0.0  ;;  %v7593_v18 = vmax.f32 %v7401_v36, 0.0 }
 0x557   : > { %v7400_v37 = vmul.f32 %v13347_v3, %v16159_v53  ;;  %v13619_v4 = vpack.c.bf16 %v13471_v23, %v7581_v28  ;;  %v13622_v63 = vpack.c.bf16 %v13390_v22, %v7580_v51  ;;  %v7409_v43 = vmul.f32 %v13424_v45, %v16161_v21  ;;  %v16173_v51 = vld [vmem:[#allocation23_spill] sm:$0xff] }
 0x558   : > { %v7588_v19 = vmax.f32 %v7396_v46, 0.0  ;;  %v13629_v35 = vpack.c.bf16 %v7593_v18, %v7589_v41  ;;  %v16164_v34 = vsub.f32 %v16163_v42, %v13215_v40  ;;  %v16166_v16 = vsub.f32 %v16165_v12, %v13217_v61 }
 0x559   : > { %v7592_v14 = vmax.f32 %v7400_v37, 0.0  ;;  %v7601_v58 = vmax.f32 %v7409_v43, 0.0  ;;  %v16168_v59 = vsub.f32 %v16167_v54, %v13215_v40  ;;  %v16170_v10 = vsub.f32 %v16169_v50, %v13217_v61 }
 0x55a   : > { %v7408_v0 = vmul.f32 %v13347_v3, %v16164_v34  ;;  %v7413_v56 = vmul.f32 %v13424_v45, %v16166_v16  ;;  %v16172_v52 = vsub.f32 %v16171_v11, %v13217_v61  ;;  %v16174_v27 = vsub.f32 %v16173_v51, %v13215_v40  ;;  %v16177_v34 = vld [vmem:[#allocation27_spill] sm:$0xff]  ;;  %v16179_v16 = vld [vmem:[#allocation25_spill] sm:$0xff] }
 0x55b   : > { %v7412_v13 = vmul.f32 %v13347_v3, %v16168_v59  ;;  %v7421_v2 = vmul.f32 %v13424_v45, %v16170_v10  ;;  %v13654_v20 = vpack.c.bf16 %v7592_v14, %v7588_v19  ;;  %v13661_v41 = vpack.c.bf16 %v7601_v58, %v13471_v23  ;;  %v16175_v19 = vld [vmem:[#allocation29_spill] sm:$0xff]  ;;  %v16181_v59 = vld [vmem:[#allocation30_spill] sm:$0xff]  ;;  %8076 = vmatmul.mubr.bf16.gmra.mrb[108].mxu0 %v13396_v30 }
 0x55c   : > { %v7425_v48 = vmul.f32 %v13424_v45, %v16172_v52  ;;  %v7600_v36 = vmax.f32 %v7408_v0, 0.0  ;;  %v7605_v28 = vmax.f32 %v7413_v56, 0.0  ;;  %v7420_v46 = vmul.f32 %v13347_v3, %v16174_v27  ;;  %v16183_v10 = vld [vmem:[#allocation33_spill] sm:$0xff]  ;;  %v16185_v52 = vld [vmem:[#allocation31_spill] sm:$0xff]  ;;  %v16187_v27 = vld [vmem:[#allocation56_spill] sm:$0xff]  ;;  %8083 = vmatprep.mubr.bf16.mxu0 %v13486_v62 }
 0x55d   : > { %v7604_v18 = vmax.f32 %v7412_v13, 0.0  ;;  %v7613_v53 = vmax.f32 %v7421_v2, 0.0  ;;  %v16176_v21 = vsub.f32 %v16175_v19, %v13215_v40  ;;  %v16178_v0 = vsub.f32 %v16177_v34, %v13217_v61 }
 0x55e   : > { %v7617_v37 = vmax.f32 %v7425_v48, 0.0  ;;  %v13664_v17 = vpack.c.bf16 %v7600_v36, %v13390_v22  ;;  %v13667_v57 = vpack.c.bf16 %v13471_v23, %v7605_v28  ;;  %v7612_v7 = vmax.f32 %v7420_v46, 0.0 }
 0x55f   : > { %v7424_v43 = vmul.f32 %v13347_v3, %v16176_v21  ;;  %v13674_v14 = vpack.c.bf16 %v13390_v22, %v7604_v18  ;;  %v7433_v12 = vmul.f32 %v13424_v45, %v16178_v0  ;;  %v16180_v56 = vsub.f32 %v16179_v16, %v13215_v40  ;;  %v16191_v21 = vld [vmem:[#allocation47_spill] sm:$0xff] }
 0x560   : > { %v13676_v42 = vpack.c.bf16 %v7617_v37, %v7613_v53  ;;  %v16182_v13 = vsub.f32 %v16181_v59, %v13217_v61  ;;  %v16184_v2 = vsub.f32 %v16183_v10, %v13215_v40  ;;  %v16186_v48 = vsub.f32 %v16185_v52, %v13217_v61  ;;  %v16189_v53 = vld [vmem:[#allocation53_spill] sm:$0xff]  ;;  %5873 = vmatmul.mubr.bf16.gmra.mrb[124].mxu1 %v16191_v21  ;;  %v16192_v59 = vld [vmem:[#allocation36_spill] sm:$0xff]  ;;  %v16194_v10 = vld [vmem:[#allocation39_spill] sm:$0xff] }
 0x561   : > { %v7432_v58 = vmul.f32 %v13347_v3, %v16180_v56  ;;  %v7616_v54 = vmax.f32 %v7424_v43, 0.0  ;;  %v7625_v28 = vmax.f32 %v7433_v12, 0.0  ;;  %v16188_v46 = vsub.f32 %v16187_v27, %v13217_v61  ;;  %5882 = vmatprep.mubr.bf16.mxu1 %v15727_v25 }
 0x562   : > { %v7437_v50 = vmul.f32 %v13424_v45, %v16182_v13  ;;  %v7436_v11 = vmul.f32 %v13347_v3, %v16184_v2  ;;  %v7445_v36 = vmul.f32 %v13424_v45, %v16186_v48  ;;  %v16190_v37 = vsub.f32 %v16189_v53, %v13215_v40  ;;  %v16200_v53 = vld [vmem:[#allocation62_spill] sm:$0xff] }
 0x563   : > { %v7624_v51 = vmax.f32 %v7432_v58, 0.0  ;;  %v7449_v18 = vmul.f32 %v13424_v45, %v16188_v46  ;;  %v13707_v43 = vpack.c.bf16 %v7616_v54, %v7612_v7  ;;  %v13712_v12 = vpack.c.bf16 %v7625_v28, %v13471_v23  ;;  %8084 = vmatmul.mubr.bf16.gmra.mrb[112].mxu0 %v13417_v29  ;;  %v16206_v29 = vld [vmem:[#allocation65_spill] sm:$0xff] }
 0x564   : > { %v7444_v19 = vmul.f32 %v13347_v3, %v16190_v37  ;;  %v7629_v34 = vmax.f32 %v7437_v50, 0.0  ;;  %v7628_v0 = vmax.f32 %v7436_v11, 0.0  ;;  %v7637_v16 = vmax.f32 %v7445_v36, 0.0  ;;  %v16196_v36 = vld [vmem:[#allocation37_spill] sm:$0xff]  ;;  %8091 = vmatprep.mubr.bf16.mxu0 %v13508_v15 }
 0x565   : > { %v13715_v56 = vpack.c.bf16 %v7624_v51, %v13390_v22  ;;  %v7641_v58 = vmax.f32 %v7449_v18, 0.0  ;;  %v16193_v13 = vsub.f32 %v16192_v59, %v13215_v40  ;;  %v16195_v2 = vsub.f32 %v16194_v10, %v13217_v61  ;;  %v16198_v51 = vld [vmem:[#allocation43_spill] sm:$0xff]  ;;  %v10942_v15 = vld [vmem:[#allocation4 + $0x80] sm:$0xff]  }
 0x566   : > { %v13723_v54 = vpack.c.bf16 %v13471_v23, %v7629_v34  ;;  %v13726_v30 = vpack.c.bf16 %v13390_v22, %v7628_v0  ;;  %v7636_v50 = vmax.f32 %v7444_v19, 0.0  ;;  %v16197_v28 = vsub.f32 %v16196_v36, %v13215_v40  ;;  %8245 = vmatpush1.bf16.msra.mxu0 %v10942_v15 }
 0x567   : > { %v7448_v7 = vmul.f32 %v13347_v3, %v16193_v13  ;;  %v7457_v11 = vmul.f32 %v13424_v45, %v16195_v2  ;;  %v13732_v52 = vpack.c.bf16 %v7641_v58, %v7637_v16  ;;  %v16199_v27 = vsub.f32 %v16198_v51, %v13217_v61  ;;  %8246 = vmatprep.subr.bf16.mxu0 %v15727_v25 }
 0x568   : > { %v7456_v62 = vmul.f32 %v13347_v3, %v16197_v28  ;;  %v16201_v37 = vsub.f32 %v16200_v53, %v13215_v40 }
 0x569   : > { %v7640_v48 = vmax.f32 %v7448_v7, 0.0  ;;  %v7461_v46 = vmul.f32 %v13424_v45, %v16199_v27  ;;  %v7649_v18 = vmax.f32 %v7457_v11, 0.0  ;;  %v16202_v45 = vld [vmem:[#allocation55_spill] sm:$0xff]  ;;  %v10950_v7 = vld [vmem:[#allocation4 + $0xc0] sm:$0xff]  }
 0x56a   : > { %v7460_v19 = vmul.f32 %v13347_v3, %v16201_v37  ;;  %v7648_v34 = vmax.f32 %v7456_v62, 0.0  ;;  %5883 = vmatmul.mubr.bf16.gmra.mrb[128].mxu1 %v16202_v45  ;;  %v16203_v3 = vld [vmem:[#allocation58_spill] sm:$0xff] }
 0x56b   : > { %v13746_v21 = vpack.c.bf16 %v7640_v48, %v7636_v50  ;;  %v7653_v0 = vmax.f32 %v7461_v46, 0.0  ;;  %v13749_v16 = vpack.c.bf16 %v7649_v18, %v13471_v23  ;;  %5892 = vmatprep.mubr.bf16.mxu1 %v15727_v25  ;;  %8092 = vmatmul.mubr.bf16.gmra.mrb[116].mxu0 %v13428_v32  ;;  %v16207_v32 = vld [vmem:[#allocation68_spill] sm:$0xff] }
 0x56c   : > { %v7652_v58 = vmax.f32 %v7460_v19, 0.0  ;;  %v13752_v59 = vpack.c.bf16 %v7648_v34, %v13390_v22  ;;  %8099 = vmatprep.mubr.bf16.mxu0 %v13518_v49  ;;  %v16210_v49 = vld [vmem:[#allocation110_spill] sm:$0xff] }
 0x56d   : > { %v13755_v61 = vpack.c.bf16 %v13471_v23, %v7653_v0  ;;  %v16204_v23 = vld [vmem:[#allocation60_spill] sm:$0xff]  ;;  %v10951_v0 = vld [vmem:[#allocation4 + $0xc8] sm:$0xff]  }
 0x56e   : > { %v13759_v40 = vpack.c.bf16 %v13390_v22, %v7652_v58  ;;  %v16205_v22 = vld [vmem:[#allocation63_spill] sm:$0xff] }
 0x572   : > { %5893 = vmatmul.mubr.bf16.gmra.mrb[132].mxu1 %v16203_v3 }
 0x573   : > { %5902 = vmatprep.mubr.bf16.mxu1 %v15727_v25  ;;  %8100 = vmatmul.mubr.bf16.gmra.mrb[120].mxu0 %v13493_v38  ;;  %v16208_v38 = vld [vmem:[#allocation70_spill] sm:$0xff] }
 0x574   : > { %8107 = vmatprep.mubr.bf16.mxu0 %v13524_v6  ;;  %v16211_v6 = vld [vmem:[#allocation112_spill] sm:$0xff] }
 0x57a   : > { %5903 = vmatmul.mubr.bf16.gmra.mrb[136].mxu1 %v16204_v23 }
 0x57b   : > { %5912 = vmatprep.mubr.bf16.mxu1 %v15727_v25  ;;  %8108 = vmatmul.mubr.bf16.gmra.mrb[124].mxu0 %v13501_v24  ;;  %v16209_v24 = vld [vmem:[#allocation73_spill] sm:$0xff] }
 0x57c   : > { %8115 = vmatprep.mubr.bf16.mxu0 %v13527_v26  ;;  %v16212_v26 = vld [vmem:[#allocation78_spill] sm:$0xff] }
 0x582   : > { %5913 = vmatmul.mubr.bf16.gmra.mrb[140].mxu1 %v16205_v22 }
 0x583   : > { %5922 = vmatprep.mubr.bf16.mxu1 %v15727_v25  ;;  %8116 = vmatmul.mubr.bf16.gmra.mrb[128].mxu0 %v13521_v31  ;;  %v10943_v31 = vld [vmem:[#allocation4 + $0x88] sm:$0xff]  }
 0x584   : > { %8123 = vmatprep.mubr.bf16.mxu0 %v13537_v60  ;;  %8247 = vmatpush1.bf16.msra.mxu0 %v10943_v31  ;;  %v10944_v60 = vld [vmem:[#allocation4 + $0x90] sm:$0xff]  }
 0x585   : > { %8248 = vmatprep.subr.bf16.mxu0 %v15727_v25 }
 0x588   : > { %8249 = vmatpush1.bf16.msra.mxu0 %v10944_v60 }
 0x589   : > { %8250 = vmatprep.subr.bf16.mxu0 %v15727_v25 }
 0x58a   : > { %5923 = vmatmul.mubr.bf16.gmra.mrb[144].mxu1 %v16206_v29 }
 0x58b   : > { %5932 = vmatprep.mubr.bf16.mxu1 %v15727_v25  ;;  %8124 = vmatmul.mubr.bf16.gmra.mrb[132].mxu0 %v13539_v33  ;;  %v16213_v33 = vld [vmem:[#allocation79_spill] sm:$0xff] }
 0x58c   : > { %8131 = vmatprep.mubr.bf16.mxu0 %v13568_v39  ;;  %v16214_v39 = vld [vmem:[#allocation80_spill] sm:$0xff] }
 0x592   : > { %5933 = vmatmul.mubr.bf16.gmra.mrb[148].mxu1 %v16207_v32 }
 0x593   : > { %5942 = vmatprep.mubr.bf16.mxu1 %v15727_v25  ;;  %8132 = vmatmul.mubr.bf16.gmra.mrb[136].mxu0 %v13550_v9  ;;  %v10945_v9 = vld [vmem:[#allocation4 + $0x98] sm:$0xff]  }
 0x594   : > { %8139 = vmatprep.mubr.bf16.mxu0 %v13571_v55  ;;  %8251 = vmatpush1.bf16.msra.mxu0 %v10945_v9  ;;  %v16215_v55 = vld [vmem:[#allocation115_spill] sm:$0xff] }
 0x595   : > { %8252 = vmatprep.subr.bf16.mxu0 %v15727_v25 }
 0x59a   : > { %5943 = vmatmul.mubr.bf16.gmra.mrb[152].mxu1 %v16208_v38 }
 0x59b   : > { %5952 = vmatprep.mubr.bf16.mxu1 %v15727_v25  ;;  %8140 = vmatmul.mubr.bf16.gmra.mrb[140].mxu0 %v13578_v44  ;;  %v10946_v44 = vld [vmem:[#allocation4 + $0xa0] sm:$0xff]  }
 0x59c   : > { %8147 = vmatprep.mubr.bf16.mxu0 %v13584_v5  ;;  %8253 = vmatpush1.bf16.msra.mxu0 %v10946_v44  ;;  %v16216_v5 = vld [vmem:[#allocation116_spill] sm:$0xff] }
 0x59d   : > { %8254 = vmatprep.subr.bf16.mxu0 %v15727_v25 }
 0x5a2   : > { %5953 = vmatmul.mubr.bf16.gmra.mrb[156].mxu1 %v16209_v24 }
 0x5a3   : > { %5962 = vmatprep.mubr.bf16.mxu1 %v15727_v25  ;;  %8148 = vmatmul.mubr.bf16.gmra.mrb[144].mxu0 %v13594_v1  ;;  %v10947_v1 = vld [vmem:[#allocation4 + $0xa8] sm:$0xff]  }
 0x5a4   : > { %8155 = vmatprep.mubr.bf16.mxu0 %v13605_v47  ;;  %v16217_v47 = vld [vmem:[#allocation75_spill] sm:$0xff]  ;;  %8255 = vmatpush1.bf16.msra.mxu0 %v10947_v1 }
 0x5a5   : > { %8256 = vmatprep.subr.bf16.mxu0 %v15727_v25 }
 0x5aa   : > { %5963 = vmatmul.mubr.bf16.gmra.mrb[160].mxu1 %v16210_v49 }
 0x5ab   : > { %5972 = vmatprep.mubr.bf16.mxu1 %v15727_v25  ;;  %8156 = vmatmul.mubr.bf16.gmra.mrb[148].mxu0 %v13612_v8  ;;  %v10948_v8 = vld [vmem:[#allocation4 + $0xb0] sm:$0xff]  }
 0x5ac   : > { %8163 = vmatprep.mubr.bf16.mxu0 %v13619_v4  ;;  %8257 = vmatpush1.bf16.msra.mxu0 %v10948_v8  ;;  %v10949_v4 = vld [vmem:[#allocation4 + $0xb8] sm:$0xff]  }
 0x5ad   : > { %8258 = vmatprep.subr.bf16.mxu0 %v15727_v25 }
 0x5b0   : > { %8259 = vmatpush1.bf16.msra.mxu0 %v10949_v4 }
 0x5b1   : > { %8260 = vmatprep.subr.bf16.mxu0 %v15727_v25 }
 0x5b2   : > { %5973 = vmatmul.mubr.bf16.gmra.mrb[164].mxu1 %v16211_v6  ;;  %v10952_v6 = vld [vmem:[#allocation4 + $0xd0] sm:$0xff]  }
 0x5b3   : > { %5982 = vmatprep.mubr.bf16.mxu1 %v15727_v25  ;;  %8164 = vmatmul.mubr.bf16.gmra.mrb[152].mxu0 %v13622_v63 }
 0x5b4   : > { %8171 = vmatprep.mubr.bf16.mxu0 %v13629_v35  ;;  %8261 = vmatpush1.bf16.msra.mxu0 %v10950_v7  ;;  %v10953_v7 = vld [vmem:[#allocation4 + $0xd8] sm:$0xff]  }
 0x5b5   : > { %8262 = vmatprep.subr.bf16.mxu0 %v15727_v25 }
 0x5b8   : > { %8263 = vmatpush1.bf16.msra.mxu0 %v10951_v0  ;;  %v10954_v0 = vld [vmem:[#allocation4 + $0xe0] sm:$0xff]  }
 0x5b9   : > { %8264 = vmatprep.subr.bf16.mxu0 %v15727_v25 }
 0x5ba   : > { %5983 = vmatmul.mubr.bf16.gmra.mrb[168].mxu1 %v16212_v26 }
 0x5bb   : > { %5992 = vmatprep.mubr.bf16.mxu1 %v15727_v25  ;;  %8172 = vmatmul.mubr.bf16.gmra.mrb[156].mxu0 %v13654_v20 }
 0x5bc   : > { %8179 = vmatprep.mubr.bf16.mxu0 %v13661_v41  ;;  %8265 = vmatpush1.bf16.msra.mxu0 %v10952_v6 }
 0x5bd   : > { %8266 = vmatprep.subr.bf16.mxu0 %v15727_v25 }
 0x5c0   : > { %8267 = vmatpush1.bf16.msra.mxu0 %v10953_v7 }
 0x5c1   : > { %8268 = vmatprep.subr.bf16.mxu0 %v15727_v25 }
 0x5c2   : > { %5993 = vmatmul.mubr.bf16.gmra.mrb[172].mxu1 %v16213_v33 }
 0x5c3   : > { %6002 = vmatprep.mubr.bf16.mxu1 %v15727_v25  ;;  %8180 = vmatmul.mubr.bf16.gmra.mrb[160].mxu0 %v13664_v17 }
 0x5c4   : > { %8187 = vmatprep.mubr.bf16.mxu0 %v13667_v57  ;;  %8269 = vmatpush1.bf16.msra.mxu0 %v10954_v0 }
 0x5c5   : > { %8270 = vmatprep.subr.bf16.mxu0 %v15727_v25 }
 0x5ca   : > { %6003 = vmatmul.mubr.bf16.gmra.mrb[176].mxu1 %v16214_v39 }
 0x5cb   : > { %6012 = vmatprep.mubr.bf16.mxu1 %v15727_v25  ;;  %8188 = vmatmul.mubr.bf16.gmra.mrb[164].mxu0 %v13674_v14 }
 0x5cc   : > { %8195 = vmatprep.mubr.bf16.mxu0 %v13676_v42 }
 0x5d2   : > { %6013 = vmatmul.mubr.bf16.gmra.mrb[180].mxu1 %v16215_v55 }
 0x5d3   : > { %6022 = vmatprep.mubr.bf16.mxu1 %v15727_v25  ;;  %8196 = vmatmul.mubr.bf16.gmra.mrb[168].mxu0 %v13707_v43 }
 0x5d4   : > { %8203 = vmatprep.mubr.bf16.mxu0 %v13712_v12 }
 0x5da   : > { %6023 = vmatmul.mubr.bf16.gmra.mrb[184].mxu1 %v16216_v5 }
 0x5db   : > { %6032 = vmatprep.mubr.bf16.mxu1 %v15727_v25  ;;  %8204 = vmatmul.mubr.bf16.gmra.mrb[172].mxu0 %v13715_v56 }
 0x5dc   : > { %8211 = vmatprep.mubr.bf16.mxu0 %v13723_v54 }
 0x5e2   : > { %6033 = vmatmul.mubr.bf16.gmra.mrb[188].mxu1 %v16217_v47 }
 0x5e3   : > { %8212 = vmatmul.mubr.bf16.gmra.mrb[176].mxu0 %v13726_v30 }
 0x5e4   : > { %8219 = vmatprep.mubr.bf16.mxu0 %v13732_v52 }
 0x5eb   : > { %8220 = vmatmul.mubr.bf16.gmra.mrb[180].mxu0 %v13746_v21 }
 0x5ec   : > { %8227 = vmatprep.mubr.bf16.mxu0 %v13749_v16 }
 0x5f1   : > { %v13836_v63 = vpop.f32.mrb[96].mxu1 }
 0x5f2   : > { %v13839_v35 = vpop.f32.mrb[97].mxu1  ;;  %v6654_v41 = vmul.f32 %v13836_v63, %v13836_v63 }
 0x5f3   : > { %8228 = vmatmul.mubr.bf16.gmra.mrb[184].mxu0 %v13752_v59  ;;  %v13841_v20 = vpop.f32.mrb[98].mxu1  ;;  %v6655_v42 = vmul.f32 %v13839_v35, %v13839_v35 }
 0x5f4   : > { %8235 = vmatprep.mubr.bf16.mxu0 %v13755_v61  ;;  %v6546_v17 = vadd.f32 %v13841_v20, %v13836_v63  ;;  %v6658_v57 = vmul.f32 %v13841_v20, %v13841_v20  ;;  %v13849_v14 = vpop.f32.mrb[99].mxu1 }
 0x5f5   : > { %v6599_v43 = vadd.f32 %v13849_v14, %v13839_v35  ;;  %v6659_v12 = vmul.f32 %v13849_v14, %v13849_v14 }
 0x5f6   : > { %v6950_v56 = vadd.f32 %v6658_v57, %v6654_v41 }
 0x5f7   : > { %v7003_v13 = vadd.f32 %v6659_v12, %v6655_v42 }
 0x5f9   : > { %v5814_v54 = vpop.f32.mrb[100].mxu1 }
 0x5fa   : > { %v5816_v30 = vpop.f32.mrb[101].mxu1 }
 0x5fb   : > { %8236 = vmatmul.mubr.bf16.gmra.mrb[188].mxu0 %v13759_v40  ;;  %v13859_v50 = vpop.f32.mrb[102].mxu1 }
 0x5fc   : > { %v6548_v10 = vadd.f32 %v6546_v17, %v13859_v50  ;;  %v6666_v2 = vmul.f32 %v13859_v50, %v13859_v50  ;;  %v13864_v11 = vpop.f32.mrb[103].mxu1 }
 0x5fd   : > { %v6601_v52 = vadd.f32 %v6599_v43, %v13864_v11  ;;  %v6667_v48 = vmul.f32 %v13864_v11, %v13864_v11 }
 0x5fe   : > { %v6952_v36 = vadd.f32 %v6950_v56, %v6666_v2 }
 0x5ff   : > { %v7005_v28 = vadd.f32 %v7003_v13, %v6667_v48 }
 0x601   : > { %v13869_v62 = vpop.f32.mrb[104].mxu1 }
 0x602   : > { %v6549_v51 = vadd.f32 %v6548_v10, %v13869_v62  ;;  %v6670_v27 = vmul.f32 %v13869_v62, %v13869_v62  ;;  %v13874_v46 = vpop.f32.mrb[105].mxu1 }
 0x603   : > { %v6602_v18 = vadd.f32 %v6601_v52, %v13874_v46  ;;  %v6671_v53 = vmul.f32 %v13874_v46, %v13874_v46  ;;  %v5828_v37 = vpop.f32.mrb[106].mxu1 }
 0x604   : > { %v6953_v19 = vadd.f32 %v6952_v36, %v6670_v27  ;;  %v5830_v21 = vpop.f32.mrb[107].mxu1 }
 0x605   : > { %v7006_v34 = vadd.f32 %v7005_v28, %v6671_v53 }
 0x609   : > { %v13880_v16 = vpop.f32.mrb[108].mxu1 }
 0x60a   : > { %v6551_v58 = vadd.f32 %v6549_v51, %v13880_v16  ;;  %v6678_v59 = vmul.f32 %v13880_v16, %v13880_v16  ;;  %v13885_v61 = vpop.f32.mrb[109].mxu1 }
 0x60b   : > { %16218 = vst [vmem:[#allocation42_spill] sm:$0xff] %v13885_v61  ;;  %v6604_v45 = vadd.f32 %v6602_v18, %v13885_v61  ;;  %v6679_v40 = vmul.f32 %v13885_v61, %v13885_v61  ;;  %v13890_v3 = vpop.f32.mrb[110].mxu1 }
 0x60c   : > { %v6955_v23 = vadd.f32 %v6953_v19, %v6678_v59  ;;  %v6552_v22 = vadd.f32 %v6551_v58, %v13890_v3  ;;  %v6682_v29 = vmul.f32 %v13890_v3, %v13890_v3  ;;  %v13895_v32 = vpop.f32.mrb[111].mxu1 }
 0x60d   : > { %16219 = vst [vmem:[#allocation46_spill] sm:$0xff] %v13895_v32  ;;  %v7008_v38 = vadd.f32 %v7006_v34, %v6679_v40  ;;  %v6605_v24 = vadd.f32 %v6604_v45, %v13895_v32  ;;  %v6683_v15 = vmul.f32 %v13895_v32, %v13895_v32 }
 0x60e   : > { %v6956_v49 = vadd.f32 %v6955_v23, %v6682_v29 }
 0x60f   : > { %v7009_v31 = vadd.f32 %v7008_v38, %v6683_v15 }
 0x613   : > { %v5844_v26 = vpop.f32.mrb[112].mxu1 }
 0x614   : > { %v5846_v60 = vpop.f32.mrb[113].mxu1 }
 0x615   : > { %v13901_v33 = vpop.f32.mrb[114].mxu1 }
 0x616   : > { %v6554_v9 = vadd.f32 %v6552_v22, %v13901_v33  ;;  %v6690_v39 = vmul.f32 %v13901_v33, %v13901_v33  ;;  %v13906_v55 = vpop.f32.mrb[115].mxu1 }
 0x617   : > { %16220 = vst [vmem:[#allocation51_spill] sm:$0xff] %v13906_v55  ;;  %v6607_v44 = vadd.f32 %v6605_v24, %v13906_v55  ;;  %v6691_v5 = vmul.f32 %v13906_v55, %v13906_v55 }
 0x618   : > { %v6958_v1 = vadd.f32 %v6956_v49, %v6690_v39 }
 0x619   : > { %v7011_v47 = vadd.f32 %v7009_v31, %v6691_v5 }
 0x61b   : > { %v13911_v8 = vpop.f32.mrb[116].mxu1 }
 0x61c   : > { %v6555_v4 = vadd.f32 %v6554_v9, %v13911_v8  ;;  %v6694_v41 = vmul.f32 %v13911_v8, %v13911_v8  ;;  %v13916_v17 = vpop.f32.mrb[117].mxu1 }
 0x61d   : > { %16221 = vst [vmem:[#allocation44_spill] sm:$0xff] %v13916_v17  ;;  %v6608_v57 = vadd.f32 %v6607_v44, %v13916_v17  ;;  %v6695_v42 = vmul.f32 %v13916_v17, %v13916_v17  ;;  %v5858_v43 = vpop.f32.mrb[118].mxu1 }
 0x61e   : > { %v6959_v12 = vadd.f32 %v6958_v1, %v6694_v41  ;;  %v5860_v56 = vpop.f32.mrb[119].mxu1 }
 0x61f   : > { %v7012_v13 = vadd.f32 %v7011_v47, %v6695_v42 }
 0x623   : > { %v13922_v54 = vpop.f32.mrb[120].mxu1 }
 0x624   : > { %v6557_v30 = vadd.f32 %v6555_v4, %v13922_v54  ;;  %v6702_v10 = vmul.f32 %v13922_v54, %v13922_v54  ;;  %v13927_v2 = vpop.f32.mrb[121].mxu1 }
 0x625   : > { %16222 = vst [vmem:[#allocation50_spill] sm:$0xff] %v13927_v2  ;;  %v6610_v52 = vadd.f32 %v6608_v57, %v13927_v2  ;;  %v6703_v48 = vmul.f32 %v13927_v2, %v13927_v2  ;;  %v13932_v36 = vpop.f32.mrb[122].mxu1 }
 0x626   : > { %v6961_v28 = vadd.f32 %v6959_v12, %v6702_v10  ;;  %v6558_v51 = vadd.f32 %v6557_v30, %v13932_v36  ;;  %v6706_v27 = vmul.f32 %v13932_v36, %v13932_v36  ;;  %v13937_v18 = vpop.f32.mrb[123].mxu1 }
 0x627   : > { %16223 = vst [vmem:[#allocation66_spill] sm:$0xff] %v13937_v18  ;;  %v7014_v53 = vadd.f32 %v7012_v13, %v6703_v48  ;;  %v6611_v37 = vadd.f32 %v6610_v52, %v13937_v18  ;;  %v6707_v19 = vmul.f32 %v13937_v18, %v13937_v18 }
 0x628   : > { %v6962_v21 = vadd.f32 %v6961_v28, %v6706_v27 }
 0x629   : > { %v7015_v34 = vadd.f32 %v7014_v53, %v6707_v19 }
 0x633   : > { %v5874_v58 = vpop.f32.mrb[124].mxu1 }
 0x634   : > { %v5876_v59 = vpop.f32.mrb[125].mxu1 }
 0x635   : > { %v13943_v45 = vpop.f32.mrb[126].mxu1 }
 0x636   : > { %v6560_v40 = vadd.f32 %v6558_v51, %v13943_v45  ;;  %v6714_v23 = vmul.f32 %v13943_v45, %v13943_v45  ;;  %v13948_v22 = vpop.f32.mrb[127].mxu1 }
 0x637   : > { %16224 = vst [vmem:[#allocation82_spill] sm:$0xff] %v13948_v22  ;;  %v6613_v29 = vadd.f32 %v6611_v37, %v13948_v22  ;;  %v6715_v38 = vmul.f32 %v13948_v22, %v13948_v22 }
 0x638   : > { %v6964_v24 = vadd.f32 %v6962_v21, %v6714_v23 }
 0x639   : > { %v7017_v15 = vadd.f32 %v7015_v34, %v6715_v38 }
 0x63d   : > { %v13953_v49 = vpop.f32.mrb[128].mxu1 }
 0x63e   : > { %v6561_v31 = vadd.f32 %v6560_v40, %v13953_v49  ;;  %v6718_v6 = vmul.f32 %v13953_v49, %v13953_v49  ;;  %v13958_v26 = vpop.f32.mrb[129].mxu1 }
 0x63f   : > { %16225 = vst [vmem:[#allocation102_spill] sm:$0xff] %v13958_v26  ;;  %v6614_v60 = vadd.f32 %v6613_v29, %v13958_v26  ;;  %v6719_v9 = vmul.f32 %v13958_v26, %v13958_v26  ;;  %v5888_v39 = vpop.f32.mrb[130].mxu1 }
 0x640   : > { %v6965_v44 = vadd.f32 %v6964_v24, %v6718_v6  ;;  %v5890_v5 = vpop.f32.mrb[131].mxu1 }
 0x641   : > { %v7018_v1 = vadd.f32 %v7017_v15, %v6719_v9 }
 0x645   : > { %v13963_v47 = vpop.f32.mrb[132].mxu1 }
 0x646   : > { %v6563_v4 = vadd.f32 %v6561_v31, %v13963_v47  ;;  %v6726_v41 = vmul.f32 %v13963_v47, %v13963_v47  ;;  %v13968_v57 = vpop.f32.mrb[133].mxu1 }
 0x647   : > { %16226 = vst [vmem:[#allocation48_spill] sm:$0xff] %v13968_v57  ;;  %v6616_v42 = vadd.f32 %v6614_v60, %v13968_v57  ;;  %v6727_v43 = vmul.f32 %v13968_v57, %v13968_v57  ;;  %v13973_v12 = vpop.f32.mrb[134].mxu1 }
 0x648   : > { %v6967_v56 = vadd.f32 %v6965_v44, %v6726_v41  ;;  %v6564_v13 = vadd.f32 %v6563_v4, %v13973_v12  ;;  %v6730_v7 = vmul.f32 %v13973_v12, %v13973_v12  ;;  %v13978_v30 = vpop.f32.mrb[135].mxu1 }
 0x649   : > { %16227 = vst [vmem:[#allocation54_spill] sm:$0xff] %v13978_v30  ;;  %v7020_v10 = vadd.f32 %v7018_v1, %v6727_v43  ;;  %v6617_v52 = vadd.f32 %v6616_v42, %v13978_v30  ;;  %v6731_v48 = vmul.f32 %v13978_v30, %v13978_v30 }
 0x64a   : > { %v6968_v28 = vadd.f32 %v6967_v56, %v6730_v7 }
 0x64b   : > { %v7021_v51 = vadd.f32 %v7020_v10, %v6731_v48 }
 0x64d   : > { %v5904_v27 = vpop.f32.mrb[136].mxu1 }
 0x64e   : > { %v5906_v53 = vpop.f32.mrb[137].mxu1 }
 0x64f   : > { %v13983_v37 = vpop.f32.mrb[138].mxu1 }
 0x650   : > { %v6566_v19 = vadd.f32 %v6564_v13, %v13983_v37  ;;  %v6738_v21 = vmul.f32 %v13983_v37, %v13983_v37  ;;  %v13988_v34 = vpop.f32.mrb[139].mxu1 }
 0x651   : > { %16228 = vst [vmem:[#allocation103_spill] sm:$0xff] %v13988_v34  ;;  %v6619_v0 = vadd.f32 %v6617_v52, %v13988_v34  ;;  %v6739_v58 = vmul.f32 %v13988_v34, %v13988_v34 }
 0x652   : > { %v6970_v59 = vadd.f32 %v6968_v28, %v6738_v21 }
 0x653   : > { %v7023_v40 = vadd.f32 %v7021_v51, %v6739_v58 }
 0x655   : > { %v13993_v23 = vpop.f32.mrb[140].mxu1 }
 0x656   : > { %v6567_v29 = vadd.f32 %v6566_v19, %v13993_v23  ;;  %v6742_v38 = vmul.f32 %v13993_v23, %v13993_v23  ;;  %v13998_v24 = vpop.f32.mrb[141].mxu1 }
 0x657   : > { %16229 = vst [vmem:[#allocation69_spill] sm:$0xff] %v13998_v24  ;;  %v6620_v15 = vadd.f32 %v6619_v0, %v13998_v24  ;;  %v6743_v31 = vmul.f32 %v13998_v24, %v13998_v24  ;;  %v5918_v6 = vpop.f32.mrb[142].mxu1 }
 0x658   : > { %v6971_v60 = vadd.f32 %v6970_v59, %v6742_v38  ;;  %v5920_v9 = vpop.f32.mrb[143].mxu1  ;;  %v10956_v6 = vld [vmem:[#allocation4 + $0xf0] sm:$0xff]  }
 0x659   : > { %v7024_v39 = vadd.f32 %v7023_v40, %v6743_v31 }
 0x65d   : > { %v14003_v44 = vpop.f32.mrb[144].mxu1 }
 0x65e   : > { %v6569_v5 = vadd.f32 %v6567_v29, %v14003_v44  ;;  %v6750_v1 = vmul.f32 %v14003_v44, %v14003_v44  ;;  %v14008_v4 = vpop.f32.mrb[145].mxu1 }
 0x65f   : > { %16230 = vst [vmem:[#allocation52_spill] sm:$0xff] %v14008_v4  ;;  %v6622_v41 = vadd.f32 %v6620_v15, %v14008_v4  ;;  %v6751_v42 = vmul.f32 %v14008_v4, %v14008_v4  ;;  %v14013_v43 = vpop.f32.mrb[146].mxu1  ;;  %v10955_v15 = vld [vmem:[#allocation4 + $0xe8] sm:$0xff]  }
 0x660   : > { %v6973_v56 = vadd.f32 %v6971_v60, %v6750_v1  ;;  %v6570_v13 = vadd.f32 %v6569_v5, %v14013_v43  ;;  %v6754_v7 = vmul.f32 %v14013_v43, %v14013_v43  ;;  %v14018_v10 = vpop.f32.mrb[147].mxu1  ;;  %8271 = vmatpush1.bf16.msra.mxu0 %v10955_v15 }
 0x661   : > { %16231 = vst [vmem:[#allocation104_spill] sm:$0xff] %v14018_v10  ;;  %v7026_v52 = vadd.f32 %v7024_v39, %v6751_v42  ;;  %v6623_v48 = vadd.f32 %v6622_v41, %v14018_v10  ;;  %v6755_v28 = vmul.f32 %v14018_v10, %v14018_v10  ;;  %8272 = vmatprep.subr.bf16.mxu0 %v15727_v25 }
 0x662   : > { %v6974_v51 = vadd.f32 %v6973_v56, %v6754_v7  ;;  %v10957_v7 = vld [vmem:[#allocation4 + $0xf8] sm:$0xff]  }
 0x663   : > { %v7027_v27 = vadd.f32 %v7026_v52, %v6755_v28 }
 0x664   : > { %8273 = vmatpush1.bf16.msra.mxu0 %v10956_v6 }
 0x665   : > { %v5934_v53 = vpop.f32.mrb[148].mxu1  ;;  %8274 = vmatprep.subr.bf16.mxu0 %v15727_v25 }
 0x666   : > { %v5936_v19 = vpop.f32.mrb[149].mxu1 }
 0x667   : > { %v14023_v21 = vpop.f32.mrb[150].mxu1 }
 0x668   : > { %v6572_v0 = vadd.f32 %v6570_v13, %v14023_v21  ;;  %v6762_v58 = vmul.f32 %v14023_v21, %v14023_v21  ;;  %v14028_v59 = vpop.f32.mrb[151].mxu1  ;;  %8275 = vmatpush1.bf16.msra.mxu0 %v10957_v7 }
 0x669   : > { %16232 = vst [vmem:[#allocation57_spill] sm:$0xff] %v14028_v59  ;;  %v6625_v40 = vadd.f32 %v6623_v48, %v14028_v59  ;;  %v6763_v29 = vmul.f32 %v14028_v59, %v14028_v59 }
 0x66a   : > { %v6976_v38 = vadd.f32 %v6974_v51, %v6762_v58 }
 0x66b   : > { %v7029_v31 = vadd.f32 %v7027_v27, %v6763_v29 }
 0x66d   : > { %v14033_v60 = vpop.f32.mrb[152].mxu1 }
 0x66e   : > { %v6573_v9 = vadd.f32 %v6572_v0, %v14033_v60  ;;  %v6766_v39 = vmul.f32 %v14033_v60, %v14033_v60  ;;  %v14039_v5 = vpop.f32.mrb[153].mxu1 }
 0x66f   : > { %16233 = vst [vmem:[#allocation72_spill] sm:$0xff] %v14039_v5  ;;  %v6626_v1 = vadd.f32 %v6625_v40, %v14039_v5  ;;  %v6767_v41 = vmul.f32 %v14039_v5, %v14039_v5  ;;  %v5948_v42 = vpop.f32.mrb[154].mxu1 }
 0x670   : > { %v6977_v56 = vadd.f32 %v6976_v38, %v6766_v39  ;;  %v5950_v13 = vpop.f32.mrb[155].mxu1 }
 0x671   : > { %v7030_v52 = vadd.f32 %v7029_v31, %v6767_v41 }
 0x675   : > { %v14045_v48 = vpop.f32.mrb[156].mxu1 }
 0x676   : > { %v6575_v28 = vadd.f32 %v6573_v9, %v14045_v48  ;;  %v6774_v51 = vmul.f32 %v14045_v48, %v14045_v48  ;;  %v14050_v27 = vpop.f32.mrb[157].mxu1 }
 0x677   : > { %16234 = vst [vmem:[#allocation59_spill] sm:$0xff] %v14050_v27  ;;  %v6628_v53 = vadd.f32 %v6626_v1, %v14050_v27  ;;  %v6775_v19 = vmul.f32 %v14050_v27, %v14050_v27  ;;  %v14055_v0 = vpop.f32.mrb[158].mxu1 }
 0x678   : > { %v6979_v58 = vadd.f32 %v6977_v56, %v6774_v51  ;;  %v6576_v25 = vadd.f32 %v6575_v28, %v14055_v0  ;;  %v6778_v40 = vmul.f32 %v14055_v0, %v14055_v0  ;;  %v14060_v29 = vpop.f32.mrb[159].mxu1 }
 0x679   : > { %16235 = vst [vmem:[#allocation83_spill] sm:$0xff] %v14060_v29  ;;  %v7032_v38 = vadd.f32 %v7030_v52, %v6775_v19  ;;  %v6629_v15 = vadd.f32 %v6628_v53, %v14060_v29  ;;  %v6779_v31 = vmul.f32 %v14060_v29, %v14060_v29 }
 0x67a   : > { %v6980_v6 = vadd.f32 %v6979_v58, %v6778_v40 }
 0x67b   : > { %v7033_v9 = vadd.f32 %v7032_v38, %v6779_v31 }
 0x67d   : > { %v5964_v39 = vpop.f32.mrb[160].mxu1 }
 0x67e   : > { %v5966_v1 = vpop.f32.mrb[161].mxu1 }
 0x67f   : > { %v14065_v41 = vpop.f32.mrb[162].mxu1 }
 0x680   : > { %v6578_v42 = vadd.f32 %v6576_v25, %v14065_v41  ;;  %v6786_v56 = vmul.f32 %v14065_v41, %v14065_v41  ;;  %v14070_v13 = vpop.f32.mrb[163].mxu1 }
 0x681   : > { %16236 = vst [vmem:[#allocation105_spill] sm:$0xff] %v14070_v13  ;;  %v6631_v7 = vadd.f32 %v6629_v15, %v14070_v13  ;;  %v6787_v52 = vmul.f32 %v14070_v13, %v14070_v13 }
 0x682   : > { %v6982_v28 = vadd.f32 %v6980_v6, %v6786_v56 }
 0x683   : > { %v7035_v51 = vadd.f32 %v7033_v9, %v6787_v52 }
 0x685   : > { %v14075_v53 = vpop.f32.mrb[164].mxu1 }
 0x686   : > { %v6579_v19 = vadd.f32 %v6578_v42, %v14075_v53  ;;  %v6790_v58 = vmul.f32 %v14075_v53, %v14075_v53  ;;  %v14080_v25 = vpop.f32.mrb[165].mxu1 }
 0x687   : > { %16237 = vst [vmem:[#allocation61_spill] sm:$0xff] %v14080_v25  ;;  %v6632_v40 = vadd.f32 %v6631_v7, %v14080_v25  ;;  %v6791_v38 = vmul.f32 %v14080_v25, %v14080_v25  ;;  %v5978_v15 = vpop.f32.mrb[166].mxu1 }
 0x688   : > { %v6983_v31 = vadd.f32 %v6982_v28, %v6790_v58  ;;  %v5980_v39 = vpop.f32.mrb[167].mxu1 }
 0x689   : > { %v7036_v1 = vadd.f32 %v7035_v51, %v6791_v38 }
 0x68d   : > { %v14085_v6 = vpop.f32.mrb[168].mxu1 }
 0x68e   : > { %v6581_v9 = vadd.f32 %v6579_v19, %v14085_v6  ;;  %v6798_v42 = vmul.f32 %v14085_v6, %v14085_v6  ;;  %v14090_v56 = vpop.f32.mrb[169].mxu1 }
 0x68f   : > { %16238 = vst [vmem:[#allocation84_spill] sm:$0xff] %v14090_v56  ;;  %v6634_v52 = vadd.f32 %v6632_v40, %v14090_v56  ;;  %v6799_v7 = vmul.f32 %v14090_v56, %v14090_v56  ;;  %v14095_v13 = vpop.f32.mrb[170].mxu1 }
 0x690   : > { %v6985_v15 = vadd.f32 %v6983_v31, %v6798_v42  ;;  %v6582_v28 = vadd.f32 %v6581_v9, %v14095_v13  ;;  %v6802_v51 = vmul.f32 %v14095_v13, %v14095_v13  ;;  %v14100_v58 = vpop.f32.mrb[171].mxu1 }
 0x691   : > { %16239 = vst [vmem:[#allocation106_spill] sm:$0xff] %v14100_v58  ;;  %v7038_v19 = vadd.f32 %v7036_v1, %v6799_v7  ;;  %v6635_v38 = vadd.f32 %v6634_v52, %v14100_v58  ;;  %v6803_v39 = vmul.f32 %v14100_v58, %v14100_v58 }
 0x692   : > { %v6986_v40 = vadd.f32 %v6985_v15, %v6802_v51 }
 0x693   : > { %v7039_v25 = vadd.f32 %v7038_v19, %v6803_v39 }
 0x695   : > { %v5994_v29 = vpop.f32.mrb[172].mxu1 }
 0x696   : > { %v5996_v56 = vpop.f32.mrb[173].mxu1 }
 0x697   : > { %v14105_v27 = vpop.f32.mrb[174].mxu1 }
 0x698   : > { %v6584_v31 = vadd.f32 %v6582_v28, %v14105_v27  ;;  %v6810_v9 = vmul.f32 %v14105_v27, %v14105_v27  ;;  %v14110_v42 = vpop.f32.mrb[175].mxu1 }
 0x699   : > { %16240 = vst [vmem:[#allocation64_spill] sm:$0xff] %v14110_v42  ;;  %v6637_v1 = vadd.f32 %v6635_v38, %v14110_v42  ;;  %v6811_v52 = vmul.f32 %v14110_v42, %v14110_v42 }
 0x69a   : > { %v6988_v7 = vadd.f32 %v6986_v40, %v6810_v9 }
 0x69b   : > { %v7041_v58 = vadd.f32 %v7039_v25, %v6811_v52 }
 0x69d   : > { %v14115_v15 = vpop.f32.mrb[176].mxu1 }
 0x69e   : > { %v6585_v29 = vadd.f32 %v6584_v31, %v14115_v15  ;;  %v6814_v56 = vmul.f32 %v14115_v15, %v14115_v15  ;;  %v14120_v28 = vpop.f32.mrb[177].mxu1 }
 0x69f   : > { %16241 = vst [vmem:[#allocation85_spill] sm:$0xff] %v14120_v28  ;;  %v6638_v51 = vadd.f32 %v6637_v1, %v14120_v28  ;;  %v6815_v19 = vmul.f32 %v14120_v28, %v14120_v28  ;;  %v6008_v38 = vpop.f32.mrb[178].mxu1 }
 0x6a0   : > { %v6989_v39 = vadd.f32 %v6988_v7, %v6814_v56  ;;  %v6010_v5 = vpop.f32.mrb[179].mxu1 }
 0x6a1   : > { %v7042_v42 = vadd.f32 %v7041_v58, %v6815_v19 }
 0x6a5   : > { %v14125_v40 = vpop.f32.mrb[180].mxu1 }
 0x6a6   : > { %v6587_v25 = vadd.f32 %v6585_v29, %v14125_v40  ;;  %v6822_v31 = vmul.f32 %v14125_v40, %v14125_v40  ;;  %v14130_v9 = vpop.f32.mrb[181].mxu1 }
 0x6a7   : > { %16242 = vst [vmem:[#allocation107_spill] sm:$0xff] %v14130_v9  ;;  %v6640_v52 = vadd.f32 %v6638_v51, %v14130_v9  ;;  %v6823_v1 = vmul.f32 %v14130_v9, %v14130_v9  ;;  %v14135_v59 = vpop.f32.mrb[182].mxu1 }
 0x6a8   : > { %v6991_v38 = vadd.f32 %v6989_v39, %v6822_v31  ;;  %v6588_v5 = vadd.f32 %v6587_v25, %v14135_v59  ;;  %v6826_v58 = vmul.f32 %v14135_v59, %v14135_v59  ;;  %v14140_v7 = vpop.f32.mrb[183].mxu1 }
 0x6a9   : > { %16243 = vst [vmem:[#allocation86_spill] sm:$0xff] %v14140_v7  ;;  %v7044_v29 = vadd.f32 %v7042_v42, %v6823_v1  ;;  %v6641_v56 = vadd.f32 %v6640_v52, %v14140_v7  ;;  %v6827_v19 = vmul.f32 %v14140_v7, %v14140_v7 }
 0x6aa   : > { %v6992_v51 = vadd.f32 %v6991_v38, %v6826_v58 }
 0x6ab   : > { %v7045_v28 = vadd.f32 %v7044_v29, %v6827_v19 }
 0x6ad   : > { %v6024_v10 = vpop.f32.mrb[184].mxu1 }
 0x6ae   : > { %v6026_v9 = vpop.f32.mrb[185].mxu1 }
 0x6af   : > { %v14145_v4 = vpop.f32.mrb[186].mxu1 }
 0x6b0   : > { %v6590_v39 = vadd.f32 %v6588_v5, %v14145_v4  ;;  %v6834_v25 = vmul.f32 %v14145_v4, %v14145_v4  ;;  %v14150_v31 = vpop.f32.mrb[187].mxu1 }
 0x6b1   : > { %16244 = vst [vmem:[#allocation87_spill] sm:$0xff] %v14150_v31  ;;  %v6643_v42 = vadd.f32 %v6641_v56, %v14150_v31  ;;  %v6835_v52 = vmul.f32 %v14150_v31, %v14150_v31 }
 0x6b2   : > { %v6994_v1 = vadd.f32 %v6992_v51, %v6834_v25 }
 0x6b3   : > { %v7047_v7 = vadd.f32 %v7045_v28, %v6835_v52 }
 0x6b5   : > { %v14155_v38 = vpop.f32.mrb[188].mxu1 }
 0x6b6   : > { %v6591_v10 = vadd.f32 %v6590_v39, %v14155_v38  ;;  %v6838_v9 = vmul.f32 %v14155_v38, %v14155_v38  ;;  %v14160_v5 = vpop.f32.mrb[189].mxu1 }
 0x6b7   : > { %v6644_v58 = vadd.f32 %v6643_v42, %v14160_v5  ;;  %v6839_v29 = vmul.f32 %v14160_v5, %v14160_v5  ;;  %v6038_v56 = vpop.f32.mrb[190].mxu1 }
 0x6b8   : > { %v6593_v19 = vrot.slane %v6591_v10, 4  ;;  %v6995_v24 = vadd.f32 %v6994_v1, %v6838_v9  ;;  %v6040_v31 = vpop.f32.mrb[191].mxu1 }
 0x6b9   : > { %v6646_v51 = vrot.slane %v6644_v58, 4  ;;  %v7048_v28 = vadd.f32 %v7047_v7, %v6839_v29 }
 0x6ba   : > { %v6594_v25 = vadd.f32 %v6593_v19, %v6591_v10  ;;  %v6997_v52 = vrot.slane %v6995_v24, 4 }
 0x6bb   : > { %v6647_v34 = vadd.f32 %v6646_v51, %v6644_v58  ;;  %v7050_v39 = vrot.slane %v7048_v28, 4 }
 0x6bc   : > { %v6595_v30 = vrot.slane %v6594_v25, 2  ;;  %v6998_v57 = vadd.f32 %v6997_v52, %v6995_v24 }
 0x6bd   : > { %v6648_v26 = vrot.slane %v6647_v34, 2  ;;  %v7051_v22 = vadd.f32 %v7050_v39, %v7048_v28  ;;  %v16269_v28 = vld [vmem:[#allocation107_spill] sm:$0xff] }
 0x6be   : > { %v6596_v18 = vadd.f32 %v6595_v30, %v6594_v25  ;;  %v6999_v2 = vrot.slane %v6998_v57, 2  ;;  %v16268_v25 = vld [vmem:[#allocation85_spill] sm:$0xff] }
 0x6bf   : > { %v6649_v42 = vadd.f32 %v6648_v26, %v6647_v34  ;;  %v7052_v17 = vrot.slane %v7051_v22, 2  ;;  %v16267_v26 = vld [vmem:[#allocation64_spill] sm:$0xff] }
 0x6c0   : > { %v6597_v55 = vrot.slane %v6596_v18, 1  ;;  %v7000_v32 = vadd.f32 %v6999_v2, %v6998_v57 }
 0x6c1   : > { %v6650_v56 = vrot.slane %v6649_v42, 1  ;;  %v7053_v61 = vadd.f32 %v7052_v17, %v7051_v22  ;;  %v16261_v22 = vld [vmem:[#allocation59_spill] sm:$0xff] }
 0x6c2   : > { %v6598_v1 = vadd.f32 %v6597_v55, %v6596_v18  ;;  %v7001_v31 = vrot.slane %v7000_v32, 1  ;;  %v16265_v55 = vld [vmem:[#allocation84_spill] sm:$0xff] }
 0x6c3   : > { %v6651_v9 = vadd.f32 %v6650_v56, %v6649_v42  ;;  %v7054_v7 = vrot.slane %v7053_v61, 1  ;;  %v16246_v56 = vld [vmem:[#allocation46_spill] sm:$0xff]  ;;  %v16253_v42 = vld [vmem:[#allocation48_spill] sm:$0xff] }
 0x6c4   : > { %v7002_v10 = vadd.f32 %v7001_v31, %v7000_v32  ;;  %v14165_v29 = vmul.f32 0.00390625, %v6598_v1 }
 0x6c5   : > { %v7055_v58 = vadd.f32 %v7054_v7, %v7053_v61  ;;  %v14167_v19 = vmul.f32 0.00390625, %v6651_v9  ;;  %v16251_v9 = vld [vmem:[#allocation82_spill] sm:$0xff] }
 0x6c6   : > { %v7062_v24 = vmul.f32 0.00390625, %v7002_v10  ;;  %v7066_v30 = vmul.f32 %v14165_v29, %v14165_v29  ;;  %v16252_v10 = vld [vmem:[#allocation102_spill] sm:$0xff]  ;;  %v16272_v34 = vsub.f32 %v14155_v38, %v14165_v29  ;;  %v16274_v57 = vsub.f32 %v13836_v63, %v14165_v29 }
 0x6c7   : > { %v7063_v7 = vmul.f32 0.00390625, %v7055_v58  ;;  %v16245_v58 = vld [vmem:[#allocation42_spill] sm:$0xff]  ;;  %v16275_v61 = vsub.f32 %v13841_v20, %v14165_v29  ;;  %v16276_v51 = vsub.f32 %v13859_v50, %v14165_v29 }
 0x6c8   : > { %v7070_v18 = vsub.f32 %v7062_v24, %v7066_v30  ;;  %v16248_v30 = vld [vmem:[#allocation44_spill] sm:$0xff] }
 0x6ca   : > { %v7074_v39 = vmax.f32 %v7070_v18, 0.0  ;;  %v16249_v18 = vld [vmem:[#allocation50_spill] sm:$0xff] }
 0x6cc   : > { %v7078_v24 = vadd.f32 1e-05, %v7074_v39  ;;  %v7067_v39 = vmul.f32 %v14167_v19, %v14167_v19 }
 0x6ce   : > { %10962 = vrsqrt.f32 %v7078_v24  ;;  %v7071_v31 = vsub.f32 %v7063_v7, %v7067_v39  ;;  %v16247_v24 = vld [vmem:[#allocation51_spill] sm:$0xff]  ;;  %v16250_v7 = vld [vmem:[#allocation66_spill] sm:$0xff] }
 0x6cf   : > { %v16270_v39 = vld [vmem:[#allocation86_spill] sm:$0xff] }
 0x6d0   : > { %v7075_v1 = vmax.f32 %v7071_v31, 0.0  ;;  %v16257_v31 = vld [vmem:[#allocation52_spill] sm:$0xff] }
 0x6d2   : > { %v7079_v32 = vadd.f32 1e-05, %v7075_v1  ;;  %v16271_v1 = vld [vmem:[#allocation87_spill] sm:$0xff] }
 0x6d4   : > { %10964 = vrsqrt.f32 %v7079_v32 }
 0x6d8   : > { %v14293_v52 = vpop.eup %10962 }
 0x6d9   : > { %v14307_v17 = vmul.f32 %v14293_v52, %v16272_v34  ;;  %v14313_v2 = vmul.f32 %v14293_v52, %v16274_v57  ;;  %v14319_v32 = vmul.f32 %v14293_v52, %v16275_v61  ;;  %v14325_v38 = vmul.f32 %v14293_v52, %v16276_v51 }
 0x6da   : > { %v16277_v34 = vsub.f32 %v13869_v62, %v14165_v29  ;;  %v16278_v57 = vsub.f32 %v13880_v16, %v14165_v29  ;;  %v16279_v61 = vsub.f32 %v13890_v3, %v14165_v29  ;;  %v16280_v51 = vsub.f32 %v13901_v33, %v14165_v29 }
 0x6db   : > { %16273 = vst [vmem:[#allocation88_spill] sm:$0xff] %v14307_v17  ;;  %v7470_v17 = vmax.f32 %v14313_v2, 0.0  ;;  %v16320_v2 = vsub.f32 %v13864_v11, %v14167_v19  ;;  %v16325_v11 = vsub.f32 %v16248_v30, %v14167_v19  ;;  %v16330_v30 = vsub.f32 %v16253_v42, %v14167_v19 }
 0x6dc   : > { %v14331_v63 = vmul.f32 %v14293_v52, %v16277_v34  ;;  %v14337_v20 = vmul.f32 %v14293_v52, %v16278_v57  ;;  %v14343_v50 = vmul.f32 %v14293_v52, %v16279_v61  ;;  %v14349_v62 = vmul.f32 %v14293_v52, %v16280_v51 }
 0x6dd   : > { %v16281_v34 = vsub.f32 %v13911_v8, %v14165_v29  ;;  %v16282_v57 = vsub.f32 %v13922_v54, %v14165_v29  ;;  %v16283_v61 = vsub.f32 %v13932_v36, %v14165_v29  ;;  %v16284_v51 = vsub.f32 %v13943_v45, %v14165_v29 }
 0x6de   : > { %v16337_v42 = vsub.f32 %v16257_v31, %v14167_v19  ;;  %v16344_v31 = vsub.f32 %v16261_v22, %v14167_v19  ;;  %v16352_v22 = vsub.f32 %v16265_v55, %v14167_v19  ;;  %v16361_v55 = vsub.f32 %v16269_v28, %v14167_v19 }
 0x6df   : > { %v14355_v16 = vmul.f32 %v14293_v52, %v16281_v34  ;;  %v14361_v3 = vmul.f32 %v14293_v52, %v16282_v57  ;;  %v14367_v33 = vmul.f32 %v14293_v52, %v16283_v61  ;;  %v14373_v8 = vmul.f32 %v14293_v52, %v16284_v51 }
 0x6e0   : > { %v16285_v34 = vsub.f32 %v13953_v49, %v14165_v29  ;;  %v16286_v57 = vsub.f32 %v13963_v47, %v14165_v29  ;;  %v16287_v61 = vsub.f32 %v13973_v12, %v14165_v29  ;;  %v16288_v51 = vsub.f32 %v13983_v37, %v14165_v29 }
 0x6e1   : > { %v7482_v28 = vmax.f32 %v14325_v38, 0.0 }
 0x6e2   : > { %v14379_v54 = vmul.f32 %v14293_v52, %v16285_v34  ;;  %v14385_v36 = vmul.f32 %v14293_v52, %v16286_v57  ;;  %v14391_v45 = vmul.f32 %v14293_v52, %v16287_v61  ;;  %v14397_v49 = vmul.f32 %v14293_v52, %v16288_v51 }
 0x6e3   : > { %v16289_v34 = vsub.f32 %v13993_v23, %v14165_v29  ;;  %v16290_v57 = vsub.f32 %v14003_v44, %v14165_v29  ;;  %v16291_v61 = vsub.f32 %v14013_v43, %v14165_v29  ;;  %v16292_v51 = vsub.f32 %v14023_v21, %v14165_v29 }
 0x6e5   : > { %v14403_v47 = vmul.f32 %v14293_v52, %v16289_v34  ;;  %v14409_v12 = vmul.f32 %v14293_v52, %v16290_v57  ;;  %v14415_v37 = vmul.f32 %v14293_v52, %v16291_v61  ;;  %v14421_v23 = vmul.f32 %v14293_v52, %v16292_v51 }
 0x6e6   : > { %v16293_v34 = vsub.f32 %v14033_v60, %v14165_v29  ;;  %v16294_v57 = vsub.f32 %v14045_v48, %v14165_v29  ;;  %v16296_v61 = vsub.f32 %v14055_v0, %v14165_v29  ;;  %v16298_v51 = vsub.f32 %v14065_v41, %v14165_v29 }
 0x6e8   : > { %v14427_v44 = vmul.f32 %v14293_v52, %v16293_v34  ;;  %v14433_v43 = vmul.f32 %v14293_v52, %v16294_v57  ;;  %v14439_v21 = vmul.f32 %v14293_v52, %v16296_v61  ;;  %v14445_v60 = vmul.f32 %v14293_v52, %v16298_v51 }
 0x6e9   : > { %v16300_v34 = vsub.f32 %v14075_v53, %v14165_v29  ;;  %v16302_v57 = vsub.f32 %v14085_v6, %v14165_v29  ;;  %v16304_v61 = vsub.f32 %v14095_v13, %v14165_v29  ;;  %v16306_v51 = vsub.f32 %v14105_v27, %v14165_v29 }
 0x6ea   : > { %16295 = vst [vmem:[#allocation89_spill] sm:$0xff] %v14433_v43  ;;  %16297 = vst [vmem:[#allocation108_spill] sm:$0xff] %v14439_v21  ;;  %v16349_v21 = vld [vmem:[#allocation61_spill] sm:$0xff]  ;;  %v16354_v43 = vld [vmem:[#allocation106_spill] sm:$0xff] }
 0x6eb   : > { %16299 = vst [vmem:[#allocation90_spill] sm:$0xff] %v14445_v60  ;;  %v14451_v48 = vmul.f32 %v14293_v52, %v16300_v34  ;;  %v14457_v0 = vmul.f32 %v14293_v52, %v16302_v57  ;;  %v14463_v41 = vmul.f32 %v14293_v52, %v16304_v61  ;;  %v14469_v53 = vmul.f32 %v14293_v52, %v16306_v51  ;;  %v16347_v60 = vld [vmem:[#allocation105_spill] sm:$0xff] }
 0x6ec   : > { %v16308_v34 = vsub.f32 %v14115_v15, %v14165_v29  ;;  %v16310_v57 = vsub.f32 %v14125_v40, %v14165_v29  ;;  %v16312_v61 = vsub.f32 %v14135_v59, %v14165_v29  ;;  %v16314_v51 = vsub.f32 %v14145_v4, %v14165_v29 }
 0x6ed   : > { %16301 = vst [vmem:[#allocation91_spill] sm:$0xff] %v14451_v48  ;;  %16303 = vst [vmem:[#allocation109_spill] sm:$0xff] %v14457_v0  ;;  %v7474_v40 = vmax.f32 %v14319_v32, 0.0  ;;  %v16316_v59 = vsub.f32 %v14160_v5, %v14167_v19  ;;  %v16318_v4 = vsub.f32 %v13839_v35, %v14167_v19  ;;  %v16322_v5 = vsub.f32 %v16245_v58, %v14167_v19  ;;  %v16342_v0 = vld [vmem:[#allocation72_spill] sm:$0xff]  ;;  %v16345_v48 = vld [vmem:[#allocation83_spill] sm:$0xff] }
 0x6ee   : > { %16305 = vst [vmem:[#allocation92_spill] sm:$0xff] %v14463_v41  ;;  %16307 = vst [vmem:[#allocation93_spill] sm:$0xff] %v14469_v53  ;;  %v14475_v6 = vmul.f32 %v14293_v52, %v16308_v34  ;;  %v14481_v13 = vmul.f32 %v14293_v52, %v16310_v57  ;;  %v14487_v27 = vmul.f32 %v14293_v52, %v16312_v61  ;;  %v10965_v34 = vpop.eup %10964  ;;  %v7095_v57 = vsub.f32 0.0, %v14167_v19  ;;  %v16338_v53 = vld [vmem:[#allocation104_spill] sm:$0xff]  ;;  %v16340_v41 = vld [vmem:[#allocation57_spill] sm:$0xff] }
 0x6ef   : > { %v14493_v15 = vmul.f32 %v14293_v52, %v16314_v51  ;;  %v14502_v61 = vmul.f32 %v10965_v34, %v16316_v59  ;;  %v16319_v51 = vsub.f32 %v13849_v14, %v14167_v19  ;;  %v7291_v32 = vmul.f32 %v10965_v34, %v16320_v2 }
 0x6f0   : > { %16309 = vst [vmem:[#allocation111_spill] sm:$0xff] %v14475_v6  ;;  %16311 = vst [vmem:[#allocation94_spill] sm:$0xff] %v14481_v13  ;;  %v7094_v13 = vsub.f32 0.0, %v14165_v29  ;;  %v16321_v29 = vsub.f32 %v13874_v46, %v14167_v19  ;;  %v7303_v59 = vmul.f32 %v10965_v34, %v16322_v5  ;;  %v16323_v35 = vsub.f32 %v16246_v56, %v14167_v19 }
 0x6f1   : > { %16313 = vst [vmem:[#allocation95_spill] sm:$0xff] %v14487_v27  ;;  %16315 = vst [vmem:[#allocation96_spill] sm:$0xff] %v14493_v15  ;;  %v7279_v27 = vmul.f32 %v10965_v34, %v16318_v4  ;;  %v7283_v15 = vmul.f32 %v10965_v34, %v16319_v51  ;;  %v16324_v14 = vsub.f32 %v16247_v24, %v14167_v19 }
 0x6f2   : > { %16317 = vst [vmem:[#allocation97_spill] sm:$0xff] %v14502_v61  ;;  %v7295_v6 = vmul.f32 %v10965_v34, %v16321_v29  ;;  %v7307_v4 = vmul.f32 %v10965_v34, %v16323_v35  ;;  %v7319_v2 = vmul.f32 %v10965_v34, %v16325_v11  ;;  %v16326_v46 = vsub.f32 %v16249_v18, %v14167_v19  ;;  %v16331_v11 = vld [vmem:[#allocation54_spill] sm:$0xff]  ;;  %v16335_v61 = vld [vmem:[#allocation69_spill] sm:$0xff] }
 0x6f3   : > { %v7315_v51 = vmul.f32 %v10965_v34, %v16324_v14  ;;  %v16327_v58 = vsub.f32 %v16250_v7, %v14167_v19  ;;  %v16328_v56 = vsub.f32 %v16251_v9, %v14167_v19  ;;  %v16329_v24 = vsub.f32 %v16252_v10, %v14167_v19 }
 0x6f4   : > { %v14531_v29 = vmul.f32 %v10965_v34, %v16326_v46  ;;  %v14549_v18 = vmul.f32 %v10965_v34, %v16330_v30  ;;  %v16332_v46 = vsub.f32 %v16331_v11, %v14167_v19  ;;  %v16336_v10 = vsub.f32 %v16335_v61, %v14167_v19 }
 0x6f5   : > { %v7331_v5 = vmul.f32 %v10965_v34, %v16327_v58  ;;  %v14539_v35 = vmul.f32 %v10965_v34, %v16328_v56  ;;  %v14544_v14 = vmul.f32 %v10965_v34, %v16329_v24  ;;  %v16333_v58 = vld [vmem:[#allocation103_spill] sm:$0xff]  ;;  %v14569_v30 = vmul.f32 %v10965_v34, %v16337_v42 }
 0x6f6   : > { %v14554_v7 = vmul.f32 %v10965_v34, %v16332_v46  ;;  %v16334_v9 = vsub.f32 %v16333_v58, %v14167_v19  ;;  %v14564_v24 = vmul.f32 %v10965_v34, %v16336_v10  ;;  %v16339_v11 = vsub.f32 %v16338_v53, %v14167_v19 }
 0x6f7   : > { %v16341_v58 = vsub.f32 %v16340_v41, %v14167_v19  ;;  %v16343_v61 = vsub.f32 %v16342_v0, %v14167_v19  ;;  %v14589_v42 = vmul.f32 %v10965_v34, %v16344_v31  ;;  %v16346_v53 = vsub.f32 %v16345_v48, %v14167_v19 }
 0x6f8   : > { %v14559_v56 = vmul.f32 %v10965_v34, %v16334_v9  ;;  %v14574_v46 = vmul.f32 %v10965_v34, %v16339_v11  ;;  %v16348_v41 = vsub.f32 %v16347_v60, %v14167_v19  ;;  %v16350_v0 = vsub.f32 %v16349_v21, %v14167_v19 }
 0x6f9   : > { %v14579_v9 = vmul.f32 %v10965_v34, %v16341_v58  ;;  %v14584_v10 = vmul.f32 %v10965_v34, %v16343_v61  ;;  %v14594_v11 = vmul.f32 %v10965_v34, %v16346_v53  ;;  %v14609_v31 = vmul.f32 %v10965_v34, %v16352_v22 }
 0x6fa   : > { %v14599_v58 = vmul.f32 %v10965_v34, %v16348_v41  ;;  %v14604_v61 = vmul.f32 %v10965_v34, %v16350_v0  ;;  %v16355_v48 = vsub.f32 %v16354_v43, %v14167_v19  ;;  %v16357_v60 = vsub.f32 %v16267_v26, %v14167_v19 }
 0x6fb   : > { %16353 = vst [vmem:[#allocation98_spill] sm:$0xff] %v14609_v31  ;;  %v16359_v21 = vsub.f32 %v16268_v25, %v14167_v19  ;;  %v14629_v22 = vmul.f32 %v10965_v34, %v16361_v55  ;;  %v16363_v43 = vsub.f32 %v16270_v39, %v14167_v19  ;;  %v16365_v26 = vsub.f32 %v16271_v1, %v14167_v19 }
 0x6fc   : > { %16351 = vst [vmem:[#allocation113_spill] sm:$0xff] %v14604_v61  ;;  %v14614_v53 = vmul.f32 %v10965_v34, %v16355_v48  ;;  %v14619_v41 = vmul.f32 %v10965_v34, %v16357_v60  ;;  %v7475_v25 = vmax.f32 %v7283_v15, 0.0  ;;  %v7286_v31 = vmul.f32 %v14293_v52, %v7094_v13 }
 0x6fd   : > { %v14624_v0 = vmul.f32 %v10965_v34, %v16359_v21  ;;  %16362 = vst [vmem:[#allocation101_spill] sm:$0xff] %v14629_v22  ;;  %v14634_v48 = vmul.f32 %v10965_v34, %v16363_v43  ;;  %v14639_v60 = vmul.f32 %v10965_v34, %v16365_v26  ;;  %v7287_v21 = vmul.f32 %v10965_v34, %v7095_v57 }
 0x6fe   : > { %16356 = vst [vmem:[#allocation99_spill] sm:$0xff] %v14614_v53  ;;  %16358 = vst [vmem:[#allocation114_spill] sm:$0xff] %v14619_v41  ;;  %v7662_v41 = vpack.c.bf16 %v7474_v40, %v7470_v17  ;;  %v7471_v53 = vmax.f32 %v7279_v27, 0.0  ;;  %v7487_v55 = vmax.f32 %v7295_v6, 0.0  ;;  %v7486_v39 = vmax.f32 %v14331_v63, 0.0 }
 0x6ff   : > { %16360 = vst [vmem:[#allocation100_spill] sm:$0xff] %v14624_v0  ;;  %16364 = vst [vmem:[#allocation81_spill] sm:$0xff] %v14634_v48  ;;  %v7483_v0 = vmax.f32 %v7291_v32, 0.0  ;;  %v14643_v61 = vmax.f32 %v7287_v21, 0.0  ;;  %v7495_v43 = vmax.f32 %v7303_v59, 0.0  ;;  %v14646_v48 = vmax.f32 %v7286_v31, 0.0 }
 0x700   : > { %v7663_v22 = vpack.c.bf16 %v7475_v25, %v7471_v53  ;;  %v7499_v19 = vmax.f32 %v7307_v4, 0.0  ;;  %v7494_v17 = vmax.f32 %v14337_v20, 0.0  ;;  %v7498_v1 = vmax.f32 %v14343_v50, 0.0 }
 0x701   : > { %v7667_v27 = vpack.c.bf16 %v7483_v0, %v14643_v61  ;;  %v7671_v52 = vpack.c.bf16 %v14643_v61, %v7487_v55  ;;  %v7507_v38 = vmax.f32 %v7315_v51, 0.0  ;;  %v7506_v6 = vmax.f32 %v14349_v62, 0.0 }
 0x702   : > { %8276 = vmatprep.mubr.bf16.mxu0 %v7663_v22  ;;  %v7666_v13 = vpack.c.bf16 %v7482_v28, %v14646_v48  ;;  %v14655_v63 = vpack.c.bf16 %v14646_v48, %v7486_v39  ;;  %v14657_v15 = vpack.c.bf16 %v7499_v19, %v7495_v43  ;;  %v14659_v34 = vpack.c.bf16 %v7498_v1, %v7494_v17 }
 0x703   : > { %8277 = vmatmul.mubr.bf16.vlgmr.msra.gmra.mrb[96].mxu0 %v7662_v41  ;;  %v14662_v20 = vpack.c.bf16 %v7507_v38, %v14643_v61  ;;  %v14665_v50 = vpack.c.bf16 %v7506_v6, %v14646_v48  ;;  %v7511_v40 = vmax.f32 %v7319_v2, 0.0  ;;  %v7510_v62 = vmax.f32 %v14355_v16, 0.0  ;;  %v16366_v38 = vld [vmem:[#allocation89_spill] sm:$0xff] }
 0x704   : > { %8284 = vmatprep.mubr.bf16.mxu0 %v7667_v27  ;;  %v7519_v57 = vmax.f32 %v14531_v29, 0.0  ;;  %v7523_v32 = vmax.f32 %v7331_v5, 0.0  ;;  %v7518_v59 = vmax.f32 %v14361_v3, 0.0  ;;  %v7522_v4 = vmax.f32 %v14367_v33, 0.0 }
 0x705   : > { %v14672_v51 = vpack.c.bf16 %v14643_v61, %v7511_v40  ;;  %v14675_v31 = vpack.c.bf16 %v14646_v48, %v7510_v62  ;;  %v7531_v53 = vmax.f32 %v14539_v35, 0.0  ;;  %v7530_v41 = vmax.f32 %v14373_v8, 0.0  ;;  %v16368_v40 = vld [vmem:[#allocation90_spill] sm:$0xff] }
 0x706   : > { %v14679_v2 = vpack.c.bf16 %v7523_v32, %v7519_v57  ;;  %v14681_v16 = vpack.c.bf16 %v7522_v4, %v7518_v59  ;;  %v7535_v29 = vmax.f32 %v14544_v14, 0.0  ;;  %v7534_v3 = vmax.f32 %v14379_v54, 0.0  ;;  %v16369_v57 = vld [vmem:[#allocation113_spill] sm:$0xff]  ;;  %v16370_v59 = vld [vmem:[#allocation91_spill] sm:$0xff] }
 0x707   : > { %v14686_v33 = vpack.c.bf16 %v7531_v53, %v14643_v61  ;;  %v14689_v5 = vpack.c.bf16 %v7530_v41, %v14646_v48  ;;  %v7543_v0 = vmax.f32 %v14549_v18, 0.0  ;;  %v7547_v35 = vmax.f32 %v14554_v7, 0.0  ;;  %v16371_v53 = vld [vmem:[#allocation98_spill] sm:$0xff] }
 0x708   : > { %v14694_v8 = vpack.c.bf16 %v14643_v61, %v7535_v29  ;;  %v14697_v22 = vpack.c.bf16 %v14646_v48, %v7534_v3  ;;  %v7542_v14 = vmax.f32 %v14385_v36, 0.0  ;;  %v7546_v54 = vmax.f32 %v14391_v45, 0.0  ;;  %v16372_v29 = vld [vmem:[#allocation99_spill] sm:$0xff] }
 0x709   : > { %v14701_v26 = vpack.c.bf16 %v7547_v35, %v7543_v0  ;;  %v7555_v25 = vmax.f32 %v14559_v56, 0.0  ;;  %v7554_v21 = vmax.f32 %v14397_v49, 0.0  ;;  %v7559_v18 = vmax.f32 %v14564_v24, 0.0 }
 0x70a   : > { %v14706_v7 = vpack.c.bf16 %v7546_v54, %v7542_v14  ;;  %v7558_v28 = vmax.f32 %v14403_v47, 0.0  ;;  %v7567_v55 = vmax.f32 %v14569_v30, 0.0  ;;  %v7571_v39 = vmax.f32 %v14574_v46, 0.0 }
 0x70b   : > { %8285 = vmatmul.mubr.bf16.gmra.mrb[100].mxu0 %v7666_v13  ;;  %v14712_v36 = vpack.c.bf16 %v7555_v25, %v14643_v61  ;;  %v14715_v45 = vpack.c.bf16 %v7554_v21, %v14646_v48  ;;  %v14718_v49 = vpack.c.bf16 %v14643_v61, %v7559_v18  ;;  %v7566_v56 = vmax.f32 %v14409_v12, 0.0  ;;  %v16374_v18 = vld [vmem:[#allocation92_spill] sm:$0xff] }
 0x70c   : > { %8292 = vmatprep.mubr.bf16.mxu0 %v7671_v52  ;;  %v14722_v24 = vpack.c.bf16 %v14646_v48, %v7558_v28  ;;  %v14724_v47 = vpack.c.bf16 %v7571_v39, %v7567_v55  ;;  %v7570_v30 = vmax.f32 %v14415_v37, 0.0  ;;  %v7579_v46 = vmax.f32 %v14579_v9, 0.0  ;;  %v16375_v55 = vld [vmem:[#allocation114_spill] sm:$0xff] }
 0x70d   : > { %v7578_v43 = vmax.f32 %v14421_v23, 0.0  ;;  %v7583_v19 = vmax.f32 %v14584_v10, 0.0  ;;  %v7582_v17 = vmax.f32 %v14427_v44, 0.0  ;;  %v7591_v1 = vmax.f32 %v14589_v42, 0.0  ;;  %v16367_v44 = vld [vmem:[#allocation108_spill] sm:$0xff] }
 0x70e   : > { %v14732_v27 = vpack.c.bf16 %v7570_v30, %v7566_v56  ;;  %v14735_v12 = vpack.c.bf16 %v7579_v46, %v14643_v61  ;;  %v7595_v52 = vmax.f32 %v14594_v11, 0.0  ;;  %v7590_v6 = vmax.f32 %v16366_v38, 0.0  ;;  %v16376_v56 = vld [vmem:[#allocation93_spill] sm:$0xff] }
 0x70f   : > { %v14740_v37 = vpack.c.bf16 %v7578_v43, %v14646_v48  ;;  %v14743_v23 = vpack.c.bf16 %v14643_v61, %v7583_v19  ;;  %v14746_v9 = vpack.c.bf16 %v14646_v48, %v7582_v17  ;;  %v7594_v10 = vmax.f32 %v16367_v44, 0.0  ;;  %v16378_v43 = vld [vmem:[#allocation111_spill] sm:$0xff]  ;;  %v16379_v17 = vld [vmem:[#allocation101_spill] sm:$0xff]  ;;  %v16381_v44 = vld [vmem:[#allocation94_spill] sm:$0xff] }
 0x710   : > { %v7723_v42 = vpack.c.bf16 %v7595_v52, %v7591_v1  ;;  %v7603_v13 = vmax.f32 %v14599_v58, 0.0  ;;  %v7602_v62 = vmax.f32 %v16368_v40, 0.0  ;;  %v7607_v11 = vmax.f32 %v16369_v57, 0.0  ;;  %v16373_v58 = vld [vmem:[#allocation109_spill] sm:$0xff]  ;;  %v16382_v57 = vld [vmem:[#allocation95_spill] sm:$0xff] }
 0x711   : > { %v7722_v32 = vpack.c.bf16 %v7594_v10, %v7590_v6  ;;  %v7606_v4 = vmax.f32 %v16370_v59, 0.0  ;;  %v7615_v41 = vmax.f32 %v16371_v53, 0.0  ;;  %v7619_v3 = vmax.f32 %v16372_v29, 0.0  ;;  %v16380_v6 = vld [vmem:[#allocation81_spill] sm:$0xff]  ;;  %v16383_v53 = vld [vmem:[#allocation96_spill] sm:$0xff] }
 0x712   : > { %v7727_v0 = vpack.c.bf16 %v7603_v13, %v14643_v61  ;;  %v7726_v35 = vpack.c.bf16 %v7602_v62, %v14646_v48  ;;  %v7731_v14 = vpack.c.bf16 %v14643_v61, %v7607_v11  ;;  %v7614_v54 = vmax.f32 %v16373_v58, 0.0  ;;  %v16384_v29 = vld [vmem:[#allocation97_spill] sm:$0xff] }
 0x713   : > { %8293 = vmatmul.mubr.bf16.gmra.mrb[104].mxu0 %v14655_v63  ;;  %v7730_v25 = vpack.c.bf16 %v14646_v48, %v7606_v4  ;;  %v7735_v21 = vpack.c.bf16 %v7619_v3, %v7615_v41  ;;  %v7618_v28 = vmax.f32 %v16374_v18, 0.0  ;;  %v7627_v39 = vmax.f32 %v16375_v55, 0.0  ;;  %v16377_v63 = vld [vmem:[#allocation100_spill] sm:$0xff] }
 0x714   : > { %8300 = vmatprep.mubr.bf16.mxu0 %v14657_v15  ;;  %v7626_v30 = vmax.f32 %v16376_v56, 0.0  ;;  %v7631_v46 = vmax.f32 %v16377_v63, 0.0  ;;  %v7630_v19 = vmax.f32 %v16378_v43, 0.0  ;;  %v7639_v1 = vmax.f32 %v16379_v17, 0.0 }
 0x715   : > { %v7734_v52 = vpack.c.bf16 %v7618_v28, %v7614_v54  ;;  %v7739_v38 = vpack.c.bf16 %v7627_v39, %v14643_v61  ;;  %v7643_v15 = vmax.f32 %v16380_v6, 0.0  ;;  %v7638_v10 = vmax.f32 %v16381_v44, 0.0  ;;  %v16385_v54 = vld [vmem:[#allocation88_spill] sm:$0xff] }
 0x716   : > { %v7738_v13 = vpack.c.bf16 %v7626_v30, %v14646_v48  ;;  %v7743_v40 = vpack.c.bf16 %v14643_v61, %v7631_v46  ;;  %v7742_v62 = vpack.c.bf16 %v14646_v48, %v7630_v19  ;;  %v7642_v11 = vmax.f32 %v16382_v57, 0.0 }
 0x717   : > { %v7747_v59 = vpack.c.bf16 %v7643_v15, %v7639_v1  ;;  %v7651_v4 = vmax.f32 %v14639_v60, 0.0  ;;  %v7650_v41 = vmax.f32 %v16383_v53, 0.0  ;;  %v7655_v3 = vmax.f32 %v16384_v29, 0.0  ;;  %v14806_v60 = vld [vmem:[#allocation6] ss:$0 sm:$0xff] }
 0x718   : > { %v7746_v58 = vpack.c.bf16 %v7642_v11, %v7638_v10  ;;  %v7654_v18 = vmax.f32 %v16385_v54, 0.0 }
 0x719   : > { %v7751_v28 = vpack.c.bf16 %v7651_v4, %v14643_v61  ;;  %v7750_v55 = vpack.c.bf16 %v7650_v41, %v14646_v48  ;;  %v7755_v39 = vpack.c.bf16 %v14643_v61, %v7655_v3  ;;  %v8469_v61 = vlaneseq }
 0x71a   : > { %v7754_v56 = vpack.c.bf16 %v14646_v48, %v7654_v18 }
 0x71b   : > { %8301 = vmatmul.mubr.bf16.gmra.mrb[108].mxu0 %v14659_v34  ;;  %v8470_v48 = vand.u32 127, %v8469_v61 }
 0x71c   : > { %8308 = vmatprep.mubr.bf16.mxu0 %v14662_v20 }
 0x71d   : > { %vm8471_vm2 = vcmp.ge.s32.totalorder %v8470_v48, 7  ;;  %vm8472_vm3 = vcmp.lt.s32.totalorder %v8470_v48, 71 }
 0x71e   : > { %vm14811_vm4 = vmand %vm8471_vm2, %vm8472_vm3 }
 0x723   : > { %8309 = vmatmul.mubr.bf16.gmra.mrb[112].mxu0 %v14665_v50 }
 0x724   : > { %8316 = vmatprep.mubr.bf16.mxu0 %v14672_v51 }
 0x72b   : > { %8317 = vmatmul.mubr.bf16.gmra.mrb[116].mxu0 %v14675_v31 }
 0x72c   : > { %8324 = vmatprep.mubr.bf16.mxu0 %v14679_v2 }
 0x733   : > { %8325 = vmatmul.mubr.bf16.gmra.mrb[120].mxu0 %v14681_v16 }
 0x734   : > { %8332 = vmatprep.mubr.bf16.mxu0 %v14686_v33 }
 0x73b   : > { %8333 = vmatmul.mubr.bf16.gmra.mrb[124].mxu0 %v14689_v5 }
 0x73c   : > { %8340 = vmatprep.mubr.bf16.mxu0 %v14694_v8 }
 0x743   : > { %8341 = vmatmul.mubr.bf16.gmra.mrb[128].mxu0 %v14697_v22 }
 0x744   : > { %8348 = vmatprep.mubr.bf16.mxu0 %v14701_v26 }
 0x74b   : > { %8349 = vmatmul.mubr.bf16.gmra.mrb[132].mxu0 %v14706_v7 }
 0x74c   : > { %8356 = vmatprep.mubr.bf16.mxu0 %v14712_v36 }
 0x753   : > { %8357 = vmatmul.mubr.bf16.gmra.mrb[136].mxu0 %v14715_v45 }
 0x754   : > { %8364 = vmatprep.mubr.bf16.mxu0 %v14718_v49 }
 0x75b   : > { %8365 = vmatmul.mubr.bf16.gmra.mrb[140].mxu0 %v14722_v24 }
 0x75c   : > { %8372 = vmatprep.mubr.bf16.mxu0 %v14724_v47 }
 0x763   : > { %8373 = vmatmul.mubr.bf16.gmra.mrb[144].mxu0 %v14732_v27 }
 0x764   : > { %8380 = vmatprep.mubr.bf16.mxu0 %v14735_v12 }
 0x76b   : > { %8381 = vmatmul.mubr.bf16.gmra.mrb[148].mxu0 %v14740_v37 }
 0x76c   : > { %8388 = vmatprep.mubr.bf16.mxu0 %v14743_v23 }
 0x773   : > { %8389 = vmatmul.mubr.bf16.gmra.mrb[152].mxu0 %v14746_v9 }
 0x774   : > { %8396 = vmatprep.mubr.bf16.mxu0 %v7723_v42 }
 0x77b   : > { %8397 = vmatmul.mubr.bf16.gmra.mrb[156].mxu0 %v7722_v32 }
 0x77c   : > { %8404 = vmatprep.mubr.bf16.mxu0 %v7727_v0 }
 0x783   : > { %8405 = vmatmul.mubr.bf16.gmra.mrb[160].mxu0 %v7726_v35 }
 0x784   : > { %8412 = vmatprep.mubr.bf16.mxu0 %v7731_v14 }
 0x78b   : > { %8413 = vmatmul.mubr.bf16.gmra.mrb[164].mxu0 %v7730_v25 }
 0x78c   : > { %8420 = vmatprep.mubr.bf16.mxu0 %v7735_v21 }
 0x793   : > { %8421 = vmatmul.mubr.bf16.gmra.mrb[168].mxu0 %v7734_v52 }
 0x794   : > { %8428 = vmatprep.mubr.bf16.mxu0 %v7739_v38 }
 0x79b   : > { %8429 = vmatmul.mubr.bf16.gmra.mrb[172].mxu0 %v7738_v13 }
 0x79c   : > { %8436 = vmatprep.mubr.bf16.mxu0 %v7743_v40 }
 0x7a3   : > { %8437 = vmatmul.mubr.bf16.gmra.mrb[176].mxu0 %v7742_v62 }
 0x7a4   : > { %8444 = vmatprep.mubr.bf16.mxu0 %v7747_v59 }
 0x7ab   : > { %8445 = vmatmul.mubr.bf16.gmra.mrb[180].mxu0 %v7746_v58 }
 0x7ac   : > { %8452 = vmatprep.mubr.bf16.mxu0 %v7751_v28 }
 0x7b3   : > { %8453 = vmatmul.mubr.bf16.gmra.mrb[184].mxu0 %v7750_v55 }
 0x7b4   : > { %8460 = vmatprep.mubr.bf16.mxu0 %v7755_v39 }
 0x7bb   : > { %8461 = vmatmul.mubr.bf16.gmra.mrb[188].mxu0 %v7754_v56 }
 0x7d6   : > { %v8278_v34 = vpop.f32.mrb[96].mxu0 }
 0x7d7   : > { %v14809_v20 = vadd.f32 %v14806_v60, %v8278_v34  ;;  %v8280_v50 = vpop.f32.mrb[97].mxu0 }
 0x7d8   : > { %v8281_v51 = vpop.f32.mrb[98].mxu0 }
 0x7d9   : > { %v14816_v2 = vadd.f32 %v14806_v60, %v8281_v51  ;;  %v8283_v16 = vpop.f32.mrb[99].mxu0  ;;  %v8474_v33 = vmul.f32 %v14809_v20, %v14809_v20 }
 0x7db   : > { %v8522_v5 = vsel %vm14811_vm4, %v8474_v33, 0.0  ;;  %v8475_v8 = vmul.f32 %v14816_v2, %v14816_v2 }
 0x7dc   : > { %8570 = vadd.xlane.f32.xlu0 %v8522_v5 }
 0x7dd   : > { %v8523_v36 = vsel %vm14811_vm4, %v8475_v8, 0.0 }
 0x7de   : > { %v8286_v22 = vpop.f32.mrb[100].mxu0 }
 0x7df   : > { %v14825_v26 = vadd.f32 %v14806_v60, %v8286_v22  ;;  %v8288_v7 = vpop.f32.mrb[101].mxu0 }
 0x7e0   : > { %v8289_v45 = vpop.f32.mrb[102].mxu0  ;;  %8572 = vadd.xlane.f32.xlu0 %v8523_v36 }
 0x7e1   : > { %v14830_v49 = vadd.f32 %v14806_v60, %v8289_v45  ;;  %v8291_v24 = vpop.f32.mrb[103].mxu0  ;;  %v8476_v47 = vmul.f32 %v14825_v26, %v14825_v26 }
 0x7e3   : > { %v8524_v27 = vsel %vm14811_vm4, %v8476_v47, 0.0  ;;  %v8477_v12 = vmul.f32 %v14830_v49, %v14830_v49 }
 0x7e4   : > { %8574 = vadd.xlane.f32.xlu1 %v8524_v27 }
 0x7e5   : > { %v8525_v42 = vsel %vm14811_vm4, %v8477_v12, 0.0 }
 0x7e6   : > { %v8294_v37 = vpop.f32.mrb[104].mxu0 }
 0x7e7   : > { %v14839_v23 = vadd.f32 %v14806_v60, %v8294_v37  ;;  %v8296_v9 = vpop.f32.mrb[105].mxu0 }
 0x7e8   : > { %v8297_v32 = vpop.f32.mrb[106].mxu0  ;;  %8576 = vadd.xlane.f32.xlu1 %v8525_v42 }
 0x7e9   : > { %v14844_v0 = vadd.f32 %v14806_v60, %v8297_v32  ;;  %v8299_v35 = vpop.f32.mrb[107].mxu0  ;;  %v8478_v14 = vmul.f32 %v14839_v23, %v14839_v23 }
 0x7eb   : > { %v8526_v25 = vsel %vm14811_vm4, %v8478_v14, 0.0  ;;  %v8479_v21 = vmul.f32 %v14844_v0, %v14844_v0 }
 0x7ec   : > { %8578 = vadd.xlane.f32.xlu0 %v8526_v25 }
 0x7ed   : > { %v8527_v30 = vsel %vm14811_vm4, %v8479_v21, 0.0 }
 0x7ee   : > { %v8302_v63 = vpop.f32.mrb[108].mxu0  ;;  %8580 = vadd.xlane.f32.xlu1 %v8527_v30 }
 0x7ef   : > { %v14855_v46 = vadd.f32 %v14806_v60, %v8302_v63  ;;  %v8304_v43 = vpop.f32.mrb[109].mxu0 }
 0x7f0   : > { %v8305_v19 = vpop.f32.mrb[110].mxu0 }
 0x7f1   : > { %v14858_v17 = vadd.f32 %v14806_v60, %v8305_v19  ;;  %v8307_v1 = vpop.f32.mrb[111].mxu0  ;;  %v8480_v52 = vmul.f32 %v14855_v46, %v14855_v46 }
 0x7f3   : > { %v8528_v38 = vsel %vm14811_vm4, %v8480_v52, 0.0  ;;  %v8481_v6 = vmul.f32 %v14858_v17, %v14858_v17 }
 0x7f4   : > { %8582 = vadd.xlane.f32.xlu0 %v8528_v38 }
 0x7f5   : > { %v8529_v15 = vsel %vm14811_vm4, %v8481_v6, 0.0 }
 0x7f6   : > { %v8310_v44 = vpop.f32.mrb[112].mxu0  ;;  %8584 = vadd.xlane.f32.xlu1 %v8529_v15 }
 0x7f7   : > { %v14869_v10 = vadd.f32 %v14806_v60, %v8310_v44  ;;  %v8312_v13 = vpop.f32.mrb[113].mxu0 }
 0x7f8   : > { %v8313_v40 = vpop.f32.mrb[114].mxu0 }
 0x7f9   : > { %v14872_v62 = vadd.f32 %v14806_v60, %v8313_v40  ;;  %v8315_v57 = vpop.f32.mrb[115].mxu0  ;;  %v8482_v11 = vmul.f32 %v14869_v10, %v14869_v10 }
 0x7fb   : > { %v8530_v59 = vsel %vm14811_vm4, %v8482_v11, 0.0  ;;  %v8483_v4 = vmul.f32 %v14872_v62, %v14872_v62 }
 0x7fc   : > { %8586 = vadd.xlane.f32.xlu0 %v8530_v59 }
 0x7fd   : > { %v8531_v53 = vsel %vm14811_vm4, %v8483_v4, 0.0 }
 0x7fe   : > { %v8318_v41 = vpop.f32.mrb[116].mxu0  ;;  %8588 = vadd.xlane.f32.xlu1 %v8531_v53 }
 0x7ff   : > { %v14883_v29 = vadd.f32 %v14806_v60, %v8318_v41  ;;  %v8320_v3 = vpop.f32.mrb[117].mxu0 }
 0x800   : > { %v8321_v58 = vpop.f32.mrb[118].mxu0 }
 0x801   : > { %v14886_v54 = vadd.f32 %v14806_v60, %v8321_v58  ;;  %v8323_v18 = vpop.f32.mrb[119].mxu0  ;;  %v8484_v28 = vmul.f32 %v14883_v29, %v14883_v29 }
 0x803   : > { %v8532_v55 = vsel %vm14811_vm4, %v8484_v28, 0.0  ;;  %v8485_v39 = vmul.f32 %v14886_v54, %v14886_v54 }
 0x804   : > { %8590 = vadd.xlane.f32.xlu0 %v8532_v55 }
 0x805   : > { %v8533_v56 = vsel %vm14811_vm4, %v8485_v39, 0.0 }
 0x806   : > { %v8326_v61 = vpop.f32.mrb[120].mxu0  ;;  %8592 = vadd.xlane.f32.xlu1 %v8533_v56 }
 0x807   : > { %v14897_v48 = vadd.f32 %v14806_v60, %v8326_v61  ;;  %v8328_v34 = vpop.f32.mrb[121].mxu0 }
 0x808   : > { %v8329_v50 = vpop.f32.mrb[122].mxu0 }
 0x809   : > { %v14900_v51 = vadd.f32 %v14806_v60, %v8329_v50  ;;  %v8331_v16 = vpop.f32.mrb[123].mxu0  ;;  %v8486_v33 = vmul.f32 %v14897_v48, %v14897_v48 }
 0x80b   : > { %v8534_v5 = vsel %vm14811_vm4, %v8486_v33, 0.0  ;;  %v8487_v8 = vmul.f32 %v14900_v51, %v14900_v51 }
 0x80c   : > { %8594 = vadd.xlane.f32.xlu0 %v8534_v5 }
 0x80d   : > { %v8535_v22 = vsel %vm14811_vm4, %v8487_v8, 0.0 }
 0x80e   : > { %v8334_v7 = vpop.f32.mrb[124].mxu0  ;;  %8596 = vadd.xlane.f32.xlu1 %v8535_v22 }
 0x80f   : > { %v14911_v36 = vadd.f32 %v14806_v60, %v8334_v7  ;;  %v8336_v45 = vpop.f32.mrb[125].mxu0 }
 0x810   : > { %v8337_v24 = vpop.f32.mrb[126].mxu0 }
 0x811   : > { %v14914_v47 = vadd.f32 %v14806_v60, %v8337_v24  ;;  %v8339_v27 = vpop.f32.mrb[127].mxu0  ;;  %v8488_v12 = vmul.f32 %v14911_v36, %v14911_v36 }
 0x813   : > { %v8536_v37 = vsel %vm14811_vm4, %v8488_v12, 0.0  ;;  %v8489_v9 = vmul.f32 %v14914_v47, %v14914_v47 }
 0x814   : > { %8598 = vadd.xlane.f32.xlu0 %v8536_v37 }
 0x815   : > { %v8537_v42 = vsel %vm14811_vm4, %v8489_v9, 0.0 }
 0x816   : > { %v8342_v32 = vpop.f32.mrb[128].mxu0  ;;  %8600 = vadd.xlane.f32.xlu1 %v8537_v42 }
 0x817   : > { %v14925_v35 = vadd.f32 %v14806_v60, %v8342_v32  ;;  %v8344_v14 = vpop.f32.mrb[129].mxu0 }
 0x818   : > { %v8345_v25 = vpop.f32.mrb[130].mxu0 }
 0x819   : > { %v14928_v21 = vadd.f32 %v14806_v60, %v8345_v25  ;;  %v8347_v30 = vpop.f32.mrb[131].mxu0  ;;  %v8490_v63 = vmul.f32 %v14925_v35, %v14925_v35 }
 0x81b   : > { %v8538_v43 = vsel %vm14811_vm4, %v8490_v63, 0.0  ;;  %v8491_v19 = vmul.f32 %v14928_v21, %v14928_v21 }
 0x81c   : > { %8602 = vadd.xlane.f32.xlu0 %v8538_v43 }
 0x81d   : > { %v8539_v1 = vsel %vm14811_vm4, %v8491_v19, 0.0 }
 0x81e   : > { %v8350_v52 = vpop.f32.mrb[132].mxu0  ;;  %8604 = vadd.xlane.f32.xlu1 %v8539_v1 }
 0x81f   : > { %v14939_v38 = vadd.f32 %v14806_v60, %v8350_v52  ;;  %v8352_v6 = vpop.f32.mrb[133].mxu0 }
 0x820   : > { %v8353_v15 = vpop.f32.mrb[134].mxu0 }
 0x821   : > { %v14942_v44 = vadd.f32 %v14806_v60, %v8353_v15  ;;  %v8355_v13 = vpop.f32.mrb[135].mxu0  ;;  %v8492_v40 = vmul.f32 %v14939_v38, %v14939_v38 }
 0x823   : > { %v8540_v57 = vsel %vm14811_vm4, %v8492_v40, 0.0  ;;  %v8493_v11 = vmul.f32 %v14942_v44, %v14942_v44 }
 0x824   : > { %8606 = vadd.xlane.f32.xlu0 %v8540_v57 }
 0x825   : > { %v8541_v59 = vsel %vm14811_vm4, %v8493_v11, 0.0 }
 0x826   : > { %v8358_v4 = vpop.f32.mrb[136].mxu0  ;;  %8608 = vadd.xlane.f32.xlu1 %v8541_v59 }
 0x827   : > { %v14953_v53 = vadd.f32 %v14806_v60, %v8358_v4  ;;  %v8360_v41 = vpop.f32.mrb[137].mxu0 }
 0x828   : > { %v8361_v3 = vpop.f32.mrb[138].mxu0 }
 0x829   : > { %v14956_v58 = vadd.f32 %v14806_v60, %v8361_v3  ;;  %v8363_v18 = vpop.f32.mrb[139].mxu0  ;;  %v8494_v28 = vmul.f32 %v14953_v53, %v14953_v53 }
 0x82b   : > { %v8542_v55 = vsel %vm14811_vm4, %v8494_v28, 0.0  ;;  %v8495_v39 = vmul.f32 %v14956_v58, %v14956_v58 }
 0x82c   : > { %8610 = vadd.xlane.f32.xlu0 %v8542_v55 }
 0x82d   : > { %v8543_v56 = vsel %vm14811_vm4, %v8495_v39, 0.0 }
 0x82e   : > { %v8366_v61 = vpop.f32.mrb[140].mxu0  ;;  %8612 = vadd.xlane.f32.xlu1 %v8543_v56 }
 0x82f   : > { %v14967_v34 = vadd.f32 %v14806_v60, %v8366_v61  ;;  %v8368_v50 = vpop.f32.mrb[141].mxu0 }
 0x830   : > { %v8369_v16 = vpop.f32.mrb[142].mxu0 }
 0x831   : > { %v14970_v33 = vadd.f32 %v14806_v60, %v8369_v16  ;;  %v8371_v5 = vpop.f32.mrb[143].mxu0  ;;  %v8496_v8 = vmul.f32 %v14967_v34, %v14967_v34 }
 0x833   : > { %v8544_v22 = vsel %vm14811_vm4, %v8496_v8, 0.0  ;;  %v8497_v7 = vmul.f32 %v14970_v33, %v14970_v33 }
 0x834   : > { %8614 = vadd.xlane.f32.xlu0 %v8544_v22 }
 0x835   : > { %v8545_v45 = vsel %vm14811_vm4, %v8497_v7, 0.0 }
 0x836   : > { %v8374_v24 = vpop.f32.mrb[144].mxu0  ;;  %8616 = vadd.xlane.f32.xlu1 %v8545_v45 }
 0x837   : > { %v14981_v27 = vadd.f32 %v14806_v60, %v8374_v24  ;;  %v8376_v12 = vpop.f32.mrb[145].mxu0 }
 0x838   : > { %v8377_v37 = vpop.f32.mrb[146].mxu0 }
 0x839   : > { %v14984_v9 = vadd.f32 %v14806_v60, %v8377_v37  ;;  %v8379_v42 = vpop.f32.mrb[147].mxu0  ;;  %v8498_v32 = vmul.f32 %v14981_v27, %v14981_v27 }
 0x83b   : > { %v8546_v14 = vsel %vm14811_vm4, %v8498_v32, 0.0  ;;  %v8499_v25 = vmul.f32 %v14984_v9, %v14984_v9 }
 0x83c   : > { %8618 = vadd.xlane.f32.xlu0 %v8546_v14 }
 0x83d   : > { %v8547_v30 = vsel %vm14811_vm4, %v8499_v25, 0.0 }
 0x83e   : > { %v8382_v63 = vpop.f32.mrb[148].mxu0  ;;  %8620 = vadd.xlane.f32.xlu1 %v8547_v30 }
 0x83f   : > { %v14995_v43 = vadd.f32 %v14806_v60, %v8382_v63  ;;  %v8384_v19 = vpop.f32.mrb[149].mxu0 }
 0x840   : > { %v8385_v1 = vpop.f32.mrb[150].mxu0 }
 0x841   : > { %v14998_v52 = vadd.f32 %v14806_v60, %v8385_v1  ;;  %v8387_v6 = vpop.f32.mrb[151].mxu0  ;;  %v8500_v15 = vmul.f32 %v14995_v43, %v14995_v43 }
 0x843   : > { %v8548_v13 = vsel %vm14811_vm4, %v8500_v15, 0.0  ;;  %v8501_v40 = vmul.f32 %v14998_v52, %v14998_v52 }
 0x844   : > { %8622 = vadd.xlane.f32.xlu0 %v8548_v13 }
 0x845   : > { %v8549_v57 = vsel %vm14811_vm4, %v8501_v40, 0.0 }
 0x846   : > { %v8390_v11 = vpop.f32.mrb[152].mxu0  ;;  %8624 = vadd.xlane.f32.xlu1 %v8549_v57 }
 0x847   : > { %v15009_v59 = vadd.f32 %v14806_v60, %v8390_v11  ;;  %v8392_v4 = vpop.f32.mrb[153].mxu0 }
 0x848   : > { %v8393_v41 = vpop.f32.mrb[154].mxu0 }
 0x849   : > { %v15012_v3 = vadd.f32 %v14806_v60, %v8393_v41  ;;  %v8395_v18 = vpop.f32.mrb[155].mxu0  ;;  %v8502_v28 = vmul.f32 %v15009_v59, %v15009_v59 }
 0x84b   : > { %v8550_v55 = vsel %vm14811_vm4, %v8502_v28, 0.0  ;;  %v8503_v39 = vmul.f32 %v15012_v3, %v15012_v3 }
 0x84c   : > { %8626 = vadd.xlane.f32.xlu0 %v8550_v55 }
 0x84d   : > { %v8551_v56 = vsel %vm14811_vm4, %v8503_v39, 0.0 }
 0x84e   : > { %v8398_v61 = vpop.f32.mrb[156].mxu0  ;;  %8628 = vadd.xlane.f32.xlu1 %v8551_v56 }
 0x84f   : > { %v15023_v50 = vadd.f32 %v14806_v60, %v8398_v61  ;;  %v8400_v16 = vpop.f32.mrb[157].mxu0 }
 0x850   : > { %v8401_v5 = vpop.f32.mrb[158].mxu0 }
 0x851   : > { %v15026_v8 = vadd.f32 %v14806_v60, %v8401_v5  ;;  %v8403_v22 = vpop.f32.mrb[159].mxu0  ;;  %v8504_v7 = vmul.f32 %v15023_v50, %v15023_v50 }
 0x853   : > { %v8552_v45 = vsel %vm14811_vm4, %v8504_v7, 0.0  ;;  %v8505_v24 = vmul.f32 %v15026_v8, %v15026_v8 }
 0x854   : > { %8630 = vadd.xlane.f32.xlu0 %v8552_v45 }
 0x855   : > { %v8553_v12 = vsel %vm14811_vm4, %v8505_v24, 0.0 }
 0x856   : > { %v8406_v37 = vpop.f32.mrb[160].mxu0  ;;  %8632 = vadd.xlane.f32.xlu1 %v8553_v12 }
 0x857   : > { %v15037_v42 = vadd.f32 %v14806_v60, %v8406_v37  ;;  %v8408_v32 = vpop.f32.mrb[161].mxu0 }
 0x858   : > { %v8409_v14 = vpop.f32.mrb[162].mxu0 }
 0x859   : > { %v15040_v25 = vadd.f32 %v14806_v60, %v8409_v14  ;;  %v8411_v30 = vpop.f32.mrb[163].mxu0  ;;  %v8506_v63 = vmul.f32 %v15037_v42, %v15037_v42 }
 0x85b   : > { %v8554_v19 = vsel %vm14811_vm4, %v8506_v63, 0.0  ;;  %v8507_v1 = vmul.f32 %v15040_v25, %v15040_v25 }
 0x85c   : > { %8634 = vadd.xlane.f32.xlu0 %v8554_v19 }
 0x85d   : > { %v8555_v6 = vsel %vm14811_vm4, %v8507_v1, 0.0 }
 0x85e   : > { %v8414_v15 = vpop.f32.mrb[164].mxu0  ;;  %8636 = vadd.xlane.f32.xlu1 %v8555_v6 }
 0x85f   : > { %v15051_v13 = vadd.f32 %v14806_v60, %v8414_v15  ;;  %v8416_v40 = vpop.f32.mrb[165].mxu0 }
 0x860   : > { %v8417_v57 = vpop.f32.mrb[166].mxu0 }
 0x861   : > { %v15054_v11 = vadd.f32 %v14806_v60, %v8417_v57  ;;  %v8419_v4 = vpop.f32.mrb[167].mxu0  ;;  %v8508_v41 = vmul.f32 %v15051_v13, %v15051_v13 }
 0x863   : > { %v8556_v18 = vsel %vm14811_vm4, %v8508_v41, 0.0  ;;  %v8509_v28 = vmul.f32 %v15054_v11, %v15054_v11 }
 0x864   : > { %8638 = vadd.xlane.f32.xlu0 %v8556_v18 }
 0x865   : > { %v8557_v55 = vsel %vm14811_vm4, %v8509_v28, 0.0 }
 0x866   : > { %v8422_v39 = vpop.f32.mrb[168].mxu0  ;;  %8640 = vadd.xlane.f32.xlu1 %v8557_v55 }
 0x867   : > { %v15065_v56 = vadd.f32 %v14806_v60, %v8422_v39  ;;  %v8424_v61 = vpop.f32.mrb[169].mxu0 }
 0x868   : > { %v8425_v16 = vpop.f32.mrb[170].mxu0 }
 0x869   : > { %v15068_v5 = vadd.f32 %v14806_v60, %v8425_v16  ;;  %v8427_v22 = vpop.f32.mrb[171].mxu0  ;;  %v8571_v7 = vpop.xlane.xlu0 %8570  ;;  %v8510_v45 = vmul.f32 %v15065_v56, %v15065_v56 }
 0x86a   : > { %v8666_v24 = vmax.f32 %v8571_v7, 1e-24 }
 0x86b   : > { %v8558_v12 = vsel %vm14811_vm4, %v8510_v45, 0.0  ;;  %v8511_v37 = vmul.f32 %v15068_v5, %v15068_v5 }
 0x86c   : > { %10966 = vrsqrt.f32 %v8666_v24  ;;  %8642 = vadd.xlane.f32.xlu0 %v8558_v12 }
 0x86d   : > { %v8573_v32 = vpop.xlane.xlu0 %8572  ;;  %v8559_v14 = vsel %vm14811_vm4, %v8511_v37, 0.0 }
 0x86e   : > { %v8667_v30 = vmax.f32 %v8573_v32, 1e-24  ;;  %v8430_v63 = vpop.f32.mrb[172].mxu0  ;;  %8644 = vadd.xlane.f32.xlu1 %v8559_v14 }
 0x86f   : > { %v15079_v19 = vadd.f32 %v14806_v60, %v8430_v63  ;;  %v8432_v1 = vpop.f32.mrb[173].mxu0 }
 0x870   : > { %10968 = vrsqrt.f32 %v8667_v30  ;;  %v8433_v6 = vpop.f32.mrb[174].mxu0 }
 0x871   : > { %v15082_v15 = vadd.f32 %v14806_v60, %v8433_v6  ;;  %v8435_v40 = vpop.f32.mrb[175].mxu0  ;;  %v8575_v57 = vpop.xlane.xlu1 %8574  ;;  %v8512_v4 = vmul.f32 %v15079_v19, %v15079_v19 }
 0x872   : > { %v8668_v41 = vmax.f32 %v8575_v57, 1e-24 }
 0x873   : > { %v8560_v18 = vsel %vm14811_vm4, %v8512_v4, 0.0  ;;  %v8513_v28 = vmul.f32 %v15082_v15, %v15082_v15 }
 0x874   : > { %10970 = vrsqrt.f32 %v8668_v41  ;;  %8646 = vadd.xlane.f32.xlu0 %v8560_v18 }
 0x875   : > { %v8577_v55 = vpop.xlane.xlu1 %8576  ;;  %v8561_v39 = vsel %vm14811_vm4, %v8513_v28, 0.0 }
 0x876   : > { %v10967_v61 = vpop.eup %10966  ;;  %v8669_v16 = vmax.f32 %v8577_v55, 1e-24  ;;  %v8438_v22 = vpop.f32.mrb[176].mxu0  ;;  %8648 = vadd.xlane.f32.xlu1 %v8561_v39 }
 0x877   : > { %v8762_v7 = vmul.f32 6.498481, %v10967_v61  ;;  %v15094_v45 = vadd.f32 %v14806_v60, %v8438_v22  ;;  %v8440_v24 = vpop.f32.mrb[177].mxu0 }
 0x878   : > { %10972 = vrsqrt.f32 %v8669_v16  ;;  %v8441_v12 = vpop.f32.mrb[178].mxu0 }
 0x879   : > { %v8810_v37 = vmul.f32 %v14809_v20, %v8762_v7  ;;  %v15103_v32 = vadd.f32 %v14806_v60, %v8441_v12  ;;  %v8443_v14 = vpop.f32.mrb[179].mxu0  ;;  %v8579_v30 = vpop.xlane.xlu0 %8578  ;;  %v8514_v63 = vmul.f32 %v15094_v45, %v15094_v45 }
 0x87a   : > { %v10969_v1 = vpop.eup %10968  ;;  %v8670_v6 = vmax.f32 %v8579_v30, 1e-24 }
 0x87b   : > { %v8858_v40 = vsel %vm14811_vm4, %v8810_v37, %v14809_v20  ;;  %v8763_v57 = vmul.f32 6.498481, %v10969_v1  ;;  %v8581_v4 = vpop.xlane.xlu1 %8580  ;;  %v8562_v41 = vsel %vm14811_vm4, %v8514_v63, 0.0  ;;  %v8515_v18 = vmul.f32 %v15103_v32, %v15103_v32 }
 0x87c   : > { %8906 = vst [vmem:[%s15099_s25] sm:$0xff] %v8858_v40  ;;  %10974 = vrsqrt.f32 %v8670_v6  ;;  %v8671_v28 = vmax.f32 %v8581_v4, 1e-24  ;;  %8650 = vadd.xlane.f32.xlu0 %v8562_v41 }
 0x87d   : > { %v8811_v55 = vmul.f32 %v14816_v2, %v8763_v57  ;;  %v8563_v39 = vsel %vm14811_vm4, %v8515_v18, 0.0 }
 0x87e   : > { %v10971_v61 = vpop.eup %10970  ;;  %10976 = vrsqrt.f32 %v8671_v28  ;;  %v8446_v20 = vpop.f32.mrb[180].mxu0  ;;  %8652 = vadd.xlane.f32.xlu1 %v8563_v39 }
 0x87f   : > { %v8859_v16 = vsel %vm14811_vm4, %v8811_v55, %v14816_v2  ;;  %v8764_v22 = vmul.f32 6.498481, %v10971_v61  ;;  %v15122_v7 = vadd.f32 %v14806_v60, %v8446_v20  ;;  %v8448_v24 = vpop.f32.mrb[181].mxu0 }
 0x880   : > { %8907 = vst [vmem:[%s15099_s25 + $0x8] sm:$0xff] %v8859_v16  ;;  %v8449_v12 = vpop.f32.mrb[182].mxu0 }
 0x881   : > { %v8812_v37 = vmul.f32 %v14825_v26, %v8764_v22  ;;  %v15127_v14 = vadd.f32 %v14806_v60, %v8449_v12  ;;  %v8451_v30 = vpop.f32.mrb[183].mxu0  ;;  %v8583_v63 = vpop.xlane.xlu0 %8582  ;;  %v8516_v1 = vmul.f32 %v15122_v7, %v15122_v7 }
 0x882   : > { %v10973_v6 = vpop.eup %10972  ;;  %v8672_v2 = vmax.f32 %v8583_v63, 1e-24 }
 0x883   : > { %v8860_v40 = vsel %vm14811_vm4, %v8812_v37, %v14825_v26  ;;  %v8765_v57 = vmul.f32 6.498481, %v10973_v6  ;;  %v8585_v4 = vpop.xlane.xlu1 %8584  ;;  %v8564_v41 = vsel %vm14811_vm4, %v8516_v1, 0.0  ;;  %v8517_v18 = vmul.f32 %v15127_v14, %v15127_v14 }
 0x884   : > { %8908 = vst [vmem:[%s15099_s25 + $0x10] sm:$0xff] %v8860_v40  ;;  %10978 = vrsqrt.f32 %v8672_v2  ;;  %v8673_v28 = vmax.f32 %v8585_v4, 1e-24  ;;  %8654 = vadd.xlane.f32.xlu0 %v8564_v41 }
 0x885   : > { %v8813_v55 = vmul.f32 %v14830_v49, %v8765_v57  ;;  %v8565_v39 = vsel %vm14811_vm4, %v8517_v18, 0.0 }
 0x886   : > { %v10975_v61 = vpop.eup %10974  ;;  %10980 = vrsqrt.f32 %v8673_v28  ;;  %v8454_v26 = vpop.f32.mrb[184].mxu0  ;;  %8656 = vadd.xlane.f32.xlu1 %v8565_v39 }
 0x887   : > { %v8861_v20 = vsel %vm14811_vm4, %v8813_v55, %v14830_v49  ;;  %v8766_v16 = vmul.f32 6.498481, %v10975_v61  ;;  %v15146_v22 = vadd.f32 %v14806_v60, %v8454_v26  ;;  %v8456_v24 = vpop.f32.mrb[185].mxu0 }
 0x888   : > { %v10977_v12 = vpop.eup %10976  ;;  %8909 = vst [vmem:[%s15099_s25 + $0x18] sm:$0xff] %v8861_v20  ;;  %v8457_v37 = vpop.f32.mrb[186].mxu0 }
 0x889   : > { %v8814_v30 = vmul.f32 %v14839_v23, %v8766_v16  ;;  %v8767_v63 = vmul.f32 6.498481, %v10977_v12  ;;  %v15151_v1 = vadd.f32 %v14806_v60, %v8457_v37  ;;  %v8459_v6 = vpop.f32.mrb[187].mxu0  ;;  %v8587_v2 = vpop.xlane.xlu0 %8586  ;;  %v8518_v49 = vmul.f32 %v15146_v22, %v15146_v22 }
 0x88a   : > { %v8674_v40 = vmax.f32 %v8587_v2, 1e-24 }
 0x88b   : > { %v8862_v57 = vsel %vm14811_vm4, %v8814_v30, %v14839_v23  ;;  %v8815_v4 = vmul.f32 %v14844_v0, %v8767_v63  ;;  %v8589_v41 = vpop.xlane.xlu1 %8588  ;;  %v8566_v18 = vsel %vm14811_vm4, %v8518_v49, 0.0  ;;  %v8519_v28 = vmul.f32 %v15151_v1, %v15151_v1 }
 0x88c   : > { %8910 = vst [vmem:[%s15099_s25 + $0x20] sm:$0xff] %v8862_v57  ;;  %10982 = vrsqrt.f32 %v8674_v40  ;;  %v8675_v55 = vmax.f32 %v8589_v41, 1e-24  ;;  %8658 = vadd.xlane.f32.xlu0 %v8566_v18 }
 0x88d   : > { %v8863_v39 = vsel %vm14811_vm4, %v8815_v4, %v14844_v0  ;;  %v8567_v23 = vsel %vm14811_vm4, %v8519_v28, 0.0 }
 0x88e   : > { %v10979_v61 = vpop.eup %10978  ;;  %8911 = vst [vmem:[%s15099_s25 + $0x28] sm:$0xff] %v8863_v39  ;;  %10984 = vrsqrt.f32 %v8675_v55  ;;  %v8462_v26 = vpop.f32.mrb[188].mxu0  ;;  %8660 = vadd.xlane.f32.xlu1 %v8567_v23 }
 0x88f   : > { %v8768_v20 = vmul.f32 6.498481, %v10979_v61  ;;  %v15171_v16 = vadd.f32 %v14806_v60, %v8462_v26  ;;  %v8464_v24 = vpop.f32.mrb[189].mxu0 }
 0x890   : > { %v10981_v12 = vpop.eup %10980  ;;  %v8465_v37 = vpop.f32.mrb[190].mxu0 }
 0x891   : > { %v8816_v30 = vmul.f32 %v14855_v46, %v8768_v20  ;;  %v8769_v63 = vmul.f32 6.498481, %v10981_v12  ;;  %v15175_v0 = vadd.f32 %v14806_v60, %v8465_v37  ;;  %v8467_v6 = vpop.f32.mrb[191].mxu0  ;;  %v8591_v2 = vpop.xlane.xlu0 %8590  ;;  %v8520_v49 = vmul.f32 %v15171_v16, %v15171_v16 }
 0x892   : > { %v8676_v40 = vmax.f32 %v8591_v2, 1e-24 }
 0x893   : > { %v8864_v57 = vsel %vm14811_vm4, %v8816_v30, %v14855_v46  ;;  %v8817_v4 = vmul.f32 %v14858_v17, %v8769_v63  ;;  %v8593_v41 = vpop.xlane.xlu1 %8592  ;;  %v8568_v18 = vsel %vm14811_vm4, %v8520_v49, 0.0  ;;  %v8521_v60 = vmul.f32 %v15175_v0, %v15175_v0 }
 0x894   : > { %8912 = vst [vmem:[%s15099_s25 + $0x30] sm:$0xff] %v8864_v57  ;;  %10986 = vrsqrt.f32 %v8676_v40  ;;  %v8677_v28 = vmax.f32 %v8593_v41, 1e-24  ;;  %8662 = vadd.xlane.f32.xlu0 %v8568_v18 }
 0x895   : > { %v8865_v55 = vsel %vm14811_vm4, %v8817_v4, %v14858_v17  ;;  %v8569_v46 = vsel %vm14811_vm4, %v8521_v60, 0.0 }
 0x896   : > { %v10983_v39 = vpop.eup %10982  ;;  %8913 = vst [vmem:[%s15099_s25 + $0x38] sm:$0xff] %v8865_v55  ;;  %10988 = vrsqrt.f32 %v8677_v28  ;;  %8664 = vadd.xlane.f32.xlu1 %v8569_v46 }
 0x897   : > { %v8770_v23 = vmul.f32 6.498481, %v10983_v39 }
 0x898   : > { %v10985_v61 = vpop.eup %10984 }
 0x899   : > { %v8818_v26 = vmul.f32 %v14869_v10, %v8770_v23  ;;  %v8771_v20 = vmul.f32 6.498481, %v10985_v61  ;;  %v8595_v24 = vpop.xlane.xlu0 %8594 }
 0x89a   : > { %v8678_v12 = vmax.f32 %v8595_v24, 1e-24 }
 0x89b   : > { %v8866_v37 = vsel %vm14811_vm4, %v8818_v26, %v14869_v10  ;;  %v8819_v17 = vmul.f32 %v14872_v62, %v8771_v20  ;;  %v8597_v30 = vpop.xlane.xlu1 %8596 }
 0x89c   : > { %8914 = vst [vmem:[%s15099_s25 + $0x40] sm:$0xff] %v8866_v37  ;;  %10990 = vrsqrt.f32 %v8678_v12  ;;  %v8679_v63 = vmax.f32 %v8597_v30, 1e-24 }
 0x89d   : > { %v8867_v6 = vsel %vm14811_vm4, %v8819_v17, %v14872_v62 }
 0x89e   : > { %v10987_v2 = vpop.eup %10986  ;;  %8915 = vst [vmem:[%s15099_s25 + $0x48] sm:$0xff] %v8867_v6  ;;  %10992 = vrsqrt.f32 %v8679_v63 }
 0x89f   : > { %v8772_v49 = vmul.f32 6.498481, %v10987_v2 }
 0x8a0   : > { %v10989_v40 = vpop.eup %10988 }
 0x8a1   : > { %v8820_v57 = vmul.f32 %v14883_v29, %v8772_v49  ;;  %v8773_v10 = vmul.f32 6.498481, %v10989_v40  ;;  %v8599_v4 = vpop.xlane.xlu0 %8598 }
 0x8a2   : > { %v8680_v41 = vmax.f32 %v8599_v4, 1e-24 }
 0x8a3   : > { %v8868_v18 = vsel %vm14811_vm4, %v8820_v57, %v14883_v29  ;;  %v8821_v60 = vmul.f32 %v14886_v54, %v8773_v10  ;;  %v8601_v28 = vpop.xlane.xlu1 %8600 }
 0x8a4   : > { %8916 = vst [vmem:[%s15099_s25 + $0x50] sm:$0xff] %v8868_v18  ;;  %10994 = vrsqrt.f32 %v8680_v41  ;;  %v8681_v62 = vmax.f32 %v8601_v28, 1e-24 }
 0x8a5   : > { %v8869_v55 = vsel %vm14811_vm4, %v8821_v60, %v14886_v54 }
 0x8a6   : > { %v10991_v46 = vpop.eup %10990  ;;  %8917 = vst [vmem:[%s15099_s25 + $0x58] sm:$0xff] %v8869_v55  ;;  %10996 = vrsqrt.f32 %v8681_v62 }
 0x8a7   : > { %v8774_v39 = vmul.f32 6.498481, %v10991_v46 }
 0x8a8   : > { %v10993_v23 = vpop.eup %10992 }
 0x8a9   : > { %v8822_v61 = vmul.f32 %v14897_v48, %v8774_v39  ;;  %v8775_v29 = vmul.f32 6.498481, %v10993_v23  ;;  %v8603_v26 = vpop.xlane.xlu0 %8602 }
 0x8aa   : > { %v8682_v20 = vmax.f32 %v8603_v26, 1e-24 }
 0x8ab   : > { %v8870_v24 = vsel %vm14811_vm4, %v8822_v61, %v14897_v48  ;;  %v8823_v12 = vmul.f32 %v14900_v51, %v8775_v29  ;;  %v8605_v37 = vpop.xlane.xlu1 %8604 }
 0x8ac   : > { %8918 = vst [vmem:[%s15099_s25 + $0x60] sm:$0xff] %v8870_v24  ;;  %10998 = vrsqrt.f32 %v8682_v20  ;;  %v8683_v54 = vmax.f32 %v8605_v37, 1e-24 }
 0x8ad   : > { %v8871_v17 = vsel %vm14811_vm4, %v8823_v12, %v14900_v51 }
 0x8ae   : > { %v10995_v30 = vpop.eup %10994  ;;  %8919 = vst [vmem:[%s15099_s25 + $0x68] sm:$0xff] %v8871_v17  ;;  %11000 = vrsqrt.f32 %v8683_v54 }
 0x8af   : > { %v8776_v63 = vmul.f32 6.498481, %v10995_v30 }
 0x8b0   : > { %v10997_v6 = vpop.eup %10996 }
 0x8b1   : > { %v8824_v2 = vmul.f32 %v14911_v36, %v8776_v63  ;;  %v8777_v48 = vmul.f32 6.498481, %v10997_v6  ;;  %v8607_v49 = vpop.xlane.xlu0 %8606 }
 0x8b2   : > { %v8684_v40 = vmax.f32 %v8607_v49, 1e-24 }
 0x8b3   : > { %v8872_v57 = vsel %vm14811_vm4, %v8824_v2, %v14911_v36  ;;  %v8825_v10 = vmul.f32 %v14914_v47, %v8777_v48  ;;  %v8609_v4 = vpop.xlane.xlu1 %8608 }
 0x8b4   : > { %8920 = vst [vmem:[%s15099_s25 + $0x70] sm:$0xff] %v8872_v57  ;;  %11002 = vrsqrt.f32 %v8684_v40  ;;  %v8685_v51 = vmax.f32 %v8609_v4, 1e-24 }
 0x8b5   : > { %v8873_v41 = vsel %vm14811_vm4, %v8825_v10, %v14914_v47 }
 0x8b6   : > { %v10999_v18 = vpop.eup %10998  ;;  %8921 = vst [vmem:[%s15099_s25 + $0x78] sm:$0xff] %v8873_v41  ;;  %11004 = vrsqrt.f32 %v8685_v51 }
 0x8b7   : > { %v8778_v60 = vmul.f32 6.498481, %v10999_v18 }
 0x8b8   : > { %v11001_v28 = vpop.eup %11000 }
 0x8b9   : > { %v8826_v62 = vmul.f32 %v14925_v35, %v8778_v60  ;;  %v8779_v36 = vmul.f32 6.498481, %v11001_v28  ;;  %v8611_v55 = vpop.xlane.xlu0 %8610 }
 0x8ba   : > { %v8686_v46 = vmax.f32 %v8611_v55, 1e-24 }
 0x8bb   : > { %v8874_v39 = vsel %vm14811_vm4, %v8826_v62, %v14925_v35  ;;  %v8827_v23 = vmul.f32 %v14928_v21, %v8779_v36  ;;  %v8613_v61 = vpop.xlane.xlu1 %8612 }
 0x8bc   : > { %8922 = vst [vmem:[%s15099_s25 + $0x80] sm:$0xff] %v8874_v39  ;;  %11006 = vrsqrt.f32 %v8686_v46  ;;  %v8687_v47 = vmax.f32 %v8613_v61, 1e-24 }
 0x8bd   : > { %v8875_v29 = vsel %vm14811_vm4, %v8827_v23, %v14928_v21 }
 0x8be   : > { %v11003_v26 = vpop.eup %11002  ;;  %8923 = vst [vmem:[%s15099_s25 + $0x88] sm:$0xff] %v8875_v29  ;;  %11008 = vrsqrt.f32 %v8687_v47 }
 0x8bf   : > { %v8780_v20 = vmul.f32 6.498481, %v11003_v26 }
 0x8c0   : > { %v11005_v24 = vpop.eup %11004 }
 0x8c1   : > { %v8828_v12 = vmul.f32 %v14939_v38, %v8780_v20  ;;  %v8781_v35 = vmul.f32 6.498481, %v11005_v24  ;;  %v8615_v37 = vpop.xlane.xlu0 %8614 }
 0x8c2   : > { %v8688_v54 = vmax.f32 %v8615_v37, 1e-24 }
 0x8c3   : > { %v8876_v17 = vsel %vm14811_vm4, %v8828_v12, %v14939_v38  ;;  %v8829_v30 = vmul.f32 %v14942_v44, %v8781_v35  ;;  %v8617_v63 = vpop.xlane.xlu1 %8616 }
 0x8c4   : > { %8924 = vst [vmem:[%s15099_s25 + $0x90] sm:$0xff] %v8876_v17  ;;  %11010 = vrsqrt.f32 %v8688_v54  ;;  %v8689_v21 = vmax.f32 %v8617_v63, 1e-24 }
 0x8c5   : > { %v8877_v6 = vsel %vm14811_vm4, %v8829_v30, %v14942_v44 }
 0x8c6   : > { %v11007_v2 = vpop.eup %11006  ;;  %8925 = vst [vmem:[%s15099_s25 + $0x98] sm:$0xff] %v8877_v6  ;;  %11012 = vrsqrt.f32 %v8689_v21 }
 0x8c7   : > { %v8782_v48 = vmul.f32 6.498481, %v11007_v2 }
 0x8c8   : > { %v11009_v49 = vpop.eup %11008 }
 0x8c9   : > { %v8830_v40 = vmul.f32 %v14953_v53, %v8782_v48  ;;  %v8783_v38 = vmul.f32 6.498481, %v11009_v49  ;;  %v8619_v57 = vpop.xlane.xlu0 %8618 }
 0x8ca   : > { %v8690_v10 = vmax.f32 %v8619_v57, 1e-24 }
 0x8cb   : > { %v8878_v4 = vsel %vm14811_vm4, %v8830_v40, %v14953_v53  ;;  %v8831_v51 = vmul.f32 %v14956_v58, %v8783_v38  ;;  %v8621_v41 = vpop.xlane.xlu1 %8620 }
 0x8cc   : > { %8926 = vst [vmem:[%s15099_s25 + $0xa0] sm:$0xff] %v8878_v4  ;;  %11014 = vrsqrt.f32 %v8690_v10  ;;  %v8691_v44 = vmax.f32 %v8621_v41, 1e-24 }
 0x8cd   : > { %v8879_v18 = vsel %vm14811_vm4, %v8831_v51, %v14956_v58 }
 0x8ce   : > { %v11011_v60 = vpop.eup %11010  ;;  %8927 = vst [vmem:[%s15099_s25 + $0xa8] sm:$0xff] %v8879_v18  ;;  %11016 = vrsqrt.f32 %v8691_v44 }
 0x8cf   : > { %v8784_v28 = vmul.f32 6.498481, %v11011_v60 }
 0x8d0   : > { %v11013_v62 = vpop.eup %11012 }
 0x8d1   : > { %v8832_v36 = vmul.f32 %v14967_v34, %v8784_v28  ;;  %v8785_v53 = vmul.f32 6.498481, %v11013_v62  ;;  %v8623_v55 = vpop.xlane.xlu0 %8622 }
 0x8d2   : > { %v8692_v46 = vmax.f32 %v8623_v55, 1e-24 }
 0x8d3   : > { %v8880_v39 = vsel %vm14811_vm4, %v8832_v36, %v14967_v34  ;;  %v8833_v23 = vmul.f32 %v14970_v33, %v8785_v53  ;;  %v8625_v61 = vpop.xlane.xlu1 %8624 }
 0x8d4   : > { %8928 = vst [vmem:[%s15099_s25 + $0xb0] sm:$0xff] %v8880_v39  ;;  %11018 = vrsqrt.f32 %v8692_v46  ;;  %v8693_v58 = vmax.f32 %v8625_v61, 1e-24 }
 0x8d5   : > { %v8881_v47 = vsel %vm14811_vm4, %v8833_v23, %v14970_v33 }
 0x8d6   : > { %v11015_v29 = vpop.eup %11014  ;;  %8929 = vst [vmem:[%s15099_s25 + $0xb8] sm:$0xff] %v8881_v47  ;;  %11020 = vrsqrt.f32 %v8693_v58 }
 0x8d7   : > { %v8786_v26 = vmul.f32 6.498481, %v11015_v29 }
 0x8d8   : > { %v11017_v20 = vpop.eup %11016 }
 0x8d9   : > { %v8834_v24 = vmul.f32 %v14981_v27, %v8786_v26  ;;  %v8787_v34 = vmul.f32 6.498481, %v11017_v20  ;;  %v8627_v12 = vpop.xlane.xlu0 %8626 }
 0x8da   : > { %v8694_v35 = vmax.f32 %v8627_v12, 1e-24 }
 0x8db   : > { %v8882_v37 = vsel %vm14811_vm4, %v8834_v24, %v14981_v27  ;;  %v8835_v54 = vmul.f32 %v14984_v9, %v8787_v34  ;;  %v8629_v17 = vpop.xlane.xlu1 %8628 }
 0x8dc   : > { %8930 = vst [vmem:[%s15099_s25 + $0xc0] sm:$0xff] %v8882_v37  ;;  %11022 = vrsqrt.f32 %v8694_v35  ;;  %v8695_v33 = vmax.f32 %v8629_v17, 1e-24 }
 0x8dd   : > { %v8883_v30 = vsel %vm14811_vm4, %v8835_v54, %v14984_v9 }
 0x8de   : > { %v11019_v63 = vpop.eup %11018  ;;  %8931 = vst [vmem:[%s15099_s25 + $0xc8] sm:$0xff] %v8883_v30  ;;  %11024 = vrsqrt.f32 %v8695_v33 }
 0x8df   : > { %v8788_v21 = vmul.f32 6.498481, %v11019_v63 }
 0x8e0   : > { %v11021_v6 = vpop.eup %11020 }
 0x8e1   : > { %v8836_v2 = vmul.f32 %v14995_v43, %v8788_v21  ;;  %v8789_v27 = vmul.f32 6.498481, %v11021_v6  ;;  %v8631_v48 = vpop.xlane.xlu0 %8630 }
 0x8e2   : > { %v8696_v49 = vmax.f32 %v8631_v48, 1e-24 }
 0x8e3   : > { %v8884_v40 = vsel %vm14811_vm4, %v8836_v2, %v14995_v43  ;;  %v8837_v38 = vmul.f32 %v14998_v52, %v8789_v27  ;;  %v8633_v57 = vpop.xlane.xlu1 %8632 }
 0x8e4   : > { %8932 = vst [vmem:[%s15099_s25 + $0xd0] sm:$0xff] %v8884_v40  ;;  %11026 = vrsqrt.f32 %v8696_v49  ;;  %v8697_v9 = vmax.f32 %v8633_v57, 1e-24 }
 0x8e5   : > { %v8885_v10 = vsel %vm14811_vm4, %v8837_v38, %v14998_v52 }
 0x8e6   : > { %v11023_v4 = vpop.eup %11022  ;;  %8933 = vst [vmem:[%s15099_s25 + $0xd8] sm:$0xff] %v8885_v10  ;;  %11028 = vrsqrt.f32 %v8697_v9 }
 0x8e7   : > { %v8790_v51 = vmul.f32 6.498481, %v11023_v4 }
 0x8e8   : > { %v11025_v41 = vpop.eup %11024 }
 0x8e9   : > { %v8838_v44 = vmul.f32 %v15009_v59, %v8790_v51  ;;  %v8791_v43 = vmul.f32 6.498481, %v11025_v41  ;;  %v8635_v18 = vpop.xlane.xlu0 %8634 }
 0x8ea   : > { %v8698_v60 = vmax.f32 %v8635_v18, 1e-24 }
 0x8eb   : > { %v8886_v28 = vsel %vm14811_vm4, %v8838_v44, %v15009_v59  ;;  %v8839_v62 = vmul.f32 %v15012_v3, %v8791_v43  ;;  %v8637_v36 = vpop.xlane.xlu1 %8636 }
 0x8ec   : > { %8934 = vst [vmem:[%s15099_s25 + $0xe0] sm:$0xff] %v8886_v28  ;;  %11030 = vrsqrt.f32 %v8698_v60  ;;  %v8699_v52 = vmax.f32 %v8637_v36, 1e-24 }
 0x8ed   : > { %v8887_v53 = vsel %vm14811_vm4, %v8839_v62, %v15012_v3 }
 0x8ee   : > { %v11027_v55 = vpop.eup %11026  ;;  %8935 = vst [vmem:[%s15099_s25 + $0xe8] sm:$0xff] %v8887_v53  ;;  %11032 = vrsqrt.f32 %v8699_v52 }
 0x8ef   : > { %v8792_v46 = vmul.f32 6.498481, %v11027_v55 }
 0x8f0   : > { %v11029_v39 = vpop.eup %11028 }
 0x8f1   : > { %v8840_v23 = vmul.f32 %v15023_v50, %v8792_v46  ;;  %v8793_v59 = vmul.f32 6.498481, %v11029_v39  ;;  %v8639_v61 = vpop.xlane.xlu0 %8638 }
 0x8f2   : > { %v8700_v58 = vmax.f32 %v8639_v61, 1e-24 }
 0x8f3   : > { %v8888_v47 = vsel %vm14811_vm4, %v8840_v23, %v15023_v50  ;;  %v8841_v29 = vmul.f32 %v15026_v8, %v8793_v59  ;;  %v8641_v26 = vpop.xlane.xlu1 %8640 }
 0x8f4   : > { %8936 = vst [vmem:[%s15099_s25 + $0xf0] sm:$0xff] %v8888_v47  ;;  %11034 = vrsqrt.f32 %v8700_v58  ;;  %v8701_v3 = vmax.f32 %v8641_v26, 1e-24 }
 0x8f5   : > { %v8889_v20 = vsel %vm14811_vm4, %v8841_v29, %v15026_v8 }
 0x8f6   : > { %v11031_v24 = vpop.eup %11030  ;;  %8937 = vst [vmem:[%s15099_s25 + $0xf8] sm:$0xff] %v8889_v20  ;;  %11036 = vrsqrt.f32 %v8701_v3 }
 0x8f7   : > { %v8794_v34 = vmul.f32 6.498481, %v11031_v24 }
 0x8f8   : > { %v11033_v12 = vpop.eup %11032 }
 0x8f9   : > { %v8842_v35 = vmul.f32 %v15037_v42, %v8794_v34  ;;  %v8795_v50 = vmul.f32 6.498481, %v11033_v12  ;;  %v8643_v37 = vpop.xlane.xlu0 %8642 }
 0x8fa   : > { %v8702_v54 = vmax.f32 %v8643_v37, 1e-24 }
 0x8fb   : > { %v8890_v17 = vsel %vm14811_vm4, %v8842_v35, %v15037_v42  ;;  %v8843_v33 = vmul.f32 %v15040_v25, %v8795_v50  ;;  %v8645_v30 = vpop.xlane.xlu1 %8644 }
 0x8fc   : > { %8938 = vst [vmem:[%s15099_s25 + $0x100] sm:$0xff] %v8890_v17  ;;  %11038 = vrsqrt.f32 %v8702_v54  ;;  %v8703_v8 = vmax.f32 %v8645_v30, 1e-24 }
 0x8fd   : > { %v8891_v63 = vsel %vm14811_vm4, %v8843_v33, %v15040_v25 }
 0x8fe   : > { %v11035_v21 = vpop.eup %11034  ;;  %8939 = vst [vmem:[%s15099_s25 + $0x108] sm:$0xff] %v8891_v63  ;;  %11040 = vrsqrt.f32 %v8703_v8 }
 0x8ff   : > { %v8796_v6 = vmul.f32 6.498481, %v11035_v21 }
 0x900   : > { %v11037_v2 = vpop.eup %11036 }
 0x901   : > { %v8844_v27 = vmul.f32 %v15051_v13, %v8796_v6  ;;  %v8797_v42 = vmul.f32 6.498481, %v11037_v2  ;;  %v8647_v48 = vpop.xlane.xlu0 %8646 }
 0x902   : > { %v8704_v49 = vmax.f32 %v8647_v48, 1e-24 }
 0x903   : > { %v8892_v40 = vsel %vm14811_vm4, %v8844_v27, %v15051_v13  ;;  %v8845_v38 = vmul.f32 %v15054_v11, %v8797_v42  ;;  %v8649_v57 = vpop.xlane.xlu1 %8648 }
 0x904   : > { %8940 = vst [vmem:[%s15099_s25 + $0x110] sm:$0xff] %v8892_v40  ;;  %11042 = vrsqrt.f32 %v8704_v49  ;;  %v8705_v25 = vmax.f32 %v8649_v57, 1e-24 }
 0x905   : > { %v8893_v9 = vsel %vm14811_vm4, %v8845_v38, %v15054_v11 }
 0x906   : > { %v11039_v10 = vpop.eup %11038  ;;  %8941 = vst [vmem:[%s15099_s25 + $0x118] sm:$0xff] %v8893_v9  ;;  %11044 = vrsqrt.f32 %v8705_v25 }
 0x907   : > { %v8798_v4 = vmul.f32 6.498481, %v11039_v10 }
 0x908   : > { %v11041_v51 = vpop.eup %11040 }
 0x909   : > { %v8846_v41 = vmul.f32 %v15065_v56, %v8798_v4  ;;  %v8799_v13 = vmul.f32 6.498481, %v11041_v51  ;;  %v8651_v44 = vpop.xlane.xlu0 %8650 }
 0x90a   : > { %v8706_v43 = vmax.f32 %v8651_v44, 1e-24 }
 0x90b   : > { %v8894_v18 = vsel %vm14811_vm4, %v8846_v41, %v15065_v56  ;;  %v8847_v60 = vmul.f32 %v15068_v5, %v8799_v13  ;;  %v8653_v28 = vpop.xlane.xlu1 %8652 }
 0x90c   : > { %8942 = vst [vmem:[%s15099_s25 + $0x120] sm:$0xff] %v8894_v18  ;;  %11046 = vrsqrt.f32 %v8706_v43  ;;  %v8707_v11 = vmax.f32 %v8653_v28, 1e-24 }
 0x90d   : > { %v8895_v62 = vsel %vm14811_vm4, %v8847_v60, %v15068_v5 }
 0x90e   : > { %v11043_v36 = vpop.eup %11042  ;;  %8943 = vst [vmem:[%s15099_s25 + $0x128] sm:$0xff] %v8895_v62  ;;  %11048 = vrsqrt.f32 %v8707_v11 }
 0x90f   : > { %v8800_v52 = vmul.f32 6.498481, %v11043_v36 }
 0x910   : > { %v11045_v53 = vpop.eup %11044 }
 0x911   : > { %v8848_v55 = vmul.f32 %v15079_v19, %v8800_v52  ;;  %v8801_v56 = vmul.f32 6.498481, %v11045_v53  ;;  %v8655_v46 = vpop.xlane.xlu0 %8654 }
 0x912   : > { %v8708_v39 = vmax.f32 %v8655_v46, 1e-24 }
 0x913   : > { %v8896_v23 = vsel %vm14811_vm4, %v8848_v55, %v15079_v19  ;;  %v8849_v59 = vmul.f32 %v15082_v15, %v8801_v56  ;;  %v8657_v61 = vpop.xlane.xlu1 %8656 }
 0x914   : > { %8944 = vst [vmem:[%s15099_s25 + $0x130] sm:$0xff] %v8896_v23  ;;  %11050 = vrsqrt.f32 %v8708_v39  ;;  %v8709_v5 = vmax.f32 %v8657_v61, 1e-24 }
 0x915   : > { %v8897_v58 = vsel %vm14811_vm4, %v8849_v59, %v15082_v15 }
 0x916   : > { %v11047_v47 = vpop.eup %11046  ;;  %8945 = vst [vmem:[%s15099_s25 + $0x138] sm:$0xff] %v8897_v58  ;;  %11052 = vrsqrt.f32 %v8709_v5 }
 0x917   : > { %v8802_v29 = vmul.f32 6.498481, %v11047_v47 }
 0x918   : > { %v11049_v26 = vpop.eup %11048 }
 0x919   : > { %v8850_v3 = vmul.f32 %v15094_v45, %v8802_v29  ;;  %v8803_v19 = vmul.f32 6.498481, %v11049_v26  ;;  %v8659_v20 = vpop.xlane.xlu0 %8658 }
 0x91a   : > { %v8710_v24 = vmax.f32 %v8659_v20, 1e-24 }
 0x91b   : > { %v8898_v34 = vsel %vm14811_vm4, %v8850_v3, %v15094_v45  ;;  %v8851_v12 = vmul.f32 %v15103_v32, %v8803_v19  ;;  %v8661_v35 = vpop.xlane.xlu1 %8660 }
 0x91c   : > { %8946 = vst [vmem:[%s15099_s25 + $0x140] sm:$0xff] %v8898_v34  ;;  %11054 = vrsqrt.f32 %v8710_v24  ;;  %v8711_v15 = vmax.f32 %v8661_v35, 1e-24 }
 0x91d   : > { %v8899_v50 = vsel %vm14811_vm4, %v8851_v12, %v15103_v32 }
 0x91e   : > { %v11051_v37 = vpop.eup %11050  ;;  %8947 = vst [vmem:[%s15099_s25 + $0x148] sm:$0xff] %v8899_v50  ;;  %11056 = vrsqrt.f32 %v8711_v15 }
 0x91f   : > { %v8804_v54 = vmul.f32 6.498481, %v11051_v37 }
 0x920   : > { %v11053_v17 = vpop.eup %11052 }
 0x921   : > { %v8852_v33 = vmul.f32 %v15122_v7, %v8804_v54  ;;  %v8805_v45 = vmul.f32 6.498481, %v11053_v17  ;;  %v8663_v30 = vpop.xlane.xlu0 %8662 }
 0x922   : > { %v8712_v8 = vmax.f32 %v8663_v30, 1e-24 }
 0x923   : > { %v8900_v63 = vsel %vm14811_vm4, %v8852_v33, %v15122_v7  ;;  %v8853_v21 = vmul.f32 %v15127_v14, %v8805_v45  ;;  %v8665_v6 = vpop.xlane.xlu1 %8664 }
 0x924   : > { %8948 = vst [vmem:[%s15099_s25 + $0x150] sm:$0xff] %v8900_v63  ;;  %11058 = vrsqrt.f32 %v8712_v8  ;;  %v8713_v32 = vmax.f32 %v8665_v6, 1e-24 }
 0x925   : > { %v8901_v2 = vsel %vm14811_vm4, %v8853_v21, %v15127_v14 }
 0x926   : > { %v11055_v27 = vpop.eup %11054  ;;  %8949 = vst [vmem:[%s15099_s25 + $0x158] sm:$0xff] %v8901_v2  ;;  %11060 = vrsqrt.f32 %v8713_v32 }
 0x927   : > { %v8806_v42 = vmul.f32 6.498481, %v11055_v27 }
 0x928   : > { %v11057_v48 = vpop.eup %11056 }
 0x929   : > { %v8854_v7 = vmul.f32 %v15146_v22, %v8806_v42  ;;  %v8807_v49 = vmul.f32 6.498481, %v11057_v48 }
 0x92b   : > { %v8902_v40 = vsel %vm14811_vm4, %v8854_v7, %v15146_v22  ;;  %v8855_v38 = vmul.f32 %v15151_v1, %v8807_v49 }
 0x92c   : > { %8950 = vst [vmem:[%s15099_s25 + $0x160] sm:$0xff] %v8902_v40 }
 0x92d   : > { %v8903_v14 = vsel %vm14811_vm4, %v8855_v38, %v15151_v1 }
 0x92e   : > { %v11059_v57 = vpop.eup %11058  ;;  %8951 = vst [vmem:[%s15099_s25 + $0x168] sm:$0xff] %v8903_v14 }
 0x92f   : > { %v8808_v25 = vmul.f32 6.498481, %v11059_v57 }
 0x930   : > { %v11061_v9 = vpop.eup %11060 }
 0x931   : > { %v8856_v10 = vmul.f32 %v15171_v16, %v8808_v25  ;;  %v8809_v4 = vmul.f32 6.498481, %v11061_v9 }
 0x933   : > { %v8904_v51 = vsel %vm14811_vm4, %v8856_v10, %v15171_v16  ;;  %v8857_v22 = vmul.f32 %v15175_v0, %v8809_v4 }
 0x934   : > { %8952 = vst [vmem:[%s15099_s25 + $0x170] sm:$0xff] %v8904_v51 }
 0x935   : > { %v8905_v41 = vsel %vm14811_vm4, %v8857_v22, %v15175_v0 }
 0x936   : > { %8953 = vst [vmem:[%s15099_s25 + $0x178] sm:$0xff] %v8905_v41 }
 0x937 PF: > { %s16_s15 = sadd.s32 1, %s11160_s15  }
 0x938   : > { %p13_p5 = scmp.ge.s32.totalorder %s16_s15, 4  }
 0x93a   :  { %15 = sbr.rel (!%p13_p5) target bundleno = 2 (0x2), region = 81 }
 0x941   :  { %8975 = vsyncpa [#allocation3], 1 }
 0x942   :  { %8977 = vsyncpa [#allocation3 + $0x1], 1 }
 0x943   :  { %8978 = vsyncpa [#allocation5], 1 }

</bundles_post_ra>
